<compile_context>
chip_gen: v7x
topology: tpu7x:2x2x1
jax: 0.10.0
libtpu: 0.0.40
codegen_flags: <defaults>
</compile_context>

<pallas_src>
import functools

import jax
import jax.numpy as jnp
from jax import lax
from jax.experimental import pallas as pl
from jax.experimental.pallas import tpu as pltpu


def _round_up(x, m):
    return (x + m - 1) // m * m


def _pad_head_size(hs):
    p = 8
    while p < hs:
        p *= 2
    return p


def block_kernel(x_ref, g1_ref, b1_ref, wq_ref, wk_ref, wv_ref, wp_ref, bp_ref,
                 g2_ref, b2_ref, w1_ref, bf1_ref, w2_ref, bf2_ref, o_ref,
                 *, n_head, hs, hs_pad, c_true):
    """One grid step = one batch element; full (padded) sequence resident in VMEM."""
    eps = 1e-5
    neg_big = jnp.float32(-1e30)            # finite mask fill (diagonal never masked)

    x = x_ref[0].astype(jnp.float32)        # (T, Cp); channels >= c_true are zero
    T, Cp = x.shape
    scale = jnp.float32(hs) ** -0.5         # true head size, not padded
    inv_c = jnp.float32(1.0 / c_true)

    # Channel-validity mask: LayerNorm statistics over the TRUE c_true channels only.
    chan_mask = (lax.broadcasted_iota(jnp.int32, (1, Cp), 1) < c_true).astype(jnp.float32)

    def layer_norm(v, g, b):                # f32 statistics (no bf16 VPU/EUP on v5e)
        mu = jnp.sum(v * chan_mask, axis=-1, keepdims=True) * inv_c
        d = v - mu
        var = jnp.sum(d * d * chan_mask, axis=-1, keepdims=True) * inv_c
        # padded gamma/beta are zero -> padded output channels stay exactly zero.
        return d * lax.rsqrt(var + eps) * g + b

    # ---------------- self-attention branch: sa(ln1(x)) ----------------
    xln = layer_norm(x, g1_ref[...], b1_ref[...])
    xb = xln.astype(jnp.bfloat16)           # single full-width cast (bf16 MXU operand)

    q = jnp.dot(xb, wq_ref[...], preferred_element_type=jnp.float32)   # (T, Cq)
    k = jnp.dot(xb, wk_ref[...], preferred_element_type=jnp.float32)
    v = jnp.dot(xb, wv_ref[...], preferred_element_type=jnp.float32)
    # Full-width casts once, before the head loop (no 25/32-wide slice casts).
    qb = q.astype(jnp.bfloat16)
    kb = k.astype(jnp.bfloat16)
    vb = v.astype(jnp.bfloat16)

    row = lax.broadcasted_iota(jnp.int32, (T, T), 0)
    col = lax.broadcasted_iota(jnp.int32, (T, T), 1)
    causal = col <= row                     # (T, T), shared across heads

    # Accumulated output projection (replaces head concat + single proj matmul).
    sa = jnp.zeros((T, wp_ref.shape[1]), jnp.float32)
    for h in range(n_head):                 # static unroll, H small
        sl = slice(h * hs_pad, (h + 1) * hs_pad)
        q_h = qb[:, sl]                     # (T, hs_pad), clean 32-lane offset
        k_h = kb[:, sl]
        v_h = vb[:, sl]

        # (T, hs_pad) x (T, hs_pad) contracted on hs_pad -> (T, T); padded head
        # channels are exactly zero so they contribute nothing.
        s = lax.dot_general(q_h, k_h, (((1,), (1,)), ((), ())),
                            preferred_element_type=jnp.float32) * scale
        s = jnp.where(causal, s, neg_big)

        # f32 softmax; approx reciprocal goes to the EUP slot.
        s = s - jnp.max(s, axis=-1, keepdims=True)
        p = jnp.exp(s)
        p = p * pl.reciprocal(jnp.sum(p, axis=-1, keepdims=True), approx=True)
        # dropout(p) with p_drop = 0.0 -> identity

        head_out = jnp.dot(p.astype(jnp.bfloat16), v_h,
                           preferred_element_type=jnp.float32)          # (T, hs_pad)
        sa = sa + jnp.dot(head_out.astype(jnp.bfloat16), wp_ref[sl, :],
                          preferred_element_type=jnp.float32)
    sa = sa + bp_ref[...]
    x1 = x + sa                              # residual (f32)

    # ---------------- feed-forward branch: ffwd(ln2(x1)) ----------------
    x2 = layer_norm(x1, g2_ref[...], b2_ref[...])
    hdn = jnp.dot(x2.astype(jnp.bfloat16), w1_ref[...],
                  preferred_element_type=jnp.float32) + bf1_ref[...]
    hdn = jnp.maximum(hdn, 0.0)              # ReLU (f32)
    ff = jnp.dot(hdn.astype(jnp.bfloat16), w2_ref[...],
                 preferred_element_type=jnp.float32) + bf2_ref[...]

    o_ref[0] = (x1 + ff).astype(o_ref.dtype)


def block_forward(x, params, n_head):
    B, T, C = x.shape
    assert C % n_head == 0 and T % 8 == 0
    hs = C // n_head
    hs_pad = _pad_head_size(hs)              # 25 -> 32 (4 heads per 128-lane vreg)
    Cq = n_head * hs_pad                     # padded q/k/v width (256 here)
    C_pad = _round_up(C, 128)                # lane-dense channel width (200 -> 256)
    H4 = 4 * C
    H4_pad = _round_up(H4, 256)              # 800 -> 1024

    (g1, b1, wq, wk, wv, wp, bp, g2, b2, w1, bf1, w2, bf2) = params
    bf16 = jnp.bfloat16

    def pad_to(a, shape):
        return jnp.pad(a, [(0, s - d) for d, s in zip(a.shape, shape)])

    def pad_head_cols(w):                    # (C, H*hs) -> (C_pad, Cq), bf16
        w3 = w.reshape(C, n_head, hs)
        w3 = jnp.pad(w3, ((0, C_pad - C), (0, 0), (0, hs_pad - hs)))
        return w3.reshape(C_pad, Cq).astype(bf16)

    def pad_head_rows(w):                    # (H*hs, C) -> (Cq, C_pad), bf16
        w3 = w.reshape(n_head, hs, C)
        w3 = jnp.pad(w3, ((0, 0), (0, hs_pad - hs), (0, C_pad - C)))
        return w3.reshape(Cq, C_pad).astype(bf16)

    # Zero-padded parameters; weights pre-cast to bf16 (halves the weight DMA).
    x_p = pad_to(x, (B, T, C_pad))
    g1_p, b1_p = pad_to(g1, (1, C_pad)), pad_to(b1, (1, C_pad))
    wq_p, wk_p, wv_p = pad_head_cols(wq), pad_head_cols(wk), pad_head_cols(wv)
    wp_p = pad_head_rows(wp)
    bp_p = pad_to(bp, (1, C_pad))
    g2_p, b2_p = pad_to(g2, (1, C_pad)), pad_to(b2, (1, C_pad))
    w1_p = pad_to(w1, (C_pad, H4_pad)).astype(bf16)
    bf1_p = pad_to(bf1, (1, H4_pad))
    w2_p = pad_to(w2, (H4_pad, C_pad)).astype(bf16)
    bf2_p = pad_to(bf2, (1, C_pad))

    def whole(shape):
        nd = len(shape)
        return pl.BlockSpec(shape, lambda b, _nd=nd: (0,) * _nd)

    kernel = functools.partial(block_kernel, n_head=n_head, hs=hs,
                               hs_pad=hs_pad, c_true=C)

    flops = (3 * 2 * B * T * C_pad * Cq                 # q, k, v
             + 2 * 2 * B * n_head * T * T * hs_pad      # scores + p@v
             + 2 * B * T * Cq * C_pad                   # output projection
             + 2 * 2 * B * T * C_pad * H4_pad)          # ffn
    bytes_accessed = (4 * B * T * C_pad * 2             # x in + out (f32)
                      + 2 * (3 * C_pad * Cq + Cq * C_pad
                             + 2 * C_pad * H4_pad)      # bf16 weights, read once
                      + 4 * (6 * C_pad + H4_pad))       # f32 biases / LN params
    cost = pl.CostEstimate(flops=int(flops),
                           transcendentals=int(B * n_head * T * T),
                           bytes_accessed=int(bytes_accessed))

    out_p = pl.pallas_call(
        kernel,
        out_shape=jax.ShapeDtypeStruct((B, T, C_pad), x.dtype),
        grid_spec=pltpu.PrefetchScalarGridSpec(
            num_scalar_prefetch=0,
            grid=(B,),
            in_specs=[
                pl.BlockSpec((1, T, C_pad), lambda b: (b, 0, 0)),  # x (padded)
                whole((1, C_pad)),     # ln1 gamma
                whole((1, C_pad)),     # ln1 beta
                whole((C_pad, Cq)),    # Wq (per-head column blocks, bf16)
                whole((C_pad, Cq)),    # Wk
                whole((C_pad, Cq)),    # Wv
                whole((Cq, C_pad)),    # proj W (per-head row blocks, bf16)
                whole((1, C_pad)),     # proj b
                whole((1, C_pad)),     # ln2 gamma
                whole((1, C_pad)),     # ln2 beta
                whole((C_pad, H4_pad)),  # ffwd W1 (bf16)
                whole((1, H4_pad)),      # ffwd b1
                whole((H4_pad, C_pad)),  # ffwd W2 (bf16)
                whole((1, C_pad)),       # ffwd b2
            ],
            out_specs=pl.BlockSpec((1, T, C_pad), lambda b: (b, 0, 0)),
        ),
        compiler_params=pltpu.CompilerParams(
            dimension_semantics=("parallel",),
            vmem_limit_bytes=24 * 1024 * 1024),
        cost_estimate=cost,
    )(x_p, g1_p, b1_p, wq_p, wk_p, wv_p, wp_p, bp_p, g2_p, b2_p,
      w1_p, bf1_p, w2_p, bf2_p)

    return out_p[:, :, :C]


def block_reference(x, params, n_head, mxu_dtype=jnp.float32):
    """Pure-JAX reference mirroring the PyTorch module.

    mxu_dtype=float32  -> exact module semantics.
    mxu_dtype=bfloat16 -> matmul operands rounded to bf16 (f32 accumulation),
                          matching the kernel's MXU numerics.
    """
    (g1, b1, wq, wk, wv, wp, bp, g2, b2, w1, bf1, w2, bf2) = params
    B, T, C = x.shape
    hs = C // n_head
    eps = 1e-5

    def mm(a, b):
        return jnp.dot(a.astype(mxu_dtype), b.astype(mxu_dtype),
                       preferred_element_type=jnp.float32)

    def ln(v, g, b):
        mu = jnp.mean(v, axis=-1, keepdims=True)
        var = jnp.mean((v - mu) ** 2, axis=-1, keepdims=True)
        return (v - mu) / jnp.sqrt(var + eps) * g[0] + b[0]

    xln = ln(x, g1, b1)
    q = mm(xln, wq).reshape(B, T, n_head, hs)
    k = mm(xln, wk).reshape(B, T, n_head, hs)
    v = mm(xln, wv).reshape(B, T, n_head, hs)
    scores = jnp.einsum('bthd,bshd->bhts',
                        q.astype(mxu_dtype), k.astype(mxu_dtype),
                        preferred_element_type=jnp.float32) * (hs ** -0.5)
    mask = jnp.tril(jnp.ones((T, T), dtype=bool))
    scores = jnp.where(mask[None, None], scores, -jnp.inf)
    p = jax.nn.softmax(scores, axis=-1)
    attn = jnp.einsum('bhts,bshd->bthd',
                      p.astype(mxu_dtype), v.astype(mxu_dtype),
                      preferred_element_type=jnp.float32).reshape(B, T, C)
    x1 = x + mm(attn, wp) + bp[0]
    x2 = ln(x1, g2, b2)
    h = jnp.maximum(mm(x2, w1) + bf1[0], 0.0)
    return x1 + mm(h, w2) + bf2[0]


if __name__ == "__main__":
    # Module constants: n_embd=200, n_head=8, T <= block_size=128.
    B, T, C, n_head = 2, 128, 200, 8
    H4 = 4 * C

    key = jax.random.PRNGKey(0)
    keys = jax.random.split(key, 16)
    s = 0.05
    x = jax.random.normal(keys[0], (B, T, C), dtype=jnp.float32)

    params = (
        1.0 + s * jax.random.normal(keys[1], (1, C), jnp.float32),   # ln1 gamma
        s * jax.random.normal(keys[2], (1, C), jnp.float32),         # ln1 beta
        s * jax.random.normal(keys[3], (C, C), jnp.float32),         # Wq
        s * jax.random.normal(keys[4], (C, C), jnp.float32),         # Wk
        s * jax.random.normal(keys[5], (C, C), jnp.float32),         # Wv
        s * jax.random.normal(keys[6], (C, C), jnp.float32),         # proj W
        s * jax.random.normal(keys[7], (1, C), jnp.float32),         # proj b
        1.0 + s * jax.random.normal(keys[8], (1, C), jnp.float32),   # ln2 gamma
        s * jax.random.normal(keys[9], (1, C), jnp.float32),         # ln2 beta
        s * jax.random.normal(keys[10], (C, H4), jnp.float32),       # ffwd W1
        s * jax.random.normal(keys[11], (1, H4), jnp.float32),       # ffwd b1
        s * jax.random.normal(keys[12], (H4, C), jnp.float32),       # ffwd W2
        s * jax.random.normal(keys[13], (1, C), jnp.float32),        # ffwd b2
    )

    out = jax.block_until_ready(block_forward(x, params, n_head))
    assert out.shape == (B, T, C)

    # Tight check against a reference with matching MXU numerics (bf16 operands,
    # f32 accumulation) -- validates the kernel logic (padding, masking, per-head
    # accumulated projection) itself.
    ref_bf16 = block_reference(x, params, n_head, mxu_dtype=jnp.bfloat16)
    err_bf16 = float(jnp.max(jnp.abs(out - ref_bf16)))
    assert jnp.allclose(out, ref_bf16, atol=2e-2, rtol=2e-2), (
        f"max err vs bf16-matched ref {err_bf16}")

    # Looser sanity check against the exact f32 module semantics; the gap is the
    # expected bf16 MXU quantization.
    ref_f32 = block_reference(x, params, n_head, mxu_dtype=jnp.float32)
    err_f32 = float(jnp.max(jnp.abs(out - ref_f32)))
    assert jnp.allclose(out, ref_f32, atol=1e-1, rtol=1e-1), (
        f"max err vs f32 ref {err_f32}")

    print("KERNEL_OK")
</pallas_src>

<mosaic_0001>
module attributes {stable_mosaic.version = 11 : i64} {
  func.func @block_kernel(%arg0: i32, %arg1: memref<1x128x256xf32, #tpu.memory_space<vmem>>, %arg2: memref<1x256xf32, #tpu.memory_space<vmem>>, %arg3: memref<1x256xf32, #tpu.memory_space<vmem>>, %arg4: memref<256x256xbf16, #tpu.memory_space<vmem>>, %arg5: memref<256x256xbf16, #tpu.memory_space<vmem>>, %arg6: memref<256x256xbf16, #tpu.memory_space<vmem>>, %arg7: memref<256x256xbf16, #tpu.memory_space<vmem>>, %arg8: memref<1x256xf32, #tpu.memory_space<vmem>>, %arg9: memref<1x256xf32, #tpu.memory_space<vmem>>, %arg10: memref<1x256xf32, #tpu.memory_space<vmem>>, %arg11: memref<256x1024xbf16, #tpu.memory_space<vmem>>, %arg12: memref<1x1024xf32, #tpu.memory_space<vmem>>, %arg13: memref<1024x256xbf16, #tpu.memory_space<vmem>>, %arg14: memref<1x256xf32, #tpu.memory_space<vmem>>, %arg15: memref<1x128x256xf32, #tpu.memory_space<vmem>>) attributes {dimension_semantics = [#tpu.dimension_semantics<parallel>], iteration_bounds = array<i64: 2>, scalar_prefetch = 0 : i64, scratch_operands = 0 : i64, tpu.core_type = #tpu.core_type<tc>, window_params = [{transform_indices = @transform_0, window_bounds = array<i64: 1, 128, 256>}, {pipeline_mode = #tpu.pipeline_mode<synchronous>, transform_indices = @transform_1, window_bounds = array<i64: 1, 256>}, {pipeline_mode = #tpu.pipeline_mode<synchronous>, transform_indices = @transform_2, window_bounds = array<i64: 1, 256>}, {pipeline_mode = #tpu.pipeline_mode<synchronous>, transform_indices = @transform_3, window_bounds = array<i64: 256, 256>}, {pipeline_mode = #tpu.pipeline_mode<synchronous>, transform_indices = @transform_4, window_bounds = array<i64: 256, 256>}, {pipeline_mode = #tpu.pipeline_mode<synchronous>, transform_indices = @transform_5, window_bounds = array<i64: 256, 256>}, {pipeline_mode = #tpu.pipeline_mode<synchronous>, transform_indices = @transform_6, window_bounds = array<i64: 256, 256>}, {pipeline_mode = #tpu.pipeline_mode<synchronous>, transform_indices = @transform_7, window_bounds = array<i64: 1, 256>}, {pipeline_mode = #tpu.pipeline_mode<synchronous>, transform_indices = @transform_8, window_bounds = array<i64: 1, 256>}, {pipeline_mode = #tpu.pipeline_mode<synchronous>, transform_indices = @transform_9, window_bounds = array<i64: 1, 256>}, {pipeline_mode = #tpu.pipeline_mode<synchronous>, transform_indices = @transform_10, window_bounds = array<i64: 256, 1024>}, {pipeline_mode = #tpu.pipeline_mode<synchronous>, transform_indices = @transform_11, window_bounds = array<i64: 1, 1024>}, {pipeline_mode = #tpu.pipeline_mode<synchronous>, transform_indices = @transform_12, window_bounds = array<i64: 1024, 256>}, {pipeline_mode = #tpu.pipeline_mode<synchronous>, transform_indices = @transform_13, window_bounds = array<i64: 1, 256>}, {transform_indices = @transform_14, window_bounds = array<i64: 1, 128, 256>}]} {
    %c0 = arith.constant 0 : index
    %c0_0 = arith.constant 0 : index
    %c0_1 = arith.constant 0 : index
    %0 = vector.load %arg1[%c0, %c0_0, %c0_1] : memref<1x128x256xf32, #tpu.memory_space<vmem>>, vector<1x128x256xf32>
    %1 = vector.shape_cast %0 : vector<1x128x256xf32> to vector<128x256xf32>
    %cst = arith.constant 2.500000e+01 : f32
    %cst_2 = arith.constant -5.000000e-01 : f32
    %2 = math.powf %cst, %cst_2 : f32
    %3 = tpu.iota {dimensions = array<i32: 1>} : vector<1x256xi32>
    %c200_i32 = arith.constant 200 : i32
    %4 = vector.broadcast %c200_i32 : i32 to vector<1x256xi32>
    %5 = arith.cmpi slt, %3, %4 : vector<1x256xi32>
    %6 = arith.extui %5 : vector<1x256xi1> to vector<1x256xi32>
    %7 = arith.sitofp %6 : vector<1x256xi32> to vector<1x256xf32>
    %c0_3 = arith.constant 0 : index
    %c0_4 = arith.constant 0 : index
    %8 = vector.load %arg2[%c0_3, %c0_4] : memref<1x256xf32, #tpu.memory_space<vmem>>, vector<1x256xf32>
    %c0_5 = arith.constant 0 : index
    %c0_6 = arith.constant 0 : index
    %9 = vector.load %arg3[%c0_5, %c0_6] : memref<1x256xf32, #tpu.memory_space<vmem>>, vector<1x256xf32>
    %10 = vector.broadcast %7 : vector<1x256xf32> to vector<128x256xf32>
    %11 = arith.mulf %1, %10 : vector<128x256xf32>
    %cst_7 = arith.constant dense<0.000000e+00> : vector<128xf32>
    %12 = vector.multi_reduction <add>, %11, %cst_7 [1] : vector<128x256xf32> to vector<128xf32>
    %13 = vector.shape_cast %12 : vector<128xf32> to vector<128x1xf32>
    %cst_8 = arith.constant 5.000000e-03 : f32
    %14 = vector.broadcast %cst_8 : f32 to vector<128x1xf32>
    %15 = arith.mulf %13, %14 : vector<128x1xf32>
    %16 = vector.broadcast %15 : vector<128x1xf32> to vector<128x256xf32>
    %17 = arith.subf %1, %16 : vector<128x256xf32>
    %18 = arith.mulf %17, %17 : vector<128x256xf32>
    %19 = vector.broadcast %7 : vector<1x256xf32> to vector<128x256xf32>
    %20 = arith.mulf %18, %19 : vector<128x256xf32>
    %cst_9 = arith.constant dense<0.000000e+00> : vector<128xf32>
    %21 = vector.multi_reduction <add>, %20, %cst_9 [1] : vector<128x256xf32> to vector<128xf32>
    %22 = vector.shape_cast %21 : vector<128xf32> to vector<128x1xf32>
    %cst_10 = arith.constant 5.000000e-03 : f32
    %23 = vector.broadcast %cst_10 : f32 to vector<128x1xf32>
    %24 = arith.mulf %22, %23 : vector<128x1xf32>
    %cst_11 = arith.constant 9.99999974E-6 : f32
    %25 = vector.broadcast %cst_11 : f32 to vector<128x1xf32>
    %26 = arith.addf %24, %25 : vector<128x1xf32>
    %27 = math.rsqrt %26 : vector<128x1xf32>
    %28 = vector.broadcast %27 : vector<128x1xf32> to vector<128x256xf32>
    %29 = arith.mulf %17, %28 : vector<128x256xf32>
    %30 = vector.broadcast %8 : vector<1x256xf32> to vector<128x256xf32>
    %31 = arith.mulf %29, %30 : vector<128x256xf32>
    %32 = vector.broadcast %9 : vector<1x256xf32> to vector<128x256xf32>
    %33 = arith.addf %31, %32 : vector<128x256xf32>
    %34 = arith.truncf %33 : vector<128x256xf32> to vector<128x256xbf16>
    %c0_12 = arith.constant 0 : index
    %c0_13 = arith.constant 0 : index
    %35 = vector.load %arg4[%c0_12, %c0_13] : memref<256x256xbf16, #tpu.memory_space<vmem>>, vector<256x256xbf16>
    %cst_14 = arith.constant dense<0.000000e+00> : vector<128x256xf32>
    %36 = tpu.matmul %34, %35, %cst_14 {dimension_numbers = #tpu.dot_dimension_numbers<[1], [0], [0], [1], [0, 0, 1, 1], [], []>} : vector<128x256xbf16>, vector<256x256xbf16>, vector<128x256xf32> -> vector<128x256xf32>
    %c0_15 = arith.constant 0 : index
    %c0_16 = arith.constant 0 : index
    %37 = vector.load %arg5[%c0_15, %c0_16] : memref<256x256xbf16, #tpu.memory_space<vmem>>, vector<256x256xbf16>
    %cst_17 = arith.constant dense<0.000000e+00> : vector<128x256xf32>
    %38 = tpu.matmul %34, %37, %cst_17 {dimension_numbers = #tpu.dot_dimension_numbers<[1], [0], [0], [1], [0, 0, 1, 1], [], []>} : vector<128x256xbf16>, vector<256x256xbf16>, vector<128x256xf32> -> vector<128x256xf32>
    %c0_18 = arith.constant 0 : index
    %c0_19 = arith.constant 0 : index
    %39 = vector.load %arg6[%c0_18, %c0_19] : memref<256x256xbf16, #tpu.memory_space<vmem>>, vector<256x256xbf16>
    %cst_20 = arith.constant dense<0.000000e+00> : vector<128x256xf32>
    %40 = tpu.matmul %34, %39, %cst_20 {dimension_numbers = #tpu.dot_dimension_numbers<[1], [0], [0], [1], [0, 0, 1, 1], [], []>} : vector<128x256xbf16>, vector<256x256xbf16>, vector<128x256xf32> -> vector<128x256xf32>
    %41 = arith.truncf %36 : vector<128x256xf32> to vector<128x256xbf16>
    %42 = arith.truncf %38 : vector<128x256xf32> to vector<128x256xbf16>
    %43 = arith.truncf %40 : vector<128x256xf32> to vector<128x256xbf16>
    %44 = tpu.iota {dimensions = array<i32: 0>} : vector<128x128xi32>
    %45 = tpu.iota {dimensions = array<i32: 1>} : vector<128x128xi32>
    %46 = arith.cmpi sle, %45, %44 : vector<128x128xi32>
    %cst_21 = arith.constant 0.000000e+00 : f32
    %47 = vector.broadcast %cst_21 : f32 to vector<128x256xf32>
    %48 = vector.extract_strided_slice %41 {offsets = [0, 0], sizes = [128, 32], strides = [1, 1]} : vector<128x256xbf16> to vector<128x32xbf16>
    %49 = vector.extract_strided_slice %42 {offsets = [0, 0], sizes = [128, 32], strides = [1, 1]} : vector<128x256xbf16> to vector<128x32xbf16>
    %50 = vector.extract_strided_slice %43 {offsets = [0, 0], sizes = [128, 32], strides = [1, 1]} : vector<128x256xbf16> to vector<128x32xbf16>
    %cst_22 = arith.constant dense<0.000000e+00> : vector<128x128xf32>
    %51 = tpu.matmul %48, %49, %cst_22 {dimension_numbers = #tpu.dot_dimension_numbers<[1], [1], [0], [0], [0, 0, 1, 0], [], []>} : vector<128x32xbf16>, vector<128x32xbf16>, vector<128x128xf32> -> vector<128x128xf32>
    %52 = vector.broadcast %2 : f32 to vector<128x128xf32>
    %53 = arith.mulf %51, %52 : vector<128x128xf32>
    %cst_23 = arith.constant -1.000000e+30 : f32
    %54 = vector.broadcast %cst_23 : f32 to vector<128x128xf32>
    %55 = arith.select %46, %53, %54 : vector<128x128xi1>, vector<128x128xf32>
    %cst_24 = arith.constant dense<0xFF800000> : vector<128xf32>
    %56 = vector.multi_reduction <maximumf>, %55, %cst_24 [1] : vector<128x128xf32> to vector<128xf32>
    %57 = vector.shape_cast %56 : vector<128xf32> to vector<128x1xf32>
    %58 = vector.broadcast %57 : vector<128x1xf32> to vector<128x128xf32>
    %59 = arith.subf %55, %58 : vector<128x128xf32>
    %60 = math.exp %59 : vector<128x128xf32>
    %cst_25 = arith.constant dense<0.000000e+00> : vector<128xf32>
    %61 = vector.multi_reduction <add>, %60, %cst_25 [1] : vector<128x128xf32> to vector<128xf32>
    %62 = vector.shape_cast %61 : vector<128xf32> to vector<128x1xf32>
    %63 = tpu.reciprocal %62 {approx = true} : vector<128x1xf32> -> vector<128x1xf32>
    %64 = vector.broadcast %63 : vector<128x1xf32> to vector<128x128xf32>
    %65 = arith.mulf %60, %64 : vector<128x128xf32>
    %66 = arith.truncf %65 : vector<128x128xf32> to vector<128x128xbf16>
    %cst_26 = arith.constant dense<0.000000e+00> : vector<128x32xf32>
    %67 = tpu.matmul %66, %50, %cst_26 {dimension_numbers = #tpu.dot_dimension_numbers<[1], [0], [0], [1], [0, 0, 1, 1], [], []>} : vector<128x128xbf16>, vector<128x32xbf16>, vector<128x32xf32> -> vector<128x32xf32>
    %68 = arith.truncf %67 : vector<128x32xf32> to vector<128x32xbf16>
    %c0_27 = arith.constant 0 : index
    %c0_28 = arith.constant 0 : index
    %69 = vector.load %arg7[%c0_27, %c0_28] : memref<256x256xbf16, #tpu.memory_space<vmem>>, vector<32x256xbf16>
    %cst_29 = arith.constant dense<0.000000e+00> : vector<128x256xf32>
    %70 = tpu.matmul %68, %69, %cst_29 {dimension_numbers = #tpu.dot_dimension_numbers<[1], [0], [0], [1], [0, 0, 1, 1], [], []>} : vector<128x32xbf16>, vector<32x256xbf16>, vector<128x256xf32> -> vector<128x256xf32>
    %71 = arith.addf %47, %70 : vector<128x256xf32>
    %72 = vector.extract_strided_slice %41 {offsets = [0, 32], sizes = [128, 32], strides = [1, 1]} : vector<128x256xbf16> to vector<128x32xbf16>
    %73 = vector.extract_strided_slice %42 {offsets = [0, 32], sizes = [128, 32], strides = [1, 1]} : vector<128x256xbf16> to vector<128x32xbf16>
    %74 = vector.extract_strided_slice %43 {offsets = [0, 32], sizes = [128, 32], strides = [1, 1]} : vector<128x256xbf16> to vector<128x32xbf16>
    %cst_30 = arith.constant dense<0.000000e+00> : vector<128x128xf32>
    %75 = tpu.matmul %72, %73, %cst_30 {dimension_numbers = #tpu.dot_dimension_numbers<[1], [1], [0], [0], [0, 0, 1, 0], [], []>} : vector<128x32xbf16>, vector<128x32xbf16>, vector<128x128xf32> -> vector<128x128xf32>
    %76 = vector.broadcast %2 : f32 to vector<128x128xf32>
    %77 = arith.mulf %75, %76 : vector<128x128xf32>
    %cst_31 = arith.constant -1.000000e+30 : f32
    %78 = vector.broadcast %cst_31 : f32 to vector<128x128xf32>
    %79 = arith.select %46, %77, %78 : vector<128x128xi1>, vector<128x128xf32>
    %cst_32 = arith.constant dense<0xFF800000> : vector<128xf32>
    %80 = vector.multi_reduction <maximumf>, %79, %cst_32 [1] : vector<128x128xf32> to vector<128xf32>
    %81 = vector.shape_cast %80 : vector<128xf32> to vector<128x1xf32>
    %82 = vector.broadcast %81 : vector<128x1xf32> to vector<128x128xf32>
    %83 = arith.subf %79, %82 : vector<128x128xf32>
    %84 = math.exp %83 : vector<128x128xf32>
    %cst_33 = arith.constant dense<0.000000e+00> : vector<128xf32>
    %85 = vector.multi_reduction <add>, %84, %cst_33 [1] : vector<128x128xf32> to vector<128xf32>
    %86 = vector.shape_cast %85 : vector<128xf32> to vector<128x1xf32>
    %87 = tpu.reciprocal %86 {approx = true} : vector<128x1xf32> -> vector<128x1xf32>
    %88 = vector.broadcast %87 : vector<128x1xf32> to vector<128x128xf32>
    %89 = arith.mulf %84, %88 : vector<128x128xf32>
    %90 = arith.truncf %89 : vector<128x128xf32> to vector<128x128xbf16>
    %cst_34 = arith.constant dense<0.000000e+00> : vector<128x32xf32>
    %91 = tpu.matmul %90, %74, %cst_34 {dimension_numbers = #tpu.dot_dimension_numbers<[1], [0], [0], [1], [0, 0, 1, 1], [], []>} : vector<128x128xbf16>, vector<128x32xbf16>, vector<128x32xf32> -> vector<128x32xf32>
    %92 = arith.truncf %91 : vector<128x32xf32> to vector<128x32xbf16>
    %c32 = arith.constant 32 : index
    %c0_35 = arith.constant 0 : index
    %93 = vector.load %arg7[%c32, %c0_35] : memref<256x256xbf16, #tpu.memory_space<vmem>>, vector<32x256xbf16>
    %cst_36 = arith.constant dense<0.000000e+00> : vector<128x256xf32>
    %94 = tpu.matmul %92, %93, %cst_36 {dimension_numbers = #tpu.dot_dimension_numbers<[1], [0], [0], [1], [0, 0, 1, 1], [], []>} : vector<128x32xbf16>, vector<32x256xbf16>, vector<128x256xf32> -> vector<128x256xf32>
    %95 = arith.addf %71, %94 : vector<128x256xf32>
    %96 = vector.extract_strided_slice %41 {offsets = [0, 64], sizes = [128, 32], strides = [1, 1]} : vector<128x256xbf16> to vector<128x32xbf16>
    %97 = vector.extract_strided_slice %42 {offsets = [0, 64], sizes = [128, 32], strides = [1, 1]} : vector<128x256xbf16> to vector<128x32xbf16>
    %98 = vector.extract_strided_slice %43 {offsets = [0, 64], sizes = [128, 32], strides = [1, 1]} : vector<128x256xbf16> to vector<128x32xbf16>
    %cst_37 = arith.constant dense<0.000000e+00> : vector<128x128xf32>
    %99 = tpu.matmul %96, %97, %cst_37 {dimension_numbers = #tpu.dot_dimension_numbers<[1], [1], [0], [0], [0, 0, 1, 0], [], []>} : vector<128x32xbf16>, vector<128x32xbf16>, vector<128x128xf32> -> vector<128x128xf32>
    %100 = vector.broadcast %2 : f32 to vector<128x128xf32>
    %101 = arith.mulf %99, %100 : vector<128x128xf32>
    %cst_38 = arith.constant -1.000000e+30 : f32
    %102 = vector.broadcast %cst_38 : f32 to vector<128x128xf32>
    %103 = arith.select %46, %101, %102 : vector<128x128xi1>, vector<128x128xf32>
    %cst_39 = arith.constant dense<0xFF800000> : vector<128xf32>
    %104 = vector.multi_reduction <maximumf>, %103, %cst_39 [1] : vector<128x128xf32> to vector<128xf32>
    %105 = vector.shape_cast %104 : vector<128xf32> to vector<128x1xf32>
    %106 = vector.broadcast %105 : vector<128x1xf32> to vector<128x128xf32>
    %107 = arith.subf %103, %106 : vector<128x128xf32>
    %108 = math.exp %107 : vector<128x128xf32>
    %cst_40 = arith.constant dense<0.000000e+00> : vector<128xf32>
    %109 = vector.multi_reduction <add>, %108, %cst_40 [1] : vector<128x128xf32> to vector<128xf32>
    %110 = vector.shape_cast %109 : vector<128xf32> to vector<128x1xf32>
    %111 = tpu.reciprocal %110 {approx = true} : vector<128x1xf32> -> vector<128x1xf32>
    %112 = vector.broadcast %111 : vector<128x1xf32> to vector<128x128xf32>
    %113 = arith.mulf %108, %112 : vector<128x128xf32>
    %114 = arith.truncf %113 : vector<128x128xf32> to vector<128x128xbf16>
    %cst_41 = arith.constant dense<0.000000e+00> : vector<128x32xf32>
    %115 = tpu.matmul %114, %98, %cst_41 {dimension_numbers = #tpu.dot_dimension_numbers<[1], [0], [0], [1], [0, 0, 1, 1], [], []>} : vector<128x128xbf16>, vector<128x32xbf16>, vector<128x32xf32> -> vector<128x32xf32>
    %116 = arith.truncf %115 : vector<128x32xf32> to vector<128x32xbf16>
    %c64 = arith.constant 64 : index
    %c0_42 = arith.constant 0 : index
    %117 = vector.load %arg7[%c64, %c0_42] : memref<256x256xbf16, #tpu.memory_space<vmem>>, vector<32x256xbf16>
    %cst_43 = arith.constant dense<0.000000e+00> : vector<128x256xf32>
    %118 = tpu.matmul %116, %117, %cst_43 {dimension_numbers = #tpu.dot_dimension_numbers<[1], [0], [0], [1], [0, 0, 1, 1], [], []>} : vector<128x32xbf16>, vector<32x256xbf16>, vector<128x256xf32> -> vector<128x256xf32>
    %119 = arith.addf %95, %118 : vector<128x256xf32>
    %120 = vector.extract_strided_slice %41 {offsets = [0, 96], sizes = [128, 32], strides = [1, 1]} : vector<128x256xbf16> to vector<128x32xbf16>
    %121 = vector.extract_strided_slice %42 {offsets = [0, 96], sizes = [128, 32], strides = [1, 1]} : vector<128x256xbf16> to vector<128x32xbf16>
    %122 = vector.extract_strided_slice %43 {offsets = [0, 96], sizes = [128, 32], strides = [1, 1]} : vector<128x256xbf16> to vector<128x32xbf16>
    %cst_44 = arith.constant dense<0.000000e+00> : vector<128x128xf32>
    %123 = tpu.matmul %120, %121, %cst_44 {dimension_numbers = #tpu.dot_dimension_numbers<[1], [1], [0], [0], [0, 0, 1, 0], [], []>} : vector<128x32xbf16>, vector<128x32xbf16>, vector<128x128xf32> -> vector<128x128xf32>
    %124 = vector.broadcast %2 : f32 to vector<128x128xf32>
    %125 = arith.mulf %123, %124 : vector<128x128xf32>
    %cst_45 = arith.constant -1.000000e+30 : f32
    %126 = vector.broadcast %cst_45 : f32 to vector<128x128xf32>
    %127 = arith.select %46, %125, %126 : vector<128x128xi1>, vector<128x128xf32>
    %cst_46 = arith.constant dense<0xFF800000> : vector<128xf32>
    %128 = vector.multi_reduction <maximumf>, %127, %cst_46 [1] : vector<128x128xf32> to vector<128xf32>
    %129 = vector.shape_cast %128 : vector<128xf32> to vector<128x1xf32>
    %130 = vector.broadcast %129 : vector<128x1xf32> to vector<128x128xf32>
    %131 = arith.subf %127, %130 : vector<128x128xf32>
    %132 = math.exp %131 : vector<128x128xf32>
    %cst_47 = arith.constant dense<0.000000e+00> : vector<128xf32>
    %133 = vector.multi_reduction <add>, %132, %cst_47 [1] : vector<128x128xf32> to vector<128xf32>
    %134 = vector.shape_cast %133 : vector<128xf32> to vector<128x1xf32>
    %135 = tpu.reciprocal %134 {approx = true} : vector<128x1xf32> -> vector<128x1xf32>
    %136 = vector.broadcast %135 : vector<128x1xf32> to vector<128x128xf32>
    %137 = arith.mulf %132, %136 : vector<128x128xf32>
    %138 = arith.truncf %137 : vector<128x128xf32> to vector<128x128xbf16>
    %cst_48 = arith.constant dense<0.000000e+00> : vector<128x32xf32>
    %139 = tpu.matmul %138, %122, %cst_48 {dimension_numbers = #tpu.dot_dimension_numbers<[1], [0], [0], [1], [0, 0, 1, 1], [], []>} : vector<128x128xbf16>, vector<128x32xbf16>, vector<128x32xf32> -> vector<128x32xf32>
    %140 = arith.truncf %139 : vector<128x32xf32> to vector<128x32xbf16>
    %c96 = arith.constant 96 : index
    %c0_49 = arith.constant 0 : index
    %141 = vector.load %arg7[%c96, %c0_49] : memref<256x256xbf16, #tpu.memory_space<vmem>>, vector<32x256xbf16>
    %cst_50 = arith.constant dense<0.000000e+00> : vector<128x256xf32>
    %142 = tpu.matmul %140, %141, %cst_50 {dimension_numbers = #tpu.dot_dimension_numbers<[1], [0], [0], [1], [0, 0, 1, 1], [], []>} : vector<128x32xbf16>, vector<32x256xbf16>, vector<128x256xf32> -> vector<128x256xf32>
    %143 = arith.addf %119, %142 : vector<128x256xf32>
    %144 = vector.extract_strided_slice %41 {offsets = [0, 128], sizes = [128, 32], strides = [1, 1]} : vector<128x256xbf16> to vector<128x32xbf16>
    %145 = vector.extract_strided_slice %42 {offsets = [0, 128], sizes = [128, 32], strides = [1, 1]} : vector<128x256xbf16> to vector<128x32xbf16>
    %146 = vector.extract_strided_slice %43 {offsets = [0, 128], sizes = [128, 32], strides = [1, 1]} : vector<128x256xbf16> to vector<128x32xbf16>
    %cst_51 = arith.constant dense<0.000000e+00> : vector<128x128xf32>
    %147 = tpu.matmul %144, %145, %cst_51 {dimension_numbers = #tpu.dot_dimension_numbers<[1], [1], [0], [0], [0, 0, 1, 0], [], []>} : vector<128x32xbf16>, vector<128x32xbf16>, vector<128x128xf32> -> vector<128x128xf32>
    %148 = vector.broadcast %2 : f32 to vector<128x128xf32>
    %149 = arith.mulf %147, %148 : vector<128x128xf32>
    %cst_52 = arith.constant -1.000000e+30 : f32
    %150 = vector.broadcast %cst_52 : f32 to vector<128x128xf32>
    %151 = arith.select %46, %149, %150 : vector<128x128xi1>, vector<128x128xf32>
    %cst_53 = arith.constant dense<0xFF800000> : vector<128xf32>
    %152 = vector.multi_reduction <maximumf>, %151, %cst_53 [1] : vector<128x128xf32> to vector<128xf32>
    %153 = vector.shape_cast %152 : vector<128xf32> to vector<128x1xf32>
    %154 = vector.broadcast %153 : vector<128x1xf32> to vector<128x128xf32>
    %155 = arith.subf %151, %154 : vector<128x128xf32>
    %156 = math.exp %155 : vector<128x128xf32>
    %cst_54 = arith.constant dense<0.000000e+00> : vector<128xf32>
    %157 = vector.multi_reduction <add>, %156, %cst_54 [1] : vector<128x128xf32> to vector<128xf32>
    %158 = vector.shape_cast %157 : vector<128xf32> to vector<128x1xf32>
    %159 = tpu.reciprocal %158 {approx = true} : vector<128x1xf32> -> vector<128x1xf32>
    %160 = vector.broadcast %159 : vector<128x1xf32> to vector<128x128xf32>
    %161 = arith.mulf %156, %160 : vector<128x128xf32>
    %162 = arith.truncf %161 : vector<128x128xf32> to vector<128x128xbf16>
    %cst_55 = arith.constant dense<0.000000e+00> : vector<128x32xf32>
    %163 = tpu.matmul %162, %146, %cst_55 {dimension_numbers = #tpu.dot_dimension_numbers<[1], [0], [0], [1], [0, 0, 1, 1], [], []>} : vector<128x128xbf16>, vector<128x32xbf16>, vector<128x32xf32> -> vector<128x32xf32>
    %164 = arith.truncf %163 : vector<128x32xf32> to vector<128x32xbf16>
    %c128 = arith.constant 128 : index
    %c0_56 = arith.constant 0 : index
    %165 = vector.load %arg7[%c128, %c0_56] : memref<256x256xbf16, #tpu.memory_space<vmem>>, vector<32x256xbf16>
    %cst_57 = arith.constant dense<0.000000e+00> : vector<128x256xf32>
    %166 = tpu.matmul %164, %165, %cst_57 {dimension_numbers = #tpu.dot_dimension_numbers<[1], [0], [0], [1], [0, 0, 1, 1], [], []>} : vector<128x32xbf16>, vector<32x256xbf16>, vector<128x256xf32> -> vector<128x256xf32>
    %167 = arith.addf %143, %166 : vector<128x256xf32>
    %168 = vector.extract_strided_slice %41 {offsets = [0, 160], sizes = [128, 32], strides = [1, 1]} : vector<128x256xbf16> to vector<128x32xbf16>
    %169 = vector.extract_strided_slice %42 {offsets = [0, 160], sizes = [128, 32], strides = [1, 1]} : vector<128x256xbf16> to vector<128x32xbf16>
    %170 = vector.extract_strided_slice %43 {offsets = [0, 160], sizes = [128, 32], strides = [1, 1]} : vector<128x256xbf16> to vector<128x32xbf16>
    %cst_58 = arith.constant dense<0.000000e+00> : vector<128x128xf32>
    %171 = tpu.matmul %168, %169, %cst_58 {dimension_numbers = #tpu.dot_dimension_numbers<[1], [1], [0], [0], [0, 0, 1, 0], [], []>} : vector<128x32xbf16>, vector<128x32xbf16>, vector<128x128xf32> -> vector<128x128xf32>
    %172 = vector.broadcast %2 : f32 to vector<128x128xf32>
    %173 = arith.mulf %171, %172 : vector<128x128xf32>
    %cst_59 = arith.constant -1.000000e+30 : f32
    %174 = vector.broadcast %cst_59 : f32 to vector<128x128xf32>
    %175 = arith.select %46, %173, %174 : vector<128x128xi1>, vector<128x128xf32>
    %cst_60 = arith.constant dense<0xFF800000> : vector<128xf32>
    %176 = vector.multi_reduction <maximumf>, %175, %cst_60 [1] : vector<128x128xf32> to vector<128xf32>
    %177 = vector.shape_cast %176 : vector<128xf32> to vector<128x1xf32>
    %178 = vector.broadcast %177 : vector<128x1xf32> to vector<128x128xf32>
    %179 = arith.subf %175, %178 : vector<128x128xf32>
    %180 = math.exp %179 : vector<128x128xf32>
    %cst_61 = arith.constant dense<0.000000e+00> : vector<128xf32>
    %181 = vector.multi_reduction <add>, %180, %cst_61 [1] : vector<128x128xf32> to vector<128xf32>
    %182 = vector.shape_cast %181 : vector<128xf32> to vector<128x1xf32>
    %183 = tpu.reciprocal %182 {approx = true} : vector<128x1xf32> -> vector<128x1xf32>
    %184 = vector.broadcast %183 : vector<128x1xf32> to vector<128x128xf32>
    %185 = arith.mulf %180, %184 : vector<128x128xf32>
    %186 = arith.truncf %185 : vector<128x128xf32> to vector<128x128xbf16>
    %cst_62 = arith.constant dense<0.000000e+00> : vector<128x32xf32>
    %187 = tpu.matmul %186, %170, %cst_62 {dimension_numbers = #tpu.dot_dimension_numbers<[1], [0], [0], [1], [0, 0, 1, 1], [], []>} : vector<128x128xbf16>, vector<128x32xbf16>, vector<128x32xf32> -> vector<128x32xf32>
    %188 = arith.truncf %187 : vector<128x32xf32> to vector<128x32xbf16>
    %c160 = arith.constant 160 : index
    %c0_63 = arith.constant 0 : index
    %189 = vector.load %arg7[%c160, %c0_63] : memref<256x256xbf16, #tpu.memory_space<vmem>>, vector<32x256xbf16>
    %cst_64 = arith.constant dense<0.000000e+00> : vector<128x256xf32>
    %190 = tpu.matmul %188, %189, %cst_64 {dimension_numbers = #tpu.dot_dimension_numbers<[1], [0], [0], [1], [0, 0, 1, 1], [], []>} : vector<128x32xbf16>, vector<32x256xbf16>, vector<128x256xf32> -> vector<128x256xf32>
    %191 = arith.addf %167, %190 : vector<128x256xf32>
    %192 = vector.extract_strided_slice %41 {offsets = [0, 192], sizes = [128, 32], strides = [1, 1]} : vector<128x256xbf16> to vector<128x32xbf16>
    %193 = vector.extract_strided_slice %42 {offsets = [0, 192], sizes = [128, 32], strides = [1, 1]} : vector<128x256xbf16> to vector<128x32xbf16>
    %194 = vector.extract_strided_slice %43 {offsets = [0, 192], sizes = [128, 32], strides = [1, 1]} : vector<128x256xbf16> to vector<128x32xbf16>
    %cst_65 = arith.constant dense<0.000000e+00> : vector<128x128xf32>
    %195 = tpu.matmul %192, %193, %cst_65 {dimension_numbers = #tpu.dot_dimension_numbers<[1], [1], [0], [0], [0, 0, 1, 0], [], []>} : vector<128x32xbf16>, vector<128x32xbf16>, vector<128x128xf32> -> vector<128x128xf32>
    %196 = vector.broadcast %2 : f32 to vector<128x128xf32>
    %197 = arith.mulf %195, %196 : vector<128x128xf32>
    %cst_66 = arith.constant -1.000000e+30 : f32
    %198 = vector.broadcast %cst_66 : f32 to vector<128x128xf32>
    %199 = arith.select %46, %197, %198 : vector<128x128xi1>, vector<128x128xf32>
    %cst_67 = arith.constant dense<0xFF800000> : vector<128xf32>
    %200 = vector.multi_reduction <maximumf>, %199, %cst_67 [1] : vector<128x128xf32> to vector<128xf32>
    %201 = vector.shape_cast %200 : vector<128xf32> to vector<128x1xf32>
    %202 = vector.broadcast %201 : vector<128x1xf32> to vector<128x128xf32>
    %203 = arith.subf %199, %202 : vector<128x128xf32>
    %204 = math.exp %203 : vector<128x128xf32>
    %cst_68 = arith.constant dense<0.000000e+00> : vector<128xf32>
    %205 = vector.multi_reduction <add>, %204, %cst_68 [1] : vector<128x128xf32> to vector<128xf32>
    %206 = vector.shape_cast %205 : vector<128xf32> to vector<128x1xf32>
    %207 = tpu.reciprocal %206 {approx = true} : vector<128x1xf32> -> vector<128x1xf32>
    %208 = vector.broadcast %207 : vector<128x1xf32> to vector<128x128xf32>
    %209 = arith.mulf %204, %208 : vector<128x128xf32>
    %210 = arith.truncf %209 : vector<128x128xf32> to vector<128x128xbf16>
    %cst_69 = arith.constant dense<0.000000e+00> : vector<128x32xf32>
    %211 = tpu.matmul %210, %194, %cst_69 {dimension_numbers = #tpu.dot_dimension_numbers<[1], [0], [0], [1], [0, 0, 1, 1], [], []>} : vector<128x128xbf16>, vector<128x32xbf16>, vector<128x32xf32> -> vector<128x32xf32>
    %212 = arith.truncf %211 : vector<128x32xf32> to vector<128x32xbf16>
    %c192 = arith.constant 192 : index
    %c0_70 = arith.constant 0 : index
    %213 = vector.load %arg7[%c192, %c0_70] : memref<256x256xbf16, #tpu.memory_space<vmem>>, vector<32x256xbf16>
    %cst_71 = arith.constant dense<0.000000e+00> : vector<128x256xf32>
    %214 = tpu.matmul %212, %213, %cst_71 {dimension_numbers = #tpu.dot_dimension_numbers<[1], [0], [0], [1], [0, 0, 1, 1], [], []>} : vector<128x32xbf16>, vector<32x256xbf16>, vector<128x256xf32> -> vector<128x256xf32>
    %215 = arith.addf %191, %214 : vector<128x256xf32>
    %216 = vector.extract_strided_slice %41 {offsets = [0, 224], sizes = [128, 32], strides = [1, 1]} : vector<128x256xbf16> to vector<128x32xbf16>
    %217 = vector.extract_strided_slice %42 {offsets = [0, 224], sizes = [128, 32], strides = [1, 1]} : vector<128x256xbf16> to vector<128x32xbf16>
    %218 = vector.extract_strided_slice %43 {offsets = [0, 224], sizes = [128, 32], strides = [1, 1]} : vector<128x256xbf16> to vector<128x32xbf16>
    %cst_72 = arith.constant dense<0.000000e+00> : vector<128x128xf32>
    %219 = tpu.matmul %216, %217, %cst_72 {dimension_numbers = #tpu.dot_dimension_numbers<[1], [1], [0], [0], [0, 0, 1, 0], [], []>} : vector<128x32xbf16>, vector<128x32xbf16>, vector<128x128xf32> -> vector<128x128xf32>
    %220 = vector.broadcast %2 : f32 to vector<128x128xf32>
    %221 = arith.mulf %219, %220 : vector<128x128xf32>
    %cst_73 = arith.constant -1.000000e+30 : f32
    %222 = vector.broadcast %cst_73 : f32 to vector<128x128xf32>
    %223 = arith.select %46, %221, %222 : vector<128x128xi1>, vector<128x128xf32>
    %cst_74 = arith.constant dense<0xFF800000> : vector<128xf32>
    %224 = vector.multi_reduction <maximumf>, %223, %cst_74 [1] : vector<128x128xf32> to vector<128xf32>
    %225 = vector.shape_cast %224 : vector<128xf32> to vector<128x1xf32>
    %226 = vector.broadcast %225 : vector<128x1xf32> to vector<128x128xf32>
    %227 = arith.subf %223, %226 : vector<128x128xf32>
    %228 = math.exp %227 : vector<128x128xf32>
    %cst_75 = arith.constant dense<0.000000e+00> : vector<128xf32>
    %229 = vector.multi_reduction <add>, %228, %cst_75 [1] : vector<128x128xf32> to vector<128xf32>
    %230 = vector.shape_cast %229 : vector<128xf32> to vector<128x1xf32>
    %231 = tpu.reciprocal %230 {approx = true} : vector<128x1xf32> -> vector<128x1xf32>
    %232 = vector.broadcast %231 : vector<128x1xf32> to vector<128x128xf32>
    %233 = arith.mulf %228, %232 : vector<128x128xf32>
    %234 = arith.truncf %233 : vector<128x128xf32> to vector<128x128xbf16>
    %cst_76 = arith.constant dense<0.000000e+00> : vector<128x32xf32>
    %235 = tpu.matmul %234, %218, %cst_76 {dimension_numbers = #tpu.dot_dimension_numbers<[1], [0], [0], [1], [0, 0, 1, 1], [], []>} : vector<128x128xbf16>, vector<128x32xbf16>, vector<128x32xf32> -> vector<128x32xf32>
    %236 = arith.truncf %235 : vector<128x32xf32> to vector<128x32xbf16>
    %c224 = arith.constant 224 : index
    %c0_77 = arith.constant 0 : index
    %237 = vector.load %arg7[%c224, %c0_77] : memref<256x256xbf16, #tpu.memory_space<vmem>>, vector<32x256xbf16>
    %cst_78 = arith.constant dense<0.000000e+00> : vector<128x256xf32>
    %238 = tpu.matmul %236, %237, %cst_78 {dimension_numbers = #tpu.dot_dimension_numbers<[1], [0], [0], [1], [0, 0, 1, 1], [], []>} : vector<128x32xbf16>, vector<32x256xbf16>, vector<128x256xf32> -> vector<128x256xf32>
    %239 = arith.addf %215, %238 : vector<128x256xf32>
    %c0_79 = arith.constant 0 : index
    %c0_80 = arith.constant 0 : index
    %240 = vector.load %arg8[%c0_79, %c0_80] : memref<1x256xf32, #tpu.memory_space<vmem>>, vector<1x256xf32>
    %241 = vector.broadcast %240 : vector<1x256xf32> to vector<128x256xf32>
    %242 = arith.addf %239, %241 : vector<128x256xf32>
    %243 = arith.addf %1, %242 : vector<128x256xf32>
    %c0_81 = arith.constant 0 : index
    %c0_82 = arith.constant 0 : index
    %244 = vector.load %arg9[%c0_81, %c0_82] : memref<1x256xf32, #tpu.memory_space<vmem>>, vector<1x256xf32>
    %c0_83 = arith.constant 0 : index
    %c0_84 = arith.constant 0 : index
    %245 = vector.load %arg10[%c0_83, %c0_84] : memref<1x256xf32, #tpu.memory_space<vmem>>, vector<1x256xf32>
    %246 = vector.broadcast %7 : vector<1x256xf32> to vector<128x256xf32>
    %247 = arith.mulf %243, %246 : vector<128x256xf32>
    %cst_85 = arith.constant dense<0.000000e+00> : vector<128xf32>
    %248 = vector.multi_reduction <add>, %247, %cst_85 [1] : vector<128x256xf32> to vector<128xf32>
    %249 = vector.shape_cast %248 : vector<128xf32> to vector<128x1xf32>
    %cst_86 = arith.constant 5.000000e-03 : f32
    %250 = vector.broadcast %cst_86 : f32 to vector<128x1xf32>
    %251 = arith.mulf %249, %250 : vector<128x1xf32>
    %252 = vector.broadcast %251 : vector<128x1xf32> to vector<128x256xf32>
    %253 = arith.subf %243, %252 : vector<128x256xf32>
    %254 = arith.mulf %253, %253 : vector<128x256xf32>
    %255 = vector.broadcast %7 : vector<1x256xf32> to vector<128x256xf32>
    %256 = arith.mulf %254, %255 : vector<128x256xf32>
    %cst_87 = arith.constant dense<0.000000e+00> : vector<128xf32>
    %257 = vector.multi_reduction <add>, %256, %cst_87 [1] : vector<128x256xf32> to vector<128xf32>
    %258 = vector.shape_cast %257 : vector<128xf32> to vector<128x1xf32>
    %cst_88 = arith.constant 5.000000e-03 : f32
    %259 = vector.broadcast %cst_88 : f32 to vector<128x1xf32>
    %260 = arith.mulf %258, %259 : vector<128x1xf32>
    %cst_89 = arith.constant 9.99999974E-6 : f32
    %261 = vector.broadcast %cst_89 : f32 to vector<128x1xf32>
    %262 = arith.addf %260, %261 : vector<128x1xf32>
    %263 = math.rsqrt %262 : vector<128x1xf32>
    %264 = vector.broadcast %263 : vector<128x1xf32> to vector<128x256xf32>
    %265 = arith.mulf %253, %264 : vector<128x256xf32>
    %266 = vector.broadcast %244 : vector<1x256xf32> to vector<128x256xf32>
    %267 = arith.mulf %265, %266 : vector<128x256xf32>
    %268 = vector.broadcast %245 : vector<1x256xf32> to vector<128x256xf32>
    %269 = arith.addf %267, %268 : vector<128x256xf32>
    %270 = arith.truncf %269 : vector<128x256xf32> to vector<128x256xbf16>
    %c0_90 = arith.constant 0 : index
    %c0_91 = arith.constant 0 : index
    %271 = vector.load %arg11[%c0_90, %c0_91] : memref<256x1024xbf16, #tpu.memory_space<vmem>>, vector<256x1024xbf16>
    %cst_92 = arith.constant dense<0.000000e+00> : vector<128x1024xf32>
    %272 = tpu.matmul %270, %271, %cst_92 {dimension_numbers = #tpu.dot_dimension_numbers<[1], [0], [0], [1], [0, 0, 1, 1], [], []>} : vector<128x256xbf16>, vector<256x1024xbf16>, vector<128x1024xf32> -> vector<128x1024xf32>
    %c0_93 = arith.constant 0 : index
    %c0_94 = arith.constant 0 : index
    %273 = vector.load %arg12[%c0_93, %c0_94] : memref<1x1024xf32, #tpu.memory_space<vmem>>, vector<1x1024xf32>
    %274 = vector.broadcast %273 : vector<1x1024xf32> to vector<128x1024xf32>
    %275 = arith.addf %272, %274 : vector<128x1024xf32>
    %cst_95 = arith.constant 0.000000e+00 : f32
    %276 = vector.broadcast %cst_95 : f32 to vector<128x1024xf32>
    %277 = arith.maximumf %275, %276 : vector<128x1024xf32>
    %278 = arith.truncf %277 : vector<128x1024xf32> to vector<128x1024xbf16>
    %c0_96 = arith.constant 0 : index
    %c0_97 = arith.constant 0 : index
    %279 = vector.load %arg13[%c0_96, %c0_97] : memref<1024x256xbf16, #tpu.memory_space<vmem>>, vector<1024x256xbf16>
    %cst_98 = arith.constant dense<0.000000e+00> : vector<128x256xf32>
    %280 = tpu.matmul %278, %279, %cst_98 {dimension_numbers = #tpu.dot_dimension_numbers<[1], [0], [0], [1], [0, 0, 1, 1], [], []>} : vector<128x1024xbf16>, vector<1024x256xbf16>, vector<128x256xf32> -> vector<128x256xf32>
    %c0_99 = arith.constant 0 : index
    %c0_100 = arith.constant 0 : index
    %281 = vector.load %arg14[%c0_99, %c0_100] : memref<1x256xf32, #tpu.memory_space<vmem>>, vector<1x256xf32>
    %282 = vector.broadcast %281 : vector<1x256xf32> to vector<128x256xf32>
    %283 = arith.addf %280, %282 : vector<128x256xf32>
    %284 = arith.addf %243, %283 : vector<128x256xf32>
    %c0_101 = arith.constant 0 : index
    %c0_102 = arith.constant 0 : index
    %c0_103 = arith.constant 0 : index
    %285 = vector.load %arg15[%c0_101, %c0_102, %c0_103] : memref<1x128x256xf32, #tpu.memory_space<vmem>>, vector<1x128x256xf32>
    %286 = vector.shape_cast %285 : vector<1x128x256xf32> to vector<128x256xf32>
    %287 = vector.shape_cast %284 : vector<128x256xf32> to vector<1x128x256xf32>
    tpu.vector_store %arg15[%c0_101, %c0_102, %c0_103], %287 {strides = array<i32>} : memref<1x128x256xf32, #tpu.memory_space<vmem>>, vector<1x128x256xf32>,
    return
  }
  func.func @transform_0(%arg0: i32) -> (i32, i32, i32) {
    %c0_i32 = arith.constant 0 : i32
    %c0_i32_0 = arith.constant 0 : i32
    %c0_i32_1 = arith.constant 0 : i32
    return %arg0, %c0_i32, %c0_i32_0 : i32, i32, i32
  }
  func.func @transform_1(%arg0: i32) -> (i32, i32) {
    %c0_i32 = arith.constant 0 : i32
    %c0_i32_0 = arith.constant 0 : i32
    %c0_i32_1 = arith.constant 0 : i32
    return %c0_i32, %c0_i32_0 : i32, i32
  }
  func.func @transform_2(%arg0: i32) -> (i32, i32) {
    %c0_i32 = arith.constant 0 : i32
    %c0_i32_0 = arith.constant 0 : i32
    %c0_i32_1 = arith.constant 0 : i32
    return %c0_i32, %c0_i32_0 : i32, i32
  }
  func.func @transform_3(%arg0: i32) -> (i32, i32) {
    %c0_i32 = arith.constant 0 : i32
    %c0_i32_0 = arith.constant 0 : i32
    %c0_i32_1 = arith.constant 0 : i32
    return %c0_i32, %c0_i32_0 : i32, i32
  }
  func.func @transform_4(%arg0: i32) -> (i32, i32) {
    %c0_i32 = arith.constant 0 : i32
    %c0_i32_0 = arith.constant 0 : i32
    %c0_i32_1 = arith.constant 0 : i32
    return %c0_i32, %c0_i32_0 : i32, i32
  }
  func.func @transform_5(%arg0: i32) -> (i32, i32) {
    %c0_i32 = arith.constant 0 : i32
    %c0_i32_0 = arith.constant 0 : i32
    %c0_i32_1 = arith.constant 0 : i32
    return %c0_i32, %c0_i32_0 : i32, i32
  }
  func.func @transform_6(%arg0: i32) -> (i32, i32) {
    %c0_i32 = arith.constant 0 : i32
    %c0_i32_0 = arith.constant 0 : i32
    %c0_i32_1 = arith.constant 0 : i32
    return %c0_i32, %c0_i32_0 : i32, i32
  }
  func.func @transform_7(%arg0: i32) -> (i32, i32) {
    %c0_i32 = arith.constant 0 : i32
    %c0_i32_0 = arith.constant 0 : i32
    %c0_i32_1 = arith.constant 0 : i32
    return %c0_i32, %c0_i32_0 : i32, i32
  }
  func.func @transform_8(%arg0: i32) -> (i32, i32) {
    %c0_i32 = arith.constant 0 : i32
    %c0_i32_0 = arith.constant 0 : i32
    %c0_i32_1 = arith.constant 0 : i32
    return %c0_i32, %c0_i32_0 : i32, i32
  }
  func.func @transform_9(%arg0: i32) -> (i32, i32) {
    %c0_i32 = arith.constant 0 : i32
    %c0_i32_0 = arith.constant 0 : i32
    %c0_i32_1 = arith.constant 0 : i32
    return %c0_i32, %c0_i32_0 : i32, i32
  }
  func.func @transform_10(%arg0: i32) -> (i32, i32) {
    %c0_i32 = arith.constant 0 : i32
    %c0_i32_0 = arith.constant 0 : i32
    %c0_i32_1 = arith.constant 0 : i32
    return %c0_i32, %c0_i32_0 : i32, i32
  }
  func.func @transform_11(%arg0: i32) -> (i32, i32) {
    %c0_i32 = arith.constant 0 : i32
    %c0_i32_0 = arith.constant 0 : i32
    %c0_i32_1 = arith.constant 0 : i32
    return %c0_i32, %c0_i32_0 : i32, i32
  }
  func.func @transform_12(%arg0: i32) -> (i32, i32) {
    %c0_i32 = arith.constant 0 : i32
    %c0_i32_0 = arith.constant 0 : i32
    %c0_i32_1 = arith.constant 0 : i32
    return %c0_i32, %c0_i32_0 : i32, i32
  }
  func.func @transform_13(%arg0: i32) -> (i32, i32) {
    %c0_i32 = arith.constant 0 : i32
    %c0_i32_0 = arith.constant 0 : i32
    %c0_i32_1 = arith.constant 0 : i32
    return %c0_i32, %c0_i32_0 : i32, i32
  }
  func.func @transform_14(%arg0: i32) -> (i32, i32, i32) {
    %c0_i32 = arith.constant 0 : i32
    %c0_i32_0 = arith.constant 0 : i32
    %c0_i32_1 = arith.constant 0 : i32
    return %arg0, %c0_i32, %c0_i32_0 : i32, i32, i32
  }
}

</mosaic_0001>

<bundles_post_ra>
// kernel: tpu_custom_call.1
= control target key start
LH: loop header
LB: loop body
LE: loop exit
PB: predicated region body
PF: predicated region fallthrough
CT: control target
= control target key end

     0   :  { %s18429_s0 = inlined_call_operand.hbm [shape: f32[2,128,256], index: 0, kind: input, shape index: {}]   ;;  %s18430_s1 = inlined_call_operand.vmem [shape: f32[1,256], index: 1, kind: input, shape index: {}]   ;;  %s18431_s2 = inlined_call_operand.vmem [shape: f32[1,256], index: 2, kind: input, shape index: {}]   ;;  %s18432_s3 = inlined_call_operand.hbm [shape: bf16[256,256], index: 3, kind: input, shape index: {}]   ;;  %s18433_s4 = inlined_call_operand.hbm [shape: bf16[256,256], index: 4, kind: input, shape index: {}]   ;;  %s18434_s5 = inlined_call_operand.hbm [shape: bf16[256,256], index: 5, kind: input, shape index: {}]   ;;  %s18435_s6 = inlined_call_operand.hbm [shape: bf16[256,256], index: 6, kind: input, shape index: {}]   ;;  %s18436_s7 = inlined_call_operand.vmem [shape: f32[1,256], index: 7, kind: input, shape index: {}]   ;;  %s18437_s8 = inlined_call_operand.vmem [shape: f32[1,256], index: 8, kind: input, shape index: {}]   ;;  %s18438_s9 = inlined_call_operand.vmem [shape: f32[1,256], index: 9, kind: input, shape index: {}]   ;;  %s18439_s10 = inlined_call_operand.hbm [shape: bf16[256,1024], index: 10, kind: input, shape index: {}]   ;;  %s18440_s11 = inlined_call_operand.vmem [shape: f32[1,1024], index: 11, kind: input, shape index: {}]   ;;  %s18441_s12 = inlined_call_operand.hbm [shape: bf16[1024,256], index: 12, kind: input, shape index: {}]   ;;  %s18442_s13 = inlined_call_operand.vmem [shape: f32[1,256], index: 13, kind: input, shape index: {}]   ;;  %s18443_s14 = inlined_call_operand.hbm [shape: f32[2,128,256], index: 14, kind: output, shape index: {}]  }
   0x1   :  { %18657 = sst [smem:[#allocation87_spill]] %s18432_s3 }
   0x2   :  { %18658 = sst [smem:[#allocation88_spill]] %s18434_s5 }
   0x3   :  { %18659 = sst [smem:[#allocation89_spill]] %s18436_s7 }
   0x4   :  { %18660 = sst [smem:[#allocation90_spill]] %s18437_s8 }
   0x5   :  { %18661 = sst [smem:[#allocation91_spill]] %s18438_s9 }
   0x6   :  { %18662 = sst [smem:[#allocation92_spill]] %s18440_s11 }
   0x7   :  { %18663 = sst [smem:[#allocation93_spill]] %s18442_s13 }
   0x8   :  { %18664 = sst [smem:[#allocation94_spill]] %s18443_s14 }
   0x9   :  { %19 = vsyncpa [#allocation3], 0 }
   0xa   :  { %21 = vsyncpa [#allocation3 + $0x1], 0 }
   0xb   :  { %22 = vsyncpa [#allocation6], 0 }
   0xc   :  { %23 = vsyncpa [#allocation9], 0 }
   0xd   :  { %24 = vsyncpa [#allocation12], 0 }
   0xe   :  { %25 = vsyncpa [#allocation4], 0 }
   0xf   :  { %27 = vsyncpa [#allocation4 + $0x1], 0  ;;  %s13977_s29 = smov 0   ;;  %s13979_s30 = smov 0  }
  0x10   :  { %s13981_s15 = smov 0   ;;  %s13983_s16 = smov 0  }
  0x11 LB: > { %s13881_s17 = smov [#allocation5]   ;;  %s13998_s19 = sadd.s32 4294967295, %s13879_s16   ;;  %s13879_s16 = sphi %s13983_s16, %s19237_s16   ;;  %s13875_s15 = sphi %s13981_s15, %s19236_s15   ;;  %s13871_s30 = sphi %s13979_s30, %s19235_s30   ;;  %s13867_s29 = sphi %s13977_s29, %s19234_s29  }
  0x12   : > { %s381_s18 = sshll.u32 %s13881_s17, 4  ;;  %p10767_p0 = scmp.ge.s32.totalorder %s13879_s16, 1  ;;  %s14003_s18 = int_to_ptr.vmem [resolvable:$true] %s381_s18 }
  0x13   : > { %p18449_p1 = scmp.eq.s32.totalorder %s13998_s19, 0  ;;  %p363_p2 = scmp.lt.s32.totalorder %s13879_s16, 3 }
  0x14   : > { %s13882_s21 = smov [#allocation8]   ;;  %s13883_s24 = smov [#allocation11]  }
  0x15   : > { %p14005_p3 = pnand %p10767_p0, %p363_p2  ;;  %s407_s22 = sshll.u32 %s13882_s21, 4  ;;  %s14018_s22 = int_to_ptr.vmem [resolvable:$true] %s407_s22 }
  0x16   : > { %s442_s25 = sshll.u32 %s13883_s24, 4  ;;  %s18667_s3 = sld [smem:[#allocation87_spill]]  ;;  %s14020_s25 = int_to_ptr.vmem [resolvable:$true] %s442_s25 }
  0x17   : > { %s18665_s20 = scalar_select %p14005_p3, 1, 0 }
  0x18   : > { %p12519_p5 = pneg %p14005_p3 }
  0x1a   : > { %p14014_p6 = pnand %p12519_p5, %p18449_p1 }
  0x1c   : > { %s13603_s28 = scalar_lea.hbm %s18667_s3, 4096  ;;  %p14030_p8 = pneg %p14014_p6 }
  0x1d   : > { %p13604_p7 = scmp.ne.s32.totalorder %s18667_s3, %s13603_s28  ;;  %p13610_p11 = scmp.lt.u32.totalorder %s13603_s28, %s18667_s3 }
  0x1f   : > { %p13606_p9 = pnand %p14030_p8, %p13604_p7 }
  0x21   : > { %p13607_p10 = pneg %p13606_p9 }
  0x23   : > { %p13612_p12 = pnand %p13610_p11, %p13607_p10 }
  0x25   : > { %13615 = shalt.err (!%p13612_p12)
}
  0x26   : > { %s13616_s14 = scalar_lea.vmem %s14003_s18, 4096  ;;  %p13624_p5 = scmp.lt.s32.totalorder %s14003_s18, %s14003_s18 }
  0x27   : > { %p13617_p13 = scmp.ne.s32.totalorder %s14003_s18, %s13616_s14  ;;  %p13625_p4 = scmp.lt.s32.totalorder %s13616_s14, %s13616_s14 }
  0x29   : > { %p13619_p0 = pnand %p13617_p13, %p14030_p8  ;;  %p13626_p7 = por %p13625_p4, %p13624_p5 }
  0x2b   : > { %p13620_p2 = pneg %p13619_p0 }
  0x2d   : > { %p13627_p9 = pnand %p13626_p7, %p13620_p2 }
  0x2f   : > { %13630 = shalt.err (!%p13627_p9)
}
  0x30   : > { %s18445_s26 = smov 128   ;;  %s18447_s13 = smov 8  }
  0x31   : > { %12522 = dma.hbm_to_vmem [thread:$0]  (!%p14014_p6), %s18667_s3, 4096, %s14003_s18, [#allocation6], %s18445_s26, %s18445_s26, %s18447_s13  }
  0x32   : > { %s18669_s5 = sld [smem:[#allocation88_spill]] }
  0x38   : > { %s13631_s14 = scalar_lea.hbm %s18669_s5, 4096 }
  0x39   : > { %p13632_p4 = scmp.ne.s32.totalorder %s18669_s5, %s13631_s14  ;;  %p13638_p12 = scmp.lt.u32.totalorder %s13631_s14, %s18669_s5 }
  0x3b   : > { %p13634_p10 = pnand %p13632_p4, %p14030_p8 }
  0x3d   : > { %p13635_p11 = pneg %p13634_p10 }
  0x3f   : > { %p13640_p13 = pnand %p13638_p12, %p13635_p11 }
  0x41   : > { %13643 = shalt.err (!%p13640_p13)
}
  0x42   : > { %s13644_s18 = scalar_lea.vmem %s14018_s22, 4096  ;;  %p13652_p7 = scmp.lt.s32.totalorder %s14018_s22, %s14018_s22 }
  0x43   : > { %p13645_p0 = scmp.ne.s32.totalorder %s14018_s22, %s13644_s18  ;;  %p13653_p9 = scmp.lt.s32.totalorder %s13644_s18, %s13644_s18 }
  0x45   : > { %p13647_p2 = pnand %p13645_p0, %p14030_p8  ;;  %p13654_p4 = por %p13653_p9, %p13652_p7 }
  0x47   : > { %p13648_p5 = pneg %p13647_p2 }
  0x49   : > { %p13655_p10 = pnand %p13654_p4, %p13648_p5 }
  0x4b   : > { %13658 = shalt.err (!%p13655_p10)
}
  0x4c   : > { %12528 = dma.hbm_to_vmem [thread:$0]  (!%p14014_p6), %s18669_s5, 4096, %s14018_s22, [#allocation9], %s18445_s26, %s18445_s26, %s18447_s13  }
  0x4d   : > { %s13659_s27 = scalar_lea.hbm %s18439_s10, 16384 }
  0x4e   : > { %p13660_p11 = scmp.ne.s32.totalorder %s18439_s10, %s13659_s27  ;;  %p13666_p0 = scmp.lt.u32.totalorder %s13659_s27, %s18439_s10 }
  0x50   : > { %p13662_p12 = pnand %p13660_p11, %p14030_p8 }
  0x52   : > { %p13663_p13 = pneg %p13662_p12 }
  0x54   : > { %p13668_p2 = pnand %p13666_p0, %p13663_p13 }
  0x56   : > { %13671 = shalt.err (!%p13668_p2)
}
  0x57   : > { %s13672_s22 = scalar_lea.vmem %s14020_s25, 16384  ;;  %p13680_p4 = scmp.lt.s32.totalorder %s14020_s25, %s14020_s25 }
  0x58   : > { %p13673_p5 = scmp.ne.s32.totalorder %s14020_s25, %s13672_s22  ;;  %p13681_p10 = scmp.lt.s32.totalorder %s13672_s22, %s13672_s22 }
  0x5a   : > { %p13675_p7 = pnand %p13673_p5, %p14030_p8  ;;  %p13682_p11 = por %p13681_p10, %p13680_p4 }
  0x5c   : > { %p13676_p9 = pneg %p13675_p7 }
  0x5e   : > { %p13683_p12 = pnand %p13682_p11, %p13676_p9 }
  0x60   : > { %13686 = shalt.err (!%p13683_p12)
}
  0x61   : > { %s13886_s18 = smov 512   ;;  %s13887_s7 = smov 32  }
  0x62   : > { %12534 = dma.hbm_to_vmem [thread:$0]  (!%p14014_p6), %s18439_s10, 16384, %s14020_s25, [#allocation12], %s13886_s18, %s13886_s18, %s13887_s7  }
  0x63   : > { %s13888_s11 = smov [#allocation7]   ;;  %s13889_s28 = smov [#allocation10]  }
  0x64   : > { %s394_s27 = sshll.u32 %s13888_s11, 4  ;;  %s420_s17 = sshll.u32 %s13889_s28, 4  ;;  %s395_s27 = int_to_ptr.vmem [resolvable:$true] %s394_s27  ;;  %s421_s17 = int_to_ptr.vmem [resolvable:$true] %s420_s17 }
  0x65   : > { %s13687_s22 = scalar_lea.hbm %s18433_s4, 4096 }
  0x66   : > { %p13688_p13 = scmp.ne.s32.totalorder %s18433_s4, %s13687_s22  ;;  %p13694_p5 = scmp.lt.u32.totalorder %s13687_s22, %s18433_s4 }
  0x68   : > { %p13690_p0 = pnand %p13688_p13, %p14030_p8 }
  0x6a   : > { %p13691_p2 = pneg %p13690_p0 }
  0x6c   : > { %p13696_p7 = pnand %p13694_p5, %p13691_p2 }
  0x6e   : > { %13699 = shalt.err (!%p13696_p7)
}
  0x6f   : > { %s13700_s25 = scalar_lea.vmem %s395_s27, 4096  ;;  %p13708_p11 = scmp.lt.s32.totalorder %s395_s27, %s395_s27 }
  0x70   : > { %p13701_p9 = scmp.ne.s32.totalorder %s395_s27, %s13700_s25  ;;  %p13709_p12 = scmp.lt.s32.totalorder %s13700_s25, %s13700_s25 }
  0x72   : > { %p13703_p4 = pnand %p13701_p9, %p14030_p8  ;;  %p13710_p1 = por %p13709_p12, %p13708_p11 }
  0x74   : > { %p13704_p10 = pneg %p13703_p4 }
  0x76   : > { %p13711_p3 = pnand %p13710_p1, %p13704_p10 }
  0x78   : > { %13714 = shalt.err (!%p13711_p3)
}
  0x79   : > { %s18670_s26 = smov 8   ;;  %s18671_s13 = smov 128  }
  0x7a   : > { %12525 = dma.hbm_to_vmem [thread:$0]  (!%p14014_p6), %s18433_s4, 4096, %s395_s27, [#allocation6], %s18671_s13, %s18671_s13, %s18670_s26  }
  0x7b   : > { %s13715_s8 = scalar_lea.hbm %s18435_s6, 4096 }
  0x7c   : > { %p13716_p1 = scmp.ne.s32.totalorder %s18435_s6, %s13715_s8  ;;  %p13722_p0 = scmp.lt.u32.totalorder %s13715_s8, %s18435_s6 }
  0x7e   : > { %p13718_p3 = pnand %p13716_p1, %p14030_p8 }
  0x80   : > { %p13719_p13 = pneg %p13718_p3 }
  0x82   : > { %p13724_p2 = pnand %p13722_p0, %p13719_p13 }
  0x84   : > { %13727 = shalt.err (!%p13724_p2)
}
  0x85   : > { %s13728_s14 = scalar_lea.vmem %s421_s17, 4096  ;;  %p13736_p4 = scmp.lt.s32.totalorder %s421_s17, %s421_s17 }
  0x86   : > { %p13729_p5 = scmp.ne.s32.totalorder %s421_s17, %s13728_s14  ;;  %p13737_p10 = scmp.lt.s32.totalorder %s13728_s14, %s13728_s14 }
  0x88   : > { %p13731_p7 = pnand %p13729_p5, %p14030_p8  ;;  %p13738_p11 = por %p13737_p10, %p13736_p4 }
  0x8a   : > { %p13732_p9 = pneg %p13731_p7 }
  0x8c   : > { %p13739_p12 = pnand %p13738_p11, %p13732_p9 }
  0x8e   : > { %13742 = shalt.err (!%p13739_p12)
}
  0x8f   : > { %12531 = dma.hbm_to_vmem [thread:$0]  (!%p14014_p6), %s18435_s6, 4096, %s421_s17, [#allocation9], %s18671_s13, %s18671_s13, %s18670_s26  }
  0x90   : > { %s13890_s25 = smov [#allocation13]   ;;  %s13743_s7 = scalar_lea.hbm %s18441_s12, 16384 }
  0x91   : > { %s458_s3 = sshll.u32 %s13890_s25, 4  ;;  %p13744_p1 = scmp.ne.s32.totalorder %s18441_s12, %s13743_s7  ;;  %s459_s3 = int_to_ptr.vmem [resolvable:$true] %s458_s3 }
  0x92   : > { %p13750_p0 = scmp.lt.u32.totalorder %s13743_s7, %s18441_s12 }
  0x93   : > { %p13746_p3 = pnand %p13744_p1, %p14030_p8 }
  0x95   : > { %p13747_p13 = pneg %p13746_p3 }
  0x97   : > { %p13752_p2 = pnand %p13750_p0, %p13747_p13 }
  0x99   : > { %13755 = shalt.err (!%p13752_p2)
}
  0x9a   : > { %s13756_s17 = scalar_lea.vmem %s459_s3, 16384  ;;  %p13764_p4 = scmp.lt.s32.totalorder %s459_s3, %s459_s3 }
  0x9b   : > { %p13757_p5 = scmp.ne.s32.totalorder %s459_s3, %s13756_s17  ;;  %p13765_p10 = scmp.lt.s32.totalorder %s13756_s17, %s13756_s17 }
  0x9d   : > { %p13759_p7 = pnand %p13757_p5, %p14030_p8  ;;  %p13766_p11 = por %p13765_p10, %p13764_p4 }
  0x9f   : > { %p13760_p9 = pneg %p13759_p7 }
  0xa1   : > { %p13767_p12 = pnand %p13766_p11, %p13760_p9 }
  0xa3   : > { %13770 = shalt.err (!%p13767_p12)
}
  0xa4   : > { %12537 = dma.hbm_to_vmem [thread:$0]  (!%p14014_p6), %s18441_s12, 16384, %s459_s3, [#allocation12], %s18671_s13, %s18671_s13, %s18670_s26  }
  0xa5   : > { %s10766_s23 = sadd.s32 4294967294, %s13879_s16   ;;  %s14168_s21 = sadd.s32 1, %s13879_s16  }
  0xa6   : > { %s37_s27 = ssub.s32 %s13879_s16, %s14168_s21  ;;  %s40_s22 = sadd.s32 1, %s13875_s15 }
  0xa7   : > { %p38_p8 = scmp.eq.s32.totalorder %s37_s27, 0  ;;  %p47_p1 = scmp.ne.s32.totalorder %s13875_s15, %s13871_s30 }
  0xa8   : > { %p48_p3 = scmp.eq.s32.totalorder %s13879_s16, 0  ;;  %p53_p13 = scmp.ne.s32.totalorder %s13871_s30, %s13867_s29 }
  0xa9   : > { %s14179_s25 = scalar_select %p38_p8, %s13875_s15, %s40_s22  }
  0xaa   : > { %p14181_p0 = por %p48_p3, %p47_p1  ;;  %p18673_p2 = scmp.eq.s32.totalorder %s13998_s19, 0 }
  0xab   : > { %p350_p5 = scmp.eq.s32.totalorder %s13998_s19, 1  ;;  %p356_p7 = scmp.eq.s32.totalorder %s10766_s23, 1 }
  0xac   : > { %p14187_p6 = por %p18673_p2, %p53_p13  ;;  %p12552_p9 = scmp.lt.s32.totalorder %s13879_s16, 2 }
  0xad   : > { %s475_s13 = sand.u32 1, %s13875_s15   ;;  %p14194_p4 = por %p350_p5, %p47_p1 }
  0xae   : > { %p14198_p10 = por %p356_p7, %p53_p13  ;;  %s10775_s7 = sshll.u32 %s475_s13, 8 }
  0xaf   : > { %s18675_s3 = scalar_select %p14194_p4, 1, 0 }
  0xb0   : > { %s18676_s18 = scalar_select %p14198_p10, 1, 0 }
  0xb1   : > { %s11305_s8 = sshll.u32 %s13879_s16, 12  ;;  %s479_s17 = scalar_lea.vmem [#allocation2], %s10775_s7 }
  0xb2   : > { %s14206_s28 = scalar_lea.hbm %s18429_s0, %s11305_s8  ;;  %s486_s24 = sshll.u32 %s479_s17, 4  ;;  %s14208_s24 = int_to_ptr.vmem [resolvable:$true] %s486_s24 }
  0xb3   : > { %p14212_p11 = pnand %p12552_p9, %p14181_p0  ;;  %s14216_s23 = scalar_lea.sflag [#allocation3], %s475_s13 }
  0xb4   : > { %s13771_s27 = scalar_lea.hbm %s14206_s28, 4096  ;;  %s13776_s5 = scalar_lea.hbm %s18429_s0, 8192 }
  0xb5   : > { %p13772_p12 = scmp.ne.s32.totalorder %s14206_s28, %s13771_s27  ;;  %p13773_p8 = pneg %p14212_p11 }
  0xb6   : > { %p13777_p13 = scmp.lt.u32.totalorder %s14206_s28, %s18429_s0  ;;  %p13778_p0 = scmp.lt.u32.totalorder %s13776_s5, %s13771_s27 }
  0xb7   : > { %p13774_p1 = pnand %p13773_p8, %p13772_p12  ;;  %p13780_p5 = scmp.lt.u32.totalorder %s13771_s27, %s14206_s28 }
  0xb8   : > { %p13779_p2 = por %p13778_p0, %p13777_p13 }
  0xb9   : > { %p13775_p3 = pneg %p13774_p1 }
  0xba   : > { %p13781_p7 = por %p13780_p5, %p13779_p2 }
  0xbc   : > { %p13782_p9 = pnand %p13781_p7, %p13775_p3 }
  0xbe   : > { %13785 = shalt.err (!%p13782_p9)
}
  0xbf   : > { %s13786_s13 = scalar_lea.vmem %s14208_s24, 4096  ;;  %s13891_s11 = smov [#allocation2]  }
  0xc0   : > { %p13787_p12 = scmp.ne.s32.totalorder %s14208_s24, %s13786_s13  ;;  %s13791_s17 = sshll.u32 %s13891_s11, 4  ;;  %s13792_s17 = int_to_ptr.vmem [resolvable:$false] %s13791_s17 }
  0xc1   : > { %s13793_s22 = scalar_lea.vmem %s13792_s17, 8192  ;;  %p13794_p4 = scmp.lt.s32.totalorder %s14208_s24, %s13792_s17 }
  0xc2   : > { %p13789_p1 = pnand %p13787_p12, %p13773_p8  ;;  %p13795_p13 = scmp.lt.s32.totalorder %s13793_s22, %s13786_s13 }
  0xc4   : > { %p13790_p10 = pneg %p13789_p1  ;;  %p13796_p0 = por %p13795_p13, %p13794_p4 }
  0xc6   : > { %p13797_p2 = pnand %p13796_p0, %p13790_p10 }
  0xc8   : > { %13800 = shalt.err (!%p13797_p2)
}
  0xc9   : > { %s13892_s27 = smov 256   ;;  %s13893_s7 = smov 16  }
  0xca   : > { %12541 = dma.hbm_to_vmem [thread:$0]  (!%p14212_p11), %s14206_s28, 4096, %s14208_s24, %s14216_s23, %s13892_s27, %s13892_s27, %s13893_s7  }
  0xcb   : > { %p18678_p8 = scmp.ne.s32.totalorder %s18665_s20, 0 }
  0xcd   : > { %498 = sbr.rel (%p18678_p8) target bundleno = 6062 (0x17ae), region = 76 }
  0xd4   : > { %s14247_s5 = sand.u32 1, %s13871_s30  }
  0xd5   : > { %s10779_s8 = sshll.u32 %s14247_s5, 8  ;;  %s501_s9 = scalar_lea.sflag [#allocation3], %s14247_s5 }
  0xd6   : > { %s14253_s13 = scalar_lea.vmem [#allocation2], %s10779_s8 }
  0xd7   : > { %13846 = dma.done.wait (%p14187_p6), %s501_s9, 4096  }
  0xd8   : > { %13848 = vsyncadd (%p14187_p6), %s501_s9, 4294963200  ;;  %p18679_p4 = scmp.eq.s32.totalorder %s13998_s19, 0 }
  0xda   : > { %13850 = dma.done.wait (%p18679_p4), [#allocation6], 8192   ;;  %p18680_p10 = pmov %p18679_p4 }
  0xdb   : > { %p18681_p11 = pmov %p18679_p4 }
  0xdc   : > { %13852 = vsyncadd (%p18680_p10), [#allocation6], 4294959104 }
  0xdd   : > { %13854 = dma.done.wait (%p18681_p11), [#allocation9], 8192   ;;  %p18682_p3 = pmov %p18679_p4 }
  0xdf   : > { %13856 = vsyncadd (%p18682_p3), [#allocation9], 4294959104  ;;  %p18683_p5 = pmov %p18682_p3 }
  0xe0   : > { %p18684_p7 = pmov %p18682_p3 }
  0xe1   : > { %13858 = dma.done.wait (%p18683_p5), [#allocation12], 32768  }
  0xe2   : > { %13860 = vsyncadd (%p18684_p7), [#allocation12], 4294934528  ;;  %v606_v0 = vlaneseq  ;;  %v14276_v3 = vld [vmem:[%s14253_s13] sm:$0xff]  ;;  %v14279_v4 = vld [vmem:[%s14253_s13 + $0x8] sm:$0xff]  ;;  %v13894_v5 = vmov 0.0   ;;  %vm18482_vm1 = vcmask 261120  }
  0xe3   : > { %v14286_v8 = vld [vmem:[%s14253_s13 + $0x20] sm:$0xff]  ;;  %v14289_v9 = vld [vmem:[%s14253_s13 + $0x28] sm:$0xff]  ;;  %v14292_v10 = vld [vmem:[%s14253_s13 + $0x18] sm:$0xff]  ;;  %s13895_s14 = smov 96   ;;  %s13896_s23 = smov 64  }
  0xe4   : > { %v14272_v1 = vand.u32 127, %v606_v0  ;;  %v14297_v12 = vld [vmem:[%s14253_s13 + $0x10] sm:$0xff]  ;;  %v14302_v14 = vld [vmem:[%s14253_s13 + $0x38] sm:$0xff]  ;;  %v14311_v18 = vld [vmem:[%s14253_s13 + $0x48] sm:$0xff]  ;;  %s13897_s11 = smov 32   ;;  %s19161_s27 = sld [smem:[#allocation89_spill]] }
  0xe5   : > { %v14306_v16 = vld [vmem:[%s14253_s13 + $0x30] sm:$0xff]  ;;  %v14314_v19 = vld [vmem:[%s14253_s13 + $0x58] sm:$0xff]  ;;  %v14322_v24 = vld [vmem:[%s14253_s13 + $0x40] sm:$0xff]  ;;  %s19195_s28 = sld [smem:[#allocation91_spill]]  ;;  %s19200_s22 = sld [smem:[#allocation93_spill]] }
  0xe6   : > { %v608_v2 = vadd.s32 128, %v14272_v1  ;;  %v14327_v26 = vld [vmem:[%s14253_s13 + $0x68] sm:$0xff]  ;;  %v14330_v27 = vld [vmem:[%s14253_s13 + $0x50] sm:$0xff]  ;;  %v14333_v28 = vld [vmem:[%s14253_s13 + $0x78] sm:$0xff]  ;;  %s19229_s20 = sld [smem:[#allocation94_spill]]  ;;  %p19231_p9 = scmp.ne.s32.totalorder %s18675_s3, 0 }
  0xe7   : > { %v14337_v30 = vld [vmem:[%s14253_s13 + $0x60] sm:$0xff]  ;;  %v14342_v32 = vld [vmem:[%s14253_s13 + $0x70] sm:$0xff]  ;;  %v14348_v35 = vld [vmem:[%s14253_s13 + $0x88] sm:$0xff]  ;;  %s13899_s24 = smov [#allocation14]  }
  0xe8   : > { %vm610_vm0 = vcmp.lt.s32.totalorder %v608_v2, 200  ;;  %v14351_v36 = vld [vmem:[%s14253_s13 + $0x98] sm:$0xff]  ;;  %v14354_v37 = vld [vmem:[%s14253_s13 + $0x80] sm:$0xff]  ;;  %v14357_v38 = vld [vmem:[%s14253_s13 + $0xa8] sm:$0xff] }
  0xe9   : > { %v14281_v6 = vsel %vm610_vm0, 1.0, %v13894_v5  ;;  %v14363_v41 = vld [vmem:[%s14253_s13 + $0x90] sm:$0xff]  ;;  %v14366_v42 = vld [vmem:[%s14253_s13 + $0xb8] sm:$0xff]  ;;  %v14372_v45 = vld [vmem:[%s14253_s13 + $0xa0] sm:$0xff] }
  0xea   : > { %18685 = vst [vmem:[#allocation20_spill] sm:$0xff] %v14281_v6  ;;  %v618_v7 = vmul.f32 %v14281_v6, %v14279_v4  ;;  %v622_v11 = vmul.f32 %v14281_v6, %v14289_v9  ;;  %v620_v13 = vmul.f32 %v14281_v6, %v14292_v10  ;;  %v624_v17 = vmul.f32 %v14281_v6, %v14302_v14  ;;  %v14375_v46 = vld [vmem:[%s14253_s13 + $0xc8] sm:$0xff]  ;;  %v14381_v49 = vld [vmem:[%s14253_s13 + $0xb0] sm:$0xff]  ;;  %v14384_v50 = vld [vmem:[%s14253_s13 + $0xd8] sm:$0xff] }
  0xeb   : > { %v626_v22 = vmul.f32 %v14281_v6, %v14311_v18  ;;  %v628_v25 = vmul.f32 %v14281_v6, %v14314_v19  ;;  %v630_v31 = vmul.f32 %v14281_v6, %v14327_v26  ;;  %v632_v34 = vmul.f32 %v14281_v6, %v14333_v28  ;;  %v14390_v53 = vld [vmem:[%s14253_s13 + $0xc0] sm:$0xff]  ;;  %v14393_v54 = vld [vmem:[%s14253_s13 + $0xe8] sm:$0xff]  ;;  %v14399_v57 = vld [vmem:[%s14253_s13 + $0xd0] sm:$0xff] }
  0xec   : > { %v649_v15 = vadd.f32 %v618_v7, %v14276_v3  ;;  %v655_v20 = vadd.f32 %v622_v11, %v14286_v8  ;;  %v652_v21 = vadd.f32 %v620_v13, %v14297_v12  ;;  %v658_v23 = vadd.f32 %v624_v17, %v14306_v16  ;;  %v14402_v58 = vld [vmem:[%s14253_s13 + $0xf8] sm:$0xff]  ;;  %v14408_v61 = vld [vmem:[%s14253_s13 + $0xe0] sm:$0xff]  ;;  %v14414_v2 = vld [vmem:[%s14253_s13 + $0xf0] sm:$0xff] }
  0xed   : > { %v661_v29 = vadd.f32 %v626_v22, %v14322_v24  ;;  %v664_v33 = vadd.f32 %v628_v25, %v14330_v27  ;;  %v667_v39 = vadd.f32 %v630_v31, %v14337_v30  ;;  %v634_v40 = vmul.f32 %v14281_v6, %v14348_v35  ;;  %v12613_v17 = vld [vmem:[#allocation5] ss:$8 sps:$4 sm:$0xff]   ;;  %v12617_v22 = vld [vmem:[#allocation5 + $0x24] ss:$8 sps:$4 sm:$0xff]   ;;  %v12620_v25 = vld [vmem:[#allocation5 + $0x34] ss:$8 sps:$4 sm:$0xff]  }
  0xee   : > { %650 = vadd.xlane.f32.xlu0 %v649_v15  ;;  %656 = vadd.xlane.f32.xlu1 %v655_v20  ;;  %v670_v43 = vadd.f32 %v632_v34, %v14342_v32  ;;  %v636_v44 = vmul.f32 %v14281_v6, %v14351_v36  ;;  %v638_v48 = vmul.f32 %v14281_v6, %v14357_v38  ;;  %v12611_v15 = vld [vmem:[#allocation5 + $0x4] ss:$8 sps:$4 sm:$0xff]   ;;  %v12614_v20 = vld [vmem:[#allocation5 + $0x14] ss:$8 sps:$4 sm:$0xff]  }
  0xef   : > { %v673_v47 = vadd.f32 %v634_v40, %v14354_v37  ;;  %v640_v52 = vmul.f32 %v14281_v6, %v14366_v42  ;;  %v642_v56 = vmul.f32 %v14281_v6, %v14375_v46  ;;  %v644_v60 = vmul.f32 %v14281_v6, %v14384_v50  ;;  %1231 = vmatprep.subr.bf16.mxu0 %v12611_v15  ;;  %v12623_v31 = vld [vmem:[#allocation5 + $0x44] ss:$8 sps:$4 sm:$0xff]   ;;  %v12626_v34 = vld [vmem:[#allocation5 + $0x54] ss:$8 sps:$4 sm:$0xff]  }
  0xf0   : > { %v676_v51 = vadd.f32 %v636_v44, %v14363_v41  ;;  %v679_v55 = vadd.f32 %v638_v48, %v14372_v45  ;;  %v646_v63 = vmul.f32 %v14281_v6, %v14393_v54  ;;  %v648_v7 = vmul.f32 %v14281_v6, %v14402_v58  ;;  %1232 = vmatpush1.bf16.msra.mxu0 %v12613_v17  ;;  %v12629_v40 = vld [vmem:[#allocation5 + $0x64] ss:$8 sps:$4 sm:$0xff]   ;;  %v12632_v44 = vld [vmem:[#allocation5 + $0x74] ss:$8 sps:$4 sm:$0xff]  }
  0xf1   : > { %v682_v59 = vadd.f32 %v640_v52, %v14381_v49  ;;  %v685_v62 = vadd.f32 %v642_v56, %v14390_v53  ;;  %v688_v5 = vadd.f32 %v644_v60, %v14399_v57  ;;  %1233 = vmatprep.subr.bf16.mxu0 %v12614_v20  ;;  %v12635_v48 = vld [vmem:[#allocation5 + $0x84] ss:$8 sps:$4 sm:$0xff]  }
  0xf2   : > { %653 = vadd.xlane.f32.xlu0 %v652_v21  ;;  %659 = vadd.xlane.f32.xlu1 %v658_v23  ;;  %v691_v11 = vadd.f32 %v646_v63, %v14408_v61  ;;  %v694_v13 = vadd.f32 %v648_v7, %v14414_v2  ;;  %v12616_v21 = vld [vmem:[#allocation5 + $0x10] ss:$8 sps:$4 sm:$0xff]   ;;  %v12619_v23 = vld [vmem:[#allocation5 + $0x20] ss:$8 sps:$4 sm:$0xff]  }
  0xf4   : > { %1234 = vmatpush1.bf16.msra.mxu0 %v12616_v21 }
  0xf5   : > { %1235 = vmatprep.subr.bf16.mxu0 %v12617_v22 }
  0xf6   : > { %662 = vadd.xlane.f32.xlu0 %v661_v29  ;;  %665 = vadd.xlane.f32.xlu1 %v664_v33  ;;  %v12622_v29 = vld [vmem:[#allocation5 + $0x30] ss:$8 sps:$4 sm:$0xff]   ;;  %v12625_v33 = vld [vmem:[#allocation5 + $0x40] ss:$8 sps:$4 sm:$0xff]  }
  0xf8   : > { %1236 = vmatpush1.bf16.msra.mxu0 %v12619_v23 }
  0xf9   : > { %1237 = vmatprep.subr.bf16.mxu0 %v12620_v25 }
  0xfa   : > { %668 = vadd.xlane.f32.xlu0 %v667_v39  ;;  %671 = vadd.xlane.f32.xlu1 %v670_v43  ;;  %v12628_v39 = vld [vmem:[#allocation5 + $0x50] ss:$8 sps:$4 sm:$0xff]   ;;  %v12631_v43 = vld [vmem:[#allocation5 + $0x60] ss:$8 sps:$4 sm:$0xff]  }
  0xfc   : > { %1238 = vmatpush1.bf16.msra.mxu0 %v12622_v29 }
  0xfd   : > { %1239 = vmatprep.subr.bf16.mxu0 %v12623_v31 }
  0xfe   : > { %674 = vadd.xlane.f32.xlu0 %v673_v47  ;;  %677 = vadd.xlane.f32.xlu1 %v676_v51  ;;  %v12634_v47 = vld [vmem:[#allocation5 + $0x70] ss:$8 sps:$4 sm:$0xff]   ;;  %v12637_v51 = vld [vmem:[#allocation5 + $0x80] ss:$8 sps:$4 sm:$0xff]  }
 0x100   : > { %1240 = vmatpush1.bf16.msra.mxu0 %v12625_v33 }
 0x101   : > { %1241 = vmatprep.subr.bf16.mxu0 %v12626_v34 }
 0x102   : > { %680 = vadd.xlane.f32.xlu0 %v679_v55  ;;  %683 = vadd.xlane.f32.xlu1 %v682_v59 }
 0x104   : > { %1242 = vmatpush1.bf16.msra.mxu0 %v12628_v39 }
 0x105   : > { %1243 = vmatprep.subr.bf16.mxu0 %v12629_v40 }
 0x106   : > { %686 = vadd.xlane.f32.xlu0 %v685_v62  ;;  %689 = vadd.xlane.f32.xlu1 %v688_v5 }
 0x108   : > { %1244 = vmatpush1.bf16.msra.mxu0 %v12631_v43 }
 0x109   : > { %1245 = vmatprep.subr.bf16.mxu0 %v12632_v44 }
 0x10a   : > { %692 = vadd.xlane.f32.xlu0 %v691_v11  ;;  %695 = vadd.xlane.f32.xlu1 %v694_v13 }
 0x10c   : > { %1246 = vmatpush1.bf16.msra.mxu0 %v12634_v47 }
 0x10d   : > { %1247 = vmatprep.subr.bf16.mxu0 %v12635_v48 }
 0x110   : > { %1248 = vmatpush1.bf16.msra.mxu0 %v12637_v51 }
 0x17b   : > { %v651_v52 = vpop.xlane.xlu0 %650  ;;  %v657_v56 = vpop.xlane.xlu1 %656 }
 0x17c   : > { %v697_v55 = vmul.f32 0.005, %v651_v52  ;;  %v699_v59 = vmul.f32 0.005, %v657_v56 }
 0x17e   : > { %v14422_v60 = vsub.f32 %v14276_v3, %v697_v55  ;;  %v14425_v62 = vsub.f32 %v14279_v4, %v697_v55  ;;  %v14428_v63 = vsub.f32 %v14286_v8, %v699_v59  ;;  %v14431_v5 = vsub.f32 %v14289_v9, %v699_v59 }
 0x17f   : > { %v654_v7 = vpop.xlane.xlu0 %653  ;;  %v660_v13 = vpop.xlane.xlu1 %659 }
 0x180   : > { %v698_v11 = vmul.f32 0.005, %v654_v7  ;;  %v746_v15 = vmul.f32 %v14425_v62, %v14425_v62  ;;  %v700_v17 = vmul.f32 0.005, %v660_v13  ;;  %v745_v3 = vmul.f32 %v14422_v60, %v14422_v60 }
 0x181   : > { %v750_v4 = vmul.f32 %v14431_v5, %v14431_v5  ;;  %v749_v21 = vmul.f32 %v14428_v63, %v14428_v63 }
 0x182   : > { %v14440_v20 = vsub.f32 %v14297_v12, %v698_v11  ;;  %v14443_v8 = vsub.f32 %v14292_v10, %v698_v11  ;;  %v778_v9 = vmul.f32 %v14281_v6, %v746_v15  ;;  %v14449_v22 = vsub.f32 %v14306_v16, %v700_v17 }
 0x183   : > { %v14452_v23 = vsub.f32 %v14302_v14, %v700_v17  ;;  %v663_v25 = vpop.xlane.xlu0 %662  ;;  %v782_v29 = vmul.f32 %v14281_v6, %v750_v4  ;;  %v666_v33 = vpop.xlane.xlu1 %665 }
 0x184   : > { %v701_v31 = vmul.f32 0.005, %v663_v25  ;;  %v809_v12 = vadd.f32 %v778_v9, %v745_v3  ;;  %v748_v10 = vmul.f32 %v14443_v8, %v14443_v8  ;;  %v702_v34 = vmul.f32 0.005, %v666_v33 }
 0x185   : > { %v747_v39 = vmul.f32 %v14440_v20, %v14440_v20  ;;  %v751_v16 = vmul.f32 %v14449_v22, %v14449_v22  ;;  %v752_v14 = vmul.f32 %v14452_v23, %v14452_v23  ;;  %v815_v44 = vadd.f32 %v782_v29, %v749_v21 }
 0x186   : > { %v14464_v40 = vsub.f32 %v14322_v24, %v701_v31  ;;  %v14467_v43 = vsub.f32 %v14311_v18, %v701_v31  ;;  %810 = vadd.xlane.f32.xlu0 %v809_v12  ;;  %v780_v47 = vmul.f32 %v14281_v6, %v748_v10  ;;  %v14471_v48 = vsub.f32 %v14330_v27, %v702_v34 }
 0x187   : > { %v14474_v51 = vsub.f32 %v14314_v19, %v702_v34  ;;  %v669_v52 = vpop.xlane.xlu0 %668  ;;  %v784_v55 = vmul.f32 %v14281_v6, %v752_v14  ;;  %v672_v24 = vpop.xlane.xlu1 %671 }
 0x188   : > { %v703_v56 = vmul.f32 0.005, %v669_v52  ;;  %v812_v59 = vadd.f32 %v780_v47, %v747_v39  ;;  %v753_v18 = vmul.f32 %v14464_v40, %v14464_v40  ;;  %v754_v7 = vmul.f32 %v14467_v43, %v14467_v43 }
 0x189   : > { %v704_v11 = vmul.f32 0.005, %v672_v24  ;;  %v818_v13 = vadd.f32 %v784_v55, %v751_v16  ;;  %v755_v27 = vmul.f32 %v14471_v48, %v14471_v48  ;;  %v756_v19 = vmul.f32 %v14474_v51, %v14474_v51 }
 0x18a   : > { %v14486_v15 = vsub.f32 %v14337_v30, %v703_v56  ;;  %v14489_v17 = vsub.f32 %v14327_v26, %v703_v56  ;;  %816 = vadd.xlane.f32.xlu0 %v815_v44  ;;  %813 = vadd.xlane.f32.xlu1 %v812_v59  ;;  %v786_v3 = vmul.f32 %v14281_v6, %v754_v7 }
 0x18b   : > { %v14493_v4 = vsub.f32 %v14342_v32, %v704_v11  ;;  %v14496_v9 = vsub.f32 %v14333_v28, %v704_v11  ;;  %v675_v21 = vpop.xlane.xlu0 %674  ;;  %v788_v25 = vmul.f32 %v14281_v6, %v756_v19  ;;  %v678_v30 = vpop.xlane.xlu1 %677 }
 0x18c   : > { %v705_v29 = vmul.f32 0.005, %v675_v21  ;;  %v821_v31 = vadd.f32 %v786_v3, %v753_v18  ;;  %v757_v26 = vmul.f32 %v14486_v15, %v14486_v15  ;;  %v758_v12 = vmul.f32 %v14489_v17, %v14489_v17 }
 0x18d   : > { %v706_v33 = vmul.f32 0.005, %v678_v30  ;;  %v824_v10 = vadd.f32 %v788_v25, %v755_v27  ;;  %v759_v32 = vmul.f32 %v14493_v4, %v14493_v4  ;;  %v760_v28 = vmul.f32 %v14496_v9, %v14496_v9  ;;  %v12638_v27 = vld [vmem:[#allocation5 + $0x94] ss:$8 sps:$4 sm:$0xff]  }
 0x18e   : > { %v14508_v34 = vsub.f32 %v14354_v37, %v705_v29  ;;  %v14511_v39 = vsub.f32 %v14348_v35, %v705_v29  ;;  %819 = vadd.xlane.f32.xlu1 %v818_v13  ;;  %822 = vadd.xlane.f32.xlu0 %v821_v31  ;;  %v790_v16 = vmul.f32 %v14281_v6, %v758_v12  ;;  %v12640_v29 = vld [vmem:[#allocation5 + $0x90] ss:$8 sps:$4 sm:$0xff]  }
 0x18f   : > { %v14515_v14 = vsub.f32 %v14363_v41, %v706_v33  ;;  %v14518_v44 = vsub.f32 %v14351_v36, %v706_v33  ;;  %v681_v47 = vpop.xlane.xlu0 %680  ;;  %v792_v52 = vmul.f32 %v14281_v6, %v760_v28  ;;  %v684_v37 = vpop.xlane.xlu1 %683  ;;  %1249 = vmatprep.subr.bf16.mxu0 %v12638_v27 }
 0x190   : > { %v707_v55 = vmul.f32 0.005, %v681_v47  ;;  %v827_v56 = vadd.f32 %v790_v16, %v757_v26  ;;  %v761_v35 = vmul.f32 %v14508_v34, %v14508_v34  ;;  %v762_v59 = vmul.f32 %v14511_v39, %v14511_v39  ;;  %1250 = vmatpush1.bf16.msra.mxu0 %v12640_v29 }
 0x191   : > { %v708_v24 = vmul.f32 0.005, %v684_v37  ;;  %v830_v18 = vadd.f32 %v792_v52, %v759_v32  ;;  %v763_v41 = vmul.f32 %v14515_v14, %v14515_v14  ;;  %v764_v36 = vmul.f32 %v14518_v44, %v14518_v44 }
 0x192   : > { %v14530_v7 = vsub.f32 %v14372_v45, %v707_v55  ;;  %v14533_v11 = vsub.f32 %v14357_v38, %v707_v55  ;;  %825 = vadd.xlane.f32.xlu1 %v824_v10  ;;  %828 = vadd.xlane.f32.xlu0 %v827_v56  ;;  %v794_v13 = vmul.f32 %v14281_v6, %v762_v59  ;;  %v12641_v56 = vld [vmem:[#allocation5 + $0xa4] ss:$8 sps:$4 sm:$0xff]  }
 0x193   : > { %v14537_v19 = vsub.f32 %v14381_v49, %v708_v24  ;;  %v14540_v3 = vsub.f32 %v14366_v42, %v708_v24  ;;  %v687_v21 = vpop.xlane.xlu0 %686  ;;  %v796_v25 = vmul.f32 %v14281_v6, %v764_v36  ;;  %v690_v30 = vpop.xlane.xlu1 %689  ;;  %v12643_v24 = vld [vmem:[#allocation5 + $0xa0] ss:$8 sps:$4 sm:$0xff]   ;;  %1251 = vmatprep.subr.bf16.mxu0 %v12641_v56  ;;  %v12653_v56 = vld [vmem:[#allocation5 + $0xe4] ss:$8 sps:$4 sm:$0xff]  }
 0x194   : > { %v709_v45 = vmul.f32 0.005, %v687_v21  ;;  %v833_v31 = vadd.f32 %v794_v13, %v761_v35  ;;  %v765_v38 = vmul.f32 %v14530_v7, %v14530_v7  ;;  %v766_v26 = vmul.f32 %v14533_v11, %v14533_v11  ;;  %1252 = vmatpush1.bf16.msra.mxu0 %v12643_v24 }
 0x195   : > { %v710_v12 = vmul.f32 0.005, %v690_v30  ;;  %v836_v49 = vadd.f32 %v796_v25, %v763_v41  ;;  %v767_v42 = vmul.f32 %v14537_v19, %v14537_v19  ;;  %v768_v33 = vmul.f32 %v14540_v3, %v14540_v3  ;;  %v12646_v30 = vld [vmem:[#allocation5 + $0xb0] ss:$8 sps:$4 sm:$0xff]  }
 0x196   : > { %v14552_v10 = vsub.f32 %v14390_v53, %v709_v45  ;;  %v14555_v32 = vsub.f32 %v14375_v46, %v709_v45  ;;  %831 = vadd.xlane.f32.xlu1 %v830_v18  ;;  %834 = vadd.xlane.f32.xlu0 %v833_v31  ;;  %v798_v28 = vmul.f32 %v14281_v6, %v766_v26  ;;  %v12644_v45 = vld [vmem:[#allocation5 + $0xb4] ss:$8 sps:$4 sm:$0xff]  }
 0x197   : > { %v14559_v16 = vsub.f32 %v14399_v57, %v710_v12  ;;  %v14562_v47 = vsub.f32 %v14384_v50, %v710_v12  ;;  %v693_v52 = vpop.xlane.xlu0 %692  ;;  %v800_v55 = vmul.f32 %v14281_v6, %v768_v33  ;;  %v696_v35 = vpop.xlane.xlu1 %695  ;;  %1253 = vmatprep.subr.bf16.mxu0 %v12644_v45  ;;  %v12649_v33 = vld [vmem:[#allocation5 + $0xc0] ss:$8 sps:$4 sm:$0xff]  }
 0x198   : > { %v711_v37 = vmul.f32 0.005, %v693_v52  ;;  %v839_v53 = vadd.f32 %v798_v28, %v765_v38  ;;  %v769_v46 = vmul.f32 %v14552_v10, %v14552_v10  ;;  %v770_v59 = vmul.f32 %v14555_v32, %v14555_v32  ;;  %1254 = vmatpush1.bf16.msra.mxu0 %v12646_v30  ;;  %v12650_v52 = vld [vmem:[#allocation5 + $0xd4] ss:$8 sps:$4 sm:$0xff]  }
 0x199   : > { %v712_v18 = vmul.f32 0.005, %v696_v35  ;;  %v842_v57 = vadd.f32 %v800_v55, %v767_v42  ;;  %v771_v50 = vmul.f32 %v14559_v16, %v14559_v16  ;;  %v772_v41 = vmul.f32 %v14562_v47, %v14562_v47  ;;  %v12652_v55 = vld [vmem:[#allocation5 + $0xd0] ss:$8 sps:$4 sm:$0xff]  }
 0x19a   : > { %v14574_v36 = vsub.f32 %v14408_v61, %v711_v37  ;;  %v14577_v13 = vsub.f32 %v14393_v54, %v711_v37  ;;  %837 = vadd.xlane.f32.xlu1 %v836_v49  ;;  %840 = vadd.xlane.f32.xlu0 %v839_v53  ;;  %v802_v27 = vmul.f32 %v14281_v6, %v770_v59  ;;  %v12647_v49 = vld [vmem:[#allocation5 + $0xc4] ss:$8 sps:$4 sm:$0xff]   ;;  %v12655_v37 = vld [vmem:[#allocation5 + $0xe0] ss:$8 sps:$4 sm:$0xff]   ;;  %v12656_v53 = vld [vmem:[#allocation5 + $0xf4] ss:$8 sps:$4 sm:$0xff]  }
 0x19b   : > { %v14581_v21 = vsub.f32 %v14414_v2, %v712_v18  ;;  %v14584_v25 = vsub.f32 %v14402_v58, %v712_v18  ;;  %v804_v29 = vmul.f32 %v14281_v6, %v772_v41  ;;  %1255 = vmatprep.subr.bf16.mxu0 %v12647_v49  ;;  %v12658_v35 = vld [vmem:[#allocation5 + $0xf0] ss:$8 sps:$4 sm:$0xff]  }
 0x19c   : > { %v845_v31 = vadd.f32 %v802_v27, %v769_v46  ;;  %v773_v61 = vmul.f32 %v14574_v36, %v14574_v36  ;;  %v774_v54 = vmul.f32 %v14577_v13, %v14577_v13  ;;  %1256 = vmatpush1.bf16.msra.mxu0 %v12649_v33  ;;  %v12661_v46 = vld [vmem:[#allocation7 + $0x4] ss:$8 sps:$4 sm:$0xff]  }
 0x19d   : > { %v776_v38 = vmul.f32 %v14584_v25, %v14584_v25  ;;  %v848_v58 = vadd.f32 %v804_v29, %v771_v50  ;;  %v775_v26 = vmul.f32 %v14581_v21, %v14581_v21  ;;  %1257 = vmatprep.subr.bf16.mxu0 %v12650_v52 }
 0x19e   : > { %843 = vadd.xlane.f32.xlu1 %v842_v57  ;;  %846 = vadd.xlane.f32.xlu0 %v845_v31  ;;  %v806_v2 = vmul.f32 %v14281_v6, %v774_v54  ;;  %v14598_v31 = vshrl.u32 %v606_v0, 7  ;;  %v615_v0 = vld [vmem:[%s18430_s1] sm:$0x3] }
 0x19f   : > { %v808_v12 = vmul.f32 %v14281_v6, %v776_v38 }
 0x1a0   : > { %v851_v42 = vadd.f32 %v806_v2, %v773_v61  ;;  %1258 = vmatpush1.bf16.msra.mxu0 %v12652_v55  ;;  %18686 = vst [vmem:[#allocation21_spill] sm:$0xff] %v14598_v31  ;;  %vm15051_vm4 = vcmp.le.s32.totalorder %v14272_v1, %v14598_v31 }
 0x1a1   : > { %v854_v28 = vadd.f32 %v808_v12, %v775_v26  ;;  %1259 = vmatprep.subr.bf16.mxu0 %v12653_v56  ;;  %v14601_v26 = vsub.s32 1, %v14598_v31  ;;  %v14604_v12 = vsub.s32 0, %v14598_v31  ;;  %v616_v56 = vld [vmem:[%s18431_s2] sm:$0x3] }
 0x1a2   : > { %849 = vadd.xlane.f32.xlu1 %v848_v58  ;;  %852 = vadd.xlane.f32.xlu0 %v851_v42 }
 0x1a3   : > { %18687 = vst [vmem:[#allocation22_spill] sm:$0xff] %v14601_v26  ;;  %18688 = vst [vmem:[#allocation23_spill] sm:$0xff] %v14604_v12 }
 0x1a4   : > { %1260 = vmatpush1.bf16.msra.mxu0 %v12655_v37  ;;  %v14613_v37 = vrot.slane %v615_v0, %v14601_v26 }
 0x1a5   : > { %1261 = vmatprep.subr.bf16.mxu0 %v12656_v53  ;;  %v14616_v53 = vrot.slane %v615_v0, %v14604_v12 }
 0x1a6   : > { %855 = vadd.xlane.f32.xlu1 %v854_v28 }
 0x1a8   : > { %1262 = vmatpush1.bf16.msra.mxu0 %v12658_v35 }
 0x1a9   : > { %1536 = vmatprep.subr.bf16.mxu0 %v12661_v46 }
 0x213   : > { %v811_v59 = vpop.xlane.xlu0 %810 }
 0x214   : > { %v857_v24 = vmul.f32 0.005, %v811_v59 }
 0x216   : > { %v873_v18 = vadd.f32 1e-05, %v857_v24 }
 0x217   : > { %v814_v57 = vpop.xlane.xlu1 %813  ;;  %v817_v50 = vpop.xlane.xlu0 %816 }
 0x218   : > { %12995 = vrsqrt.f32 %v873_v18  ;;  %v858_v41 = vmul.f32 0.005, %v814_v57  ;;  %v859_v27 = vmul.f32 0.005, %v817_v50  ;;  %v14621_v50 = vrot.slane %v616_v56, %v14601_v26 }
 0x219   : > { %v2006_v26 = vadd.s32 24, %v14598_v31 }
 0x21a   : > { %v874_v29 = vadd.f32 1e-05, %v858_v41  ;;  %v875_v45 = vadd.f32 1e-05, %v859_v27 }
 0x21b   : > { %v820_v61 = vpop.xlane.xlu1 %819  ;;  %v823_v54 = vpop.xlane.xlu0 %822  ;;  %vm15066_vm5 = vcmp.le.s32.totalorder %v14272_v1, %v2006_v26  ;;  %v2008_v26 = vadd.s32 40, %v14598_v31 }
 0x21c   : > { %12997 = vrsqrt.f32 %v874_v29  ;;  %v860_v30 = vmul.f32 0.005, %v820_v61  ;;  %v861_v38 = vmul.f32 0.005, %v823_v54  ;;  %v14626_v61 = vrot.slane %v616_v56, %v14604_v12 }
 0x21d   : > { %12999 = vrsqrt.f32 %v875_v45  ;;  %v2010_v12 = vadd.s32 56, %v14598_v31  ;;  %vm15095_vm8 = vcmp.le.s32.totalorder %v14272_v1, %v2008_v26 }
 0x21e   : > { %v876_v58 = vadd.f32 1e-05, %v860_v30  ;;  %v877_v2 = vadd.f32 1e-05, %v861_v38 }
 0x21f   : > { %v826_v49 = vpop.xlane.xlu1 %825  ;;  %v829_v42 = vpop.xlane.xlu0 %828  ;;  %vm15077_vm6 = vcmp.le.s32.totalorder %v14272_v1, %v2010_v12 }
 0x220   : > { %13001 = vrsqrt.f32 %v876_v58  ;;  %v862_v33 = vmul.f32 0.005, %v826_v49  ;;  %v863_v28 = vmul.f32 0.005, %v829_v42 }
 0x221   : > { %13003 = vrsqrt.f32 %v877_v2 }
 0x222   : > { %v12996_v52 = vpop.eup %12995  ;;  %v878_v55 = vadd.f32 1e-05, %v862_v33  ;;  %v879_v35 = vadd.f32 1e-05, %v863_v28 }
 0x223   : > { %v832_v46 = vpop.xlane.xlu1 %831  ;;  %v906_v59 = vmul.f32 %v12996_v52, %v14425_v62  ;;  %v905_v24 = vmul.f32 %v12996_v52, %v14422_v60  ;;  %v835_v57 = vpop.xlane.xlu0 %834 }
 0x224   : > { %13005 = vrsqrt.f32 %v878_v55  ;;  %v864_v18 = vmul.f32 0.005, %v832_v46  ;;  %v865_v38 = vmul.f32 0.005, %v835_v57 }
 0x225   : > { %v949_v29 = vmul.f32 %v14613_v37, %v906_v59  ;;  %v948_v45 = vmul.f32 %v14616_v53, %v905_v24  ;;  %13007 = vrsqrt.f32 %v879_v35 }
 0x226   : > { %v12998_v41 = vpop.eup %12997  ;;  %v880_v27 = vadd.f32 1e-05, %v864_v18  ;;  %v881_v59 = vadd.f32 1e-05, %v865_v38 }
 0x227   : > { %v13000_v54 = vpop.eup %12999  ;;  %v838_v62 = vpop.xlane.xlu1 %837  ;;  %v908_v60 = vmul.f32 %v12998_v41, %v14443_v8  ;;  %v907_v30 = vmul.f32 %v12998_v41, %v14440_v20  ;;  %v992_v28 = vadd.f32 %v14621_v50, %v949_v29  ;;  %v991_v52 = vadd.f32 %v14626_v61, %v948_v45 }
 0x228   : > { %13009 = vrsqrt.f32 %v880_v27  ;;  %v866_v58 = vmul.f32 0.005, %v838_v62  ;;  %v910_v2 = vmul.f32 %v13000_v54, %v14431_v5  ;;  %v909_v24 = vmul.f32 %v13000_v54, %v14428_v63  ;;  %v841_v18 = vpop.xlane.xlu0 %840  ;;  %v12659_v27 = vld [vmem:[#allocation7] ss:$8 sps:$4 sm:$0xff]  }
 0x229   : > { %v951_v49 = vmul.f32 %v14613_v37, %v908_v60  ;;  %v950_v42 = vmul.f32 %v14616_v53, %v907_v30  ;;  %v12664_v60 = vld [vmem:[#allocation7 + $0x14] ss:$8 sps:$4 sm:$0xff]   ;;  %v867_v38 = vmul.f32 0.005, %v841_v18 }
 0x22a   : > { %v13002_v0 = vpop.eup %13001  ;;  %v882_v33 = vadd.f32 1e-05, %v866_v58  ;;  %v953_v55 = vmul.f32 %v14613_v37, %v910_v2  ;;  %v952_v58 = vmul.f32 %v14616_v53, %v909_v24  ;;  %v12665_v24 = vld [vmem:[#allocation7 + $0x20] ss:$8 sps:$4 sm:$0xff]  }
 0x22b   : > { %v844_v8 = vpop.xlane.xlu1 %843  ;;  %v994_v20 = vadd.f32 %v14621_v50, %v951_v49  ;;  %v993_v56 = vadd.f32 %v14626_v61, %v950_v42  ;;  %v912_v35 = vmul.f32 %v13002_v0, %v14452_v23  ;;  %v911_v5 = vmul.f32 %v13002_v0, %v14449_v22  ;;  %v13004_v46 = vpop.eup %13003  ;;  %v12662_v42 = vld [vmem:[#allocation7 + $0x10] ss:$8 sps:$4 sm:$0xff]  }
 0x22c   : > { %13011 = vrsqrt.f32 %v882_v33  ;;  %v868_v62 = vmul.f32 0.005, %v844_v8  ;;  %v996_v22 = vadd.f32 %v14621_v50, %v953_v55  ;;  %v914_v54 = vmul.f32 %v13004_v46, %v14467_v43 }
 0x22d   : > { %v14641_v57 = vpack.c.bf16 %v994_v20, %v992_v28  ;;  %v14643_v41 = vpack.c.bf16 %v993_v56, %v991_v52  ;;  %v955_v29 = vmul.f32 %v14613_v37, %v912_v35  ;;  %v954_v23 = vmul.f32 %v14616_v53, %v911_v5  ;;  %v12667_v52 = vld [vmem:[#allocation7 + $0x24] ss:$8 sps:$4 sm:$0xff]  }
 0x22e   : > { %v13006_v45 = vpop.eup %13005  ;;  %13013 = vrsqrt.f32 %v881_v59  ;;  %v957_v0 = vmul.f32 %v14613_v37, %v914_v54  ;;  %v884_v28 = vadd.f32 1e-05, %v868_v62  ;;  %v883_v20 = vadd.f32 1e-05, %v867_v38  ;;  %v847_v59 = vpop.xlane.xlu0 %846  ;;  %v12670_v62 = vld [vmem:[#allocation7 + $0x34] ss:$8 sps:$4 sm:$0xff]  }
 0x22f   : > { %1263 = vmatprep.mubr.bf16.mxu0 %v14641_v57  ;;  %v998_v63 = vadd.f32 %v14621_v50, %v955_v29  ;;  %v916_v30 = vmul.f32 %v13006_v45, %v14474_v51  ;;  %v13008_v2 = vpop.eup %13007  ;;  %v997_v43 = vadd.f32 %v14626_v61, %v954_v23  ;;  %v915_v55 = vmul.f32 %v13006_v45, %v14471_v48  ;;  %v850_v8 = vpop.xlane.xlu1 %849 }
 0x230   : > { %1264 = vmatmul.mubr.bf16.vlgmr.msra.gmra.mrb[0].mxu0 %v14643_v41  ;;  %v995_v56 = vadd.f32 %v14626_v61, %v952_v58  ;;  %v913_v5 = vmul.f32 %v13004_v46, %v14464_v40  ;;  %v1000_v18 = vadd.f32 %v14621_v50, %v957_v0  ;;  %13015 = vrsqrt.f32 %v884_v28  ;;  %v12673_v58 = vld [vmem:[#allocation7 + $0x44] ss:$8 sps:$4 sm:$0xff]  }
 0x231   : > { %1537 = vmatpush1.bf16.msra.mxu0 %v12659_v27  ;;  %v14654_v49 = vpack.c.bf16 %v998_v63, %v996_v22  ;;  %v959_v51 = vmul.f32 %v14613_v37, %v916_v30  ;;  %v918_v27 = vmul.f32 %v13008_v2, %v14489_v17  ;;  %v870_v48 = vmul.f32 0.005, %v850_v8 }
 0x232   : > { %v13010_v33 = vpop.eup %13009  ;;  %1538 = vmatprep.subr.bf16.mxu0 %v12664_v60  ;;  %v14667_v45 = vpack.c.bf16 %v997_v43, %v995_v56  ;;  %v958_v60 = vmul.f32 %v14616_v53, %v915_v55  ;;  %13017 = vrsqrt.f32 %v883_v20  ;;  %v869_v22 = vmul.f32 0.005, %v847_v59  ;;  %v853_v8 = vpop.xlane.xlu0 %852  ;;  %v12671_v20 = vld [vmem:[#allocation7 + $0x40] ss:$8 sps:$4 sm:$0xff]  }
 0x233   : > { %1273 = vmatprep.mubr.bf16.mxu0 %v14654_v49  ;;  %v1002_v35 = vadd.f32 %v14621_v50, %v959_v51  ;;  %v920_v29 = vmul.f32 %v13010_v33, %v14496_v9  ;;  %v956_v17 = vmul.f32 %v14616_v53, %v913_v5  ;;  %v12668_v9 = vld [vmem:[#allocation7 + $0x30] ss:$8 sps:$4 sm:$0xff]   ;;  %v961_v63 = vmul.f32 %v14613_v37, %v918_v27  ;;  %v856_v0 = vpop.xlane.xlu1 %855 }
 0x234   : > { %v886_v30 = vadd.f32 1e-05, %v870_v48  ;;  %v1001_v38 = vadd.f32 %v14626_v61, %v958_v60  ;;  %v917_v55 = vmul.f32 %v13008_v2, %v14486_v15  ;;  %v872_v5 = vmul.f32 0.005, %v856_v0  ;;  %v12679_v60 = vld [vmem:[#allocation7 + $0x64] ss:$8 sps:$4 sm:$0xff]  }
 0x235   : > { %1539 = vmatpush1.bf16.msra.mxu0 %v12662_v42  ;;  %v14670_v23 = vpack.c.bf16 %v1002_v35, %v1000_v18  ;;  %v963_v40 = vmul.f32 %v14613_v37, %v920_v29  ;;  %v919_v42 = vmul.f32 %v13010_v33, %v14493_v4  ;;  %v999_v51 = vadd.f32 %v14626_v61, %v956_v17  ;;  %v12676_v33 = vld [vmem:[#allocation7 + $0x54] ss:$8 sps:$4 sm:$0xff]  }
 0x236   : > { %1540 = vmatprep.subr.bf16.mxu0 %v12667_v52  ;;  %v13012_v46 = vpop.eup %13011  ;;  %v885_v52 = vadd.f32 1e-05, %v869_v22  ;;  %v1004_v56 = vadd.f32 %v14621_v50, %v961_v63  ;;  %13019 = vrsqrt.f32 %v886_v30  ;;  %v871_v2 = vmul.f32 0.005, %v853_v8 }
 0x237   : > { %v1006_v28 = vadd.f32 %v14621_v50, %v963_v40  ;;  %v924_v43 = vmul.f32 %v13012_v46, %v14518_v44  ;;  %v14685_v4 = vpack.c.bf16 %v1001_v38, %v999_v51  ;;  %v962_v44 = vmul.f32 %v14616_v53, %v919_v42  ;;  %v12677_v38 = vld [vmem:[#allocation7 + $0x60] ss:$8 sps:$4 sm:$0xff]  }
 0x238   : > { %1274 = vmatmul.mubr.bf16.gmra.mrb[4].mxu0 %v14667_v45  ;;  %v13014_v54 = vpop.eup %13013  ;;  %13021 = vrsqrt.f32 %v885_v52  ;;  %v960_v18 = vmul.f32 %v14616_v53, %v917_v55  ;;  %v888_v48 = vadd.f32 1e-05, %v872_v5  ;;  %v923_v40 = vmul.f32 %v13012_v46, %v14515_v14  ;;  %v12682_v14 = vld [vmem:[#allocation7 + $0x74] ss:$8 sps:$4 sm:$0xff]   ;;  %v12685_v55 = vld [vmem:[#allocation7 + $0x84] ss:$8 sps:$4 sm:$0xff]  }
 0x239   : > { %1283 = vmatprep.mubr.bf16.mxu0 %v14670_v23  ;;  %1541 = vmatpush1.bf16.msra.mxu0 %v12665_v24  ;;  %v922_v35 = vmul.f32 %v13014_v54, %v14511_v39  ;;  %v14688_v59 = vpack.c.bf16 %v1006_v28, %v1004_v56  ;;  %v967_v24 = vmul.f32 %v14613_v37, %v924_v43  ;;  %v12674_v39 = vld [vmem:[#allocation7 + $0x50] ss:$8 sps:$4 sm:$0xff]  }
 0x23a   : > { %1542 = vmatprep.subr.bf16.mxu0 %v12670_v62  ;;  %v13016_v15 = vpop.eup %13015  ;;  %v1005_v62 = vadd.f32 %v14626_v61, %v962_v44  ;;  %v1003_v63 = vadd.f32 %v14626_v61, %v960_v18  ;;  %v921_v30 = vmul.f32 %v13014_v54, %v14508_v34  ;;  %13023 = vrsqrt.f32 %v888_v48  ;;  %v12688_v18 = vld [vmem:[#allocation7 + $0x94] ss:$8 sps:$4 sm:$0xff]  }
 0x23b   : > { %v965_v27 = vmul.f32 %v14613_v37, %v922_v35  ;;  %v1010_v22 = vadd.f32 %v14621_v50, %v967_v24  ;;  %v928_v17 = vmul.f32 %v13016_v15, %v14540_v3  ;;  %v966_v46 = vmul.f32 %v14616_v53, %v923_v40 }
 0x23c   : > { %v13018_v29 = vpop.eup %13017  ;;  %v14703_v0 = vpack.c.bf16 %v1005_v62, %v1003_v63  ;;  %v964_v34 = vmul.f32 %v14616_v53, %v921_v30  ;;  %v927_v8 = vmul.f32 %v13016_v15, %v14537_v19  ;;  %v12691_v62 = vld [vmem:[#allocation7 + $0xa4] ss:$8 sps:$4 sm:$0xff]   ;;  %v12689_v63 = vld [vmem:[#allocation7 + $0xa0] ss:$8 sps:$4 sm:$0xff]  }
 0x23d   : > { %1543 = vmatpush1.bf16.msra.mxu0 %v12668_v9  ;;  %v887_v9 = vadd.f32 1e-05, %v871_v2  ;;  %v926_v42 = vmul.f32 %v13018_v29, %v14533_v11  ;;  %v971_v3 = vmul.f32 %v14613_v37, %v928_v17  ;;  %v12680_v11 = vld [vmem:[#allocation7 + $0x70] ss:$8 sps:$4 sm:$0xff]   ;;  %v1009_v51 = vadd.f32 %v14626_v61, %v966_v46 }
 0x23e   : > { %1544 = vmatprep.subr.bf16.mxu0 %v12673_v58  ;;  %v1008_v58 = vadd.f32 %v14621_v50, %v965_v27  ;;  %v1007_v35 = vadd.f32 %v14626_v61, %v964_v34  ;;  %v925_v5 = vmul.f32 %v13018_v29, %v14530_v7  ;;  %v970_v19 = vmul.f32 %v14616_v53, %v927_v8  ;;  %v12686_v27 = vld [vmem:[#allocation7 + $0x90] ss:$8 sps:$4 sm:$0xff]  }
 0x23f   : > { %13025 = vrsqrt.f32 %v887_v9  ;;  %v969_v54 = vmul.f32 %v14613_v37, %v926_v42  ;;  %v12694_v42 = vld [vmem:[#allocation7 + $0xb4] ss:$8 sps:$4 sm:$0xff]   ;;  %v12692_v46 = vld [vmem:[#allocation7 + $0xb0] ss:$8 sps:$4 sm:$0xff]  }
 0x240   : > { %1284 = vmatmul.mubr.bf16.gmra.mrb[8].mxu0 %v14685_v4  ;;  %v14706_v28 = vpack.c.bf16 %v1010_v22, %v1008_v58  ;;  %v13020_v43 = vpop.eup %13019  ;;  %v14721_v2 = vpack.c.bf16 %v1009_v51, %v1007_v35  ;;  %v968_v7 = vmul.f32 %v14616_v53, %v925_v5  ;;  %v1013_v48 = vadd.f32 %v14626_v61, %v970_v19  ;;  %v12695_v51 = vld [vmem:[#allocation7 + $0xc0] ss:$8 sps:$4 sm:$0xff]  }
 0x241   : > { %1293 = vmatprep.mubr.bf16.mxu0 %v14688_v59  ;;  %1545 = vmatpush1.bf16.msra.mxu0 %v12671_v20  ;;  %v1014_v20 = vadd.f32 %v14621_v50, %v971_v3  ;;  %v932_v56 = vmul.f32 %v13020_v43, %v14562_v47  ;;  %v1012_v44 = vadd.f32 %v14621_v50, %v969_v54  ;;  %v12707_v19 = vld [vmem:[#allocation8] ss:$8 sps:$4 sm:$0xff]  }
 0x242   : > { %1546 = vmatprep.subr.bf16.mxu0 %v12676_v33  ;;  %v13022_v52 = vpop.eup %13021  ;;  %v12683_v33 = vld [vmem:[#allocation7 + $0x80] ss:$8 sps:$4 sm:$0xff]   ;;  %v1011_v17 = vadd.f32 %v14626_v61, %v968_v7 }
 0x243   : > { %v930_v24 = vmul.f32 %v13022_v52, %v14555_v32  ;;  %v14724_v15 = vpack.c.bf16 %v1014_v20, %v1012_v44  ;;  %v975_v47 = vmul.f32 %v14613_v37, %v932_v56  ;;  %v929_v9 = vmul.f32 %v13022_v52, %v14552_v10  ;;  %v12713_v7 = vld [vmem:[#allocation8 + $0x20] ss:$8 sps:$4 sm:$0xff]  }
 0x244   : > { %v14739_v58 = vpack.c.bf16 %v1013_v48, %v1011_v17  ;;  %v12719_v48 = vld [vmem:[#allocation8 + $0x40] ss:$8 sps:$4 sm:$0xff]   ;;  %v12730_v17 = vld [vmem:[#allocation8 + $0x74] ss:$8 sps:$4 sm:$0xff]  }
 0x245   : > { %1547 = vmatpush1.bf16.msra.mxu0 %v12674_v39  ;;  %v13024_v39 = vpop.eup %13023  ;;  %v973_v32 = vmul.f32 %v14613_v37, %v930_v24  ;;  %v1018_v40 = vadd.f32 %v14621_v50, %v975_v47  ;;  %v972_v10 = vmul.f32 %v14616_v53, %v929_v9  ;;  %v12706_v24 = vld [vmem:[#allocation7 + $0xf4] ss:$8 sps:$4 sm:$0xff]   ;;  %v12728_v9 = vld [vmem:[#allocation8 + $0x70] ss:$8 sps:$4 sm:$0xff]  }
 0x246   : > { %1548 = vmatprep.subr.bf16.mxu0 %v12679_v60  ;;  %v931_v60 = vmul.f32 %v13020_v43, %v14559_v16  ;;  %v936_v22 = vmul.f32 %v13024_v39, %v14584_v25  ;;  %v12697_v43 = vld [vmem:[#allocation7 + $0xc4] ss:$8 sps:$4 sm:$0xff]   ;;  %v935_v34 = vmul.f32 %v13024_v39, %v14581_v21  ;;  %v12712_v47 = vld [vmem:[#allocation8 + $0x14] ss:$8 sps:$4 sm:$0xff]  }
 0x247   : > { %v1016_v30 = vadd.f32 %v14621_v50, %v973_v32  ;;  %v1015_v54 = vadd.f32 %v14626_v61, %v972_v10  ;;  %v12715_v39 = vld [vmem:[#allocation8 + $0x24] ss:$8 sps:$4 sm:$0xff]   ;;  %v12716_v32 = vld [vmem:[#allocation8 + $0x30] ss:$8 sps:$4 sm:$0xff]   ;;  %v12742_v10 = vld [vmem:[#allocation8 + $0xb4] ss:$8 sps:$4 sm:$0xff]  }
 0x248   : > { %1294 = vmatmul.mubr.bf16.gmra.mrb[12].mxu0 %v14703_v0  ;;  %v974_v16 = vmul.f32 %v14616_v53, %v931_v60  ;;  %v979_v25 = vmul.f32 %v14613_v37, %v936_v22  ;;  %v978_v20 = vmul.f32 %v14616_v53, %v935_v34  ;;  %v12722_v60 = vld [vmem:[#allocation8 + $0x50] ss:$8 sps:$4 sm:$0xff]   ;;  %v12725_v22 = vld [vmem:[#allocation8 + $0x60] ss:$8 sps:$4 sm:$0xff]  }
 0x249   : > { %1303 = vmatprep.mubr.bf16.mxu0 %v14706_v28  ;;  %1549 = vmatpush1.bf16.msra.mxu0 %v12677_v38  ;;  %v13026_v29 = vpop.eup %13025  ;;  %v12746_v34 = vld [vmem:[#allocation8 + $0xd0] ss:$8 sps:$4 sm:$0xff]  }
 0x24a   : > { %1550 = vmatprep.subr.bf16.mxu0 %v12682_v14  ;;  %v934_v38 = vmul.f32 %v13026_v29, %v14577_v13  ;;  %v14742_v14 = vpack.c.bf16 %v1018_v40, %v1016_v30  ;;  %v1017_v3 = vadd.f32 %v14626_v61, %v974_v16  ;;  %v933_v52 = vmul.f32 %v13026_v29, %v14574_v36  ;;  %v12698_v36 = vld [vmem:[#allocation7 + $0xd0] ss:$8 sps:$4 sm:$0xff]   ;;  %v12721_v29 = vld [vmem:[#allocation8 + $0x44] ss:$8 sps:$4 sm:$0xff]   ;;  %v12731_v30 = vld [vmem:[#allocation8 + $0x80] ss:$8 sps:$4 sm:$0xff]  }
 0x24b   : > { %v1021_v35 = vadd.f32 %v14626_v61, %v978_v20  ;;  %v12727_v40 = vld [vmem:[#allocation8 + $0x64] ss:$8 sps:$4 sm:$0xff]  }
 0x24c   : > { %v977_v13 = vmul.f32 %v14613_v37, %v934_v38  ;;  %v14755_v8 = vpack.c.bf16 %v1017_v3, %v1015_v54  ;;  %v12700_v37 = vld [vmem:[#allocation7 + $0xd4] ss:$8 sps:$4 sm:$0xff]   ;;  %v976_v21 = vmul.f32 %v14616_v53, %v933_v52  ;;  %v12704_v53 = vld [vmem:[#allocation7 + $0xf0] ss:$8 sps:$4 sm:$0xff]   ;;  %v12739_v16 = vld [vmem:[#allocation8 + $0xa4] ss:$8 sps:$4 sm:$0xff]  }
 0x24d   : > { %1551 = vmatpush1.bf16.msra.mxu0 %v12680_v11  ;;  %v1022_v11 = vadd.f32 %v14621_v50, %v979_v25  ;;  %v12736_v38 = vld [vmem:[#allocation8 + $0x94] ss:$8 sps:$4 sm:$0xff]   ;;  %v12737_v25 = vld [vmem:[#allocation8 + $0xa0] ss:$8 sps:$4 sm:$0xff]  }
 0x24e   : > { %1552 = vmatprep.subr.bf16.mxu0 %v12685_v55  ;;  %v1020_v55 = vadd.f32 %v14621_v50, %v977_v13  ;;  %v12703_v50 = vld [vmem:[#allocation7 + $0xe4] ss:$8 sps:$4 sm:$0xff]   ;;  %v1019_v5 = vadd.f32 %v14626_v61, %v976_v21  ;;  %v12710_v61 = vld [vmem:[#allocation8 + $0x10] ss:$8 sps:$4 sm:$0xff]   ;;  %v12743_v3 = vld [vmem:[#allocation8 + $0xc0] ss:$8 sps:$4 sm:$0xff]  }
 0x24f   : > { %v12745_v13 = vld [vmem:[#allocation8 + $0xc4] ss:$8 sps:$4 sm:$0xff]   ;;  %v12749_v54 = vld [vmem:[#allocation8 + $0xe0] ss:$8 sps:$4 sm:$0xff]   ;;  %v12754_v52 = vld [vmem:[#allocation8 + $0xf4] ss:$8 sps:$4 sm:$0xff]  }
 0x250   : > { %1304 = vmatmul.mubr.bf16.gmra.mrb[16].mxu0 %v14721_v2  ;;  %v14758_v56 = vpack.c.bf16 %v1022_v11, %v1020_v55  ;;  %v14765_v44 = vpack.c.bf16 %v1021_v35, %v1019_v5  ;;  %v12751_v11 = vld [vmem:[#allocation8 + $0xe4] ss:$8 sps:$4 sm:$0xff]  }
 0x251   : > { %1313 = vmatprep.mubr.bf16.mxu0 %v14724_v15  ;;  %1553 = vmatpush1.bf16.msra.mxu0 %v12683_v33  ;;  %v12701_v33 = vld [vmem:[#allocation7 + $0xe0] ss:$8 sps:$4 sm:$0xff]  }
 0x252   : > { %1554 = vmatprep.subr.bf16.mxu0 %v12688_v18  ;;  %v12709_v18 = vld [vmem:[#allocation8 + $0x4] ss:$8 sps:$4 sm:$0xff]  }
 0x255   : > { %1555 = vmatpush1.bf16.msra.mxu0 %v12686_v27  ;;  %v12718_v27 = vld [vmem:[#allocation8 + $0x34] ss:$8 sps:$4 sm:$0xff]  }
 0x256   : > { %1556 = vmatprep.subr.bf16.mxu0 %v12691_v62  ;;  %v12724_v62 = vld [vmem:[#allocation8 + $0x54] ss:$8 sps:$4 sm:$0xff]  }
 0x258   : > { %1314 = vmatmul.mubr.bf16.gmra.mrb[20].mxu0 %v14739_v58 }
 0x259   : > { %1323 = vmatprep.mubr.bf16.mxu0 %v14742_v14  ;;  %1557 = vmatpush1.bf16.msra.mxu0 %v12689_v63  ;;  %v12733_v63 = vld [vmem:[#allocation8 + $0x84] ss:$8 sps:$4 sm:$0xff]  }
 0x25a   : > { %1558 = vmatprep.subr.bf16.mxu0 %v12694_v42  ;;  %v12734_v42 = vld [vmem:[#allocation8 + $0x90] ss:$8 sps:$4 sm:$0xff]  }
 0x25d   : > { %1559 = vmatpush1.bf16.msra.mxu0 %v12692_v46  ;;  %v12740_v46 = vld [vmem:[#allocation8 + $0xb0] ss:$8 sps:$4 sm:$0xff]  }
 0x25e   : > { %1560 = vmatprep.subr.bf16.mxu0 %v12697_v43  ;;  %v12748_v43 = vld [vmem:[#allocation8 + $0xd4] ss:$8 sps:$4 sm:$0xff]  }
 0x260   : > { %1324 = vmatmul.mubr.bf16.gmra.mrb[24].mxu0 %v14755_v8 }
 0x261   : > { %1333 = vmatprep.mubr.bf16.mxu0 %v14758_v56  ;;  %1561 = vmatpush1.bf16.msra.mxu0 %v12695_v51  ;;  %v12752_v51 = vld [vmem:[#allocation8 + $0xf0] ss:$8 sps:$4 sm:$0xff]  }
 0x262   : > { %1562 = vmatprep.subr.bf16.mxu0 %v12700_v37 }
 0x265   : > { %1563 = vmatpush1.bf16.msra.mxu0 %v12698_v36 }
 0x266   : > { %1564 = vmatprep.subr.bf16.mxu0 %v12703_v50 }
 0x268   : > { %1334 = vmatmul.mubr.bf16.gmra.mrb[28].mxu0 %v14765_v44 }
 0x269   : > { %1565 = vmatpush1.bf16.msra.mxu0 %v12701_v33  ;;  %1568 = vmatprep.mubr.bf16.mxu0 %v14641_v57 }
 0x26a   : > { %1566 = vmatprep.subr.bf16.mxu0 %v12706_v24 }
 0x26d   : > { %1567 = vmatpush1.bf16.msra.mxu0 %v12704_v53 }
 0x26e   : > { %1841 = vmatprep.subr.bf16.mxu0 %v12709_v18 }
 0x270   : > { %1569 = vmatmul.mubr.bf16.vlgmr.msra.gmra.mrb[32].mxu0 %v14643_v41 }
 0x271   : > { %1578 = vmatprep.mubr.bf16.mxu0 %v14654_v49  ;;  %1842 = vmatpush1.bf16.msra.mxu0 %v12707_v19 }
 0x272   : > { %1843 = vmatprep.subr.bf16.mxu0 %v12712_v47 }
 0x275   : > { %1844 = vmatpush1.bf16.msra.mxu0 %v12710_v61 }
 0x276   : > { %1845 = vmatprep.subr.bf16.mxu0 %v12715_v39 }
 0x278   : > { %1579 = vmatmul.mubr.bf16.gmra.mrb[36].mxu0 %v14667_v45 }
 0x279   : > { %1588 = vmatprep.mubr.bf16.mxu0 %v14670_v23  ;;  %1846 = vmatpush1.bf16.msra.mxu0 %v12713_v7 }
 0x27a   : > { %1847 = vmatprep.subr.bf16.mxu0 %v12718_v27 }
 0x27d   : > { %1848 = vmatpush1.bf16.msra.mxu0 %v12716_v32 }
 0x27e   : > { %1849 = vmatprep.subr.bf16.mxu0 %v12721_v29 }
 0x280   : > { %1589 = vmatmul.mubr.bf16.gmra.mrb[40].mxu0 %v14685_v4 }
 0x281   : > { %1598 = vmatprep.mubr.bf16.mxu0 %v14688_v59  ;;  %1850 = vmatpush1.bf16.msra.mxu0 %v12719_v48 }
 0x282   : > { %1851 = vmatprep.subr.bf16.mxu0 %v12724_v62 }
 0x285   : > { %1852 = vmatpush1.bf16.msra.mxu0 %v12722_v60 }
 0x286   : > { %1853 = vmatprep.subr.bf16.mxu0 %v12727_v40 }
 0x288   : > { %1599 = vmatmul.mubr.bf16.gmra.mrb[44].mxu0 %v14703_v0 }
 0x289   : > { %1608 = vmatprep.mubr.bf16.mxu0 %v14706_v28  ;;  %1854 = vmatpush1.bf16.msra.mxu0 %v12725_v22 }
 0x28a   : > { %1855 = vmatprep.subr.bf16.mxu0 %v12730_v17 }
 0x28d   : > { %1856 = vmatpush1.bf16.msra.mxu0 %v12728_v9 }
 0x28e   : > { %1857 = vmatprep.subr.bf16.mxu0 %v12733_v63 }
 0x290   : > { %1609 = vmatmul.mubr.bf16.gmra.mrb[48].mxu0 %v14721_v2 }
 0x291   : > { %1618 = vmatprep.mubr.bf16.mxu0 %v14724_v15  ;;  %1858 = vmatpush1.bf16.msra.mxu0 %v12731_v30 }
 0x292   : > { %1859 = vmatprep.subr.bf16.mxu0 %v12736_v38 }
 0x295   : > { %1860 = vmatpush1.bf16.msra.mxu0 %v12734_v42 }
 0x296   : > { %1861 = vmatprep.subr.bf16.mxu0 %v12739_v16 }
 0x298   : > { %1619 = vmatmul.mubr.bf16.gmra.mrb[52].mxu0 %v14739_v58 }
 0x299   : > { %1628 = vmatprep.mubr.bf16.mxu0 %v14742_v14  ;;  %1862 = vmatpush1.bf16.msra.mxu0 %v12737_v25 }
 0x29a   : > { %1863 = vmatprep.subr.bf16.mxu0 %v12742_v10 }
 0x29d   : > { %1864 = vmatpush1.bf16.msra.mxu0 %v12740_v46 }
 0x29e   : > { %1865 = vmatprep.subr.bf16.mxu0 %v12745_v13 }
 0x2a0   : > { %1629 = vmatmul.mubr.bf16.gmra.mrb[56].mxu0 %v14755_v8 }
 0x2a1   : > { %1638 = vmatprep.mubr.bf16.mxu0 %v14758_v56  ;;  %1866 = vmatpush1.bf16.msra.mxu0 %v12743_v3 }
 0x2a2   : > { %1867 = vmatprep.subr.bf16.mxu0 %v12748_v43 }
 0x2a5   : > { %1868 = vmatpush1.bf16.msra.mxu0 %v12746_v34 }
 0x2a6   : > { %1869 = vmatprep.subr.bf16.mxu0 %v12751_v11 }
 0x2a8   : > { %1639 = vmatmul.mubr.bf16.gmra.mrb[60].mxu0 %v14765_v44 }
 0x2a9   : > { %1870 = vmatpush1.bf16.msra.mxu0 %v12749_v54  ;;  %1873 = vmatprep.mubr.bf16.mxu0 %v14641_v57 }
 0x2aa   : > { %1871 = vmatprep.subr.bf16.mxu0 %v12754_v52 }
 0x2ad   : > { %1872 = vmatpush1.bf16.msra.mxu0 %v12752_v51 }
 0x2b0   : > { %1874 = vmatmul.mubr.bf16.vlgmr.msra.gmra.mrb[64].mxu0 %v14643_v41 }
 0x2b1   : > { %1883 = vmatprep.mubr.bf16.mxu0 %v14654_v49 }
 0x2b8   : > { %1884 = vmatmul.mubr.bf16.gmra.mrb[68].mxu0 %v14667_v45 }
 0x2b9   : > { %1893 = vmatprep.mubr.bf16.mxu0 %v14670_v23 }
 0x2c0   : > { %1894 = vmatmul.mubr.bf16.gmra.mrb[72].mxu0 %v14685_v4 }
 0x2c1   : > { %1903 = vmatprep.mubr.bf16.mxu0 %v14688_v59 }
 0x2c8   : > { %1904 = vmatmul.mubr.bf16.gmra.mrb[76].mxu0 %v14703_v0 }
 0x2c9   : > { %1913 = vmatprep.mubr.bf16.mxu0 %v14706_v28 }
 0x2d0   : > { %1914 = vmatmul.mubr.bf16.gmra.mrb[80].mxu0 %v14721_v2 }
 0x2d1   : > { %1923 = vmatprep.mubr.bf16.mxu0 %v14724_v15 }
 0x2d8   : > { %1924 = vmatmul.mubr.bf16.gmra.mrb[84].mxu0 %v14739_v58 }
 0x2d9   : > { %1933 = vmatprep.mubr.bf16.mxu0 %v14742_v14 }
 0x2e0   : > { %1934 = vmatmul.mubr.bf16.gmra.mrb[88].mxu0 %v14755_v8 }
 0x2e1   : > { %1943 = vmatprep.mubr.bf16.mxu0 %v14758_v56 }
 0x2e8   : > { %1944 = vmatmul.mubr.bf16.gmra.mrb[92].mxu0 %v14765_v44 }
 0x303   : > { %v1265_v57 = vpop.f32.mrb[0].mxu0 }
 0x304   : > { %v1267_v41 = vpop.f32.mrb[1].mxu0 }
 0x305   : > { %v1269_v49 = vpop.f32.mrb[2].mxu0 }
 0x306   : > { %v14800_v45 = vpack.c.bf16 %v1269_v49, %v1265_v57  ;;  %v1271_v23 = vpop.f32.mrb[3].mxu0 }
 0x307   : > { %v14802_v4 = vpack.c.bf16 %v1271_v23, %v1267_v41 }
 0x308   : > { %11579 = vmatprep.mubr.msk.bf16.mxu1 %vm18482_vm1, %v14800_v45 }
 0x309   : > { %18689 = vst [vmem:[#allocation24_spill] sm:$0xff] %v14802_v4 }
 0x30b   : > { %v1275_v59 = vpop.f32.mrb[4].mxu0 }
 0x30c   : > { %v1277_v0 = vpop.f32.mrb[5].mxu0 }
 0x30d   : > { %v1279_v28 = vpop.f32.mrb[6].mxu0 }
 0x30e   : > { %v14806_v2 = vpack.c.bf16 %v1279_v28, %v1275_v59  ;;  %v1281_v15 = vpop.f32.mrb[7].mxu0 }
 0x30f   : > { %v14808_v58 = vpack.c.bf16 %v1281_v15, %v1277_v0 }
 0x310   : > { %18690 = vst [vmem:[#allocation25_spill] sm:$0xff] %v14806_v2 }
 0x311   : > { %18691 = vst [vmem:[#allocation26_spill] sm:$0xff] %v14808_v58 }
 0x313   : > { %v1285_v14 = vpop.f32.mrb[8].mxu0 }
 0x314   : > { %v1287_v55 = vpop.f32.mrb[9].mxu0 }
 0x315   : > { %v1289_v8 = vpop.f32.mrb[10].mxu0 }
 0x316   : > { %v14810_v37 = vpack.c.bf16 %v1289_v8, %v1285_v14  ;;  %v1291_v20 = vpop.f32.mrb[11].mxu0 }
 0x317   : > { %v14812_v56 = vpack.c.bf16 %v1291_v20, %v1287_v55 }
 0x318   : > { %18692 = vst [vmem:[#allocation27_spill] sm:$0xff] %v14810_v37 }
 0x319   : > { %18693 = vst [vmem:[#allocation28_spill] sm:$0xff] %v14812_v56 }
 0x31b   : > { %v1295_v21 = vpop.f32.mrb[12].mxu0 }
 0x31c   : > { %v1297_v36 = vpop.f32.mrb[13].mxu0 }
 0x31d   : > { %v1299_v35 = vpop.f32.mrb[14].mxu0 }
 0x31e   : > { %v14814_v50 = vpack.c.bf16 %v1299_v35, %v1295_v21  ;;  %v1301_v5 = vpop.f32.mrb[15].mxu0 }
 0x31f   : > { %v14816_v33 = vpack.c.bf16 %v1301_v5, %v1297_v36 }
 0x320   : > { %18694 = vst [vmem:[#allocation29_spill] sm:$0xff] %v14814_v50 }
 0x321   : > { %18695 = vst [vmem:[#allocation30_spill] sm:$0xff] %v14816_v33  ;;  %v2012_v33 = vadd.s32 72, %v14598_v31 }
 0x323   : > { %v1305_v44 = vpop.f32.mrb[16].mxu0  ;;  %vm15139_vm12 = vcmp.le.s32.totalorder %v14272_v1, %v2012_v33 }
 0x324   : > { %v1307_v24 = vpop.f32.mrb[17].mxu0 }
 0x325   : > { %v1309_v53 = vpop.f32.mrb[18].mxu0 }
 0x326   : > { %v14818_v18 = vpack.c.bf16 %v1309_v53, %v1305_v44  ;;  %v1311_v19 = vpop.f32.mrb[19].mxu0 }
 0x327   : > { %v14820_v47 = vpack.c.bf16 %v1311_v19, %v1307_v24 }
 0x328   : > { %18696 = vst [vmem:[#allocation31_spill] sm:$0xff] %v14818_v18 }
 0x329   : > { %18697 = vst [vmem:[#allocation32_spill] sm:$0xff] %v14820_v47 }
 0x32b   : > { %v1315_v61 = vpop.f32.mrb[20].mxu0 }
 0x32c   : > { %v1317_v39 = vpop.f32.mrb[21].mxu0 }
 0x32d   : > { %v1319_v7 = vpop.f32.mrb[22].mxu0 }
 0x32e   : > { %v14822_v27 = vpack.c.bf16 %v1319_v7, %v1315_v61  ;;  %v1321_v32 = vpop.f32.mrb[23].mxu0 }
 0x32f   : > { %v14824_v29 = vpack.c.bf16 %v1321_v32, %v1317_v39 }
 0x330   : > { %18698 = vst [vmem:[#allocation33_spill] sm:$0xff] %v14822_v27 }
 0x331   : > { %18699 = vst [vmem:[#allocation34_spill] sm:$0xff] %v14824_v29  ;;  %v18749_v29 = vmov 0 }
 0x333   : > { %v1325_v48 = vpop.f32.mrb[24].mxu0 }
 0x334   : > { %v1327_v62 = vpop.f32.mrb[25].mxu0 }
 0x335   : > { %v1329_v60 = vpop.f32.mrb[26].mxu0 }
 0x336   : > { %v14826_v40 = vpack.c.bf16 %v1329_v60, %v1325_v48  ;;  %v1331_v22 = vpop.f32.mrb[27].mxu0 }
 0x337   : > { %v14828_v17 = vpack.c.bf16 %v1331_v22, %v1327_v62 }
 0x338   : > { %18700 = vst [vmem:[#allocation35_spill] sm:$0xff] %v14826_v40 }
 0x339   : > { %18701 = vst [vmem:[#allocation36_spill] sm:$0xff] %v14828_v17  ;;  %v2014_v17 = vadd.s32 88, %v14598_v31 }
 0x33b   : > { %v1335_v9 = vpop.f32.mrb[28].mxu0  ;;  %vm15121_vm10 = vcmp.le.s32.totalorder %v14272_v1, %v2014_v17 }
 0x33c   : > { %v1337_v63 = vpop.f32.mrb[29].mxu0 }
 0x33d   : > { %v1339_v30 = vpop.f32.mrb[30].mxu0 }
 0x33e   : > { %v14830_v38 = vpack.c.bf16 %v1339_v30, %v1335_v9  ;;  %v1341_v42 = vpop.f32.mrb[31].mxu0 }
 0x33f   : > { %v14832_v16 = vpack.c.bf16 %v1341_v42, %v1337_v63 }
 0x340   : > { %18702 = vst [vmem:[#allocation37_spill] sm:$0xff] %v14830_v38 }
 0x341   : > { %18703 = vst [vmem:[#allocation38_spill] sm:$0xff] %v14832_v16  ;;  %v18743_v16 = vmov 0 }
 0x343   : > { %v1570_v25 = vpop.f32.mrb[32].mxu0 }
 0x344   : > { %v1572_v10 = vpop.f32.mrb[33].mxu0 }
 0x345   : > { %v1574_v46 = vpop.f32.mrb[34].mxu0 }
 0x346   : > { %v14834_v13 = vpack.c.bf16 %v1574_v46, %v1570_v25  ;;  %v1576_v3 = vpop.f32.mrb[35].mxu0 }
 0x347   : > { %v14836_v43 = vpack.c.bf16 %v1576_v3, %v1572_v10 }
 0x348   : > { %2506 = vrot.lane.b32.xlu0 %v14834_v13, %s13895_s14  ;;  %12427 = vmatprep.subr.msk.bf16.mxu1 %vm18482_vm1, %v14834_v13  ;;  %v2061_v34 = vsel %vm18482_vm1, %v14834_v13, 0 }
 0x349   : > { %18704 = vst [vmem:[#allocation39_spill] sm:$0xff] %v14836_v43  ;;  %11564 = vmatpush3.bf16.xpose.msra.mxu1 %v2061_v34 }
 0x34b   : > { %v1580_v11 = vpop.f32.mrb[36].mxu0 }
 0x34c   : > { %v1582_v54 = vpop.f32.mrb[37].mxu0 }
 0x34d   : > { %v1584_v52 = vpop.f32.mrb[38].mxu0 }
 0x34e   : > { %v14844_v51 = vpack.c.bf16 %v1584_v52, %v1580_v11  ;;  %v1586_v57 = vpop.f32.mrb[39].mxu0 }
 0x34f   : > { %v14846_v41 = vpack.c.bf16 %v1586_v57, %v1582_v54 }
 0x350   : > { %2508 = vrot.lane.b32.xlu1 %v14844_v51, %s13895_s14  ;;  %12428 = vmatprep.subr.msk.bf16.mxu1 %vm18482_vm1, %v14844_v51  ;;  %v2064_v49 = vsel %vm18482_vm1, %v14844_v51, 0 }
 0x351   : > { %18705 = vst [vmem:[#allocation40_spill] sm:$0xff] %v14846_v41  ;;  %11566 = vmatpush3.bf16.xpose.msra.mxu1 %v2064_v49 }
 0x353   : > { %v1590_v23 = vpop.f32.mrb[40].mxu0 }
 0x354   : > { %v1592_v59 = vpop.f32.mrb[41].mxu0 }
 0x355   : > { %v1594_v0 = vpop.f32.mrb[42].mxu0 }
 0x356   : > { %v14854_v28 = vpack.c.bf16 %v1594_v0, %v1590_v23  ;;  %v1596_v15 = vpop.f32.mrb[43].mxu0 }
 0x357   : > { %v14856_v14 = vpack.c.bf16 %v1596_v15, %v1592_v59 }
 0x358   : > { %2510 = vrot.lane.b32.xlu1 %v14854_v28, %s13895_s14  ;;  %12429 = vmatprep.subr.msk.bf16.mxu1 %vm18482_vm1, %v14854_v28  ;;  %v2067_v55 = vsel %vm18482_vm1, %v14854_v28, 0 }
 0x359   : > { %18706 = vst [vmem:[#allocation41_spill] sm:$0xff] %v14856_v14  ;;  %11568 = vmatpush3.bf16.xpose.msra.mxu1 %v2067_v55 }
 0x35b   : > { %v1600_v8 = vpop.f32.mrb[44].mxu0 }
 0x35c   : > { %v1602_v20 = vpop.f32.mrb[45].mxu0 }
 0x35d   : > { %v1604_v21 = vpop.f32.mrb[46].mxu0 }
 0x35e   : > { %v14864_v36 = vpack.c.bf16 %v1604_v21, %v1600_v8  ;;  %v1606_v35 = vpop.f32.mrb[47].mxu0 }
 0x35f   : > { %v14866_v5 = vpack.c.bf16 %v1606_v35, %v1602_v20 }
 0x360   : > { %2512 = vrot.lane.b32.xlu1 %v14864_v36, %s13895_s14  ;;  %12430 = vmatprep.subr.msk.bf16.mxu1 %vm18482_vm1, %v14864_v36  ;;  %v2070_v44 = vsel %vm18482_vm1, %v14864_v36, 0 }
 0x361   : > { %18707 = vst [vmem:[#allocation42_spill] sm:$0xff] %v14866_v5  ;;  %11570 = vmatpush3.bf16.xpose.msra.mxu1 %v2070_v44  ;;  %v2016_v5 = vadd.s32 104, %v14598_v31 }
 0x363   : > { %v1610_v24 = vpop.f32.mrb[48].mxu0  ;;  %vm15183_vm0 = vcmp.le.s32.totalorder %v14272_v1, %v2016_v5 }
 0x364   : > { %v1612_v53 = vpop.f32.mrb[49].mxu0 }
 0x365   : > { %v1614_v19 = vpop.f32.mrb[50].mxu0 }
 0x366   : > { %v14874_v61 = vpack.c.bf16 %v1614_v19, %v1610_v24  ;;  %v1616_v39 = vpop.f32.mrb[51].mxu0 }
 0x367   : > { %v14876_v7 = vpack.c.bf16 %v1616_v39, %v1612_v53 }
 0x368   : > { %2514 = vrot.lane.b32.xlu0 %v14874_v61, %s13895_s14  ;;  %12431 = vmatprep.subr.msk.bf16.mxu1 %vm18482_vm1, %v14874_v61  ;;  %v2073_v32 = vsel %vm18482_vm1, %v14874_v61, 0 }
 0x369   : > { %18708 = vst [vmem:[#allocation43_spill] sm:$0xff] %v14876_v7  ;;  %11572 = vmatpush3.bf16.xpose.msra.mxu1 %v2073_v32 }
 0x36b   : > { %v1620_v48 = vpop.f32.mrb[52].mxu0 }
 0x36c   : > { %v1622_v62 = vpop.f32.mrb[53].mxu0 }
 0x36d   : > { %v1624_v60 = vpop.f32.mrb[54].mxu0 }
 0x36e   : > { %v14884_v22 = vpack.c.bf16 %v1624_v60, %v1620_v48  ;;  %v1626_v9 = vpop.f32.mrb[55].mxu0 }
 0x36f   : > { %v14886_v63 = vpack.c.bf16 %v1626_v9, %v1622_v62 }
 0x370   : > { %2516 = vrot.lane.b32.xlu1 %v14884_v22, %s13895_s14  ;;  %12432 = vmatprep.subr.msk.bf16.mxu1 %vm18482_vm1, %v14884_v22  ;;  %v2076_v30 = vsel %vm18482_vm1, %v14884_v22, 0 }
 0x371   : > { %18709 = vst [vmem:[#allocation44_spill] sm:$0xff] %v14886_v63  ;;  %11574 = vmatpush3.bf16.xpose.msra.mxu1 %v2076_v30  ;;  %v18761_v63 = vmov 0 }
 0x373   : > { %v1630_v42 = vpop.f32.mrb[56].mxu0 }
 0x374   : > { %v1632_v25 = vpop.f32.mrb[57].mxu0 }
 0x375   : > { %v1634_v10 = vpop.f32.mrb[58].mxu0 }
 0x376   : > { %v14894_v46 = vpack.c.bf16 %v1634_v10, %v1630_v42  ;;  %v1636_v3 = vpop.f32.mrb[59].mxu0 }
 0x377   : > { %v14896_v34 = vpack.c.bf16 %v1636_v3, %v1632_v25 }
 0x378   : > { %2518 = vrot.lane.b32.xlu0 %v14894_v46, %s13895_s14  ;;  %12433 = vmatprep.subr.msk.bf16.mxu1 %vm18482_vm1, %v14894_v46  ;;  %v2079_v11 = vsel %vm18482_vm1, %v14894_v46, 0 }
 0x379   : > { %18710 = vst [vmem:[#allocation45_spill] sm:$0xff] %v14896_v34  ;;  %11576 = vmatpush3.bf16.xpose.msra.mxu1 %v2079_v11  ;;  %v2018_v34 = vadd.s32 120, %v14598_v31 }
 0x37b   : > { %v1640_v54 = vpop.f32.mrb[60].mxu0  ;;  %vm15165_vm14 = vcmp.le.s32.totalorder %v14272_v1, %v2018_v34 }
 0x37c   : > { %2482 = vrot.lane.b32.xlu0 %v14800_v45, %s13895_s14  ;;  %v1642_v52 = vpop.f32.mrb[61].mxu0 }
 0x37d   : > { %v1644_v57 = vpop.f32.mrb[62].mxu0 }
 0x37e   : > { %v14906_v49 = vpack.c.bf16 %v1644_v57, %v1640_v54  ;;  %v1646_v23 = vpop.f32.mrb[63].mxu0 }
 0x37f   : > { %v14908_v59 = vpack.c.bf16 %v1646_v23, %v1642_v52 }
 0x380   : > { %2486 = vrot.lane.b32.xlu0 %v14810_v37, %s13895_s14  ;;  %2520 = vrot.lane.b32.xlu1 %v14906_v49, %s13895_s14  ;;  %v2082_v0 = vsel %vm18482_vm1, %v14906_v49, 0 }
 0x381   : > { %18711 = vst [vmem:[#allocation46_spill] sm:$0xff] %v14908_v59  ;;  %12434 = vmatprep.subr.msk.bf16.mxu1 %vm18482_vm1, %v14906_v49  ;;  %v18755_v59 = vmov 0 }
 0x382   : > { %11578 = vmatpush3.bf16.xpose.msra.mxu1 %v2082_v0 }
 0x383   : > { %v1875_v15 = vpop.f32.mrb[64].mxu0 }
 0x384   : > { %2490 = vrot.lane.b32.xlu0 %v14818_v18, %s13895_s14  ;;  %2484 = vrot.lane.b32.xlu1 %v14806_v2, %s13895_s14  ;;  %v1877_v55 = vpop.f32.mrb[65].mxu0 }
 0x385   : > { %v1879_v8 = vpop.f32.mrb[66].mxu0 }
 0x386   : > { %v14922_v20 = vpack.c.bf16 %v1879_v8, %v1875_v15  ;;  %v1881_v21 = vpop.f32.mrb[67].mxu0 }
 0x387   : > { %v14924_v35 = vpack.c.bf16 %v1881_v21, %v1877_v55 }
 0x388   : > { %18712 = vst [vmem:[#allocation47_spill] sm:$0xff] %v14922_v20  ;;  %2494 = vrot.lane.b32.xlu0 %v14826_v40, %s13895_s14  ;;  %2488 = vrot.lane.b32.xlu1 %v14814_v50, %s13895_s14 }
 0x389   : > { %18713 = vst [vmem:[#allocation48_spill] sm:$0xff] %v14924_v35  ;;  %11580 = vmatmul.mubr.msk.bf16.vlgmr.msra.gmra.mrb[0].mxu1 %vm18482_vm1, %v14806_v2  ;;  %11595 = vmatprep.subr.bf16.mxu1 %v14922_v20 }
 0x38a   : > { %11583 = vmatprep.mubr.msk.bf16.mxu1 %vm18482_vm1, %v14810_v37  ;;  %11596 = vmatpush3.bf16.msra.mxu1 %v14922_v20 }
 0x38b   : > { %v1885_v44 = vpop.f32.mrb[68].mxu0 }
 0x38c   : > { %2492 = vrot.lane.b32.xlu1 %v14822_v27, %s13895_s14  ;;  %2859 = vrot.lane.b32.xlu0 %v14922_v20, %s13895_s14  ;;  %v1887_v24 = vpop.f32.mrb[69].mxu0 }
 0x38d   : > { %v1889_v53 = vpop.f32.mrb[70].mxu0 }
 0x38e   : > { %v14940_v19 = vpack.c.bf16 %v1889_v53, %v1885_v44  ;;  %v1891_v39 = vpop.f32.mrb[71].mxu0 }
 0x38f   : > { %v14942_v32 = vpack.c.bf16 %v1891_v39, %v1887_v24 }
 0x390   : > { %18714 = vst [vmem:[#allocation49_spill] sm:$0xff] %v14940_v19  ;;  %2496 = vrot.lane.b32.xlu1 %v14830_v38, %s13895_s14  ;;  %11597 = vmatprep.subr.bf16.mxu1 %v14940_v19 }
 0x391   : > { %18715 = vst [vmem:[#allocation50_spill] sm:$0xff] %v14942_v32  ;;  %11584 = vmatmul.mubr.msk.bf16.gmra.mrb[4].mxu1 %vm18482_vm1, %v14814_v50  ;;  %v2007_v32 = vadd.s32 32, %v14598_v31 }
 0x392   : > { %11587 = vmatprep.mubr.msk.bf16.mxu1 %vm18482_vm1, %v14818_v18  ;;  %11598 = vmatpush3.bf16.msra.mxu1 %v14940_v19 }
 0x393   : > { %v1895_v48 = vpop.f32.mrb[72].mxu0  ;;  %vm15105_vm9 = vcmp.le.s32.totalorder %v14272_v1, %v2007_v32  ;;  %v18752_v32 = vmov 0 }
 0x394   : > { %2861 = vrot.lane.b32.xlu1 %v14940_v19, %s13895_s14  ;;  %v1897_v62 = vpop.f32.mrb[73].mxu0  ;;  %v18750_v29 = vsel %vm15105_vm9, 4294967295, %v18749_v29  ;;  %v18753_v32 = vsel %vm15121_vm10, 4294967295, %v18752_v32 }
 0x395   : > { %v1899_v60 = vpop.f32.mrb[74].mxu0  ;;  %18751 = vst [vmem:[#allocation70_spill] sm:$0xff] %v18750_v29  ;;  %18754 = vst [vmem:[#allocation71_spill] sm:$0xff] %v18753_v32 }
 0x396   : > { %v14954_v9 = vpack.c.bf16 %v1899_v60, %v1895_v48  ;;  %v1901_v30 = vpop.f32.mrb[75].mxu0 }
 0x397   : > { %v14956_v42 = vpack.c.bf16 %v1901_v30, %v1897_v62 }
 0x398   : > { %18716 = vst [vmem:[#allocation51_spill] sm:$0xff] %v14954_v9  ;;  %2863 = vrot.lane.b32.xlu0 %v14954_v9, %s13895_s14  ;;  %11599 = vmatprep.subr.bf16.mxu1 %v14954_v9 }
 0x399   : > { %18717 = vst [vmem:[#allocation52_spill] sm:$0xff] %v14956_v42  ;;  %11588 = vmatmul.mubr.msk.bf16.gmra.mrb[8].mxu1 %vm18482_vm1, %v14822_v27 }
 0x39a   : > { %11591 = vmatprep.mubr.msk.bf16.mxu1 %vm18482_vm1, %v14826_v40  ;;  %11600 = vmatpush3.bf16.msra.mxu1 %v14954_v9 }
 0x39b   : > { %v1905_v25 = vpop.f32.mrb[76].mxu0 }
 0x39c   : > { %v1907_v10 = vpop.f32.mrb[77].mxu0 }
 0x39d   : > { %v1909_v3 = vpop.f32.mrb[78].mxu0 }
 0x39e   : > { %v14966_v11 = vpack.c.bf16 %v1909_v3, %v1905_v25  ;;  %v1911_v54 = vpop.f32.mrb[79].mxu0 }
 0x39f   : > { %v14968_v52 = vpack.c.bf16 %v1911_v54, %v1907_v10 }
 0x3a0   : > { %18718 = vst [vmem:[#allocation53_spill] sm:$0xff] %v14966_v11  ;;  %2865 = vrot.lane.b32.xlu0 %v14966_v11, %s13895_s14  ;;  %11601 = vmatprep.subr.bf16.mxu1 %v14966_v11 }
 0x3a1   : > { %18719 = vst [vmem:[#allocation54_spill] sm:$0xff] %v14968_v52  ;;  %11592 = vmatmul.mubr.msk.bf16.gmra.mrb[12].mxu1 %vm18482_vm1, %v14830_v38 }
 0x3a2   : > { %11602 = vmatpush3.bf16.msra.mxu1 %v14966_v11 }
 0x3a3   : > { %v1915_v57 = vpop.f32.mrb[80].mxu0 }
 0x3a4   : > { %v1917_v23 = vpop.f32.mrb[81].mxu0 }
 0x3a5   : > { %v1919_v0 = vpop.f32.mrb[82].mxu0 }
 0x3a6   : > { %v14976_v15 = vpack.c.bf16 %v1919_v0, %v1915_v57  ;;  %v1921_v55 = vpop.f32.mrb[83].mxu0 }
 0x3a7   : > { %v14978_v8 = vpack.c.bf16 %v1921_v55, %v1917_v23 }
 0x3a8   : > { %18720 = vst [vmem:[#allocation55_spill] sm:$0xff] %v14976_v15  ;;  %2867 = vrot.lane.b32.xlu0 %v14976_v15, %s13895_s14  ;;  %11603 = vmatprep.subr.bf16.mxu1 %v14976_v15 }
 0x3a9   : > { %18721 = vst [vmem:[#allocation56_spill] sm:$0xff] %v14978_v8  ;;  %11604 = vmatpush3.bf16.msra.mxu1 %v14976_v15 }
 0x3ab   : > { %v1925_v21 = vpop.f32.mrb[84].mxu0 }
 0x3ac   : > { %v1927_v44 = vpop.f32.mrb[85].mxu0 }
 0x3ad   : > { %v1929_v24 = vpop.f32.mrb[86].mxu0 }
 0x3ae   : > { %v14984_v53 = vpack.c.bf16 %v1929_v24, %v1925_v21  ;;  %v1931_v39 = vpop.f32.mrb[87].mxu0 }
 0x3af   : > { %v14986_v48 = vpack.c.bf16 %v1931_v39, %v1927_v44 }
 0x3b0   : > { %18722 = vst [vmem:[#allocation57_spill] sm:$0xff] %v14984_v53  ;;  %2869 = vrot.lane.b32.xlu1 %v14984_v53, %s13895_s14  ;;  %11605 = vmatprep.subr.bf16.mxu1 %v14984_v53 }
 0x3b1   : > { %18723 = vst [vmem:[#allocation58_spill] sm:$0xff] %v14986_v48  ;;  %11606 = vmatpush3.bf16.msra.mxu1 %v14984_v53 }
 0x3b3   : > { %v1935_v62 = vpop.f32.mrb[88].mxu0 }
 0x3b4   : > { %v1937_v60 = vpop.f32.mrb[89].mxu0 }
 0x3b5   : > { %v1939_v30 = vpop.f32.mrb[90].mxu0 }
 0x3b6   : > { %v14992_v25 = vpack.c.bf16 %v1939_v30, %v1935_v62  ;;  %v1941_v10 = vpop.f32.mrb[91].mxu0 }
 0x3b7   : > { %v14994_v3 = vpack.c.bf16 %v1941_v10, %v1937_v60 }
 0x3b8   : > { %18724 = vst [vmem:[#allocation59_spill] sm:$0xff] %v14992_v25  ;;  %11607 = vmatprep.subr.bf16.mxu1 %v14992_v25 }
 0x3b9   : > { %18725 = vst [vmem:[#allocation60_spill] sm:$0xff] %v14994_v3  ;;  %11608 = vmatpush3.bf16.msra.mxu1 %v14992_v25 }
 0x3ba   : > { %v2507_v54 = vpop.permute.xlu0 %2506 }
 0x3bb   : > { %v1945_v57 = vpop.f32.mrb[92].mxu0  ;;  %12435 = vmatprep.subr.msk.bf16.mxu0 %vm18482_vm1, %v2507_v54  ;;  %v2547_v23 = vsel %vm18482_vm1, %v2507_v54, 0 }
 0x3bc   : > { %v1947_v0 = vpop.f32.mrb[93].mxu0  ;;  %11628 = vmatpush3.bf16.xpose.msra.mxu0 %v2547_v23 }
 0x3bd   : > { %v1949_v55 = vpop.f32.mrb[94].mxu0 }
 0x3be   : > { %v15000_v21 = vpack.c.bf16 %v1949_v55, %v1945_v57  ;;  %v1951_v44 = vpop.f32.mrb[95].mxu0 }
 0x3bf   : > { %v15002_v24 = vpack.c.bf16 %v1951_v44, %v1947_v0 }
 0x3c0   : > { %18726 = vst [vmem:[#allocation61_spill] sm:$0xff] %v15000_v21  ;;  %11609 = vmatprep.subr.bf16.mxu1 %v15000_v21 }
 0x3c1   : > { %18727 = vst [vmem:[#allocation62_spill] sm:$0xff] %v15002_v24  ;;  %11610 = vmatpush3.bf16.msra.mxu1 %v15000_v21 }
 0x3c2   : > { %v2509_v39 = vpop.permute.xlu1 %2508 }
 0x3c3   : > { %12436 = vmatprep.subr.msk.bf16.mxu0 %vm18482_vm1, %v2509_v39  ;;  %v2550_v62 = vsel %vm18482_vm1, %v2509_v39, 0 }
 0x3c4   : > { %11630 = vmatpush3.bf16.xpose.msra.mxu0 %v2550_v62 }
 0x3ca   : > { %v2511_v60 = vpop.permute.xlu1 %2510 }
 0x3cb   : > { %12437 = vmatprep.subr.msk.bf16.mxu0 %vm18482_vm1, %v2511_v60  ;;  %v2553_v30 = vsel %vm18482_vm1, %v2511_v60, 0 }
 0x3cc   : > { %11632 = vmatpush3.bf16.xpose.msra.mxu0 %v2553_v30 }
 0x3d2   : > { %v2513_v10 = vpop.permute.xlu1 %2512 }
 0x3d3   : > { %12438 = vmatprep.subr.msk.bf16.mxu0 %vm18482_vm1, %v2513_v10  ;;  %v2556_v54 = vsel %vm18482_vm1, %v2513_v10, 0 }
 0x3d4   : > { %11634 = vmatpush3.bf16.xpose.msra.mxu0 %v2556_v54 }
 0x3da   : > { %v2515_v57 = vpop.permute.xlu0 %2514 }
 0x3db   : > { %12439 = vmatprep.subr.msk.bf16.mxu0 %vm18482_vm1, %v2515_v57  ;;  %v2559_v23 = vsel %vm18482_vm1, %v2515_v57, 0 }
 0x3dc   : > { %11636 = vmatpush3.bf16.xpose.msra.mxu0 %v2559_v23 }
 0x3e2   : > { %v2517_v0 = vpop.permute.xlu1 %2516 }
 0x3e3   : > { %12440 = vmatprep.subr.msk.bf16.mxu0 %vm18482_vm1, %v2517_v0  ;;  %v2562_v55 = vsel %vm18482_vm1, %v2517_v0, 0 }
 0x3e4   : > { %11638 = vmatpush3.bf16.xpose.msra.mxu0 %v2562_v55 }
 0x3ea   : > { %v2519_v44 = vpop.permute.xlu0 %2518 }
 0x3eb   : > { %12441 = vmatprep.subr.msk.bf16.mxu0 %vm18482_vm1, %v2519_v44  ;;  %v2565_v39 = vsel %vm18482_vm1, %v2519_v44, 0 }
 0x3ec   : > { %11640 = vmatpush3.bf16.xpose.msra.mxu0 %v2565_v39 }
 0x3ee   : > { %v2483_v62 = vpop.permute.xlu0 %2482 }
 0x3ef   : > { %11643 = vmatprep.mubr.msk.bf16.mxu0 %vm18482_vm1, %v2483_v62  ;;  %v2005_v62 = vadd.s32 16, %v14598_v31 }
 0x3f1   : > { %vm15034_vm2 = vcmp.le.s32.totalorder %v14272_v1, %v2005_v62 }
 0x3f2   : > { %v2487_v60 = vpop.permute.xlu0 %2486  ;;  %v2521_v30 = vpop.permute.xlu1 %2520 }
 0x3f3   : > { %12442 = vmatprep.subr.msk.bf16.mxu0 %vm18482_vm1, %v2521_v30  ;;  %v2568_v10 = vsel %vm18482_vm1, %v2521_v30, 0 }
 0x3f4   : > { %11642 = vmatpush3.bf16.xpose.msra.mxu0 %v2568_v10  ;;  %v18728_v10 = vmov 0 }
 0x3f5   : > { %v18729_v10 = vsel %vm15034_vm2, 4294967295, %v18728_v10 }
 0x3f6   : > { %v2491_v54 = vpop.permute.xlu0 %2490  ;;  %v2485_v57 = vpop.permute.xlu1 %2484  ;;  %18730 = vst [vmem:[#allocation63_spill] sm:$0xff] %v18729_v10 }
 0x3fa   : > { %v2495_v23 = vpop.permute.xlu0 %2494  ;;  %v2489_v55 = vpop.permute.xlu1 %2488 }
 0x3fb   : > { %11644 = vmatmul.mubr.msk.bf16.vlgmr.msra.gmra.mrb[96].mxu0 %vm18482_vm1, %v2485_v57 }
 0x3fc   : > { %11647 = vmatprep.mubr.msk.bf16.mxu0 %vm18482_vm1, %v2487_v60  ;;  %v2004_v60 = vadd.s32 8, %v14598_v31 }
 0x3fe   : > { %v15023_v0 = vpop.permute.xlu0 %2859  ;;  %v2493_v44 = vpop.permute.xlu1 %2492  ;;  %vm15043_vm3 = vcmp.le.s32.totalorder %v14272_v1, %v2004_v60 }
 0x3ff   : > { %11659 = vmatprep.subr.bf16.mxu1 %v15023_v0 }
 0x402   : > { %v2497_v39 = vpop.permute.xlu1 %2496 }
 0x403   : > { %11648 = vmatmul.mubr.msk.bf16.gmra.mrb[100].mxu0 %vm18482_vm1, %v2489_v55 }
 0x404   : > { %11651 = vmatprep.mubr.msk.bf16.mxu0 %vm18482_vm1, %v2491_v54 }
 0x40b   : > { %11652 = vmatmul.mubr.msk.bf16.gmra.mrb[104].mxu0 %vm18482_vm1, %v2493_v44  ;;  %v18731_v44 = vmov 0 }
 0x40c   : > { %11655 = vmatprep.mubr.msk.bf16.mxu0 %vm18482_vm1, %v2495_v23  ;;  %v18732_v44 = vsel %vm15043_vm3, 4294967295, %v18731_v44 }
 0x40d   : > { %18733 = vst [vmem:[#allocation64_spill] sm:$0xff] %v18732_v44 }
 0x413   : > { %11656 = vmatmul.mubr.msk.bf16.gmra.mrb[108].mxu0 %vm18482_vm1, %v2497_v39 }
 0x45c   : > { %v11581_v30 = vpop.f32.mrb[0].mxu1 }
 0x45d   : > { %v2118_v57 = vpop.f32.mrb[1].mxu1  ;;  %v2183_v54 = vmul.f32 0.2, %v11581_v30  ;;  %v18734_v30 = vmov 0 }
 0x45e   : > { %v11582_v55 = vpop.f32.mrb[2].mxu1  ;;  %v2181_v39 = vmul.f32 0.2, %v2118_v57  ;;  %v18735_v30 = vsel %vm15051_vm4, 4294967295, %v18734_v30 }
 0x45f   : > { %v2121_v6 = vpop.f32.mrb[3].mxu1  ;;  %v15040_v23 = vsel %vm15034_vm2, %v2183_v54, -1e+30  ;;  %18736 = vst [vmem:[#allocation65_spill] sm:$0xff] %v18735_v30  ;;  %v2184_v60 = vmul.f32 0.2, %v11582_v55 }
 0x460   : > { %2217 = vmax.xlane.f32.xlu0 %v15040_v23  ;;  %v2182_v62 = vmul.f32 0.2, %v2121_v6  ;;  %v15063_v57 = vsel %vm15051_vm4, %v2181_v39, -1e+30  ;;  %v18737_v6 = vmov 0  ;;  %v18740_v39 = vmov 0 }
 0x461   : > { %v18738_v6 = vsel %vm15066_vm5, 4294967295, %v18737_v6  ;;  %v15074_v48 = vsel %vm15066_vm5, %v2184_v60, -1e+30  ;;  %v18741_v39 = vsel %vm15077_vm6, 4294967295, %v18740_v39 }
 0x462   : > { %v15057_v54 = vsel %vm15043_vm3, %v2182_v62, -1e+30  ;;  %18739 = vst [vmem:[#allocation66_spill] sm:$0xff] %v18738_v6  ;;  %v2009_v62 = vadd.s32 48, %v14598_v31  ;;  %18742 = vst [vmem:[#allocation67_spill] sm:$0xff] %v18741_v39  ;;  %v15247_v39 = vpop.permute.xlu0 %2863 }
 0x463   : > { %2215 = vmax.xlane.f32.xlu1 %v15057_v54 }
 0x464   : > { %v11585_v24 = vpop.f32.mrb[4].mxu1  ;;  %2213 = vmax.xlane.f32.xlu0 %v15063_v57  ;;  %vm15085_vm7 = vcmp.le.s32.totalorder %v14272_v1, %v2009_v62 }
 0x465   : > { %v2134_v3 = vpop.f32.mrb[5].mxu1  ;;  %v2187_v42 = vmul.f32 0.2, %v11585_v24  ;;  %v18744_v16 = vsel %vm15085_vm7, 4294967295, %v18743_v16 }
 0x466   : > { %v11586_v55 = vpop.f32.mrb[6].mxu1  ;;  %18745 = vst [vmem:[#allocation68_spill] sm:$0xff] %v18744_v16  ;;  %v2185_v24 = vmul.f32 0.2, %v2134_v3 }
 0x467   : > { %v2137_v8 = vpop.f32.mrb[7].mxu1  ;;  %v2188_v52 = vmul.f32 0.2, %v11586_v55  ;;  %v18746_v55 = vmov 0  ;;  %v15102_v62 = vsel %vm15085_vm7, %v2187_v42, -1e+30 }
 0x468   : > { %2219 = vmax.xlane.f32.xlu0 %v15074_v48  ;;  %v2186_v60 = vmul.f32 0.2, %v2137_v8  ;;  %v18747_v55 = vsel %vm15095_vm8, 4294967295, %v18746_v55  ;;  %v2013_v8 = vadd.s32 80, %v14598_v31  ;;  %v15118_v42 = vsel %vm15105_vm9, %v2185_v24, -1e+30 }
 0x469   : > { %v15091_v12 = vsel %vm15077_vm6, %v2188_v52, -1e+30  ;;  %18748 = vst [vmem:[#allocation69_spill] sm:$0xff] %v18747_v55 }
 0x46a   : > { %2227 = vmax.xlane.f32.xlu1 %v15091_v12  ;;  %v15113_v3 = vsel %vm15095_vm8, %v2186_v60, -1e+30  ;;  %v2011_v60 = vadd.s32 64, %v14598_v31  ;;  %vm15129_vm11 = vcmp.le.s32.totalorder %v14272_v1, %v2013_v8 }
 0x46b   : > { %v18756_v59 = vsel %vm15129_vm11, 4294967295, %v18755_v59 }
 0x46c   : > { %v11589_v52 = vpop.f32.mrb[8].mxu1  ;;  %2225 = vmax.xlane.f32.xlu0 %v15102_v62  ;;  %18757 = vst [vmem:[#allocation72_spill] sm:$0xff] %v18756_v59  ;;  %vm15149_vm13 = vcmp.le.s32.totalorder %v14272_v1, %v2011_v60  ;;  %v18764_v60 = vmov 0 }
 0x46d   : > { %v2150_v26 = vpop.f32.mrb[9].mxu1  ;;  %v2191_v4 = vmul.f32 0.2, %v11589_v52  ;;  %v18762_v63 = vsel %vm15149_vm13, 4294967295, %v18761_v63  ;;  %v18765_v60 = vsel %vm15165_vm14, 4294967295, %v18764_v60 }
 0x46e   : > { %v11590_v47 = vpop.f32.mrb[10].mxu1  ;;  %2223 = vmax.xlane.f32.xlu1 %v15113_v3  ;;  %v2189_v52 = vmul.f32 0.2, %v2150_v26  ;;  %18763 = vst [vmem:[#allocation74_spill] sm:$0xff] %v18762_v63  ;;  %18766 = vst [vmem:[#allocation75_spill] sm:$0xff] %v18765_v60  ;;  %v15277_v63 = vpop.permute.xlu1 %2861 }
 0x46f   : > { %v2153_v56 = vpop.f32.mrb[11].mxu1  ;;  %v2192_v58 = vmul.f32 0.2, %v11590_v47  ;;  %v18758_v47 = vmov 0  ;;  %v15146_v8 = vsel %vm15129_vm11, %v2191_v4, -1e+30 }
 0x470   : > { %2221 = vmax.xlane.f32.xlu0 %v15118_v42  ;;  %v2190_v24 = vmul.f32 0.2, %v2153_v56  ;;  %v18759_v47 = vsel %vm15139_vm12, 4294967295, %v18758_v47  ;;  %v2017_v56 = vadd.s32 112, %v14598_v31  ;;  %v15162_v4 = vsel %vm15149_vm13, %v2189_v52, -1e+30 }
 0x471   : > { %v15135_v17 = vsel %vm15121_vm10, %v2192_v58, -1e+30  ;;  %18760 = vst [vmem:[#allocation73_spill] sm:$0xff] %v18759_v47  ;;  %v2015_v52 = vadd.s32 96, %v14598_v31  ;;  %v18773_v31 = vmov 0 }
 0x472   : > { %2235 = vmax.xlane.f32.xlu1 %v15135_v17  ;;  %v15157_v26 = vsel %vm15139_vm12, %v2190_v24, -1e+30  ;;  %vm15172_vm15 = vcmp.le.s32.totalorder %v14272_v1, %v2017_v56  ;;  %v18767_v24 = vmov 0  ;;  %v15289_v47 = vpop.permute.xlu1 %2869 }
 0x473   : > { %v18768_v24 = vsel %vm15172_vm15, 4294967295, %v18767_v24  ;;  %vm15193_vm1 = vcmp.le.s32.totalorder %v14272_v1, %v2015_v52 }
 0x474   : > { %v11593_v58 = vpop.f32.mrb[12].mxu1  ;;  %2233 = vmax.xlane.f32.xlu0 %v15146_v8  ;;  %18769 = vst [vmem:[#allocation76_spill] sm:$0xff] %v18768_v24  ;;  %v18774_v31 = vsel %vm15193_vm1, 4294967295, %v18773_v31 }
 0x475   : > { %v2166_v33 = vpop.f32.mrb[13].mxu1  ;;  %v2195_v41 = vmul.f32 0.2, %v11593_v58  ;;  %18775 = vst [vmem:[#allocation78_spill] sm:$0xff] %v18774_v31 }
 0x476   : > { %v11594_v7 = vpop.f32.mrb[14].mxu1  ;;  %2231 = vmax.xlane.f32.xlu1 %v15157_v26  ;;  %v2193_v56 = vmul.f32 0.2, %v2166_v33 }
 0x477   : > { %v2169_v43 = vpop.f32.mrb[15].mxu1  ;;  %v2196_v14 = vmul.f32 0.2, %v11594_v7  ;;  %v18770_v7 = vmov 0  ;;  %v15189_v58 = vsel %vm15172_vm15, %v2195_v41, -1e+30 }
 0x478   : > { %2229 = vmax.xlane.f32.xlu0 %v15162_v4  ;;  %v2194_v35 = vmul.f32 0.2, %v2169_v43  ;;  %v18771_v7 = vsel %vm15183_vm0, 4294967295, %v18770_v7 }
 0x479   : > { %v15179_v34 = vsel %vm15165_vm14, %v2196_v14, -1e+30  ;;  %18772 = vst [vmem:[#allocation77_spill] sm:$0xff] %v18771_v7  ;;  %v15204_v14 = vsel %vm15193_vm1, %v2193_v56, -1e+30 }
 0x47a   : > { %2243 = vmax.xlane.f32.xlu1 %v15179_v34  ;;  %v15199_v43 = vsel %vm15183_vm0, %v2194_v35, -1e+30 }
 0x47c   : > { %2241 = vmax.xlane.f32.xlu0 %v15189_v58 }
 0x47e   : > { %2239 = vmax.xlane.f32.xlu1 %v15199_v43 }
 0x480   : > { %2237 = vmax.xlane.f32.xlu0 %v15204_v14 }
 0x4ce   : > { %v11645_v41 = vpop.f32.mrb[96].mxu0 }
 0x4cf   : > { %v2669_v5 = vmul.f32 0.2, %v11645_v41  ;;  %v2604_v33 = vpop.f32.mrb[97].mxu0 }
 0x4d0   : > { %v2667_v53 = vmul.f32 0.2, %v2604_v33  ;;  %v11646_v1 = vpop.f32.mrb[98].mxu0 }
 0x4d1   : > { %v2670_v52 = vmul.f32 0.2, %v11646_v1  ;;  %v2607_v15 = vpop.f32.mrb[99].mxu0  ;;  %v15209_v11 = vsel %vm15034_vm2, %v2669_v5, -1e+30 }
 0x4d2   : > { %2703 = vmax.xlane.f32.xlu0 %v15209_v11  ;;  %v2668_v35 = vmul.f32 0.2, %v2607_v15  ;;  %v15219_v41 = vsel %vm15051_vm4, %v2667_v53, -1e+30 }
 0x4d3   : > { %v15214_v56 = vsel %vm15066_vm5, %v2670_v52, -1e+30 }
 0x4d4   : > { %2705 = vmax.xlane.f32.xlu1 %v15214_v56  ;;  %v15224_v5 = vsel %vm15043_vm3, %v2668_v35, -1e+30 }
 0x4d6   : > { %2699 = vmax.xlane.f32.xlu0 %v15219_v41  ;;  %v11649_v33 = vpop.f32.mrb[100].mxu0 }
 0x4d7   : > { %v2673_v1 = vmul.f32 0.2, %v11649_v33  ;;  %v2620_v10 = vpop.f32.mrb[101].mxu0 }
 0x4d8   : > { %v2671_v15 = vmul.f32 0.2, %v2620_v10  ;;  %2701 = vmax.xlane.f32.xlu1 %v15224_v5  ;;  %v11650_v52 = vpop.f32.mrb[102].mxu0 }
 0x4d9   : > { %v2674_v6 = vmul.f32 0.2, %v11650_v52  ;;  %v2623_v9 = vpop.f32.mrb[103].mxu0  ;;  %v15229_v30 = vsel %vm15085_vm7, %v2673_v1, -1e+30 }
 0x4da   : > { %2711 = vmax.xlane.f32.xlu0 %v15229_v30  ;;  %v2672_v53 = vmul.f32 0.2, %v2623_v9  ;;  %v15239_v10 = vsel %vm15105_vm9, %v2671_v15, -1e+30 }
 0x4db   : > { %v15234_v33 = vsel %vm15077_vm6, %v2674_v6, -1e+30 }
 0x4dc   : > { %2713 = vmax.xlane.f32.xlu1 %v15234_v33  ;;  %v15244_v1 = vsel %vm15095_vm8, %v2672_v53, -1e+30 }
 0x4de   : > { %2707 = vmax.xlane.f32.xlu0 %v15239_v10  ;;  %v11653_v35 = vpop.f32.mrb[104].mxu0 }
 0x4df   : > { %v2677_v52 = vmul.f32 0.2, %v11653_v35  ;;  %v2636_v16 = vpop.f32.mrb[105].mxu0 }
 0x4e0   : > { %v2675_v9 = vmul.f32 0.2, %v2636_v16  ;;  %2709 = vmax.xlane.f32.xlu1 %v15244_v1  ;;  %v11654_v6 = vpop.f32.mrb[106].mxu0  ;;  %v15259_v16 = vpop.permute.xlu0 %2865 }
 0x4e1   : > { %v2678_v44 = vmul.f32 0.2, %v11654_v6  ;;  %v2639_v19 = vpop.f32.mrb[107].mxu0  ;;  %v15251_v15 = vsel %vm15129_vm11, %v2677_v52, -1e+30 }
 0x4e2   : > { %2719 = vmax.xlane.f32.xlu0 %v15251_v15  ;;  %v2676_v35 = vmul.f32 0.2, %v2639_v19  ;;  %v15263_v53 = vsel %vm15149_vm13, %v2675_v9, -1e+30 }
 0x4e3   : > { %v15256_v29 = vsel %vm15121_vm10, %v2678_v44, -1e+30 }
 0x4e4   : > { %2721 = vmax.xlane.f32.xlu1 %v15256_v29  ;;  %v15268_v19 = vsel %vm15139_vm12, %v2676_v35, -1e+30  ;;  %v15271_v55 = vpop.permute.xlu0 %2867 }
 0x4e6   : > { %2715 = vmax.xlane.f32.xlu0 %v15263_v53  ;;  %v11657_v6 = vpop.f32.mrb[108].mxu0 }
 0x4e7   : > { %v2681_v52 = vmul.f32 0.2, %v11657_v6  ;;  %v2652_v59 = vpop.f32.mrb[109].mxu0 }
 0x4e8   : > { %v2679_v32 = vmul.f32 0.2, %v2652_v59  ;;  %2717 = vmax.xlane.f32.xlu1 %v15268_v19  ;;  %v11658_v44 = vpop.f32.mrb[110].mxu0 }
 0x4e9   : > { %v2682_v20 = vmul.f32 0.2, %v11658_v44  ;;  %v2655_v38 = vpop.f32.mrb[111].mxu0  ;;  %v15275_v9 = vsel %vm15172_vm15, %v2681_v52, -1e+30 }
 0x4ea   : > { %2727 = vmax.xlane.f32.xlu0 %v15275_v9  ;;  %v2680_v6 = vmul.f32 0.2, %v2655_v38  ;;  %v15287_v44 = vsel %vm15193_vm1, %v2679_v32, -1e+30 }
 0x4eb   : > { %v15282_v35 = vsel %vm15165_vm14, %v2682_v20, -1e+30 }
 0x4ec   : > { %2729 = vmax.xlane.f32.xlu1 %v15282_v35  ;;  %v15295_v38 = vsel %vm15183_vm0, %v2680_v6, -1e+30  ;;  %vm18807_vm0 = vcmask 261120  }
 0x4ed   : > { %v2218_v59 = vpop.xlane.xlu0 %2217  ;;  %vm18809_vm14 = vmmov %vm18807_vm0 }
 0x4ee   : > { %v2247_v52 = vsub.f32 %v15040_v23, %v2218_v59  ;;  %2723 = vmax.xlane.f32.xlu0 %v15287_v44  ;;  %vm18810_vm1 = vmmov %vm18807_vm0 }
 0x4ef   : > { %vm18811_vm15 = vmmov %vm18807_vm0 }
 0x4f0   : > { %v2265_v60 = vmul.f32 1.442695, %v2247_v52  ;;  %2725 = vmax.xlane.f32.xlu1 %v15295_v38  ;;  %v2216_v24 = vpop.xlane.xlu1 %2215  ;;  %vm18812_vm13 = vmmov %vm18807_vm0 }
 0x4f1   : > { %v2214_v20 = vpop.xlane.xlu0 %2213  ;;  %v2246_v40 = vsub.f32 %v15057_v54, %v2216_v24  ;;  %vm18844_vm12 = vmmov %vm18807_vm0 }
 0x4f2   : > { %13027 = vpow2.f32 %v2265_v60  ;;  %v2245_v31 = vsub.f32 %v15063_v57, %v2214_v20  ;;  %vm18846_vm11 = vmmov %vm18807_vm0 }
 0x4f3   : > { %v2263_v7 = vmul.f32 1.442695, %v2246_v40 }
 0x4f4   : > { %v2261_v32 = vmul.f32 1.442695, %v2245_v31 }
 0x4f5   : > { %v2220_v27 = vpop.xlane.xlu0 %2219 }
 0x4f6   : > { %13029 = vpow2.f32 %v2261_v32  ;;  %v2248_v23 = vsub.f32 %v15074_v48, %v2220_v27 }
 0x4f7   : > { %v2228_v59 = vpop.xlane.xlu1 %2227 }
 0x4f8   : > { %v2267_v18 = vmul.f32 1.442695, %v2248_v23  ;;  %v2252_v6 = vsub.f32 %v15091_v12, %v2228_v59 }
 0x4f9   : > { %v2226_v52 = vpop.xlane.xlu0 %2225 }
 0x4fa   : > { %13031 = vpow2.f32 %v2267_v18  ;;  %v2251_v50 = vsub.f32 %v15102_v62, %v2226_v52  ;;  %v2275_v31 = vmul.f32 1.442695, %v2252_v6 }
 0x4fb   : > { %v2224_v60 = vpop.xlane.xlu1 %2223  ;;  %13033 = vpow2.f32 %v2263_v7 }
 0x4fc   : > { %v15303_v37 = vpop.eup %13027  ;;  %v2273_v57 = vmul.f32 1.442695, %v2251_v50  ;;  %v2250_v54 = vsub.f32 %v15113_v3, %v2224_v60 }
 0x4fd   : > { %v2222_v24 = vpop.xlane.xlu0 %2221  ;;  %2297 = vadd.xlane.f32.xlu0 %v15303_v37 }
 0x4fe   : > { %13035 = vpow2.f32 %v2273_v57  ;;  %v2249_v27 = vsub.f32 %v15118_v42, %v2222_v24  ;;  %v2271_v12 = vmul.f32 1.442695, %v2250_v54 }
 0x4ff   : > { %v2236_v40 = vpop.xlane.xlu1 %2235  ;;  %13037 = vpow2.f32 %v2275_v31 }
 0x500   : > { %v15308_v48 = vpop.eup %13029  ;;  %v2269_v18 = vmul.f32 1.442695, %v2249_v27  ;;  %v2256_v62 = vsub.f32 %v15135_v17, %v2236_v40 }
 0x501   : > { %v2234_v20 = vpop.xlane.xlu0 %2233  ;;  %2293 = vadd.xlane.f32.xlu0 %v15308_v48 }
 0x502   : > { %13039 = vpow2.f32 %v2269_v18  ;;  %v2255_v50 = vsub.f32 %v15146_v8, %v2234_v20  ;;  %v2283_v42 = vmul.f32 1.442695, %v2256_v62 }
 0x503   : > { %v2232_v3 = vpop.xlane.xlu1 %2231  ;;  %13041 = vpow2.f32 %v2271_v12 }
 0x504   : > { %v15313_v7 = vpop.eup %13031  ;;  %v2281_v32 = vmul.f32 1.442695, %v2255_v50  ;;  %v2254_v23 = vsub.f32 %v15157_v26, %v2232_v3 }
 0x505   : > { %v2230_v59 = vpop.xlane.xlu0 %2229  ;;  %2299 = vadd.xlane.f32.xlu1 %v15313_v7  ;;  %v15318_v6 = vpop.eup %13033 }
 0x506   : > { %13043 = vpow2.f32 %v2281_v32  ;;  %v2253_v17 = vsub.f32 %v15162_v4, %v2230_v59  ;;  %v2279_v57 = vmul.f32 1.442695, %v2254_v23 }
 0x507   : > { %v2244_v52 = vpop.xlane.xlu1 %2243  ;;  %13045 = vpow2.f32 %v2283_v42 }
 0x508   : > { %v15320_v60 = vpop.eup %13035  ;;  %v2277_v8 = vmul.f32 1.442695, %v2253_v17  ;;  %v2260_v31 = vsub.f32 %v15179_v34, %v2244_v52 }
 0x509   : > { %v2242_v54 = vpop.xlane.xlu0 %2241  ;;  %2305 = vadd.xlane.f32.xlu0 %v15320_v60  ;;  %2295 = vadd.xlane.f32.xlu1 %v15318_v6  ;;  %v15326_v24 = vpop.eup %13037 }
 0x50a   : > { %13047 = vpow2.f32 %v2277_v8  ;;  %v2259_v26 = vsub.f32 %v15189_v58, %v2242_v54  ;;  %v2291_v18 = vmul.f32 1.442695, %v2260_v31 }
 0x50b   : > { %v2240_v4 = vpop.xlane.xlu1 %2239  ;;  %13049 = vpow2.f32 %v2279_v57 }
 0x50c   : > { %v15328_v27 = vpop.eup %13039  ;;  %v2289_v40 = vmul.f32 1.442695, %v2259_v26  ;;  %v2258_v34 = vsub.f32 %v15199_v43, %v2240_v4 }
 0x50d   : > { %v2238_v12 = vpop.xlane.xlu0 %2237  ;;  %2301 = vadd.xlane.f32.xlu0 %v15328_v27  ;;  %2307 = vadd.xlane.f32.xlu1 %v15326_v24  ;;  %v15334_v20 = vpop.eup %13041 }
 0x50e   : > { %13051 = vpow2.f32 %v2289_v40  ;;  %v2257_v62 = vsub.f32 %v15204_v14, %v2238_v12  ;;  %v2287_v3 = vmul.f32 1.442695, %v2258_v34 }
 0x50f   : > { %13053 = vpow2.f32 %v2291_v18 }
 0x510   : > { %v15336_v58 = vpop.eup %13043  ;;  %v2285_v50 = vmul.f32 1.442695, %v2257_v62 }
 0x511   : > { %2313 = vadd.xlane.f32.xlu0 %v15336_v58  ;;  %2303 = vadd.xlane.f32.xlu1 %v15334_v20  ;;  %v15340_v32 = vpop.eup %13045 }
 0x512   : > { %13055 = vpow2.f32 %v2285_v50 }
 0x513   : > { %13057 = vpow2.f32 %v2287_v3 }
 0x514   : > { %v15342_v42 = vpop.eup %13047 }
 0x515   : > { %2309 = vadd.xlane.f32.xlu0 %v15342_v42  ;;  %2315 = vadd.xlane.f32.xlu1 %v15340_v32  ;;  %v15346_v43 = vpop.eup %13049 }
 0x518   : > { %v15348_v14 = vpop.eup %13051 }
 0x519   : > { %2321 = vadd.xlane.f32.xlu0 %v15348_v14  ;;  %2311 = vadd.xlane.f32.xlu1 %v15346_v43  ;;  %v15352_v23 = vpop.eup %13053 }
 0x51c   : > { %v15354_v59 = vpop.eup %13055 }
 0x51d   : > { %2317 = vadd.xlane.f32.xlu0 %v15354_v59  ;;  %2323 = vadd.xlane.f32.xlu1 %v15352_v23  ;;  %v15358_v17 = vpop.eup %13057 }
 0x521   : > { %2319 = vadd.xlane.f32.xlu1 %v15358_v17 }
 0x55f   : > { %v2704_v52 = vpop.xlane.xlu0 %2703 }
 0x560   : > { %v2733_v8 = vsub.f32 %v15209_v11, %v2704_v52 }
 0x561   : > { %v2706_v57 = vpop.xlane.xlu1 %2705 }
 0x562   : > { %v2751_v31 = vmul.f32 1.442695, %v2733_v8  ;;  %v2734_v54 = vsub.f32 %v15214_v56, %v2706_v57 }
 0x563   : > { %v2700_v26 = vpop.xlane.xlu0 %2699 }
 0x564   : > { %13059 = vpow2.f32 %v2751_v31  ;;  %v2731_v4 = vsub.f32 %v15219_v41, %v2700_v26  ;;  %v2753_v12 = vmul.f32 1.442695, %v2734_v54 }
 0x565   : > { %v2702_v40 = vpop.xlane.xlu1 %2701 }
 0x566   : > { %v2747_v18 = vmul.f32 1.442695, %v2731_v4  ;;  %v2732_v34 = vsub.f32 %v15224_v5, %v2702_v40 }
 0x567   : > { %v2712_v62 = vpop.xlane.xlu0 %2711 }
 0x568   : > { %13061 = vpow2.f32 %v2747_v18  ;;  %v2737_v50 = vsub.f32 %v15229_v30, %v2712_v62  ;;  %v2749_v52 = vmul.f32 1.442695, %v2732_v34 }
 0x569   : > { %v2714_v3 = vpop.xlane.xlu1 %2713  ;;  %13063 = vpow2.f32 %v2753_v12 }
 0x56a   : > { %v2759_v2 = vmul.f32 1.442695, %v2737_v50  ;;  %v2738_v11 = vsub.f32 %v15234_v33, %v2714_v3 }
 0x56b   : > { %v2708_v56 = vpop.xlane.xlu0 %2707 }
 0x56c   : > { %13065 = vpow2.f32 %v2759_v2  ;;  %v2761_v8 = vmul.f32 1.442695, %v2738_v11  ;;  %v2735_v41 = vsub.f32 %v15239_v10, %v2708_v56 }
 0x56d   : > { %v2710_v57 = vpop.xlane.xlu1 %2709  ;;  %13067 = vpow2.f32 %v2749_v52 }
 0x56e   : > { %v15368_v31 = vpop.eup %13059  ;;  %v2736_v5 = vsub.f32 %v15244_v1, %v2710_v57  ;;  %v2755_v54 = vmul.f32 1.442695, %v2735_v41  ;;  %13069 = vpow2.f32 %v2761_v8 }
 0x56f   : > { %18776 = vst [vmem:[#allocation79_spill] sm:$0xff] %v15368_v31  ;;  %2783 = vadd.xlane.f32.xlu1 %v15368_v31  ;;  %v2720_v10 = vpop.xlane.xlu0 %2719 }
 0x570   : > { %v2757_v30 = vmul.f32 1.442695, %v2736_v5  ;;  %13071 = vpow2.f32 %v2755_v54 }
 0x571   : > { %v2722_v40 = vpop.xlane.xlu1 %2721 }
 0x572   : > { %v15372_v26 = vpop.eup %13061  ;;  %13073 = vpow2.f32 %v2757_v30 }
 0x573   : > { %18777 = vst [vmem:[#allocation80_spill] sm:$0xff] %v15372_v26  ;;  %2779 = vadd.xlane.f32.xlu1 %v15372_v26  ;;  %v15375_v2 = vpop.eup %13063  ;;  %v2716_v18 = vpop.xlane.xlu0 %2715 }
 0x574   : > { %18778 = vst [vmem:[#allocation81_spill] sm:$0xff] %v15375_v2 }
 0x575   : > { %v2718_v62 = vpop.xlane.xlu1 %2717 }
 0x576   : > { %v15377_v33 = vpop.eup %13065 }
 0x577   : > { %18779 = vst [vmem:[#allocation82_spill] sm:$0xff] %v15377_v33  ;;  %2791 = vadd.xlane.f32.xlu0 %v15377_v33  ;;  %2785 = vadd.xlane.f32.xlu1 %v15375_v2  ;;  %v15381_v1 = vpop.eup %13067  ;;  %v15393_v50 = vpop.xlane.xlu0 %2727  ;;  %v2739_v33 = vsub.f32 %v15263_v53, %v2716_v18  ;;  %v2742_v53 = vsub.f32 %v15256_v29, %v2722_v40 }
 0x578   : > { %18780 = vst [vmem:[#allocation83_spill] sm:$0xff] %v15381_v1  ;;  %v15383_v4 = vpop.eup %13069 }
 0x579   : > { %18781 = vst [vmem:[#allocation84_spill] sm:$0xff] %v15383_v4  ;;  %v15395_v3 = vpop.xlane.xlu1 %2729 }
 0x57a   : > { %v15387_v12 = vpop.eup %13071 }
 0x57b   : > { %2793 = vadd.xlane.f32.xlu0 %v15383_v4  ;;  %2781 = vadd.xlane.f32.xlu1 %v15381_v1  ;;  %18782 = vst [vmem:[#allocation85_spill] sm:$0xff] %v15387_v12  ;;  %v15397_v11 = vpop.xlane.xlu0 %2723 }
 0x57c   : > { %v15389_v34 = vpop.eup %13073 }
 0x57d   : > { %18783 = vst [vmem:[#allocation86_spill] sm:$0xff] %v15389_v34  ;;  %v15399_v56 = vpop.xlane.xlu1 %2725 }
 0x57f   : > { %2789 = vadd.xlane.f32.xlu0 %v15389_v34  ;;  %2787 = vadd.xlane.f32.xlu1 %v15387_v12 }
 0x58a   : > { %v2298_v52 = vpop.xlane.xlu0 %2297 }
 0x58e   : > { %v2294_v8 = vpop.xlane.xlu0 %2293 }
 0x590   : > { %2873 = vrot.lane.b32.xlu1 %v15000_v21, %s13895_s14 }
 0x592   : > { %v2300_v41 = vpop.xlane.xlu1 %2299 }
 0x593   : > { %13075 = vrcp.f32 %v2300_v41  ;;  %v2763_v41 = vmul.f32 1.442695, %v2739_v33 }
 0x594   : > { %13077 = vrcp.f32 %v2294_v8  ;;  %v2740_v8 = vsub.f32 %v15268_v19, %v2718_v62 }
 0x595   : > { %2871 = vrot.lane.b32.xlu0 %v14992_v25, %s13895_s14  ;;  %13079 = vrcp.f32 %v2298_v52  ;;  %v2741_v52 = vsub.f32 %v15251_v15, %v2720_v10 }
 0x596   : > { %v2306_v57 = vpop.xlane.xlu0 %2305  ;;  %v2296_v5 = vpop.xlane.xlu1 %2295 }
 0x597   : > { %13081 = vrcp.f32 %v2296_v5  ;;  %v2767_v19 = vmul.f32 1.442695, %v2741_v52 }
 0x59a   : > { %v2302_v54 = vpop.xlane.xlu0 %2301  ;;  %v2308_v30 = vpop.xlane.xlu1 %2307 }
 0x59b   : > { %13083 = vrcp.f32 %v2308_v30 }
 0x59c   : > { %13085 = vrcp.f32 %v2302_v54 }
 0x59d   : > { %v13076_v34 = vpop.eup %13075  ;;  %13087 = vrcp.f32 %v2306_v57 }
 0x59e   : > { %v2314_v4 = vpop.xlane.xlu0 %2313  ;;  %v2304_v12 = vpop.xlane.xlu1 %2303  ;;  %v2344_v5 = vmul.f32 %v13076_v34, %v15313_v7  ;;  %v2769_v34 = vmul.f32 1.442695, %v2742_v53 }
 0x59f   : > { %v13078_v31 = vpop.eup %13077  ;;  %13089 = vrcp.f32 %v2304_v12  ;;  %v2765_v12 = vmul.f32 1.442695, %v2740_v8 }
 0x5a0   : > { %v13080_v1 = vpop.eup %13079  ;;  %v2341_v18 = vmul.f32 %v13078_v31, %v15308_v48  ;;  %13091 = vpow2.f32 %v2763_v41 }
 0x5a1   : > { %v13082_v26 = vpop.eup %13081  ;;  %v2343_v33 = vmul.f32 %v13080_v1, %v15303_v37  ;;  %v2743_v37 = vsub.f32 %v15287_v44, %v15397_v11 }
 0x5a2   : > { %v2310_v2 = vpop.xlane.xlu0 %2309  ;;  %v2316_v21 = vpop.xlane.xlu1 %2315  ;;  %v2342_v54 = vmul.f32 %v13082_v26, %v15318_v6  ;;  %v2744_v6 = vsub.f32 %v15295_v38, %v15399_v56 }
 0x5a3   : > { %13093 = vrcp.f32 %v2316_v21  ;;  %v2358_v10 = vpack.c.bf16 %v2344_v5, %v2343_v33  ;;  %v2771_v40 = vmul.f32 1.442695, %v2743_v37  ;;  %v18792_v37 = vld [vmem:[#allocation49_spill] sm:$0xff] }
 0x5a4   : > { %v2357_v57 = vpack.c.bf16 %v2342_v54, %v2341_v18  ;;  %13095 = vrcp.f32 %v2310_v2  ;;  %v2773_v56 = vmul.f32 1.442695, %v2744_v6  ;;  %v18794_v6 = vld [vmem:[#allocation53_spill] sm:$0xff] }
 0x5a5   : > { %v13084_v7 = vpop.eup %13083  ;;  %13097 = vrcp.f32 %v2314_v4 }
 0x5a6   : > { %v2322_v62 = vpop.xlane.xlu0 %2321  ;;  %v2312_v15 = vpop.xlane.xlu1 %2311  ;;  %11611 = vmatprep.mubr.bf16.mxu1 %v2357_v57  ;;  %v2348_v2 = vmul.f32 %v13084_v7, %v15326_v24  ;;  %v2746_v24 = vsub.f32 %v15282_v35, %v15395_v3  ;;  %v18788_v7 = vld [vmem:[#allocation33_spill] sm:$0xff] }
 0x5a7   : > { %v13086_v29 = vpop.eup %13085  ;;  %13099 = vrcp.f32 %v2312_v15  ;;  %11612 = vmatmul.mubr.bf16.vlgmr.msra.gmra.mrb[16].mxu1 %v2358_v10  ;;  %v18787_v10 = vld [vmem:[#allocation31_spill] sm:$0xff] }
 0x5a8   : > { %v13088_v48 = vpop.eup %13087  ;;  %13101 = vpow2.f32 %v2765_v12  ;;  %11660 = vmatpush3.bf16.msra.mxu1 %v15023_v0  ;;  %v2345_v1 = vmul.f32 %v13086_v29, %v15328_v27  ;;  %v2745_v0 = vsub.f32 %v15275_v9, %v15393_v50  ;;  %v2777_v41 = vmul.f32 1.442695, %v2746_v24  ;;  %v18790_v29 = vld [vmem:[#allocation37_spill] sm:$0xff] }
 0x5a9   : > { %v13090_v21 = vpop.eup %13089  ;;  %13103 = vpow2.f32 %v2767_v19  ;;  %11661 = vmatprep.subr.bf16.mxu1 %v15277_v63  ;;  %v2347_v44 = vmul.f32 %v13088_v48, %v15320_v60  ;;  %v18791_v48 = vld [vmem:[#allocation47_spill] sm:$0xff] }
 0x5aa   : > { %v2318_v31 = vpop.xlane.xlu0 %2317  ;;  %v2324_v26 = vpop.xlane.xlu1 %2323  ;;  %13105 = vpow2.f32 %v2769_v34  ;;  %v2346_v4 = vmul.f32 %v13090_v21, %v15334_v20  ;;  %v2775_v30 = vmul.f32 1.442695, %v2745_v0  ;;  %v18789_v34 = vld [vmem:[#allocation35_spill] sm:$0xff] }
 0x5ab   : > { %13107 = vrcp.f32 %v2318_v31  ;;  %v15426_v11 = vpop.eup %13091  ;;  %v2360_v20 = vpack.c.bf16 %v2348_v2, %v2347_v44  ;;  %v18793_v21 = vld [vmem:[#allocation51_spill] sm:$0xff]  ;;  %v18796_v2 = vld [vmem:[#allocation57_spill] sm:$0xff] }
 0x5ac   : > { %13109 = vrcp.f32 %v2324_v26  ;;  %11662 = vmatpush3.bf16.msra.mxu1 %v15277_v63  ;;  %v2359_v38 = vpack.c.bf16 %v2346_v4, %v2345_v1  ;;  %v18795_v31 = vld [vmem:[#allocation55_spill] sm:$0xff]  ;;  %v18797_v4 = vld [vmem:[#allocation61_spill] sm:$0xff] }
 0x5ad   : > { %13111 = vrcp.f32 %v2322_v62  ;;  %11663 = vmatprep.subr.bf16.mxu1 %v15247_v39  ;;  %v13094_v60 = vpop.eup %13093 }
 0x5ae   : > { %v2320_v27 = vpop.xlane.xlu1 %2319  ;;  %11615 = vmatprep.mubr.bf16.mxu1 %v2359_v38  ;;  %v13096_v9 = vpop.eup %13095  ;;  %v2352_v35 = vmul.f32 %v13094_v60, %v15340_v32 }
 0x5af   : > { %13113 = vrcp.f32 %v2320_v27  ;;  %11616 = vmatmul.mubr.bf16.gmra.mrb[20].mxu1 %v2360_v20  ;;  %v13098_v50 = vpop.eup %13097  ;;  %v2349_v8 = vmul.f32 %v13096_v9, %v15342_v42 }
 0x5b0   : > { %13115 = vpow2.f32 %v2771_v40  ;;  %11664 = vmatpush3.bf16.msra.mxu1 %v15247_v39  ;;  %v2351_v39 = vmul.f32 %v13098_v50, %v15336_v58  ;;  %v18798_v50 = vld [vmem:[#allocation81_spill] sm:$0xff] }
 0x5b1   : > { %v13100_v63 = vpop.eup %13099  ;;  %13117 = vpow2.f32 %v2773_v56  ;;  %11665 = vmatprep.subr.bf16.mxu1 %v15259_v16 }
 0x5b2   : > { %v15434_v3 = vpop.eup %13101  ;;  %v2350_v52 = vmul.f32 %v13100_v63, %v15346_v43  ;;  %13119 = vpow2.f32 %v2775_v30  ;;  %v2362_v42 = vpack.c.bf16 %v2352_v35, %v2351_v39  ;;  %v18799_v63 = vld [vmem:[#allocation80_spill] sm:$0xff]  ;;  %v18800_v35 = vld [vmem:[#allocation83_spill] sm:$0xff] }
 0x5b3   : > { %v15438_v5 = vpop.eup %13103  ;;  %13121 = vpow2.f32 %v2777_v41 }
 0x5b4   : > { %2797 = vadd.xlane.f32.xlu0 %v15434_v3  ;;  %2795 = vadd.xlane.f32.xlu1 %v15426_v11  ;;  %v15443_v53 = vpop.eup %13105  ;;  %v2361_v32 = vpack.c.bf16 %v2350_v52, %v2349_v8  ;;  %v18801_v52 = vld [vmem:[#allocation79_spill] sm:$0xff] }
 0x5b5   : > { %11666 = vmatpush3.bf16.msra.mxu1 %v15259_v16  ;;  %v13108_v18 = vpop.eup %13107 }
 0x5b6   : > { %11667 = vmatprep.subr.bf16.mxu1 %v15271_v55  ;;  %v13110_v43 = vpop.eup %13109  ;;  %11619 = vmatprep.mubr.bf16.mxu1 %v2361_v32  ;;  %v2353_v16 = vmul.f32 %v13108_v18, %v15354_v59  ;;  %v12755_v32 = vld [vmem:[#allocation10 + $0x20] ss:$8 sps:$4 sm:$0xff]   ;;  %v12757_v18 = vld [vmem:[#allocation10 + $0x24] ss:$8 sps:$4 sm:$0xff]  }
 0x5b7   : > { %v13112_v54 = vpop.eup %13111  ;;  %11620 = vmatmul.mubr.bf16.gmra.mrb[24].mxu1 %v2362_v42  ;;  %v2356_v12 = vmul.f32 %v13110_v43, %v15352_v23  ;;  %v18786_v23 = vld [vmem:[#allocation29_spill] sm:$0xff]  ;;  %3036 = vmatprep.subr.bf16.mxu0 %v12757_v18 }
 0x5b8   : > { %2799 = vadd.xlane.f32.xlu0 %v15438_v5  ;;  %2801 = vadd.xlane.f32.xlu1 %v15443_v53  ;;  %v2355_v15 = vmul.f32 %v13112_v54, %v15348_v14  ;;  %v18785_v14 = vld [vmem:[#allocation27_spill] sm:$0xff] }
 0x5b9   : > { %v13114_v33 = vpop.eup %13113  ;;  %11668 = vmatpush3.bf16.msra.mxu1 %v15271_v55  ;;  %3037 = vmatpush1.bf16.msra.mxu0 %v12755_v32 }
 0x5ba   : > { %11669 = vmatprep.subr.bf16.mxu1 %v15289_v47  ;;  %v2354_v58 = vmul.f32 %v13114_v33, %v15358_v17  ;;  %v15454_v57 = vpop.eup %13115  ;;  %v2364_v55 = vpack.c.bf16 %v2356_v12, %v2355_v15 }
 0x5bb   : > { %v15456_v19 = vpop.eup %13117 }
 0x5bc   : > { %2803 = vadd.xlane.f32.xlu0 %v15454_v57  ;;  %v2363_v62 = vpack.c.bf16 %v2354_v58, %v2353_v16  ;;  %2805 = vadd.xlane.f32.xlu1 %v15456_v19  ;;  %v15462_v59 = vpop.eup %13119  ;;  %v18802_v16 = vld [vmem:[#allocation86_spill] sm:$0xff] }
 0x5bd   : > { %11670 = vmatpush3.bf16.msra.mxu1 %v15289_v47  ;;  %v15464_v17 = vpop.eup %13121  ;;  %v18784_v47 = vld [vmem:[#allocation25_spill] sm:$0xff] }
 0x5be   : > { %11623 = vmatprep.mubr.bf16.mxu1 %v2363_v62  ;;  %v18803_v62 = vld [vmem:[#allocation85_spill] sm:$0xff] }
 0x5bf   : > { %11624 = vmatmul.mubr.bf16.gmra.mrb[28].mxu1 %v2364_v55 }
 0x5c0   : > { %2807 = vadd.xlane.f32.xlu0 %v15462_v59  ;;  %2809 = vadd.xlane.f32.xlu1 %v15464_v17 }
 0x5d1   : > { %3324 = vrot.lane.b32.xlu1 %v14844_v51, %s13896_s23 }
 0x5d5   : > { %3326 = vrot.lane.b32.xlu1 %v14854_v28, %s13896_s23 }
 0x5d6   : > { %3322 = vrot.lane.b32.xlu0 %v14834_v13, %s13896_s23 }
 0x5d9   : > { %3328 = vrot.lane.b32.xlu1 %v14864_v36, %s13896_s23 }
 0x5da   : > { %3330 = vrot.lane.b32.xlu0 %v14874_v61, %s13896_s23 }
 0x5dd   : > { %3332 = vrot.lane.b32.xlu1 %v14884_v22, %s13896_s23 }
 0x5de   : > { %3334 = vrot.lane.b32.xlu0 %v14894_v46, %s13896_s23 }
 0x5e1   : > { %3336 = vrot.lane.b32.xlu1 %v14906_v49, %s13896_s23 }
 0x5e2   : > { %3306 = vrot.lane.b32.xlu0 %v14800_v45, %s13896_s23 }
 0x5e5   : > { %3308 = vrot.lane.b32.xlu1 %v18784_v47, %s13896_s23 }
 0x5e6   : > { %3310 = vrot.lane.b32.xlu0 %v18785_v14, %s13896_s23 }
 0x5e9   : > { %3312 = vrot.lane.b32.xlu1 %v18786_v23, %s13896_s23 }
 0x5ea   : > { %3314 = vrot.lane.b32.xlu0 %v18787_v10, %s13896_s23 }
 0x5ed   : > { %3316 = vrot.lane.b32.xlu1 %v18788_v7, %s13896_s23 }
 0x5ee   : > { %3318 = vrot.lane.b32.xlu0 %v18789_v34, %s13896_s23 }
 0x5f1   : > { %3320 = vrot.lane.b32.xlu1 %v18790_v29, %s13896_s23 }
 0x5f2   : > { %3667 = vrot.lane.b32.xlu0 %v18791_v48, %s13896_s23 }
 0x5f5   : > { %3669 = vrot.lane.b32.xlu1 %v18792_v37, %s13896_s23 }
 0x5f6   : > { %3671 = vrot.lane.b32.xlu0 %v18793_v21, %s13896_s23 }
 0x5f9   : > { %3673 = vrot.lane.b32.xlu1 %v18794_v6, %s13896_s23 }
 0x5fa   : > { %3675 = vrot.lane.b32.xlu0 %v18795_v31, %s13896_s23  ;;  %v18808_v31 = vmov 0  }
 0x5fc   : > { %v2784_v26 = vpop.xlane.xlu1 %2783 }
 0x5fd   : > { %3677 = vrot.lane.b32.xlu1 %v18796_v2, %s13896_s23 }
 0x5fe   : > { %3679 = vrot.lane.b32.xlu0 %v14992_v25, %s13896_s23  ;;  %v12766_v25 = vld [vmem:[#allocation10 + $0x14] ss:$8 sps:$4 sm:$0xff]  }
 0x600   : > { %v2780_v1 = vpop.xlane.xlu1 %2779 }
 0x601   : > { %3681 = vrot.lane.b32.xlu1 %v18797_v4, %s13896_s23  ;;  %v12764_v4 = vld [vmem:[#allocation10 + $0x10] ss:$8 sps:$4 sm:$0xff]  }
 0x602   : > { %4005 = vrot.lane.b32.xlu0 %v14834_v13, %s13897_s11 }
 0x604   : > { %v2792_v44 = vpop.xlane.xlu0 %2791  ;;  %v2786_v0 = vpop.xlane.xlu1 %2785 }
 0x605   : > { %4007 = vrot.lane.b32.xlu1 %v14844_v51, %s13897_s11  ;;  %13123 = vrcp.f32 %v2786_v0  ;;  %v18805_v0 = vld [vmem:[#allocation82_spill] sm:$0xff] }
 0x606   : > { %13125 = vrcp.f32 %v2780_v1  ;;  %v18804_v1 = vld [vmem:[#allocation84_spill] sm:$0xff] }
 0x607   : > { %13127 = vrcp.f32 %v2784_v26 }
 0x608   : > { %v2794_v40 = vpop.xlane.xlu0 %2793  ;;  %v2782_v38 = vpop.xlane.xlu1 %2781 }
 0x609   : > { %13129 = vrcp.f32 %v2782_v38 }
 0x60c   : > { %v2790_v24 = vpop.xlane.xlu0 %2789  ;;  %v2788_v56 = vpop.xlane.xlu1 %2787 }
 0x60d   : > { %13131 = vrcp.f32 %v2790_v24 }
 0x60e   : > { %13133 = vrcp.f32 %v2788_v56 }
 0x60f   : > { %13135 = vrcp.f32 %v2794_v40  ;;  %v13124_v20 = vpop.eup %13123 }
 0x610   : > { %v2872_v27 = vpop.permute.xlu0 %2871  ;;  %13137 = vrcp.f32 %v2792_v44  ;;  %v13126_v13 = vpop.eup %13125  ;;  %v2830_v30 = vmul.f32 %v13124_v20, %v18798_v50 }
 0x611   : > { %11671 = vmatprep.subr.bf16.mxu1 %v2872_v27  ;;  %v2874_v60 = vpop.permute.xlu1 %2873  ;;  %v13128_v9 = vpop.eup %13127  ;;  %v2827_v41 = vmul.f32 %v13126_v13, %v18799_v63 }
 0x612   : > { %11672 = vmatpush3.bf16.msra.mxu1 %v2872_v27  ;;  %v2829_v39 = vmul.f32 %v13128_v9, %v18801_v52 }
 0x613   : > { %11673 = vmatprep.subr.bf16.mxu1 %v2874_v60  ;;  %v13130_v51 = vpop.eup %13129 }
 0x614   : > { %v2828_v8 = vmul.f32 %v13130_v51, %v18800_v35  ;;  %v2844_v33 = vpack.c.bf16 %v2830_v30, %v2829_v39 }
 0x616   : > { %11674 = vmatpush3.bf16.msra.mxu1 %v2874_v60  ;;  %v2843_v43 = vpack.c.bf16 %v2828_v8, %v2827_v41 }
 0x617   : > { %v13132_v42 = vpop.eup %13131 }
 0x618   : > { %v13134_v54 = vpop.eup %13133  ;;  %v2832_v58 = vmul.f32 %v13132_v42, %v18802_v16  ;;  %11675 = vmatprep.mubr.bf16.mxu1 %v2843_v43 }
 0x619   : > { %v13136_v12 = vpop.eup %13135  ;;  %v2831_v15 = vmul.f32 %v13134_v54, %v18803_v62  ;;  %11676 = vmatmul.mubr.bf16.vlgmr.msra.gmra.mrb[32].mxu1 %v2844_v33 }
 0x61a   : > { %v13138_v55 = vpop.eup %13137  ;;  %v2834_v44 = vmul.f32 %v13136_v12, %v18804_v1 }
 0x61b   : > { %v2845_v26 = vpack.c.bf16 %v2832_v58, %v2831_v15  ;;  %v2833_v40 = vmul.f32 %v13138_v55, %v18805_v0 }
 0x61d   : > { %11679 = vmatprep.mubr.bf16.mxu1 %v2845_v26  ;;  %v2846_v38 = vpack.c.bf16 %v2834_v44, %v2833_v40 }
 0x621   : > { %11680 = vmatmul.mubr.bf16.gmra.mrb[36].mxu1 %v2846_v38 }
 0x641   : > { %v2798_v24 = vpop.xlane.xlu0 %2797  ;;  %v2796_v56 = vpop.xlane.xlu1 %2795 }
 0x642   : > { %13139 = vrcp.f32 %v2798_v24 }
 0x643   : > { %13141 = vrcp.f32 %v2796_v56 }
 0x645   : > { %v2800_v27 = vpop.xlane.xlu0 %2799  ;;  %v2802_v20 = vpop.xlane.xlu1 %2801 }
 0x646   : > { %13143 = vrcp.f32 %v2800_v27  ;;  %v12758_v27 = vld [vmem:[#allocation10 + $0x30] ss:$8 sps:$4 sm:$0xff]  }
 0x647   : > { %13145 = vrcp.f32 %v2802_v20  ;;  %v12760_v20 = vld [vmem:[#allocation10 + $0x34] ss:$8 sps:$4 sm:$0xff]  }
 0x648   : > { %3038 = vmatprep.subr.bf16.mxu0 %v12760_v20 }
 0x649   : > { %v2804_v13 = vpop.xlane.xlu0 %2803  ;;  %v2806_v60 = vpop.xlane.xlu1 %2805  ;;  %3039 = vmatpush1.bf16.msra.mxu0 %v12758_v27 }
 0x64a   : > { %13147 = vrcp.f32 %v2804_v13  ;;  %v12763_v13 = vld [vmem:[#allocation10 + $0x4] ss:$8 sps:$4 sm:$0xff]  }
 0x64b   : > { %13149 = vrcp.f32 %v2806_v60  ;;  %3193 = vmatprep.subr.bf16.mxu0 %v12763_v13 }
 0x64c   : > { %v13140_v9 = vpop.eup %13139 }
 0x64d   : > { %v13142_v51 = vpop.eup %13141  ;;  %v2808_v50 = vpop.xlane.xlu0 %2807  ;;  %v2836_v30 = vmul.f32 %v13140_v9, %v15434_v3  ;;  %v18555_v9 = vmov 0  }
 0x64e   : > { %13151 = vrcp.f32 %v2808_v50  ;;  %v2810_v63 = vpop.xlane.xlu1 %2809  ;;  %v2835_v41 = vmul.f32 %v13142_v51, %v15426_v11  ;;  %3068 = vmatprep.mubr.bf16.mxu0 %v18555_v9 }
 0x64f   : > { %13153 = vrcp.f32 %v2810_v63 }
 0x650   : > { %v13144_v35 = vpop.eup %13143  ;;  %v2847_v8 = vpack.c.bf16 %v2836_v30, %v2835_v41 }
 0x651   : > { %v13146_v52 = vpop.eup %13145  ;;  %v15530_v39 = vpop.permute.xlu0 %3322  ;;  %v2837_v32 = vmul.f32 %v13144_v35, %v15438_v5 }
 0x652   : > { %11683 = vmatprep.mubr.bf16.mxu1 %v2847_v8  ;;  %v15533_v18 = vpop.permute.xlu1 %3324  ;;  %v2838_v42 = vmul.f32 %v13146_v52, %v15443_v53 }
 0x654   : > { %v13148_v43 = vpop.eup %13147  ;;  %v2848_v54 = vpack.c.bf16 %v2838_v42, %v2837_v32  ;;  %v12761_v32 = vld [vmem:[#allocation10] ss:$8 sps:$4 sm:$0xff]  }
 0x655   : > { %v13150_v3 = vpop.eup %13149  ;;  %v15536_v33 = vpop.permute.xlu0 %3330  ;;  %v2839_v11 = vmul.f32 %v13148_v43, %v15454_v57 }
 0x656   : > { %11684 = vmatmul.mubr.bf16.gmra.mrb[40].mxu1 %v2848_v54  ;;  %v15539_v16 = vpop.permute.xlu1 %3326  ;;  %v2840_v58 = vmul.f32 %v13150_v3, %v15456_v19 }
 0x658   : > { %v13152_v12 = vpop.eup %13151  ;;  %v2849_v62 = vpack.c.bf16 %v2840_v58, %v2839_v11 }
 0x659   : > { %v13154_v5 = vpop.eup %13153  ;;  %v15542_v15 = vpop.permute.xlu0 %3334  ;;  %v2841_v55 = vmul.f32 %v13152_v12, %v15462_v59 }
 0x65a   : > { %11687 = vmatprep.mubr.bf16.mxu1 %v2849_v62  ;;  %v15545_v53 = vpop.permute.xlu1 %3328  ;;  %v2842_v26 = vmul.f32 %v13154_v5, %v15464_v17 }
 0x65c   : > { %v2850_v1 = vpack.c.bf16 %v2842_v26, %v2841_v55 }
 0x65d   : > { %v15548_v44 = vpop.permute.xlu0 %3306 }
 0x65e   : > { %11688 = vmatmul.mubr.bf16.gmra.mrb[44].mxu1 %v2850_v1  ;;  %v15550_v57 = vpop.permute.xlu1 %3332 }
 0x661   : > { %v15552_v0 = vpop.permute.xlu0 %3310 }
 0x662   : > { %v15554_v19 = vpop.permute.xlu1 %3336 }
 0x665   : > { %v15556_v40 = vpop.permute.xlu0 %3314 }
 0x666   : > { %v15558_v38 = vpop.permute.xlu1 %3308 }
 0x669   : > { %v15560_v59 = vpop.permute.xlu0 %3318 }
 0x66a   : > { %v15562_v24 = vpop.permute.xlu1 %3312 }
 0x66d   : > { %v3668_v56 = vpop.permute.xlu0 %3667 }
 0x66e   : > { %v15564_v17 = vpop.permute.xlu1 %3316  ;;  %11723 = vmatprep.subr.bf16.mxu1 %v3668_v56 }
 0x66f   : > { %11724 = vmatpush3.bf16.msra.mxu1 %v3668_v56 }
 0x671   : > { %v3672_v50 = vpop.permute.xlu0 %3671 }
 0x672   : > { %v15566_v60 = vpop.permute.xlu1 %3320 }
 0x675   : > { %v3676_v42 = vpop.permute.xlu0 %3675 }
 0x676   : > { %v3670_v51 = vpop.permute.xlu1 %3669 }
 0x677   : > { %11725 = vmatprep.subr.bf16.mxu1 %v3670_v51 }
 0x678   : > { %11726 = vmatpush3.bf16.msra.mxu1 %v3670_v51 }
 0x679   : > { %11727 = vmatprep.subr.bf16.mxu1 %v3672_v50  ;;  %v3680_v5 = vpop.permute.xlu0 %3679 }
 0x67a   : > { %v15569_v30 = vpop.f32.mrb[16].mxu1  ;;  %v3674_v63 = vpop.permute.xlu1 %3673 }
 0x67b   : > { %v15571_v41 = vpop.f32.mrb[17].mxu1 }
 0x67c   : > { %11728 = vmatpush3.bf16.msra.mxu1 %v3672_v50  ;;  %v15573_v35 = vpop.f32.mrb[18].mxu1 }
 0x67d   : > { %11729 = vmatprep.subr.bf16.mxu1 %v3674_v63  ;;  %v15575_v8 = vpop.f32.mrb[19].mxu1  ;;  %v15605_v51 = vpop.permute.xlu0 %4005 }
 0x67e   : > { %v3678_v54 = vpop.permute.xlu1 %3677  ;;  %18806 = vst [vmem:[#allocation25_spill] sm:$0xff] %v15605_v51 }
 0x680   : > { %11730 = vmatpush3.bf16.msra.mxu1 %v3674_v63 }
 0x681   : > { %11731 = vmatprep.subr.bf16.mxu1 %v3676_v42 }
 0x682   : > { %v15581_v43 = vpop.f32.mrb[20].mxu1  ;;  %v3682_v26 = vpop.permute.xlu1 %3681 }
 0x683   : > { %v15583_v3 = vpop.f32.mrb[21].mxu1 }
 0x684   : > { %11732 = vmatpush3.bf16.msra.mxu1 %v3676_v42  ;;  %v15585_v11 = vpop.f32.mrb[22].mxu1 }
 0x685   : > { %11733 = vmatprep.subr.bf16.mxu1 %v3678_v54  ;;  %v15587_v58 = vpop.f32.mrb[23].mxu1 }
 0x688   : > { %11734 = vmatpush3.bf16.msra.mxu1 %v3678_v54 }
 0x689   : > { %11735 = vmatprep.subr.bf16.mxu1 %v3680_v5 }
 0x68a   : > { %v15593_v55 = vpop.f32.mrb[24].mxu1 }
 0x68b   : > { %v15595_v1 = vpop.f32.mrb[25].mxu1 }
 0x68c   : > { %11736 = vmatpush3.bf16.msra.mxu1 %v3680_v5  ;;  %v15597_v56 = vpop.f32.mrb[26].mxu1 }
 0x68d   : > { %11737 = vmatprep.subr.bf16.mxu1 %v3682_v26  ;;  %v15599_v27 = vpop.f32.mrb[27].mxu1 }
 0x690   : > { %11738 = vmatpush3.bf16.msra.mxu1 %v3682_v26 }
 0x691   : > { %12451 = vmatprep.subr.msk.bf16.mxu1 %vm18807_vm0, %v15605_v51 }
 0x692   : > { %v15609_v50 = vpop.f32.mrb[28].mxu1 }
 0x693   : > { %v15611_v63 = vpop.f32.mrb[29].mxu1 }
 0x694   : > { %v15613_v42 = vpop.f32.mrb[30].mxu1 }
 0x695   : > { %v15615_v54 = vpop.f32.mrb[31].mxu1 }
 0x6ec   : > { %v11677_v13 = vpop.f32.mrb[32].mxu1 }
 0x6ed   : > { %v2917_v12 = vpop.f32.mrb[33].mxu1 }
 0x6ee   : > { %v11678_v26 = vpop.f32.mrb[34].mxu1 }
 0x6ef   : > { %v2981_v62 = vpack.c.bf16 %v11678_v26, %v11677_v13  ;;  %v2920_v52 = vpop.f32.mrb[35].mxu1  ;;  %v18819_v26 = vpack.c.bf16 %v15573_v35, %v15569_v30 }
 0x6f0   : > { %v2980_v9 = vpack.c.bf16 %v2920_v52, %v2917_v12 }
 0x6f2   : > { %10904 = vmatmul.mubr.msk.bf16.vlgmr.msra.gmra.mrb[112].mxu0 %vm18807_vm0, %v2980_v9 }
 0x6f3   : > { %3194 = vmatpush1.bf16.msra.mxu0 %v12761_v32  ;;  %3078 = vmatprep.mubr.bf16.mxu0 %v18808_v31 }
 0x6f4   : > { %v11681_v2 = vpop.f32.mrb[36].mxu1  ;;  %3195 = vmatprep.subr.bf16.mxu0 %v12766_v25 }
 0x6f5   : > { %v2933_v5 = vpop.f32.mrb[37].mxu1 }
 0x6f6   : > { %v11682_v51 = vpop.f32.mrb[38].mxu1 }
 0x6f7   : > { %v2983_v6 = vpack.c.bf16 %v11682_v51, %v11681_v2  ;;  %3196 = vmatpush1.bf16.msra.mxu0 %v12764_v4  ;;  %v2936_v20 = vpop.f32.mrb[39].mxu1 }
 0x6f8   : > { %v2982_v21 = vpack.c.bf16 %v2936_v20, %v2933_v5  ;;  %12443 = vmatprep.subr.msk.bf16.mxu0 %vm18809_vm14, %v15530_v39  ;;  %vm18814_vm14 = vmmov %vm18807_vm0  ;;  %v3363_v5 = vsel %vm18807_vm0, %v15530_v39, 0  ;;  %v18823_v39 = vpack.c.bf16 %v15587_v58, %v15583_v3 }
 0x6fa   : > { %10905 = vmatmul.mubr.msk.bf16.gmra.mrb[116].mxu0 %vm18810_vm1, %v2981_v62  ;;  %vm18813_vm1 = vmmov %vm18807_vm0 }
 0x6fb   : > { %3088 = vmatprep.mubr.bf16.mxu0 %v18808_v31 }
 0x702   : > { %10906 = vmatmul.mubr.msk.bf16.gmra.mrb[120].mxu0 %vm18807_vm0, %v2982_v21 }
 0x703   : > { %3098 = vmatprep.mubr.bf16.mxu0 %v18808_v31 }
 0x70a   : > { %10907 = vmatmul.mubr.msk.bf16.gmra.mrb[124].mxu0 %vm18811_vm15, %v2983_v6  ;;  %vm18815_vm15 = vmmov %vm18807_vm0  ;;  %v18816_v6 = vpack.c.bf16 %v15575_v8, %v15571_v41  ;;  %v3378_v8 = vsel %vm18807_vm0, %v15550_v57, 0 }
 0x70b   : > { %3108 = vmatprep.mubr.bf16.mxu0 %v18808_v31 }
 0x729   : > { %v11685_v25 = vpop.f32.mrb[40].mxu1 }
 0x72a   : > { %v2949_v2 = vpop.f32.mrb[41].mxu1 }
 0x72b   : > { %v11686_v4 = vpop.f32.mrb[42].mxu1 }
 0x72c   : > { %v2985_v9 = vpack.c.bf16 %v11686_v4, %v11685_v25  ;;  %v2952_v52 = vpop.f32.mrb[43].mxu1 }
 0x72d   : > { %v2984_v32 = vpack.c.bf16 %v2952_v52, %v2949_v2 }
 0x72f   : > { %10908 = vmatmul.mubr.msk.bf16.gmra.mrb[128].mxu0 %vm18812_vm13, %v2984_v32  ;;  %vm18817_vm13 = vmmov %vm18807_vm0 }
 0x730   : > { %3118 = vmatprep.mubr.bf16.mxu0 %v18808_v31 }
 0x731   : > { %v11689_v12 = vpop.f32.mrb[44].mxu1 }
 0x732   : > { %v2965_v62 = vpop.f32.mrb[45].mxu1 }
 0x733   : > { %v11690_v20 = vpop.f32.mrb[46].mxu1 }
 0x734   : > { %v2987_v21 = vpack.c.bf16 %v11690_v20, %v11689_v12  ;;  %v2968_v13 = vpop.f32.mrb[47].mxu1 }
 0x735   : > { %v2986_v51 = vpack.c.bf16 %v2968_v13, %v2965_v62 }
 0x737   : > { %10909 = vmatmul.mubr.msk.bf16.gmra.mrb[132].mxu0 %vm18813_vm1, %v2985_v9  ;;  %vm18818_vm1 = vmmov %vm18807_vm0 }
 0x738   : > { %3128 = vmatprep.mubr.bf16.mxu0 %v18808_v31 }
 0x73f   : > { %10910 = vmatmul.mubr.msk.bf16.gmra.mrb[136].mxu0 %vm18814_vm14, %v2986_v51  ;;  %vm18820_vm14 = vmmov %vm18807_vm0 }
 0x740   : > { %3138 = vmatprep.mubr.bf16.mxu0 %v18808_v31 }
 0x747   : > { %10911 = vmatmul.mubr.msk.bf16.gmra.mrb[140].mxu0 %vm18815_vm15, %v2987_v21  ;;  %vm18821_vm15 = vmmov %vm18807_vm0 }
 0x748   : > { %3225 = vmatprep.mubr.bf16.mxu0 %v18808_v31  ;;  %v3366_v25 = vsel %vm18821_vm15, %v15533_v18, 0  ;;  %vm18827_vm15 = vmmov %vm18807_vm0 }
 0x74f   : > { %10916 = vmatmul.mubr.msk.bf16.vlgmr.msra.gmra.mrb[112].mxu0 %vm18817_vm13, %v18816_v6  ;;  %vm18822_vm13 = vmmov %vm18807_vm0 }
 0x750   : > { %11692 = vmatpush3.bf16.xpose.msra.mxu0 %v3363_v5  ;;  %3235 = vmatprep.mubr.bf16.mxu0 %v18808_v31 }
 0x751   : > { %12444 = vmatprep.subr.msk.bf16.mxu0 %vm18818_vm1, %v15533_v18  ;;  %vm18824_vm1 = vmmov %vm18807_vm0  ;;  %v18826_v18 = vpack.c.bf16 %v15585_v11, %v15581_v43 }
 0x752   : > { %v3369_v41 = vsel %vm18824_vm1, %v15539_v16, 0  ;;  %vm18830_vm1 = vmmov %vm18807_vm0 }
 0x757   : > { %10917 = vmatmul.mubr.msk.bf16.gmra.mrb[116].mxu0 %vm18820_vm14, %v18819_v26  ;;  %vm18825_vm14 = vmmov %vm18807_vm0 }
 0x758   : > { %11694 = vmatpush3.bf16.xpose.msra.mxu0 %v3366_v25  ;;  %3245 = vmatprep.mubr.bf16.mxu0 %v18808_v31 }
 0x759   : > { %12445 = vmatprep.subr.msk.bf16.mxu0 %vm18822_vm13, %v15539_v16  ;;  %vm18828_vm13 = vmmov %vm18807_vm0  ;;  %v18829_v16 = vpack.c.bf16 %v15599_v27, %v15595_v1 }
 0x75a   : > { %v3372_v30 = vsel %vm18828_vm13, %v15545_v53, 0  ;;  %vm18834_vm13 = vmmov %vm18807_vm0 }
 0x75f   : > { %10918 = vmatmul.mubr.msk.bf16.gmra.mrb[120].mxu0 %vm18807_vm0, %v18823_v39 }
 0x760   : > { %11696 = vmatpush3.bf16.xpose.msra.mxu0 %v3369_v41  ;;  %3255 = vmatprep.mubr.bf16.mxu0 %v18808_v31 }
 0x761   : > { %12446 = vmatprep.subr.msk.bf16.mxu0 %vm18825_vm14, %v15545_v53  ;;  %vm18831_vm14 = vmmov %vm18807_vm0  ;;  %v18833_v53 = vpack.c.bf16 %v15597_v56, %v15593_v55 }
 0x762   : > { %v3375_v35 = vsel %vm18831_vm14, %v15536_v33, 0  ;;  %vm18837_vm14 = vmmov %vm18807_vm0 }
 0x767   : > { %10919 = vmatmul.mubr.msk.bf16.gmra.mrb[124].mxu0 %vm18827_vm15, %v18826_v18  ;;  %vm18832_vm15 = vmmov %vm18807_vm0 }
 0x768   : > { %11698 = vmatpush3.bf16.xpose.msra.mxu0 %v3372_v30  ;;  %3265 = vmatprep.mubr.bf16.mxu0 %v18808_v31 }
 0x769   : > { %12447 = vmatprep.subr.msk.bf16.mxu0 %vm18807_vm0, %v15536_v33  ;;  %v18836_v33 = vpack.c.bf16 %v15615_v54, %v15611_v63 }
 0x76f   : > { %10920 = vmatmul.mubr.msk.bf16.gmra.mrb[128].mxu0 %vm18830_vm1, %v18829_v16  ;;  %vm18835_vm1 = vmmov %vm18807_vm0  ;;  %v18857_v16 = vld [vmem:[#allocation71_spill] sm:$0xff] }
 0x770   : > { %11700 = vmatpush3.bf16.xpose.msra.mxu0 %v3375_v35  ;;  %3275 = vmatprep.mubr.bf16.mxu0 %v18808_v31 }
 0x771   : > { %12448 = vmatprep.subr.msk.bf16.mxu0 %vm18832_vm15, %v15550_v57  ;;  %vm18838_vm15 = vmmov %vm18807_vm0  ;;  %v18840_v57 = vpack.c.bf16 %v15613_v42, %v15609_v50 }
 0x772   : > { %v3381_v43 = vsel %vm18838_vm15, %v15542_v15, 0  ;;  %vm18843_vm15 = vmmov %vm18807_vm0 }
 0x777   : > { %10921 = vmatmul.mubr.msk.bf16.gmra.mrb[132].mxu0 %vm18834_vm13, %v18833_v53  ;;  %vm18839_vm13 = vmmov %vm18807_vm0 }
 0x778   : > { %11702 = vmatpush3.bf16.xpose.msra.mxu0 %v3378_v8  ;;  %3285 = vmatprep.mubr.bf16.mxu0 %v18808_v31  ;;  %v18858_v8 = vld [vmem:[#allocation72_spill] sm:$0xff] }
 0x779   : > { %12449 = vmatprep.subr.msk.bf16.mxu0 %vm18835_vm1, %v15542_v15  ;;  %vm18841_vm1 = vmmov %vm18807_vm0 }
 0x77a   : > { %v3384_v3 = vsel %vm18841_vm1, %v15554_v19, 0  ;;  %vm18847_vm1 = vmmov %vm18807_vm0 }
 0x77f   : > { %10922 = vmatmul.mubr.msk.bf16.gmra.mrb[136].mxu0 %vm18837_vm14, %v18836_v33  ;;  %vm18842_vm14 = vmmov %vm18807_vm0 }
 0x780   : > { %11704 = vmatpush3.bf16.xpose.msra.mxu0 %v3381_v43  ;;  %3295 = vmatprep.mubr.bf16.mxu0 %v18808_v31 }
 0x781   : > { %12450 = vmatprep.subr.msk.bf16.mxu0 %vm18839_vm13, %v15554_v19  ;;  %vm18845_vm13 = vmmov %vm18807_vm0 }
 0x787   : > { %10923 = vmatmul.mubr.msk.bf16.gmra.mrb[140].mxu0 %vm18807_vm0, %v18840_v57 }
 0x788   : > { %11706 = vmatpush3.bf16.xpose.msra.mxu0 %v3384_v3  ;;  %11707 = vmatprep.mubr.msk.bf16.mxu0 %vm18842_vm14, %v15548_v44  ;;  %vm18848_vm14 = vmmov %vm18807_vm0  ;;  %v18860_v3 = vld [vmem:[#allocation73_spill] sm:$0xff] }
 0x78f   : > { %11708 = vmatmul.mubr.msk.bf16.vlgmr.msra.gmra.mrb[144].mxu0 %vm18843_vm15, %v15558_v38 }
 0x790   : > { %11711 = vmatprep.mubr.msk.bf16.mxu0 %vm18844_vm12, %v15552_v0  ;;  %vm18861_vm12 = vnez %v18860_v3 }
 0x797   : > { %11712 = vmatmul.mubr.msk.bf16.gmra.mrb[148].mxu0 %vm18845_vm13, %v15562_v24 }
 0x798   : > { %11715 = vmatprep.mubr.msk.bf16.mxu0 %vm18846_vm11, %v15556_v40  ;;  %vm18859_vm11 = vnez %v18858_v8 }
 0x79f   : > { %11716 = vmatmul.mubr.msk.bf16.gmra.mrb[152].mxu0 %vm18807_vm0, %v15564_v17 }
 0x7a0   : > { %11719 = vmatprep.mubr.msk.bf16.mxu0 %vm18847_vm1, %v15560_v59 }
 0x7a7   : > { %11720 = vmatmul.mubr.msk.bf16.gmra.mrb[156].mxu0 %vm18848_vm14, %v15566_v60 }
 0x7a8   : > { %3876 = vmatprep.mubr.bf16.mxu0 %v18808_v31 }
 0x862   : > { %v11709_v15 = vpop.f32.mrb[144].mxu0 }
 0x863   : > { %v3485_v44 = vmul.f32 0.2, %v11709_v15  ;;  %v3420_v0 = vpop.f32.mrb[145].mxu0 }
 0x864   : > { %v11710_v19 = vpop.f32.mrb[146].mxu0  ;;  %v3483_v38 = vmul.f32 0.2, %v3420_v0 }
 0x865   : > { %v3423_v24 = vpop.f32.mrb[147].mxu0  ;;  %v15727_v40 = vsel %vm15034_vm2, %v3485_v44, -1e+30  ;;  %v3486_v17 = vmul.f32 0.2, %v11710_v19 }
 0x866   : > { %v3484_v58 = vmul.f32 0.2, %v3423_v24  ;;  %3519 = vmax.xlane.f32.xlu0 %v15727_v40  ;;  %v15737_v1 = vsel %vm15051_vm4, %v3483_v38, -1e+30  ;;  %v18862_v38 = vld [vmem:[#allocation74_spill] sm:$0xff] }
 0x867   : > { %v15742_v42 = vsel %vm15066_vm5, %v3486_v17, -1e+30  ;;  %vm18863_vm15 = vnez %v18862_v38  ;;  %v18864_v17 = vld [vmem:[#allocation76_spill] sm:$0xff] }
 0x868   : > { %v15732_v55 = vsel %vm15043_vm3, %v3484_v58, -1e+30  ;;  %vm18865_vm13 = vnez %v18864_v17 }
 0x869   : > { %3517 = vmax.xlane.f32.xlu1 %v15732_v55 }
 0x86a   : > { %3515 = vmax.xlane.f32.xlu0 %v15737_v1  ;;  %v11713_v56 = vpop.f32.mrb[148].mxu0 }
 0x86b   : > { %v3436_v27 = vpop.f32.mrb[149].mxu0  ;;  %v3489_v54 = vmul.f32 0.2, %v11713_v56 }
 0x86c   : > { %v11714_v50 = vpop.f32.mrb[150].mxu0  ;;  %v3487_v12 = vmul.f32 0.2, %v3436_v27  ;;  %v18866_v27 = vld [vmem:[#allocation78_spill] sm:$0xff] }
 0x86d   : > { %v3490_v2 = vmul.f32 0.2, %v11714_v50  ;;  %v3439_v4 = vpop.f32.mrb[151].mxu0  ;;  %v15752_v20 = vsel %vm15085_vm7, %v3489_v54, -1e+30  ;;  %vm18867_vm0 = vnez %v18866_v27 }
 0x86e   : > { %3521 = vmax.xlane.f32.xlu0 %v15742_v42  ;;  %v3488_v9 = vmul.f32 0.2, %v3439_v4  ;;  %v15762_v25 = vsel %vm15105_vm9, %v3487_v12, -1e+30  ;;  %v18868_v4 = vld [vmem:[#allocation75_spill] sm:$0xff]  ;;  %v18870_v12 = vld [vmem:[#allocation77_spill] sm:$0xff] }
 0x86f   : > { %v15747_v32 = vsel %vm15077_vm6, %v3490_v2, -1e+30  ;;  %vm18869_vm1 = vnez %v18868_v4  ;;  %vm18871_vm14 = vnez %v18870_v12 }
 0x870   : > { %3529 = vmax.xlane.f32.xlu1 %v15747_v32  ;;  %v15757_v6 = vsel %vm15095_vm8, %v3488_v9, -1e+30 }
 0x872   : > { %3527 = vmax.xlane.f32.xlu0 %v15752_v20  ;;  %v11717_v21 = vpop.f32.mrb[152].mxu0 }
 0x873   : > { %v3452_v13 = vpop.f32.mrb[153].mxu0  ;;  %v3493_v39 = vmul.f32 0.2, %v11717_v21 }
 0x874   : > { %3525 = vmax.xlane.f32.xlu1 %v15757_v6  ;;  %v11718_v5 = vpop.f32.mrb[154].mxu0  ;;  %v3491_v53 = vmul.f32 0.2, %v3452_v13  ;;  %v15809_v13 = vpop.permute.xlu1 %4007 }
 0x875   : > { %v3494_v41 = vmul.f32 0.2, %v11718_v5  ;;  %v3455_v18 = vpop.f32.mrb[155].mxu0  ;;  %v15772_v33 = vsel %vm18859_vm11, %v3493_v39, -1e+30 }
 0x876   : > { %3523 = vmax.xlane.f32.xlu0 %v15762_v25  ;;  %v3492_v30 = vmul.f32 0.2, %v3455_v18  ;;  %v15782_v24 = vsel %vm18863_vm15, %v3491_v53, -1e+30 }
 0x877   : > { %v15767_v35 = vsel %vm15121_vm10, %v3494_v41, -1e+30 }
 0x878   : > { %3537 = vmax.xlane.f32.xlu1 %v15767_v35  ;;  %v15777_v15 = vsel %vm18861_vm12, %v3492_v30, -1e+30 }
 0x87a   : > { %3535 = vmax.xlane.f32.xlu0 %v15772_v33  ;;  %v11721_v43 = vpop.f32.mrb[156].mxu0 }
 0x87b   : > { %v3468_v57 = vpop.f32.mrb[157].mxu0  ;;  %v3497_v0 = vmul.f32 0.2, %v11721_v43 }
 0x87c   : > { %3533 = vmax.xlane.f32.xlu1 %v15777_v15  ;;  %v11722_v44 = vpop.f32.mrb[158].mxu0  ;;  %v3495_v58 = vmul.f32 0.2, %v3468_v57 }
 0x87d   : > { %v3471_v19 = vpop.f32.mrb[159].mxu0  ;;  %v15787_v56 = vsel %vm18865_vm13, %v3497_v0, -1e+30  ;;  %v3498_v54 = vmul.f32 0.2, %v11722_v44 }
 0x87e   : > { %3531 = vmax.xlane.f32.xlu0 %v15782_v24  ;;  %v15792_v50 = vsel %vm18867_vm0, %v3495_v58, -1e+30  ;;  %v3496_v2 = vmul.f32 0.2, %v3471_v19  ;;  %vm18875_vm0 = vcmask 261120  }
 0x87f   : > { %v15801_v9 = vsel %vm18869_vm1, %v3498_v54, -1e+30  ;;  %vm18877_vm13 = vmmov %vm18875_vm0 }
 0x880   : > { %v15806_v21 = vsel %vm18871_vm14, %v3496_v2, -1e+30  ;;  %vm18876_vm14 = vmmov %vm18875_vm0 }
 0x881   : > { %vm18878_vm1 = vmmov %vm18875_vm0 }
 0x882   : > { %3543 = vmax.xlane.f32.xlu0 %v15787_v56  ;;  %vm18879_vm15 = vmmov %vm18875_vm0 }
 0x883   : > { %vm18880_vm12 = vmmov %vm18875_vm0 }
 0x884   : > { %vm18881_vm11 = vmmov %vm18875_vm0 }
 0x886   : > { %3539 = vmax.xlane.f32.xlu0 %v15792_v50 }
 0x88d   : > { %4011 = vrot.lane.b32.xlu1 %v14864_v36, %s13897_s11 }
 0x89c   : > { %4009 = vrot.lane.b32.xlu0 %v14854_v28, %s13897_s11 }
 0x8b1   : > { %3545 = vmax.xlane.f32.xlu1 %v15801_v9 }
 0x8b5   : > { %3541 = vmax.xlane.f32.xlu1 %v15806_v21 }
 0x8f3   : > { %v3520_v36 = vpop.xlane.xlu0 %3519 }
 0x8f4   : > { %v3549_v5 = vsub.f32 %v15727_v40, %v3520_v36 }
 0x8f6   : > { %v3567_v28 = vmul.f32 1.442695, %v3549_v5  ;;  %v3518_v39 = vpop.xlane.xlu1 %3517 }
 0x8f7   : > { %v3548_v41 = vsub.f32 %v15732_v55, %v3518_v39  ;;  %v3516_v18 = vpop.xlane.xlu0 %3515 }
 0x8f8   : > { %13155 = vpow2.f32 %v3567_v28  ;;  %v3547_v30 = vsub.f32 %v15737_v1, %v3516_v18 }
 0x8f9   : > { %v3565_v53 = vmul.f32 1.442695, %v3548_v41 }
 0x8fa   : > { %v3563_v43 = vmul.f32 1.442695, %v3547_v30 }
 0x8fb   : > { %13157 = vpow2.f32 %v3565_v53  ;;  %v3522_v57 = vpop.xlane.xlu0 %3521 }
 0x8fc   : > { %13159 = vpow2.f32 %v3563_v43  ;;  %v3550_v44 = vsub.f32 %v15742_v42, %v3522_v57 }
 0x8fd   : > { %v3530_v54 = vpop.xlane.xlu1 %3529 }
 0x8fe   : > { %v3569_v0 = vmul.f32 1.442695, %v3550_v44  ;;  %v3554_v43 = vsub.f32 %v15747_v32, %v3530_v54 }
 0x8ff   : > { %v3528_v58 = vpop.xlane.xlu0 %3527 }
 0x900   : > { %13161 = vpow2.f32 %v3569_v0  ;;  %v3553_v36 = vsub.f32 %v15752_v20, %v3528_v58  ;;  %v3577_v44 = vmul.f32 1.442695, %v3554_v43 }
 0x901   : > { %v3526_v5 = vpop.xlane.xlu1 %3525 }
 0x902   : > { %v15815_v19 = vpop.eup %13155  ;;  %v3575_v39 = vmul.f32 1.442695, %v3553_v36  ;;  %v3552_v18 = vsub.f32 %v15757_v6, %v3526_v5 }
 0x903   : > { %3599 = vadd.xlane.f32.xlu1 %v15815_v19  ;;  %v3524_v42 = vpop.xlane.xlu0 %3523 }
 0x904   : > { %v3551_v41 = vsub.f32 %v15762_v25, %v3524_v42  ;;  %13163 = vpow2.f32 %v3575_v39  ;;  %v3573_v57 = vmul.f32 1.442695, %v3552_v18 }
 0x905   : > { %v15818_v40 = vpop.eup %13157  ;;  %v3538_v30 = vpop.xlane.xlu1 %3537 }
 0x906   : > { %v15820_v55 = vpop.eup %13159  ;;  %3597 = vadd.xlane.f32.xlu0 %v15818_v40  ;;  %v3558_v32 = vsub.f32 %v15767_v35, %v3538_v30 }
 0x907   : > { %3595 = vadd.xlane.f32.xlu1 %v15820_v55  ;;  %v3536_v2 = vpop.xlane.xlu0 %3535 }
 0x909   : > { %v3534_v0 = vpop.xlane.xlu1 %3533 }
 0x90a   : > { %v15824_v1 = vpop.eup %13161 }
 0x90b   : > { %3601 = vadd.xlane.f32.xlu1 %v15824_v1  ;;  %v3532_v28 = vpop.xlane.xlu0 %3531 }
 0x90c   : > { %v3555_v25 = vsub.f32 %v15782_v24, %v3532_v28  ;;  %v3556_v24 = vsub.f32 %v15777_v15, %v3534_v0 }
 0x90e   : > { %v3579_v54 = vmul.f32 1.442695, %v3555_v25  ;;  %v15840_v5 = vpop.eup %13163 }
 0x90f   : > { %v3544_v53 = vpop.xlane.xlu0 %3543 }
 0x910   : > { %v3561_v20 = vsub.f32 %v15787_v56, %v3544_v53 }
 0x912   : > { %v3591_v6 = vmul.f32 1.442695, %v3561_v20 }
 0x913   : > { %v3540_v42 = vpop.xlane.xlu0 %3539 }
 0x914   : > { %v3559_v36 = vsub.f32 %v15792_v50, %v3540_v42 }
 0x916   : > { %v3587_v56 = vmul.f32 1.442695, %v3559_v36 }
 0x91c   : > { %4015 = vrot.lane.b32.xlu1 %v14884_v22, %s13897_s11  ;;  %4013 = vrot.lane.b32.xlu0 %v14874_v61, %s13897_s11  ;;  %v3571_v22 = vmul.f32 1.442695, %v3551_v41  ;;  %v3557_v61 = vsub.f32 %v15772_v33, %v3536_v2  ;;  %v15842_v33 = vpop.permute.xlu1 %4011  ;;  %v3585_v2 = vmul.f32 1.442695, %v3558_v32  ;;  %v3581_v41 = vmul.f32 1.442695, %v3556_v24 }
 0x91e   : > { %13165 = vpow2.f32 %v3571_v22  ;;  %v3583_v58 = vmul.f32 1.442695, %v3557_v61 }
 0x91f   : > { %13167 = vpow2.f32 %v3573_v57 }
 0x920   : > { %13169 = vpow2.f32 %v3577_v44 }
 0x921   : > { %13171 = vpow2.f32 %v3583_v58 }
 0x922   : > { %13173 = vpow2.f32 %v3591_v6 }
 0x923   : > { %13175 = vpow2.f32 %v3579_v54 }
 0x924   : > { %13177 = vpow2.f32 %v3587_v56  ;;  %v18874_v56 = vld [vmem:[#allocation25_spill] sm:$0xff] }
 0x925   : > { %13179 = vpow2.f32 %v3585_v2  ;;  %v4046_v2 = vsel %vm18875_vm0, %v18874_v56, 0 }
 0x928   : > { %v15846_v28 = vpop.eup %13165 }
 0x929   : > { %v15848_v50 = vpop.eup %13167 }
 0x92a   : > { %v15853_v30 = vpop.eup %13169 }
 0x92b   : > { %v15855_v15 = vpop.eup %13171 }
 0x92c   : > { %v15860_v22 = vpop.eup %13173 }
 0x92d   : > { %v15862_v57 = vpop.eup %13175 }
 0x92e   : > { %v15866_v61 = vpop.eup %13177 }
 0x92f   : > { %v15868_v44 = vpop.eup %13179 }
 0x93b   : > { %3607 = vadd.xlane.f32.xlu0 %v15840_v5 }
 0x93e   : > { %v3546_v39 = vpop.xlane.xlu1 %3545 }
 0x93f   : > { %v3562_v35 = vsub.f32 %v15801_v9, %v3546_v39  ;;  %3603 = vadd.xlane.f32.xlu0 %v15846_v28 }
 0x940   : > { %3605 = vadd.xlane.f32.xlu1 %v15848_v50 }
 0x941   : > { %v3593_v18 = vmul.f32 1.442695, %v3562_v35 }
 0x942   : > { %v3542_v53 = vpop.xlane.xlu1 %3541 }
 0x943   : > { %13181 = vpow2.f32 %v3593_v18  ;;  %v3560_v43 = vsub.f32 %v15806_v21, %v3542_v53  ;;  %3609 = vadd.xlane.f32.xlu0 %v15853_v30 }
 0x944   : > { %3615 = vadd.xlane.f32.xlu1 %v15855_v15  ;;  %13183 = vpow2.f32 %v3581_v41 }
 0x945   : > { %v3589_v9 = vmul.f32 1.442695, %v3560_v43 }
 0x947   : > { %3623 = vadd.xlane.f32.xlu0 %v15860_v22  ;;  %13185 = vpow2.f32 %v3589_v9 }
 0x948   : > { %3611 = vadd.xlane.f32.xlu1 %v15862_v57 }
 0x94b   : > { %3619 = vadd.xlane.f32.xlu0 %v15866_v61 }
 0x94c   : > { %3617 = vadd.xlane.f32.xlu1 %v15868_v44 }
 0x94d   : > { %v15872_v21 = vpop.eup %13181 }
 0x94e   : > { %v15874_v0 = vpop.eup %13183 }
 0x94f   : > { %3625 = vadd.xlane.f32.xlu0 %v15872_v21 }
 0x950   : > { %3613 = vadd.xlane.f32.xlu1 %v15874_v0 }
 0x951   : > { %v15878_v20 = vpop.eup %13185 }
 0x954   : > { %3621 = vadd.xlane.f32.xlu1 %v15878_v20 }
 0x965   : > { %4017 = vrot.lane.b32.xlu0 %v14894_v46, %s13897_s11  ;;  %4019 = vrot.lane.b32.xlu1 %v14906_v49, %s13897_s11  ;;  %v18873_v46 = vld [vmem:[#allocation53_spill] sm:$0xff]  ;;  %v4010_v49 = vpop.permute.xlu0 %4009 }
 0x969   : > { %3989 = vrot.lane.b32.xlu0 %v14800_v45, %s13897_s11  ;;  %3991 = vrot.lane.b32.xlu1 %v18784_v47, %s13897_s11  ;;  %v18872_v45 = vld [vmem:[#allocation51_spill] sm:$0xff] }
 0x96d   : > { %3993 = vrot.lane.b32.xlu0 %v18785_v14, %s13897_s11  ;;  %3995 = vrot.lane.b32.xlu1 %v18786_v23, %s13897_s11 }
 0x971   : > { %3997 = vrot.lane.b32.xlu0 %v18787_v10, %s13897_s11  ;;  %3999 = vrot.lane.b32.xlu1 %v18788_v7, %s13897_s11  ;;  %v12767_v10 = vld [vmem:[#allocation10 + $0x40] ss:$8 sps:$4 sm:$0xff]   ;;  %v12769_v7 = vld [vmem:[#allocation10 + $0x44] ss:$8 sps:$4 sm:$0xff]  }
 0x972   : > { %3844 = vmatprep.subr.bf16.mxu0 %v12769_v7 }
 0x973   : > { %3845 = vmatpush1.bf16.msra.mxu0 %v12767_v10 }
 0x975   : > { %4001 = vrot.lane.b32.xlu0 %v18789_v34, %s13897_s11  ;;  %4003 = vrot.lane.b32.xlu1 %v18790_v29, %s13897_s11 }
 0x979   : > { %4350 = vrot.lane.b32.xlu0 %v18791_v48, %s13897_s11  ;;  %4352 = vrot.lane.b32.xlu1 %v18792_v37, %s13897_s11 }
 0x97d   : > { %4354 = vrot.lane.b32.xlu0 %v18872_v45, %s13897_s11  ;;  %4356 = vrot.lane.b32.xlu1 %v18873_v46, %s13897_s11 }
 0x990   : > { %v3600_v47 = vpop.xlane.xlu1 %3599 }
 0x993   : > { %v3598_v14 = vpop.xlane.xlu0 %3597 }
 0x994   : > { %13187 = vrcp.f32 %v3598_v14  ;;  %v3596_v23 = vpop.xlane.xlu1 %3595 }
 0x995   : > { %13189 = vrcp.f32 %v3596_v23 }
 0x996   : > { %13191 = vrcp.f32 %v3600_v47 }
 0x998   : > { %v3602_v34 = vpop.xlane.xlu1 %3601 }
 0x999   : > { %13193 = vrcp.f32 %v3602_v34 }
 0x99e   : > { %v13188_v29 = vpop.eup %13187 }
 0x99f   : > { %v13190_v48 = vpop.eup %13189  ;;  %v3644_v37 = vmul.f32 %v13188_v29, %v15818_v40  ;;  %v4049_v40 = vsel %vm18877_vm13, %v15809_v13, 0  ;;  %vm18883_vm13 = vmmov %vm18875_vm0 }
 0x9a0   : > { %v3643_v58 = vmul.f32 %v13190_v48, %v15820_v55  ;;  %v13192_v25 = vpop.eup %13191  ;;  %v4055_v55 = vsel %vm18881_vm11, %v15842_v33, 0  ;;  %vm18885_vm11 = vmmov %vm18875_vm0 }
 0x9a1   : > { %v3645_v36 = vmul.f32 %v13192_v25, %v15815_v19  ;;  %v4052_v19 = vsel %vm18879_vm15, %v4010_v49, 0  ;;  %vm18886_vm15 = vmmov %vm18875_vm0 }
 0x9a2   : > { %v3659_v42 = vpack.c.bf16 %v3644_v37, %v3643_v58 }
 0x9a3   : > { %v13194_v6 = vpop.eup %13193 }
 0x9a4   : > { %v3646_v32 = vmul.f32 %v13194_v6, %v15824_v1  ;;  %11739 = vmatprep.mubr.bf16.mxu1 %v3659_v42  ;;  %v4014_v1 = vpop.permute.xlu0 %4013 }
 0x9a6   : > { %v3660_v54 = vpack.c.bf16 %v3646_v32, %v3645_v36 }
 0x9a8   : > { %11740 = vmatmul.mubr.bf16.vlgmr.msra.gmra.mrb[48].mxu1 %v3660_v54 }
 0x9a9   : > { %11756 = vmatpush3.bf16.xpose.msra.mxu1 %v4046_v2 }
 0x9aa   : > { %12452 = vmatprep.subr.msk.bf16.mxu1 %vm18876_vm14, %v15809_v13  ;;  %vm18882_vm14 = vmmov %vm18875_vm0  ;;  %v4016_v13 = vpop.permute.xlu1 %4015 }
 0x9ab   : > { %v4058_v39 = vsel %vm18882_vm14, %v4014_v1, 0  ;;  %vm18888_vm14 = vmmov %vm18875_vm0 }
 0x9b1   : > { %11758 = vmatpush3.bf16.xpose.msra.mxu1 %v4049_v40 }
 0x9b2   : > { %12453 = vmatprep.subr.msk.bf16.mxu1 %vm18878_vm1, %v4010_v49  ;;  %vm18887_vm1 = vmmov %vm18875_vm0 }
 0x9b9   : > { %11760 = vmatpush3.bf16.xpose.msra.mxu1 %v4052_v19 }
 0x9ba   : > { %12454 = vmatprep.subr.msk.bf16.mxu1 %vm18880_vm12, %v15842_v33  ;;  %vm18884_vm12 = vmmov %vm18875_vm0 }
 0x9bb   : > { %v4061_v53 = vsel %vm18884_vm12, %v4016_v13, 0  ;;  %vm18890_vm12 = vmmov %vm18875_vm0 }
 0x9c1   : > { %11762 = vmatpush3.bf16.xpose.msra.mxu1 %v4055_v55 }
 0x9c2   : > { %12455 = vmatprep.subr.msk.bf16.mxu1 %vm18875_vm0, %v4014_v1 }
 0x9c8   : > { %v3608_v24 = vpop.xlane.xlu0 %3607 }
 0x9c9   : > { %11764 = vmatpush3.bf16.xpose.msra.mxu1 %v4058_v39 }
 0x9ca   : > { %12456 = vmatprep.subr.msk.bf16.mxu1 %vm18883_vm13, %v4016_v13  ;;  %vm18889_vm13 = vmmov %vm18875_vm0 }
 0x9cc   : > { %v3604_v35 = vpop.xlane.xlu0 %3603 }
 0x9cd   : > { %13195 = vrcp.f32 %v3604_v35  ;;  %v3606_v41 = vpop.xlane.xlu1 %3605 }
 0x9ce   : > { %13197 = vrcp.f32 %v3606_v41 }
 0x9cf   : > { %13199 = vrcp.f32 %v3608_v24 }
 0x9d0   : > { %v3610_v18 = vpop.xlane.xlu0 %3609 }
 0x9d1   : > { %13201 = vrcp.f32 %v3610_v18  ;;  %11766 = vmatpush3.bf16.xpose.msra.mxu1 %v4061_v53  ;;  %v3616_v33 = vpop.xlane.xlu1 %3615 }
 0x9d4   : > { %v3624_v43 = vpop.xlane.xlu0 %3623 }
 0x9d5   : > { %v3612_v9 = vpop.xlane.xlu1 %3611 }
 0x9d7   : > { %v13196_v45 = vpop.eup %13195 }
 0x9d8   : > { %v13198_v46 = vpop.eup %13197  ;;  %v3620_v49 = vpop.xlane.xlu0 %3619  ;;  %v3647_v47 = vmul.f32 %v13196_v45, %v15846_v28 }
 0x9d9   : > { %v13200_v14 = vpop.eup %13199  ;;  %v3618_v23 = vpop.xlane.xlu1 %3617  ;;  %v3648_v10 = vmul.f32 %v13198_v46, %v15848_v50 }
 0x9da   : > { %13203 = vrcp.f32 %v3618_v23  ;;  %v3649_v48 = vmul.f32 %v13200_v14, %v15840_v5  ;;  %v12772_v23 = vld [vmem:[#allocation10 + $0x54] ss:$8 sps:$4 sm:$0xff]  }
 0x9db   : > { %v13202_v7 = vpop.eup %13201  ;;  %v3661_v34 = vpack.c.bf16 %v3648_v10, %v3647_v47  ;;  %13205 = vrcp.f32 %v3612_v9  ;;  %3846 = vmatprep.subr.bf16.mxu0 %v12772_v23 }
 0x9dc   : > { %v3626_v29 = vpop.xlane.xlu0 %3625  ;;  %v3650_v37 = vmul.f32 %v13202_v7, %v15853_v30  ;;  %13207 = vrcp.f32 %v3616_v33 }
 0x9dd   : > { %11743 = vmatprep.mubr.bf16.mxu1 %v3661_v34  ;;  %v3614_v58 = vpop.xlane.xlu1 %3613 }
 0x9de   : > { %13209 = vrcp.f32 %v3614_v58  ;;  %v3662_v25 = vpack.c.bf16 %v3650_v37, %v3649_v48  ;;  %v12773_v58 = vld [vmem:[#allocation10 + $0x60] ss:$8 sps:$4 sm:$0xff]  }
 0x9df   : > { %13211 = vrcp.f32 %v3620_v49 }
 0x9e0   : > { %v4018_v28 = vpop.permute.xlu0 %4017  ;;  %11744 = vmatmul.mubr.bf16.gmra.mrb[52].mxu1 %v3662_v25 }
 0x9e1   : > { %12457 = vmatprep.subr.msk.bf16.mxu1 %vm18885_vm11, %v4018_v28  ;;  %v3622_v50 = vpop.xlane.xlu1 %3621  ;;  %v4064_v42 = vsel %vm18886_vm15, %v4018_v28, 0  ;;  %vm18891_vm11 = vmmov %vm18875_vm0  ;;  %v12778_v28 = vld [vmem:[#allocation10 + $0x74] ss:$8 sps:$4 sm:$0xff]  }
 0x9e2   : > { %13213 = vrcp.f32 %v3622_v50  ;;  %11768 = vmatpush3.bf16.xpose.msra.mxu1 %v4064_v42  ;;  %vm18892_vm15 = vmmov %vm18875_vm0  ;;  %v12776_v50 = vld [vmem:[#allocation10 + $0x70] ss:$8 sps:$4 sm:$0xff]   ;;  %v18896_v42 = vld [vmem:[#allocation48_spill] sm:$0xff] }
 0x9e3   : > { %13215 = vrcp.f32 %v3626_v29 }
 0x9e4   : > { %v3990_v6 = vpop.permute.xlu0 %3989  ;;  %v13204_v5 = vpop.eup %13203  ;;  %13217 = vrcp.f32 %v3624_v43 }
 0x9e5   : > { %v4020_v30 = vpop.permute.xlu1 %4019  ;;  %v13206_v36 = vpop.eup %13205  ;;  %v3654_v2 = vmul.f32 %v13204_v5, %v15868_v44 }
 0x9e6   : > { %12458 = vmatprep.subr.msk.bf16.mxu1 %vm18887_vm1, %v4020_v30  ;;  %v13208_v32 = vpop.eup %13207  ;;  %v4067_v19 = vsel %vm18875_vm0, %v4020_v30, 0  ;;  %v3651_v55 = vmul.f32 %v13206_v36, %v15862_v57  ;;  %vm18893_vm1 = vmmov %vm18875_vm0 }
 0x9e7   : > { %v3653_v39 = vmul.f32 %v13208_v32, %v15855_v15 }
 0x9e8   : > { %v13210_v54 = vpop.eup %13209  ;;  %v3994_v56 = vpop.permute.xlu0 %3993 }
 0x9e9   : > { %v3992_v40 = vpop.permute.xlu1 %3991  ;;  %v3652_v1 = vmul.f32 %v13210_v54, %v15874_v0  ;;  %v13212_v24 = vpop.eup %13211  ;;  %v3664_v18 = vpack.c.bf16 %v3654_v2, %v3653_v39 }
 0x9ea   : > { %11770 = vmatpush3.bf16.xpose.msra.mxu1 %v4067_v19  ;;  %v3655_v44 = vmul.f32 %v13212_v24, %v15866_v61  ;;  %v12770_v61 = vld [vmem:[#allocation10 + $0x50] ss:$8 sps:$4 sm:$0xff]  }
 0x9eb   : > { %v3663_v13 = vpack.c.bf16 %v3652_v1, %v3651_v55  ;;  %3847 = vmatpush1.bf16.msra.mxu0 %v12770_v61 }
 0x9ec   : > { %v13214_v35 = vpop.eup %13213  ;;  %v3998_v41 = vpop.permute.xlu0 %3997 }
 0x9ed   : > { %v13216_v53 = vpop.eup %13215  ;;  %11747 = vmatprep.mubr.bf16.mxu1 %v3663_v13  ;;  %v3996_v33 = vpop.permute.xlu1 %3995  ;;  %v3656_v43 = vmul.f32 %v13214_v35, %v15878_v20 }
 0x9ee   : > { %11748 = vmatmul.mubr.bf16.gmra.mrb[56].mxu1 %v3664_v18  ;;  %v13218_v9 = vpop.eup %13217  ;;  %v3658_v0 = vmul.f32 %v13216_v53, %v15872_v21  ;;  %v12775_v21 = vld [vmem:[#allocation10 + $0x64] ss:$8 sps:$4 sm:$0xff]  }
 0x9ef   : > { %v3665_v57 = vpack.c.bf16 %v3656_v43, %v3655_v44  ;;  %v3657_v15 = vmul.f32 %v13218_v9, %v15860_v22  ;;  %4527 = vmatprep.subr.bf16.mxu0 %v12775_v21 }
 0x9f0   : > { %v4002_v45 = vpop.permute.xlu0 %4001 }
 0x9f1   : > { %11751 = vmatprep.mubr.bf16.mxu1 %v3665_v57  ;;  %v4000_v46 = vpop.permute.xlu1 %3999  ;;  %v3666_v47 = vpack.c.bf16 %v3658_v0, %v3657_v15 }
 0x9f4   : > { %v4351_v49 = vpop.permute.xlu0 %4350 }
 0x9f5   : > { %11787 = vmatprep.subr.bf16.mxu1 %v4351_v49  ;;  %v4004_v14 = vpop.permute.xlu1 %4003 }
 0x9f6   : > { %11752 = vmatmul.mubr.bf16.gmra.mrb[60].mxu1 %v3666_v47 }
 0x9f7   : > { %11771 = vmatprep.mubr.msk.bf16.mxu1 %vm18888_vm14, %v3990_v6  ;;  %vm18894_vm14 = vmmov %vm18875_vm0 }
 0x9f8   : > { %v4355_v22 = vpop.permute.xlu0 %4354 }
 0x9f9   : > { %v4353_v20 = vpop.permute.xlu1 %4352 }
 0x9fd   : > { %v4357_v10 = vpop.permute.xlu1 %4356 }
 0x9fe   : > { %11772 = vmatmul.mubr.msk.bf16.vlgmr.msra.gmra.mrb[64].mxu1 %vm18889_vm13, %v3992_v40  ;;  %vm18895_vm13 = vmmov %vm18875_vm0 }
 0x9ff   : > { %11788 = vmatpush3.bf16.msra.mxu1 %v4351_v49  ;;  %11775 = vmatprep.mubr.msk.bf16.mxu1 %vm18890_vm12, %v3994_v56  ;;  %vm18897_vm12 = vmmov %vm18875_vm0 }
 0xa00   : > { %11789 = vmatprep.subr.bf16.mxu1 %v4353_v20 }
 0xa03   : > { %11790 = vmatpush3.bf16.msra.mxu1 %v4353_v20 }
 0xa04   : > { %11791 = vmatprep.subr.bf16.mxu1 %v4355_v22 }
 0xa06   : > { %11776 = vmatmul.mubr.msk.bf16.gmra.mrb[68].mxu1 %vm18891_vm11, %v3996_v33  ;;  %vm18898_vm11 = vmmov %vm18875_vm0 }
 0xa07   : > { %11792 = vmatpush3.bf16.msra.mxu1 %v4355_v22  ;;  %11779 = vmatprep.mubr.msk.bf16.mxu1 %vm18892_vm15, %v3998_v41  ;;  %vm18899_vm15 = vmmov %vm18875_vm0 }
 0xa08   : > { %11793 = vmatprep.subr.bf16.mxu1 %v4357_v10 }
 0xa0b   : > { %11794 = vmatpush3.bf16.msra.mxu1 %v4357_v10 }
 0xa0e   : > { %11780 = vmatmul.mubr.msk.bf16.gmra.mrb[72].mxu1 %vm18893_vm1, %v4000_v46  ;;  %vm18900_vm1 = vmmov %vm18875_vm0 }
 0xa0f   : > { %11783 = vmatprep.mubr.msk.bf16.mxu1 %vm18875_vm0, %v4002_v45 }
 0xa16   : > { %11784 = vmatmul.mubr.msk.bf16.gmra.mrb[76].mxu1 %vm18894_vm14, %v4004_v14  ;;  %vm18901_vm14 = vmmov %vm18875_vm0 }
 0xa7b   : > { %v11741_v7 = vpop.f32.mrb[48].mxu1 }
 0xa7c   : > { %v3725_v34 = vpop.f32.mrb[49].mxu1 }
 0xa7d   : > { %v11742_v29 = vpop.f32.mrb[50].mxu1 }
 0xa7e   : > { %v3789_v48 = vpack.c.bf16 %v11742_v29, %v11741_v7  ;;  %v3728_v37 = vpop.f32.mrb[51].mxu1 }
 0xa7f   : > { %v3788_v25 = vpack.c.bf16 %v3728_v37, %v3725_v34 }
 0xa81   : > { %10936 = vmatmul.mubr.msk.bf16.vlgmr.msra.gmra.mrb[112].mxu0 %vm18895_vm13, %v3788_v25  ;;  %vm18902_vm13 = vmmov %vm18875_vm0 }
 0xa82   : > { %4528 = vmatpush1.bf16.msra.mxu0 %v12773_v58  ;;  %3886 = vmatprep.mubr.bf16.mxu0 %v18808_v31 }
 0xa83   : > { %4529 = vmatprep.subr.bf16.mxu0 %v12778_v28 }
 0xa86   : > { %4530 = vmatpush1.bf16.msra.mxu0 %v12776_v50 }
 0xa87   : > { %11851 = vmatprep.subr.bf16.mxu0 %v18896_v42 }
 0xa89   : > { %10937 = vmatmul.mubr.msk.bf16.gmra.mrb[116].mxu0 %vm18897_vm12, %v3789_v48  ;;  %vm18903_vm12 = vnez %v18858_v8 }
 0xa8a   : > { %3896 = vmatprep.mubr.bf16.mxu0 %v18808_v31 }
 0xab3   : > { %v11745_v6 = vpop.f32.mrb[52].mxu1 }
 0xab4   : > { %v3741_v5 = vpop.f32.mrb[53].mxu1 }
 0xab5   : > { %v11746_v30 = vpop.f32.mrb[54].mxu1 }
 0xab6   : > { %v3791_v36 = vpack.c.bf16 %v11746_v30, %v11745_v6  ;;  %v3744_v32 = vpop.f32.mrb[55].mxu1 }
 0xab7   : > { %v3790_v54 = vpack.c.bf16 %v3744_v32, %v3741_v5 }
 0xab9   : > { %10938 = vmatmul.mubr.msk.bf16.gmra.mrb[120].mxu0 %vm18898_vm11, %v3790_v54  ;;  %vm18904_vm11 = vnez %v18860_v3 }
 0xaba   : > { %3906 = vmatprep.mubr.bf16.mxu0 %v18808_v31 }
 0xac1   : > { %v11749_v56 = vpop.f32.mrb[56].mxu1  ;;  %10939 = vmatmul.mubr.msk.bf16.gmra.mrb[124].mxu0 %vm18899_vm15, %v3791_v36  ;;  %vm18905_vm15 = vnez %v18862_v38 }
 0xac2   : > { %v3757_v2 = vpop.f32.mrb[57].mxu1  ;;  %3916 = vmatprep.mubr.bf16.mxu0 %v18808_v31 }
 0xac3   : > { %v11750_v40 = vpop.f32.mrb[58].mxu1 }
 0xac4   : > { %v3793_v19 = vpack.c.bf16 %v11750_v40, %v11749_v56  ;;  %v3760_v55 = vpop.f32.mrb[59].mxu1 }
 0xac5   : > { %v3792_v1 = vpack.c.bf16 %v3760_v55, %v3757_v2 }
 0xac9   : > { %v11753_v24 = vpop.f32.mrb[60].mxu1  ;;  %10940 = vmatmul.mubr.msk.bf16.gmra.mrb[128].mxu0 %vm18900_vm1, %v3792_v1  ;;  %vm18906_vm1 = vnez %v18868_v4 }
 0xaca   : > { %v3773_v39 = vpop.f32.mrb[61].mxu1  ;;  %3926 = vmatprep.mubr.bf16.mxu0 %v18808_v31 }
 0xacb   : > { %v11754_v13 = vpop.f32.mrb[62].mxu1 }
 0xacc   : > { %v3795_v35 = vpack.c.bf16 %v11754_v13, %v11753_v24  ;;  %v3776_v41 = vpop.f32.mrb[63].mxu1 }
 0xacd   : > { %v3794_v18 = vpack.c.bf16 %v3776_v41, %v3773_v39 }
 0xad1   : > { %10941 = vmatmul.mubr.msk.bf16.gmra.mrb[132].mxu0 %vm18875_vm0, %v3793_v19  ;;  %v11773_v53 = vpop.f32.mrb[64].mxu1  ;;  %vm18907_vm0 = vnez %v18864_v17 }
 0xad2   : > { %v4168_v33 = vmul.f32 0.2, %v11773_v53  ;;  %v4103_v44 = vpop.f32.mrb[65].mxu1  ;;  %3936 = vmatprep.mubr.bf16.mxu0 %v18808_v31 }
 0xad3   : > { %v11774_v43 = vpop.f32.mrb[66].mxu1  ;;  %v4166_v9 = vmul.f32 0.2, %v4103_v44  ;;  %v18910_v44 = vld [vmem:[#allocation57_spill] sm:$0xff] }
 0xad4   : > { %v4106_v57 = vpop.f32.mrb[67].mxu1  ;;  %v15968_v45 = vsel %vm15034_vm2, %v4168_v33, -1e+30  ;;  %v4169_v15 = vmul.f32 0.2, %v11774_v43  ;;  %v18911_v43 = vld [vmem:[#allocation55_spill] sm:$0xff] }
 0xad5   : > { %v4167_v0 = vmul.f32 0.2, %v4106_v57  ;;  %4202 = vmax.xlane.f32.xlu0 %v15968_v45  ;;  %v15978_v49 = vsel %vm15051_vm4, %v4166_v9, -1e+30 }
 0xad6   : > { %v15985_v23 = vsel %vm15066_vm5, %v4169_v15, -1e+30 }
 0xad7   : > { %v15973_v46 = vsel %vm15043_vm3, %v4167_v0, -1e+30 }
 0xad8   : > { %4200 = vmax.xlane.f32.xlu1 %v15973_v46 }
 0xad9   : > { %10942 = vmatmul.mubr.msk.bf16.gmra.mrb[136].mxu0 %vm18901_vm14, %v3794_v18  ;;  %4198 = vmax.xlane.f32.xlu0 %v15978_v49  ;;  %v11777_v47 = vpop.f32.mrb[68].mxu1  ;;  %vm18908_vm14 = vnez %v18870_v12 }
 0xada   : > { %v4119_v14 = vpop.f32.mrb[69].mxu1  ;;  %3946 = vmatprep.mubr.bf16.mxu0 %v18808_v31  ;;  %v4172_v20 = vmul.f32 0.2, %v11777_v47 }
 0xadb   : > { %v11778_v61 = vpop.f32.mrb[70].mxu1  ;;  %v4170_v34 = vmul.f32 0.2, %v4119_v14 }
 0xadc   : > { %v4173_v21 = vmul.f32 0.2, %v11778_v61  ;;  %v4122_v22 = vpop.f32.mrb[71].mxu1  ;;  %v15995_v29 = vsel %vm15085_vm7, %v4172_v20, -1e+30 }
 0xadd   : > { %4204 = vmax.xlane.f32.xlu0 %v15985_v23  ;;  %v4171_v10 = vmul.f32 0.2, %v4122_v22  ;;  %v16007_v28 = vsel %vm15105_vm9, %v4170_v34, -1e+30 }
 0xade   : > { %v15990_v7 = vsel %vm15077_vm6, %v4173_v21, -1e+30 }
 0xadf   : > { %4212 = vmax.xlane.f32.xlu1 %v15990_v7  ;;  %v16001_v58 = vsel %vm15095_vm8, %v4171_v10, -1e+30 }
 0xae1   : > { %10943 = vmatmul.mubr.msk.bf16.gmra.mrb[140].mxu0 %vm18902_vm13, %v3795_v35  ;;  %4210 = vmax.xlane.f32.xlu0 %v15995_v29  ;;  %v11781_v48 = vpop.f32.mrb[72].mxu1  ;;  %vm18909_vm13 = vnez %v18866_v27 }
 0xae2   : > { %v4135_v37 = vpop.f32.mrb[73].mxu1  ;;  %4559 = vmatprep.mubr.bf16.mxu0 %v18808_v31  ;;  %v4176_v50 = vmul.f32 0.2, %v11781_v48 }
 0xae3   : > { %4208 = vmax.xlane.f32.xlu1 %v16001_v58  ;;  %v11782_v25 = vpop.f32.mrb[74].mxu1  ;;  %v4174_v32 = vmul.f32 0.2, %v4135_v37 }
 0xae4   : > { %v4177_v6 = vmul.f32 0.2, %v11782_v25  ;;  %v4138_v5 = vpop.f32.mrb[75].mxu1  ;;  %v16017_v54 = vsel %vm18903_vm12, %v4176_v50, -1e+30 }
 0xae5   : > { %4206 = vmax.xlane.f32.xlu0 %v16007_v28  ;;  %v4175_v30 = vmul.f32 0.2, %v4138_v5  ;;  %v16027_v55 = vsel %vm18905_vm15, %v4174_v32, -1e+30 }
 0xae6   : > { %v16012_v36 = vsel %vm15121_vm10, %v4177_v6, -1e+30 }
 0xae7   : > { %4220 = vmax.xlane.f32.xlu1 %v16012_v36  ;;  %v16022_v40 = vsel %vm18904_vm11, %v4175_v30, -1e+30 }
 0xae9   : > { %4218 = vmax.xlane.f32.xlu0 %v16017_v54  ;;  %v11785_v56 = vpop.f32.mrb[76].mxu1 }
 0xaea   : > { %v4151_v2 = vpop.f32.mrb[77].mxu1  ;;  %v4180_v1 = vmul.f32 0.2, %v11785_v56 }
 0xaeb   : > { %4216 = vmax.xlane.f32.xlu1 %v16022_v40  ;;  %v11786_v19 = vpop.f32.mrb[78].mxu1  ;;  %v4178_v41 = vmul.f32 0.2, %v4151_v2 }
 0xaec   : > { %v4181_v24 = vmul.f32 0.2, %v11786_v19  ;;  %v4154_v39 = vpop.f32.mrb[79].mxu1  ;;  %v16037_v18 = vsel %vm18907_vm0, %v4180_v1, -1e+30 }
 0xaed   : > { %4214 = vmax.xlane.f32.xlu0 %v16027_v55  ;;  %v4179_v13 = vmul.f32 0.2, %v4154_v39  ;;  %v16047_v33 = vsel %vm18909_vm13, %v4178_v41, -1e+30  ;;  %v18913_v41 = vld [vmem:[#allocation59_spill] sm:$0xff] }
 0xaee   : > { %v16032_v35 = vsel %vm18906_vm1, %v4181_v24, -1e+30 }
 0xaef   : > { %4228 = vmax.xlane.f32.xlu1 %v16032_v35  ;;  %v16042_v53 = vsel %vm18908_vm14, %v4179_v13, -1e+30  ;;  %v18912_v13 = vld [vmem:[#allocation61_spill] sm:$0xff]  ;;  %vm18937_vm14 = vcmask 261120  }
 0xaf0   : > { %vm18938_vm0 = vmmov %vm18937_vm14 }
 0xaf1   : > { %4226 = vmax.xlane.f32.xlu0 %v16037_v18  ;;  %vm18939_vm1 = vmmov %vm18938_vm0 }
 0xaf2   : > { %vm18941_vm11 = vmmov %vm18938_vm0 }
 0xaf3   : > { %4224 = vmax.xlane.f32.xlu1 %v16042_v53  ;;  %vm18942_vm13 = vmmov %vm18938_vm0 }
 0xaf4   : > { %vm18945_vm15 = vmmov %vm18938_vm0 }
 0xaf5   : > { %4222 = vmax.xlane.f32.xlu0 %v16047_v33  ;;  %vm18956_vm12 = vmmov %vm18938_vm0 }
 0xaf6   : > { %vm18960_vm10 = vmmov %vm18938_vm0 }
 0xb04   : > { %4360 = vrot.lane.b32.xlu1 %v18910_v44, %s13897_s11 }
 0xb0b   : > { %4358 = vrot.lane.b32.xlu0 %v18911_v43, %s13897_s11 }
 0xb62   : > { %v4203_v9 = vpop.xlane.xlu0 %4202 }
 0xb63   : > { %v4232_v57 = vsub.f32 %v15968_v45, %v4203_v9 }
 0xb65   : > { %v4250_v0 = vmul.f32 1.442695, %v4232_v57  ;;  %v4201_v15 = vpop.xlane.xlu1 %4200 }
 0xb66   : > { %v4231_v47 = vsub.f32 %v15973_v46, %v4201_v15  ;;  %v4199_v14 = vpop.xlane.xlu0 %4198 }
 0xb67   : > { %13219 = vpow2.f32 %v4250_v0  ;;  %v4230_v61 = vsub.f32 %v15978_v49, %v4199_v14 }
 0xb68   : > { %v4248_v20 = vmul.f32 1.442695, %v4231_v47 }
 0xb69   : > { %v4246_v21 = vmul.f32 1.442695, %v4230_v61 }
 0xb6a   : > { %13221 = vpow2.f32 %v4248_v20  ;;  %v4205_v22 = vpop.xlane.xlu0 %4204 }
 0xb6b   : > { %13223 = vpow2.f32 %v4246_v21  ;;  %v4233_v10 = vsub.f32 %v15985_v23, %v4205_v22 }
 0xb6c   : > { %v4213_v34 = vpop.xlane.xlu1 %4212 }
 0xb6d   : > { %v4252_v48 = vmul.f32 1.442695, %v4233_v10  ;;  %v4237_v0 = vsub.f32 %v15990_v7, %v4213_v34 }
 0xb6e   : > { %v4211_v37 = vpop.xlane.xlu0 %4210 }
 0xb6f   : > { %13225 = vpow2.f32 %v4252_v48  ;;  %v4236_v43 = vsub.f32 %v15995_v29, %v4211_v37  ;;  %v4260_v61 = vmul.f32 1.442695, %v4237_v0  ;;  %v18924_v0 = vld [vmem:[#allocation28_spill] sm:$0xff] }
 0xb70   : > { %v4209_v45 = vpop.xlane.xlu1 %4208 }
 0xb71   : > { %v16058_v25 = vpop.eup %13219  ;;  %v4235_v57 = vsub.f32 %v16001_v58, %v4209_v45  ;;  %v4258_v15 = vmul.f32 1.442695, %v4236_v43  ;;  %v18921_v43 = vld [vmem:[#allocation46_spill] sm:$0xff] }
 0xb72   : > { %v4207_v50 = vpop.xlane.xlu0 %4206  ;;  %4282 = vadd.xlane.f32.xlu1 %v16058_v25 }
 0xb73   : > { %v4234_v44 = vsub.f32 %v16007_v28, %v4207_v50  ;;  %v4256_v47 = vmul.f32 1.442695, %v4235_v57  ;;  %v18923_v57 = vld [vmem:[#allocation26_spill] sm:$0xff] }
 0xb74   : > { %v16061_v46 = vpop.eup %13221  ;;  %v4221_v49 = vpop.xlane.xlu1 %4220 }
 0xb75   : > { %v16063_v6 = vpop.eup %13223  ;;  %4280 = vadd.xlane.f32.xlu0 %v16061_v46  ;;  %v4254_v9 = vmul.f32 1.442695, %v4234_v44  ;;  %v4241_v21 = vsub.f32 %v16012_v36, %v4221_v49  ;;  %v18920_v44 = vld [vmem:[#allocation45_spill] sm:$0xff] }
 0xb76   : > { %v4219_v5 = vpop.xlane.xlu0 %4218  ;;  %4278 = vadd.xlane.f32.xlu1 %v16063_v6 }
 0xb77   : > { %13227 = vpow2.f32 %v4254_v9  ;;  %v4240_v29 = vsub.f32 %v16017_v54, %v4219_v5  ;;  %v4268_v58 = vmul.f32 1.442695, %v4241_v21  ;;  %v18922_v9 = vld [vmem:[#allocation24_spill] sm:$0xff]  ;;  %v18930_v21 = vld [vmem:[#allocation50_spill] sm:$0xff] }
 0xb78   : > { %v4217_v23 = vpop.xlane.xlu1 %4216  ;;  %13229 = vpow2.f32 %v4258_v15  ;;  %v18925_v15 = vld [vmem:[#allocation30_spill] sm:$0xff] }
 0xb79   : > { %v16067_v30 = vpop.eup %13225  ;;  %v4239_v14 = vsub.f32 %v16022_v40, %v4217_v23  ;;  %13231 = vpow2.f32 %v4256_v47  ;;  %v4266_v40 = vmul.f32 1.442695, %v4240_v29  ;;  %v18926_v47 = vld [vmem:[#allocation32_spill] sm:$0xff]  ;;  %v18932_v29 = vld [vmem:[#allocation54_spill] sm:$0xff] }
 0xb7a   : > { %v4215_v32 = vpop.xlane.xlu0 %4214  ;;  %4284 = vadd.xlane.f32.xlu1 %v16067_v30  ;;  %13233 = vpow2.f32 %v4260_v61  ;;  %v18928_v61 = vld [vmem:[#allocation36_spill] sm:$0xff] }
 0xb7b   : > { %v4238_v20 = vsub.f32 %v16027_v55, %v4215_v32  ;;  %v4264_v28 = vmul.f32 1.442695, %v4239_v14  ;;  %v18927_v14 = vld [vmem:[#allocation34_spill] sm:$0xff] }
 0xb7c   : > { %v4229_v56 = vpop.xlane.xlu1 %4228 }
 0xb7d   : > { %v4262_v22 = vmul.f32 1.442695, %v4238_v20  ;;  %13235 = vpow2.f32 %v4264_v28  ;;  %v4245_v36 = vsub.f32 %v16032_v35, %v4229_v56  ;;  %v18929_v20 = vld [vmem:[#allocation38_spill] sm:$0xff]  ;;  %v18931_v28 = vld [vmem:[#allocation52_spill] sm:$0xff] }
 0xb7e   : > { %v4227_v2 = vpop.xlane.xlu0 %4226 }
 0xb7f   : > { %13237 = vpow2.f32 %v4262_v22  ;;  %v4276_v45 = vmul.f32 1.442695, %v4245_v36  ;;  %v18933_v22 = vld [vmem:[#allocation56_spill] sm:$0xff] }
 0xb80   : > { %v4225_v19 = vpop.xlane.xlu1 %4224  ;;  %13239 = vpow2.f32 %v4268_v58  ;;  %v18934_v58 = vld [vmem:[#allocation58_spill] sm:$0xff] }
 0xb81   : > { %v4243_v7 = vsub.f32 %v16042_v53, %v4225_v19  ;;  %v16083_v10 = vpop.eup %13227  ;;  %13241 = vpow2.f32 %v4266_v40  ;;  %v4244_v53 = vsub.f32 %v16037_v18, %v4227_v2  ;;  %v18914_v19 = vld [vmem:[#allocation40_spill] sm:$0xff] }
 0xb82   : > { %v4223_v1 = vpop.xlane.xlu0 %4222  ;;  %v16088_v48 = vpop.eup %13229  ;;  %v18935_v40 = vld [vmem:[#allocation60_spill] sm:$0xff] }
 0xb83   : > { %v4242_v55 = vsub.f32 %v16047_v33, %v4223_v1  ;;  %v4272_v34 = vmul.f32 1.442695, %v4243_v7  ;;  %v16090_v54 = vpop.eup %13231  ;;  %v4274_v35 = vmul.f32 1.442695, %v4244_v53  ;;  %v18915_v1 = vld [vmem:[#allocation41_spill] sm:$0xff] }
 0xb84   : > { %v4361_v39 = vpop.permute.xlu1 %4360  ;;  %v16095_v50 = vpop.eup %13233 }
 0xb85   : > { %v4270_v37 = vmul.f32 1.442695, %v4242_v55  ;;  %13243 = vpow2.f32 %v4272_v34  ;;  %v18936_v55 = vld [vmem:[#allocation62_spill] sm:$0xff] }
 0xb86   : > { %v4359_v24 = vpop.permute.xlu0 %4358 }
 0xb87   : > { %11795 = vmatprep.subr.bf16.mxu1 %v4359_v24  ;;  %v16097_v33 = vpop.eup %13235  ;;  %13245 = vpow2.f32 %v4270_v37 }
 0xb88   : > { %11796 = vmatpush3.bf16.msra.mxu1 %v4359_v24  ;;  %13247 = vpow2.f32 %v4276_v45  ;;  %v18916_v24 = vld [vmem:[#allocation39_spill] sm:$0xff] }
 0xb89   : > { %11797 = vmatprep.subr.bf16.mxu1 %v4361_v39  ;;  %v16101_v49 = vpop.eup %13237  ;;  %13249 = vpow2.f32 %v4274_v35 }
 0xb8a   : > { %v16103_v5 = vpop.eup %13239 }
 0xb8b   : > { %4364 = vrot.lane.b32.xlu1 %v18912_v13, %s13897_s11  ;;  %4362 = vrot.lane.b32.xlu0 %v18913_v41, %s13897_s11  ;;  %v16107_v18 = vpop.eup %13241  ;;  %v18918_v13 = vld [vmem:[#allocation43_spill] sm:$0xff]  ;;  %v18919_v41 = vld [vmem:[#allocation44_spill] sm:$0xff] }
 0xb8c   : > { %11798 = vmatpush3.bf16.msra.mxu1 %v4361_v39  ;;  %v18917_v39 = vld [vmem:[#allocation42_spill] sm:$0xff] }
 0xb8f   : > { %v16109_v23 = vpop.eup %13243 }
 0xb91   : > { %v16113_v32 = vpop.eup %13245 }
 0xb92   : > { %v16115_v56 = vpop.eup %13247 }
 0xb93   : > { %v16119_v2 = vpop.eup %13249 }
 0xbaa   : > { %4286 = vadd.xlane.f32.xlu0 %v16083_v10 }
 0xbae   : > { %4290 = vadd.xlane.f32.xlu0 %v16088_v48 }
 0xbaf   : > { %4288 = vadd.xlane.f32.xlu1 %v16090_v54 }
 0xbb2   : > { %4292 = vadd.xlane.f32.xlu0 %v16095_v50 }
 0xbb3   : > { %4296 = vadd.xlane.f32.xlu1 %v16097_v33 }
 0xbb6   : > { %4294 = vadd.xlane.f32.xlu0 %v16101_v49 }
 0xbb7   : > { %4300 = vadd.xlane.f32.xlu1 %v16103_v5 }
 0xbba   : > { %4298 = vadd.xlane.f32.xlu0 %v16107_v18 }
 0xbbb   : > { %4304 = vadd.xlane.f32.xlu1 %v16109_v23 }
 0xbbe   : > { %4302 = vadd.xlane.f32.xlu0 %v16113_v32 }
 0xbbf   : > { %4308 = vadd.xlane.f32.xlu1 %v16115_v56 }
 0xbc2   : > { %4306 = vadd.xlane.f32.xlu0 %v16119_v2 }
 0xbd0   : > { %5333 = vrot.lane.b32.xlu1 %v18914_v19, %s13895_s14 }
 0xbd4   : > { %5335 = vrot.lane.b32.xlu1 %v18915_v1, %s13895_s14 }
 0xbd8   : > { %5331 = vrot.lane.b32.xlu0 %v18916_v24, %s13895_s14  ;;  %5337 = vrot.lane.b32.xlu1 %v18917_v39, %s13895_s14 }
 0xbdc   : > { %5339 = vrot.lane.b32.xlu0 %v18918_v13, %s13895_s14  ;;  %5341 = vrot.lane.b32.xlu1 %v18919_v41, %s13895_s14 }
 0xbe0   : > { %5343 = vrot.lane.b32.xlu0 %v18920_v44, %s13895_s14  ;;  %5345 = vrot.lane.b32.xlu1 %v18921_v43, %s13895_s14 }
 0xbe4   : > { %5307 = vrot.lane.b32.xlu0 %v18922_v9, %s13895_s14  ;;  %5309 = vrot.lane.b32.xlu1 %v18923_v57, %s13895_s14 }
 0xbe8   : > { %5311 = vrot.lane.b32.xlu0 %v18924_v0, %s13895_s14  ;;  %5313 = vrot.lane.b32.xlu1 %v18925_v15, %s13895_s14 }
 0xbec   : > { %5315 = vrot.lane.b32.xlu0 %v18926_v47, %s13895_s14  ;;  %5317 = vrot.lane.b32.xlu1 %v18927_v14, %s13895_s14 }
 0xbf0   : > { %5319 = vrot.lane.b32.xlu0 %v18928_v61, %s13895_s14  ;;  %5321 = vrot.lane.b32.xlu1 %v18929_v20, %s13895_s14 }
 0xbf4   : > { %5684 = vrot.lane.b32.xlu0 %v18896_v42, %s13895_s14  ;;  %5686 = vrot.lane.b32.xlu1 %v18930_v21, %s13895_s14 }
 0xbf8   : > { %5688 = vrot.lane.b32.xlu0 %v18931_v28, %s13895_s14  ;;  %5690 = vrot.lane.b32.xlu1 %v18932_v29, %s13895_s14 }
 0xbfc   : > { %5692 = vrot.lane.b32.xlu0 %v18933_v22, %s13895_s14  ;;  %5694 = vrot.lane.b32.xlu1 %v18934_v58, %s13895_s14 }
 0xbff   : > { %v4283_v7 = vpop.xlane.xlu1 %4282 }
 0xc00   : > { %5696 = vrot.lane.b32.xlu0 %v18935_v40, %s13895_s14  ;;  %5698 = vrot.lane.b32.xlu1 %v18936_v55, %s13895_s14  ;;  %s13805_s14 = sshll.u32 %s13899_s24, 4  ;;  %s13806_s14 = int_to_ptr.vmem [resolvable:$false] %s13805_s14 }
 0xc02   : > { %v4281_v36 = vpop.xlane.xlu0 %4280 }
 0xc03   : > { %13251 = vrcp.f32 %v4281_v36  ;;  %v4279_v34 = vpop.xlane.xlu1 %4278 }
 0xc04   : > { %13253 = vrcp.f32 %v4279_v34  ;;  %6022 = vrot.lane.b32.xlu0 %v18916_v24, %s13896_s23  ;;  %6024 = vrot.lane.b32.xlu1 %v18914_v19, %s13896_s23 }
 0xc05   : > { %13255 = vrcp.f32 %v4283_v7 }
 0xc06   : > { %v4363_v53 = vpop.permute.xlu0 %4362 }
 0xc07   : > { %11799 = vmatprep.subr.bf16.mxu1 %v4363_v53  ;;  %v4285_v37 = vpop.xlane.xlu1 %4284 }
 0xc08   : > { %13257 = vrcp.f32 %v4285_v37  ;;  %6026 = vrot.lane.b32.xlu0 %v18915_v1, %s13896_s23  ;;  %11800 = vmatpush3.bf16.msra.mxu1 %v4363_v53 }
 0xc09   : > { %6028 = vrot.lane.b32.xlu1 %v18917_v39, %s13896_s23 }
 0xc0b   : > { %v4365_v45 = vpop.permute.xlu1 %4364 }
 0xc0c   : > { %6030 = vrot.lane.b32.xlu0 %v18918_v13, %s13896_s23  ;;  %11801 = vmatprep.subr.bf16.mxu1 %v4365_v45 }
 0xc0d   : > { %v13252_v35 = vpop.eup %13251  ;;  %6032 = vrot.lane.b32.xlu1 %v18919_v41, %s13896_s23  ;;  %11802 = vmatpush3.bf16.msra.mxu1 %v4365_v45 }
 0xc0e   : > { %v13254_v7 = vpop.eup %13253  ;;  %12459 = vmatprep.subr.msk.bf16.mxu1 %vm18937_vm14, %v18916_v24  ;;  %v4327_v36 = vmul.f32 %v13252_v35, %v16061_v46 }
 0xc0f   : > { %v4326_v34 = vmul.f32 %v13254_v7, %v16063_v6  ;;  %v13256_v53 = vpop.eup %13255  ;;  %v4697_v6 = vsel %vm18937_vm14, %v18916_v24, 0  ;;  %vm18940_vm14 = vmmov %vm18938_vm0 }
 0xc10   : > { %6034 = vrot.lane.b32.xlu0 %v18920_v44, %s13896_s23  ;;  %v4328_v17 = vmul.f32 %v13256_v53, %v16058_v25  ;;  %v4706_v25 = vsel %vm18942_vm13, %v18917_v39, 0  ;;  %vm18947_vm13 = vmmov %vm18938_vm0 }
 0xc11   : > { %6036 = vrot.lane.b32.xlu1 %v18921_v43, %s13896_s23  ;;  %v4342_v37 = vpack.c.bf16 %v4327_v36, %v4326_v34 }
 0xc12   : > { %v13258_v12 = vpop.eup %13257 }
 0xc13   : > { %v4329_v45 = vmul.f32 %v13258_v12, %v16067_v30  ;;  %11803 = vmatprep.mubr.bf16.mxu1 %v4342_v37  ;;  %v4703_v12 = vsel %vm18938_vm0, %v18915_v1, 0 }
 0xc14   : > { %6705 = vrot.lane.b32.xlu0 %v18916_v24, %s13897_s11 }
 0xc15   : > { %6006 = vrot.lane.b32.xlu1 %v18922_v9, %s13896_s23  ;;  %v4343_v46 = vpack.c.bf16 %v4329_v45, %v4328_v17  ;;  %v4700_v17 = vsel %vm18939_vm1, %v18914_v19, 0  ;;  %vm18943_vm1 = vmmov %vm18938_vm0 }
 0xc17   : > { %11804 = vmatmul.mubr.bf16.vlgmr.msra.gmra.mrb[80].mxu1 %v4343_v46 }
 0xc18   : > { %11820 = vmatpush3.bf16.xpose.msra.mxu1 %v4697_v6  ;;  %6010 = vrot.lane.b32.xlu0 %v18924_v0, %s13896_s23 }
 0xc19   : > { %12460 = vmatprep.subr.msk.bf16.mxu1 %vm18938_vm0, %v18914_v19  ;;  %6008 = vrot.lane.b32.xlu1 %v18923_v57, %s13896_s23 }
 0xc1c   : > { %6709 = vrot.lane.b32.xlu0 %v18915_v1, %s13897_s11 }
 0xc1d   : > { %6707 = vrot.lane.b32.xlu1 %v18914_v19, %s13897_s11 }
 0xc20   : > { %11822 = vmatpush3.bf16.xpose.msra.mxu1 %v4700_v17 }
 0xc21   : > { %12461 = vmatprep.subr.msk.bf16.mxu1 %vm18940_vm14, %v18915_v1  ;;  %6012 = vrot.lane.b32.xlu1 %v18925_v15, %s13896_s23  ;;  %vm18944_vm14 = vmmov %vm18938_vm0 }
 0xc22   : > { %v4709_v19 = vsel %vm18944_vm14, %v18918_v13, 0  ;;  %vm18950_vm14 = vmmov %vm18938_vm0 }
 0xc25   : > { %6711 = vrot.lane.b32.xlu1 %v18917_v39, %s13897_s11 }
 0xc28   : > { %11824 = vmatpush3.bf16.xpose.msra.mxu1 %v4703_v12 }
 0xc29   : > { %12462 = vmatprep.subr.msk.bf16.mxu1 %vm18941_vm11, %v18917_v39  ;;  %vm18946_vm11 = vmmov %vm18938_vm0 }
 0xc2a   : > { %v4712_v39 = vsel %vm18946_vm11, %v18919_v41, 0  ;;  %vm18951_vm11 = vmmov %vm18938_vm0 }
 0xc30   : > { %11826 = vmatpush3.bf16.xpose.msra.mxu1 %v4706_v25 }
 0xc31   : > { %12463 = vmatprep.subr.msk.bf16.mxu1 %vm18943_vm1, %v18918_v13  ;;  %vm18949_vm1 = vmmov %vm18938_vm0 }
 0xc37   : > { %v4287_v30 = vpop.xlane.xlu0 %4286 }
 0xc38   : > { %11828 = vmatpush3.bf16.xpose.msra.mxu1 %v4709_v19  ;;  %13259 = vrcp.f32 %v4287_v30 }
 0xc39   : > { %12464 = vmatprep.subr.msk.bf16.mxu1 %vm18945_vm15, %v18919_v41  ;;  %vm18948_vm15 = vmmov %vm18938_vm0 }
 0xc3a   : > { %v4715_v46 = vsel %vm18948_vm15, %v18920_v44, 0  ;;  %vm18953_vm15 = vmmov %vm18938_vm0 }
 0xc3b   : > { %v4291_v1 = vpop.xlane.xlu0 %4290 }
 0xc3c   : > { %v4289_v24 = vpop.xlane.xlu1 %4288 }
 0xc3d   : > { %13261 = vrcp.f32 %v4289_v24 }
 0xc3e   : > { %13263 = vrcp.f32 %v4291_v1 }
 0xc3f   : > { %v4293_v35 = vpop.xlane.xlu0 %4292 }
 0xc40   : > { %13265 = vrcp.f32 %v4293_v35  ;;  %11830 = vmatpush3.bf16.xpose.msra.mxu1 %v4712_v39  ;;  %v4297_v7 = vpop.xlane.xlu1 %4296 }
 0xc41   : > { %12465 = vmatprep.subr.msk.bf16.mxu1 %vm18947_vm13, %v18920_v44  ;;  %13267 = vrcp.f32 %v4297_v7  ;;  %vm18952_vm13 = vmmov %vm18938_vm0 }
 0xc42   : > { %v13260_v53 = vpop.eup %13259 }
 0xc43   : > { %v4295_v36 = vpop.xlane.xlu0 %4294  ;;  %v4330_v12 = vmul.f32 %v13260_v53, %v16083_v10 }
 0xc44   : > { %13269 = vrcp.f32 %v4295_v36  ;;  %v4301_v34 = vpop.xlane.xlu1 %4300 }
 0xc45   : > { %13271 = vrcp.f32 %v4301_v34 }
 0xc47   : > { %v13262_v37 = vpop.eup %13261  ;;  %v4299_v45 = vpop.xlane.xlu0 %4298 }
 0xc48   : > { %v13264_v6 = vpop.eup %13263  ;;  %13273 = vrcp.f32 %v4299_v45  ;;  %11832 = vmatpush3.bf16.xpose.msra.mxu1 %v4715_v46  ;;  %v4305_v17 = vpop.xlane.xlu1 %4304  ;;  %v4331_v25 = vmul.f32 %v13262_v37, %v16090_v54  ;;  %v4718_v54 = vsel %vm18949_vm1, %v18921_v43, 0  ;;  %vm18954_vm1 = vmmov %vm18938_vm0 }
 0xc49   : > { %12466 = vmatprep.subr.msk.bf16.mxu1 %vm18938_vm0, %v18921_v43  ;;  %13275 = vrcp.f32 %v4305_v17  ;;  %v4332_v24 = vmul.f32 %v13264_v6, %v16088_v48 }
 0xc4a   : > { %v13266_v30 = vpop.eup %13265  ;;  %v4344_v19 = vpack.c.bf16 %v4331_v25, %v4330_v12 }
 0xc4b   : > { %v4303_v1 = vpop.xlane.xlu0 %4302  ;;  %v4333_v35 = vmul.f32 %v13266_v30, %v16095_v50  ;;  %v13268_v39 = vpop.eup %13267 }
 0xc4c   : > { %13277 = vrcp.f32 %v4303_v1  ;;  %11807 = vmatprep.mubr.bf16.mxu1 %v4344_v19  ;;  %v4309_v7 = vpop.xlane.xlu1 %4308  ;;  %v4335_v37 = vmul.f32 %v13268_v39, %v16097_v33 }
 0xc4d   : > { %v4345_v36 = vpack.c.bf16 %v4333_v35, %v4332_v24  ;;  %13279 = vrcp.f32 %v4309_v7 }
 0xc4e   : > { %v13270_v34 = vpop.eup %13269 }
 0xc4f   : > { %v4307_v10 = vpop.xlane.xlu0 %4306  ;;  %11808 = vmatmul.mubr.bf16.gmra.mrb[84].mxu1 %v4345_v36  ;;  %v4334_v53 = vmul.f32 %v13270_v34, %v16101_v49  ;;  %v13272_v45 = vpop.eup %13271 }
 0xc50   : > { %13281 = vrcp.f32 %v4307_v10  ;;  %11834 = vmatpush3.bf16.xpose.msra.mxu1 %v4718_v54  ;;  %v4337_v17 = vmul.f32 %v13272_v45, %v16103_v5 }
 0xc51   : > { %v4346_v48 = vpack.c.bf16 %v4335_v37, %v4334_v53 }
 0xc52   : > { %v13274_v50 = vpop.eup %13273 }
 0xc53   : > { %v5332_v46 = vpop.permute.xlu0 %5331  ;;  %11811 = vmatprep.mubr.bf16.mxu1 %v4346_v48  ;;  %v4336_v6 = vmul.f32 %v13274_v50, %v16107_v18  ;;  %v13276_v12 = vpop.eup %13275 }
 0xc54   : > { %12467 = vmatprep.subr.msk.bf16.mxu1 %vm18950_vm14, %v5332_v46  ;;  %v4339_v33 = vmul.f32 %v13276_v12, %v16109_v23  ;;  %v5372_v5 = vsel %vm18953_vm15, %v5332_v46, 0  ;;  %vm18955_vm14 = vmmov %vm18938_vm0 }
 0xc55   : > { %v4347_v25 = vpack.c.bf16 %v4337_v17, %v4336_v6  ;;  %vm18959_vm15 = vmmov %vm18938_vm0 }
 0xc56   : > { %v13278_v30 = vpop.eup %13277 }
 0xc57   : > { %11812 = vmatmul.mubr.bf16.gmra.mrb[88].mxu1 %v4347_v25  ;;  %v4338_v49 = vmul.f32 %v13278_v30, %v16113_v32  ;;  %v13280_v19 = vpop.eup %13279  ;;  %v5334_v32 = vpop.permute.xlu1 %5333 }
 0xc58   : > { %v4341_v18 = vmul.f32 %v13280_v19, %v16115_v56  ;;  %v5375_v23 = vsel %vm18956_vm12, %v5334_v32, 0  ;;  %vm18961_vm12 = vmmov %vm18938_vm0 }
 0xc59   : > { %v4348_v1 = vpack.c.bf16 %v4339_v33, %v4338_v49 }
 0xc5a   : > { %v13282_v24 = vpop.eup %13281 }
 0xc5b   : > { %11815 = vmatprep.mubr.bf16.mxu1 %v4348_v1  ;;  %v4340_v35 = vmul.f32 %v13282_v24, %v16119_v2  ;;  %v5336_v56 = vpop.permute.xlu1 %5335  ;;  %v5340_v2 = vpop.permute.xlu0 %5339 }
 0xc5c   : > { %v5378_v7 = vsel %vm18960_vm10, %v5336_v56, 0  ;;  %vm18966_vm10 = vmmov %vm18938_vm0 }
 0xc5d   : > { %v4349_v39 = vpack.c.bf16 %v4341_v18, %v4340_v35  ;;  %v5384_v37 = vsel %vm18966_vm10, %v5340_v2, 0  ;;  %vm18973_vm10 = vmmov %vm18938_vm0 }
 0xc5f   : > { %11816 = vmatmul.mubr.bf16.gmra.mrb[92].mxu1 %v4349_v39  ;;  %v5338_v36 = vpop.permute.xlu1 %5337  ;;  %v5344_v34 = vpop.permute.xlu0 %5343 }
 0xc60   : > { %11835 = vmatprep.mubr.msk.bf16.mxu1 %vm18951_vm11, %v18922_v9  ;;  %vm18957_vm11 = vmmov %vm18938_vm0 }
 0xc63   : > { %v5308_v10 = vpop.permute.xlu0 %5307  ;;  %v5342_v53 = vpop.permute.xlu1 %5341 }
 0xc64   : > { %v5387_v50 = vsel %vm18938_vm0, %v5342_v53, 0 }
 0xc67   : > { %11836 = vmatmul.mubr.msk.bf16.vlgmr.msra.gmra.mrb[96].mxu1 %vm18952_vm13, %v18923_v57  ;;  %vm18958_vm13 = vmmov %vm18938_vm0  ;;  %v5346_v45 = vpop.permute.xlu1 %5345  ;;  %v5312_v48 = vpop.permute.xlu0 %5311 }
 0xc68   : > { %11884 = vmatpush3.bf16.xpose.msra.mxu1 %v5372_v5  ;;  %11839 = vmatprep.mubr.msk.bf16.mxu1 %vm18938_vm0, %v18924_v0 }
 0xc69   : > { %12468 = vmatprep.subr.msk.bf16.mxu1 %vm18954_vm1, %v5334_v32  ;;  %vm18962_vm1 = vmmov %vm18938_vm0 }
 0xc6b   : > { %v5310_v46 = vpop.permute.xlu1 %5309  ;;  %v5316_v6 = vpop.permute.xlu0 %5315 }
 0xc6f   : > { %11840 = vmatmul.mubr.msk.bf16.gmra.mrb[100].mxu1 %vm18955_vm14, %v18925_v15  ;;  %vm18963_vm14 = vmmov %vm18938_vm0  ;;  %v5314_v17 = vpop.permute.xlu1 %5313  ;;  %v5320_v25 = vpop.permute.xlu0 %5319 }
 0xc70   : > { %11886 = vmatpush3.bf16.xpose.msra.mxu1 %v5375_v23  ;;  %11843 = vmatprep.mubr.msk.bf16.mxu1 %vm18957_vm11, %v18926_v47  ;;  %v5381_v54 = vsel %vm18963_vm14, %v5338_v36, 0  ;;  %vm18964_vm11 = vmmov %vm18938_vm0 }
 0xc71   : > { %12469 = vmatprep.subr.msk.bf16.mxu1 %vm18958_vm13, %v5336_v56  ;;  %vm18965_vm13 = vmmov %vm18938_vm0 }
 0xc72   : > { %vm18970_vm14 = vmmov %vm18938_vm0 }
 0xc73   : > { %v5318_v30 = vpop.permute.xlu1 %5317  ;;  %v5685_v33 = vpop.permute.xlu0 %5684 }
 0xc77   : > { %11844 = vmatmul.mubr.msk.bf16.gmra.mrb[104].mxu1 %vm18959_vm15, %v18927_v14  ;;  %vm18967_vm15 = vmmov %vm18938_vm0  ;;  %v5322_v19 = vpop.permute.xlu1 %5321  ;;  %v5689_v24 = vpop.permute.xlu0 %5688 }
 0xc78   : > { %11888 = vmatpush3.bf16.xpose.msra.mxu1 %v5378_v7  ;;  %11847 = vmatprep.mubr.msk.bf16.mxu1 %vm18938_vm0, %v18928_v61 }
 0xc79   : > { %12470 = vmatprep.subr.msk.bf16.mxu1 %vm18961_vm12, %v5338_v36  ;;  %vm18968_vm12 = vmmov %vm18938_vm0 }
 0xc7b   : > { %v5687_v1 = vpop.permute.xlu1 %5686  ;;  %v5693_v18 = vpop.permute.xlu0 %5692 }
 0xc7f   : > { %11848 = vmatmul.mubr.msk.bf16.gmra.mrb[108].mxu1 %vm18962_vm1, %v18929_v20  ;;  %vm18969_vm1 = vmmov %vm18938_vm0  ;;  %v5691_v35 = vpop.permute.xlu1 %5690  ;;  %v5697_v5 = vpop.permute.xlu0 %5696 }
 0xc80   : > { %11890 = vmatpush3.bf16.xpose.msra.mxu1 %v5381_v54  ;;  %11899 = vmatprep.mubr.msk.bf16.mxu1 %vm18964_vm11, %v5308_v10  ;;  %v5390_v12 = vsel %vm18969_vm1, %v5344_v34, 0  ;;  %vm18971_vm11 = vmmov %vm18938_vm0 }
 0xc81   : > { %12471 = vmatprep.subr.msk.bf16.mxu1 %vm18965_vm13, %v5340_v2  ;;  %v5393_v49 = vsel %vm18971_vm11, %v5346_v45, 0  ;;  %vm18972_vm13 = vmmov %vm18938_vm0 }
 0xc82   : > { %vm18976_vm1 = vmmov %vm18938_vm0 }
 0xc83   : > { %v5695_v39 = vpop.permute.xlu1 %5694  ;;  %v16290_v23 = vpop.permute.xlu0 %6022  ;;  %vm18978_vm11 = vmmov %vm18938_vm0 }
 0xc87   : > { %v5699_v32 = vpop.permute.xlu1 %5698 }
 0xc88   : > { %11892 = vmatpush3.bf16.xpose.msra.mxu1 %v5384_v37 }
 0xc89   : > { %12472 = vmatprep.subr.msk.bf16.mxu1 %vm18967_vm15, %v5342_v53  ;;  %vm18974_vm15 = vmmov %vm18938_vm0 }
 0xc90   : > { %11894 = vmatpush3.bf16.xpose.msra.mxu1 %v5387_v50 }
 0xc91   : > { %12473 = vmatprep.subr.msk.bf16.mxu1 %vm18968_vm12, %v5344_v34  ;;  %vm18975_vm12 = vmmov %vm18938_vm0 }
 0xc98   : > { %11896 = vmatpush3.bf16.xpose.msra.mxu1 %v5390_v12 }
 0xc99   : > { %12474 = vmatprep.subr.msk.bf16.mxu1 %vm18970_vm14, %v5346_v45  ;;  %vm18977_vm14 = vmmov %vm18938_vm0 }
 0xca0   : > { %11898 = vmatpush3.bf16.xpose.msra.mxu1 %v5393_v49 }
 0xca1   : > { %11915 = vmatprep.subr.bf16.mxu1 %v5685_v33 }
 0xca7   : > { %11900 = vmatmul.mubr.msk.bf16.vlgmr.msra.gmra.mrb[112].mxu1 %vm18972_vm13, %v5310_v46  ;;  %vm18979_vm13 = vmmov %vm18938_vm0 }
 0xca8   : > { %11903 = vmatprep.mubr.msk.bf16.mxu1 %vm18973_vm10, %v5312_v48  ;;  %11916 = vmatpush3.bf16.msra.mxu1 %v5685_v33  ;;  %vm18980_vm10 = vmmov %vm18938_vm0 }
 0xca9   : > { %11917 = vmatprep.subr.bf16.mxu1 %v5687_v1 }
 0xcac   : > { %11918 = vmatpush3.bf16.msra.mxu1 %v5687_v1 }
 0xcad   : > { %11919 = vmatprep.subr.bf16.mxu1 %v5689_v24 }
 0xcaf   : > { %11904 = vmatmul.mubr.msk.bf16.gmra.mrb[116].mxu1 %vm18974_vm15, %v5314_v17  ;;  %vm18981_vm15 = vmmov %vm18938_vm0 }
 0xcb0   : > { %11907 = vmatprep.mubr.msk.bf16.mxu1 %vm18938_vm0, %v5316_v6  ;;  %11920 = vmatpush3.bf16.msra.mxu1 %v5689_v24 }
 0xcb1   : > { %11921 = vmatprep.subr.bf16.mxu1 %v5691_v35 }
 0xcb4   : > { %11922 = vmatpush3.bf16.msra.mxu1 %v5691_v35 }
 0xcb5   : > { %11923 = vmatprep.subr.bf16.mxu1 %v5693_v18 }
 0xcb7   : > { %11908 = vmatmul.mubr.msk.bf16.gmra.mrb[120].mxu1 %vm18975_vm12, %v5318_v30  ;;  %vm18982_vm12 = vmmov %vm18938_vm0 }
 0xcb8   : > { %11911 = vmatprep.mubr.msk.bf16.mxu1 %vm18976_vm1, %v5320_v25  ;;  %11924 = vmatpush3.bf16.msra.mxu1 %v5693_v18  ;;  %vm18983_vm1 = vmmov %vm18938_vm0 }
 0xcb9   : > { %11925 = vmatprep.subr.bf16.mxu1 %v5695_v39 }
 0xcbc   : > { %11926 = vmatpush3.bf16.msra.mxu1 %v5695_v39 }
 0xcbd   : > { %11927 = vmatprep.subr.bf16.mxu1 %v5697_v5 }
 0xcbf   : > { %11912 = vmatmul.mubr.msk.bf16.gmra.mrb[124].mxu1 %vm18977_vm14, %v5322_v19  ;;  %vm18984_vm14 = vmmov %vm18938_vm0 }
 0xcc0   : > { %11928 = vmatpush3.bf16.msra.mxu1 %v5697_v5 }
 0xcc1   : > { %11929 = vmatprep.subr.bf16.mxu1 %v5699_v32 }
 0xcc4   : > { %11930 = vmatpush3.bf16.msra.mxu1 %v5699_v32 }
 0xcc5   : > { %12475 = vmatprep.subr.msk.bf16.mxu1 %vm18978_vm11, %v16290_v23  ;;  %vm18985_vm11 = vnez %v18857_v16 }
 0xcea   : > { %v11805_v56 = vpop.f32.mrb[80].mxu1 }
 0xceb   : > { %v4408_v2 = vpop.f32.mrb[81].mxu1 }
 0xcec   : > { %v11806_v7 = vpop.f32.mrb[82].mxu1 }
 0xced   : > { %v4472_v36 = vpack.c.bf16 %v11806_v7, %v11805_v56  ;;  %v4411_v34 = vpop.f32.mrb[83].mxu1 }
 0xcee   : > { %v4471_v10 = vpack.c.bf16 %v4411_v34, %v4408_v2 }
 0xcf0   : > { %10956 = vmatmul.mubr.msk.bf16.vlgmr.msra.gmra.mrb[112].mxu0 %vm18979_vm13, %v4471_v10  ;;  %vm18986_vm13 = vmmov %vm18938_vm0 }
 0xcf1   : > { %11852 = vmatpush3.bf16.msra.mxu0 %v18896_v42  ;;  %4569 = vmatprep.mubr.bf16.mxu0 %v18808_v31 }
 0xcf2   : > { %11853 = vmatprep.subr.bf16.mxu0 %v18930_v21 }
 0xcf5   : > { %11854 = vmatpush3.bf16.msra.mxu0 %v18930_v21 }
 0xcf6   : > { %11855 = vmatprep.subr.bf16.mxu0 %v18931_v28 }
 0xcf8   : > { %10957 = vmatmul.mubr.msk.bf16.gmra.mrb[116].mxu0 %vm18980_vm10, %v4472_v36  ;;  %vm18987_vm10 = vnez %v18858_v8 }
 0xcf9   : > { %11856 = vmatpush3.bf16.msra.mxu0 %v18931_v28  ;;  %4579 = vmatprep.mubr.bf16.mxu0 %v18808_v31 }
 0xcfa   : > { %11857 = vmatprep.subr.bf16.mxu0 %v18932_v29 }
 0xcfd   : > { %11858 = vmatpush3.bf16.msra.mxu0 %v18932_v29 }
 0xcfe   : > { %11859 = vmatprep.subr.bf16.mxu0 %v18933_v22 }
 0xd01   : > { %11860 = vmatpush3.bf16.msra.mxu0 %v18933_v22 }
 0xd02   : > { %11861 = vmatprep.subr.bf16.mxu0 %v18934_v58 }
 0xd05   : > { %11862 = vmatpush3.bf16.msra.mxu0 %v18934_v58 }
 0xd06   : > { %11863 = vmatprep.subr.bf16.mxu0 %v18935_v40 }
 0xd09   : > { %11864 = vmatpush3.bf16.msra.mxu0 %v18935_v40 }
 0xd0a   : > { %11865 = vmatprep.subr.bf16.mxu0 %v18936_v55 }
 0xd0d   : > { %11866 = vmatpush3.bf16.msra.mxu0 %v18936_v55 }
 0xd22   : > { %v11809_v54 = vpop.f32.mrb[84].mxu1 }
 0xd23   : > { %v4424_v53 = vpop.f32.mrb[85].mxu1 }
 0xd24   : > { %v11810_v37 = vpop.f32.mrb[86].mxu1 }
 0xd25   : > { %v4474_v45 = vpack.c.bf16 %v11810_v37, %v11809_v54  ;;  %v4427_v48 = vpop.f32.mrb[87].mxu1 }
 0xd26   : > { %v4473_v50 = vpack.c.bf16 %v4427_v48, %v4424_v53 }
 0xd28   : > { %10958 = vmatmul.mubr.msk.bf16.gmra.mrb[120].mxu0 %vm18981_vm15, %v4473_v50  ;;  %vm18988_vm15 = vnez %v18862_v38 }
 0xd29   : > { %4589 = vmatprep.mubr.bf16.mxu0 %v18808_v31 }
 0xd2a   : > { %v11813_v46 = vpop.f32.mrb[88].mxu1 }
 0xd2b   : > { %v4440_v6 = vpop.f32.mrb[89].mxu1 }
 0xd2c   : > { %v11814_v17 = vpop.f32.mrb[90].mxu1 }
 0xd2d   : > { %v4476_v12 = vpack.c.bf16 %v11814_v17, %v11813_v46  ;;  %v4443_v25 = vpop.f32.mrb[91].mxu1 }
 0xd2e   : > { %v4475_v30 = vpack.c.bf16 %v4443_v25, %v4440_v6 }
 0xd30   : > { %10959 = vmatmul.mubr.msk.bf16.gmra.mrb[124].mxu0 %vm18938_vm0, %v4474_v45  ;;  %vm18989_vm0 = vnez %v18866_v27 }
 0xd31   : > { %4599 = vmatprep.mubr.bf16.mxu0 %v18808_v31 }
 0xd32   : > { %v11817_v49 = vpop.f32.mrb[92].mxu1 }
 0xd33   : > { %v4456_v33 = vpop.f32.mrb[93].mxu1 }
 0xd34   : > { %v11818_v19 = vpop.f32.mrb[94].mxu1 }
 0xd35   : > { %v4478_v1 = vpack.c.bf16 %v11818_v19, %v11817_v49  ;;  %v4459_v24 = vpop.f32.mrb[95].mxu1 }
 0xd36   : > { %v4477_v35 = vpack.c.bf16 %v4459_v24, %v4456_v33 }
 0xd38   : > { %10960 = vmatmul.mubr.msk.bf16.gmra.mrb[128].mxu0 %vm18982_vm12, %v4475_v30  ;;  %vm18991_vm12 = vnez %v18860_v3 }
 0xd39   : > { %4609 = vmatprep.mubr.bf16.mxu0 %v18808_v31 }
 0xd3a   : > { %v11837_v18 = vpop.f32.mrb[96].mxu1 }
 0xd3b   : > { %v4819_v39 = vmul.f32 0.2, %v11837_v18  ;;  %v4754_v5 = vpop.f32.mrb[97].mxu1 }
 0xd3c   : > { %v11838_v32 = vpop.f32.mrb[98].mxu1  ;;  %v4817_v56 = vmul.f32 0.2, %v4754_v5 }
 0xd3d   : > { %v4757_v2 = vpop.f32.mrb[99].mxu1  ;;  %v16321_v7 = vsel %vm15034_vm2, %v4819_v39, -1e+30  ;;  %v4820_v34 = vmul.f32 0.2, %v11838_v32 }
 0xd3e   : > { %v4818_v36 = vmul.f32 0.2, %v4757_v2  ;;  %4853 = vmax.xlane.f32.xlu0 %v16321_v7  ;;  %v16332_v54 = vsel %vm15051_vm4, %v4817_v56, -1e+30 }
 0xd3f   : > { %v16338_v48 = vsel %vm15066_vm5, %v4820_v34, -1e+30 }
 0xd40   : > { %10961 = vmatmul.mubr.msk.bf16.gmra.mrb[132].mxu0 %vm18983_vm1, %v4476_v12  ;;  %v16327_v10 = vsel %vm15043_vm3, %v4818_v36, -1e+30  ;;  %vm18992_vm1 = vnez %v18868_v4 }
 0xd41   : > { %4851 = vmax.xlane.f32.xlu1 %v16327_v10  ;;  %4619 = vmatprep.mubr.bf16.mxu0 %v18808_v31 }
 0xd42   : > { %4849 = vmax.xlane.f32.xlu0 %v16332_v54  ;;  %v11841_v53 = vpop.f32.mrb[100].mxu1 }
 0xd43   : > { %v4770_v37 = vpop.f32.mrb[101].mxu1  ;;  %v4823_v50 = vmul.f32 0.2, %v11841_v53 }
 0xd44   : > { %v11842_v45 = vpop.f32.mrb[102].mxu1  ;;  %v4821_v25 = vmul.f32 0.2, %v4770_v37 }
 0xd45   : > { %v4824_v46 = vmul.f32 0.2, %v11842_v45  ;;  %v4773_v6 = vpop.f32.mrb[103].mxu1  ;;  %v16349_v30 = vsel %vm15085_vm7, %v4823_v50, -1e+30 }
 0xd46   : > { %4855 = vmax.xlane.f32.xlu0 %v16338_v48  ;;  %v4822_v17 = vmul.f32 0.2, %v4773_v6 }
 0xd47   : > { %v16343_v12 = vsel %vm15077_vm6, %v4824_v46, -1e+30 }
 0xd48   : > { %10962 = vmatmul.mubr.msk.bf16.gmra.mrb[136].mxu0 %vm18984_vm14, %v4477_v35  ;;  %4863 = vmax.xlane.f32.xlu1 %v16343_v12  ;;  %v16355_v19 = vsel %vm15095_vm8, %v4822_v17, -1e+30  ;;  %v16360_v35 = vsel %vm15105_vm9, %v4821_v25, -1e+30 }
 0xd49   : > { %4629 = vmatprep.mubr.bf16.mxu0 %v18808_v31 }
 0xd4a   : > { %4861 = vmax.xlane.f32.xlu0 %v16349_v30  ;;  %v11845_v49 = vpop.f32.mrb[104].mxu1 }
 0xd4b   : > { %v4786_v33 = vpop.f32.mrb[105].mxu1  ;;  %v4827_v18 = vmul.f32 0.2, %v11845_v49 }
 0xd4c   : > { %v11846_v24 = vpop.f32.mrb[106].mxu1  ;;  %4859 = vmax.xlane.f32.xlu1 %v16355_v19  ;;  %v4825_v56 = vmul.f32 0.2, %v4786_v33 }
 0xd4d   : > { %v4828_v39 = vmul.f32 0.2, %v11846_v24  ;;  %v4789_v5 = vpop.f32.mrb[107].mxu1  ;;  %v16371_v2 = vsel %vm18987_vm10, %v4827_v18, -1e+30  ;;  %v18994_v24 = vld [vmem:[#allocation76_spill] sm:$0xff] }
 0xd4e   : > { %4857 = vmax.xlane.f32.xlu0 %v16360_v35  ;;  %v4826_v45 = vmul.f32 0.2, %v4789_v5  ;;  %v16376_v46 = vsel %vm18988_vm15, %v4825_v56, -1e+30  ;;  %vm18995_vm14 = vnez %v18994_v24 }
 0xd4f   : > { %v16365_v32 = vsel %vm18985_vm11, %v4828_v39, -1e+30  ;;  %v18996_v39 = vld [vmem:[#allocation77_spill] sm:$0xff] }
 0xd50   : > { %10963 = vmatmul.mubr.msk.bf16.gmra.mrb[140].mxu0 %vm18986_vm13, %v4478_v1  ;;  %4871 = vmax.xlane.f32.xlu1 %v16365_v32  ;;  %v16386_v25 = vsel %vm18991_vm12, %v4826_v45, -1e+30  ;;  %vm18997_vm13 = vnez %v18996_v39 }
 0xd52   : > { %4869 = vmax.xlane.f32.xlu0 %v16371_v2  ;;  %v11849_v36 = vpop.f32.mrb[108].mxu1 }
 0xd53   : > { %v4802_v34 = vpop.f32.mrb[109].mxu1  ;;  %v4831_v17 = vmul.f32 0.2, %v11849_v36 }
 0xd54   : > { %v4829_v53 = vmul.f32 0.2, %v4802_v34  ;;  %v11850_v37 = vpop.f32.mrb[110].mxu1 }
 0xd55   : > { %v4805_v50 = vpop.f32.mrb[111].mxu1  ;;  %v4832_v1 = vmul.f32 0.2, %v11850_v37  ;;  %v16396_v18 = vsel %vm18995_vm14, %v4831_v17, -1e+30 }
 0xd56   : > { %4865 = vmax.xlane.f32.xlu0 %v16376_v46  ;;  %v16381_v6 = vsel %vm18989_vm0, %v4829_v53, -1e+30  ;;  %v4830_v33 = vmul.f32 0.2, %v4805_v50 }
 0xd57   : > { %18990 = vst [vmem:[#allocation27_spill] sm:$0xff] %v16381_v6  ;;  %4873 = vmax.xlane.f32.xlu1 %v16381_v6  ;;  %v16391_v49 = vsel %vm18992_vm1, %v4832_v1, -1e+30 }
 0xd58   : > { %18993 = vst [vmem:[#allocation29_spill] sm:$0xff] %v16391_v49  ;;  %v16401_v5 = vsel %vm18997_vm13, %v4830_v33, -1e+30 }
 0xd5a   : > { %4867 = vmax.xlane.f32.xlu0 %v16386_v25 }
 0xd5b   : > { %4879 = vmax.xlane.f32.xlu1 %v16391_v49 }
 0xd5e   : > { %4877 = vmax.xlane.f32.xlu0 %v16396_v18 }
 0xd62   : > { %4875 = vmax.xlane.f32.xlu0 %v16401_v5 }
 0xd7a   : > { %v11901_v56 = vpop.f32.mrb[112].mxu1 }
 0xd7b   : > { %v5494_v36 = vmul.f32 0.2, %v11901_v56  ;;  %v5429_v34 = vpop.f32.mrb[113].mxu1 }
 0xd7c   : > { %v11902_v53 = vpop.f32.mrb[114].mxu1  ;;  %v5492_v37 = vmul.f32 0.2, %v5429_v34 }
 0xd7d   : > { %v5432_v45 = vpop.f32.mrb[115].mxu1  ;;  %v16406_v50 = vsel %vm15034_vm2, %v5494_v36, -1e+30  ;;  %v5495_v17 = vmul.f32 0.2, %v11902_v53 }
 0xd7e   : > { %v5493_v1 = vmul.f32 0.2, %v5432_v45  ;;  %5528 = vmax.xlane.f32.xlu0 %v16406_v50  ;;  %v16416_v56 = vsel %vm15051_vm4, %v5492_v37, -1e+30 }
 0xd7f   : > { %v16421_v45 = vsel %vm15066_vm5, %v5495_v17, -1e+30 }
 0xd80   : > { %v16411_v33 = vsel %vm15043_vm3, %v5493_v1, -1e+30 }
 0xd81   : > { %5526 = vmax.xlane.f32.xlu1 %v16411_v33 }
 0xd82   : > { %5524 = vmax.xlane.f32.xlu0 %v16416_v56  ;;  %v11905_v34 = vpop.f32.mrb[116].mxu1 }
 0xd83   : > { %v5445_v11 = vpop.f32.mrb[117].mxu1  ;;  %v5498_v53 = vmul.f32 0.2, %v11905_v34 }
 0xd84   : > { %v11906_v36 = vpop.f32.mrb[118].mxu1  ;;  %v5496_v37 = vmul.f32 0.2, %v5445_v11 }
 0xd85   : > { %v5499_v31 = vmul.f32 0.2, %v11906_v36  ;;  %v5448_v59 = vpop.f32.mrb[119].mxu1  ;;  %v16431_v40 = vsel %vm15085_vm7, %v5498_v53, -1e+30 }
 0xd86   : > { %5530 = vmax.xlane.f32.xlu0 %v16421_v45  ;;  %v5497_v1 = vmul.f32 0.2, %v5448_v59 }
 0xd87   : > { %v16426_v60 = vsel %vm15077_vm6, %v5499_v31, -1e+30  ;;  %v16441_v31 = vsel %vm15105_vm9, %v5496_v37, -1e+30 }
 0xd88   : > { %5538 = vmax.xlane.f32.xlu1 %v16426_v60  ;;  %v16436_v36 = vsel %vm15095_vm8, %v5497_v1, -1e+30 }
 0xd8a   : > { %5536 = vmax.xlane.f32.xlu0 %v16431_v40  ;;  %v11909_v17 = vpop.f32.mrb[120].mxu1 }
 0xd8b   : > { %v5461_v34 = vpop.f32.mrb[121].mxu1  ;;  %v5502_v11 = vmul.f32 0.2, %v11909_v17 }
 0xd8c   : > { %v11910_v59 = vpop.f32.mrb[122].mxu1  ;;  %5534 = vmax.xlane.f32.xlu1 %v16436_v36  ;;  %v5500_v1 = vmul.f32 0.2, %v5461_v34 }
 0xd8d   : > { %v5503_v52 = vmul.f32 0.2, %v11910_v59  ;;  %v5464_v62 = vpop.f32.mrb[123].mxu1  ;;  %v16451_v51 = vsel %vm18987_vm10, %v5502_v11, -1e+30 }
 0xd8e   : > { %5532 = vmax.xlane.f32.xlu0 %v16441_v31  ;;  %v5501_v53 = vmul.f32 0.2, %v5464_v62  ;;  %v16461_v34 = vsel %vm18988_vm15, %v5500_v1, -1e+30  ;;  %v16480_v1 = vpop.permute.xlu0 %6026 }
 0xd8f   : > { %v16446_v63 = vsel %vm18985_vm11, %v5503_v52, -1e+30 }
 0xd90   : > { %5546 = vmax.xlane.f32.xlu1 %v16446_v63  ;;  %v16456_v59 = vsel %vm18991_vm12, %v5501_v53, -1e+30  ;;  %v16469_v53 = vpop.permute.xlu1 %6024 }
 0xd92   : > { %5544 = vmax.xlane.f32.xlu0 %v16451_v51  ;;  %v11913_v37 = vpop.f32.mrb[124].mxu1 }
 0xd93   : > { %v5477_v17 = vpop.f32.mrb[125].mxu1  ;;  %v5506_v52 = vmul.f32 0.2, %v11913_v37 }
 0xd94   : > { %v11914_v62 = vpop.f32.mrb[126].mxu1  ;;  %5542 = vmax.xlane.f32.xlu1 %v16456_v59  ;;  %v5504_v11 = vmul.f32 0.2, %v5477_v17  ;;  %v16476_v37 = vpop.permute.xlu1 %6028 }
 0xd95   : > { %v5480_v16 = vpop.f32.mrb[127].mxu1  ;;  %v16466_v8 = vsel %vm18995_vm14, %v5506_v52, -1e+30  ;;  %v16486_v52 = vpop.permute.xlu0 %6030  ;;  %v5507_v15 = vmul.f32 0.2, %v11914_v62 }
 0xd96   : > { %5540 = vmax.xlane.f32.xlu0 %v16461_v34  ;;  %v16473_v3 = vsel %vm18989_vm0, %v5504_v11, -1e+30  ;;  %v5505_v58 = vmul.f32 0.2, %v5480_v16  ;;  %vm19012_vm0 = vcmask 261120  }
 0xd97   : > { %vm19014_vm14 = vmmov %vm19012_vm0 }
 0xd98   : > { %v16482_v17 = vpop.permute.xlu1 %6032  ;;  %v16519_v62 = vsel %vm18997_vm13, %v5505_v58, -1e+30  ;;  %vm19013_vm13 = vmmov %vm19012_vm0 }
 0xd99   : > { %v16492_v11 = vpop.permute.xlu0 %6034  ;;  %vm19052_vm15 = vmmov %vm19012_vm0 }
 0xd9a   : > { %5552 = vmax.xlane.f32.xlu0 %v16466_v8  ;;  %vm19054_vm12 = vmmov %vm19012_vm0 }
 0xd9b   : > { %vm19061_vm10 = vmmov %vm19012_vm0 }
 0xd9c   : > { %v16488_v24 = vpop.permute.xlu1 %6036 }
 0xd9d   : > { %18998 = vst [vmem:[#allocation31_spill] sm:$0xff] %v16488_v24  ;;  %v16496_v38 = vpop.permute.xlu0 %6705 }
 0xd9e   : > { %5548 = vmax.xlane.f32.xlu0 %v16473_v3  ;;  %19000 = vst [vmem:[#allocation35_spill] sm:$0xff] %v16496_v38 }
 0xda0   : > { %v16494_v27 = vpop.permute.xlu1 %6006 }
 0xda1   : > { %18999 = vst [vmem:[#allocation33_spill] sm:$0xff] %v16494_v27  ;;  %v16500_v22 = vpop.permute.xlu0 %6010  ;;  %v16511_v27 = vsel %vm18992_vm1, %v5507_v15, -1e+30  ;;  %vm19015_vm1 = vmmov %vm19012_vm0 }
 0xda2   : > { %19002 = vst [vmem:[#allocation47_spill] sm:$0xff] %v16500_v22 }
 0xda4   : > { %v16498_v26 = vpop.permute.xlu1 %6008 }
 0xda5   : > { %6016 = vrot.lane.b32.xlu1 %v18927_v14, %s13896_s23  ;;  %19001 = vst [vmem:[#allocation37_spill] sm:$0xff] %v16498_v26 }
 0xda8   : > { %v16502_v21 = vpop.permute.xlu1 %6707 }
 0xda9   : > { %6713 = vrot.lane.b32.xlu1 %v18918_v13, %s13897_s11  ;;  %19003 = vst [vmem:[#allocation49_spill] sm:$0xff] %v16502_v21  ;;  %v16504_v13 = vpop.permute.xlu0 %6709 }
 0xdaa   : > { %19004 = vst [vmem:[#allocation81_spill] sm:$0xff] %v16504_v13 }
 0xdac   : > { %v16506_v14 = vpop.permute.xlu1 %6012 }
 0xdad   : > { %19005 = vst [vmem:[#allocation80_spill] sm:$0xff] %v16506_v14 }
 0xdb0   : > { %v16513_v29 = vpop.permute.xlu1 %6711 }
 0xdb1   : > { %19006 = vst [vmem:[#allocation83_spill] sm:$0xff] %v16513_v29 }
 0xdb4   : > { %6014 = vrot.lane.b32.xlu0 %v18926_v47, %s13896_s23 }
 0xdcb   : > { %v4854_v55 = vpop.xlane.xlu0 %4853 }
 0xdcc   : > { %v4883_v47 = vsub.f32 %v16321_v7, %v4854_v55 }
 0xdcd   : > { %5554 = vmax.xlane.f32.xlu1 %v16511_v27 }
 0xdce   : > { %v4901_v22 = vmul.f32 1.442695, %v4883_v47  ;;  %v4852_v16 = vpop.xlane.xlu1 %4851 }
 0xdcf   : > { %v4850_v26 = vpop.xlane.xlu0 %4849  ;;  %v4882_v15 = vsub.f32 %v16327_v10, %v4852_v16 }
 0xdd0   : > { %13283 = vpow2.f32 %v4901_v22  ;;  %v4881_v13 = vsub.f32 %v16332_v54, %v4850_v26 }
 0xdd1   : > { %5550 = vmax.xlane.f32.xlu1 %v16519_v62  ;;  %v4899_v22 = vmul.f32 1.442695, %v4882_v15 }
 0xdd2   : > { %v4897_v55 = vmul.f32 1.442695, %v4881_v13 }
 0xdd3   : > { %v4856_v7 = vpop.xlane.xlu0 %4855 }
 0xdd4   : > { %13285 = vpow2.f32 %v4897_v55  ;;  %v4884_v4 = vsub.f32 %v16338_v48, %v4856_v7 }
 0xdd5   : > { %v4864_v29 = vpop.xlane.xlu1 %4863 }
 0xdd6   : > { %v4903_v47 = vmul.f32 1.442695, %v4884_v4  ;;  %v4888_v28 = vsub.f32 %v16343_v12, %v4864_v29 }
 0xdd7   : > { %v4862_v14 = vpop.xlane.xlu0 %4861 }
 0xdd8   : > { %13287 = vpow2.f32 %v4903_v47  ;;  %v4887_v26 = vsub.f32 %v16349_v30, %v4862_v14 }
 0xdd9   : > { %v4860_v54 = vpop.xlane.xlu1 %4859  ;;  %13289 = vpow2.f32 %v4899_v22 }
 0xdda   : > { %v16525_v58 = vpop.eup %13283  ;;  %v4909_v39 = vmul.f32 1.442695, %v4887_v26  ;;  %v4886_v10 = vsub.f32 %v16355_v19, %v4860_v54 }
 0xddb   : > { %v4858_v21 = vpop.xlane.xlu0 %4857  ;;  %4933 = vadd.xlane.f32.xlu0 %v16525_v58 }
 0xddc   : > { %v4885_v13 = vsub.f32 %v16360_v35, %v4858_v21  ;;  %13291 = vpow2.f32 %v4909_v39  ;;  %v4907_v16 = vmul.f32 1.442695, %v4886_v10 }
 0xddd   : > { %v16554_v15 = vpop.xlane.xlu1 %4871 }
 0xdde   : > { %v16530_v48 = vpop.eup %13285  ;;  %v4905_v4 = vmul.f32 1.442695, %v4885_v13 }
 0xddf   : > { %4929 = vadd.xlane.f32.xlu1 %v16530_v48  ;;  %v16547_v39 = vpop.xlane.xlu0 %4869 }
 0xde0   : > { %13293 = vpow2.f32 %v4905_v4 }
 0xde1   : > { %13295 = vpow2.f32 %v4907_v16 }
 0xde2   : > { %v16533_v14 = vpop.eup %13287 }
 0xde3   : > { %4935 = vadd.xlane.f32.xlu0 %v16533_v14  ;;  %v16536_v30 = vpop.eup %13289  ;;  %v16550_v55 = vpop.xlane.xlu0 %4865 }
 0xde4   : > { %v16558_v22 = vpop.xlane.xlu1 %4873 }
 0xde5   : > { %19007 = vst [vmem:[#allocation79_spill] sm:$0xff] %v16558_v22  ;;  %v4911_v22 = vmul.f32 1.442695, %v4888_v28 }
 0xde6   : > { %v16539_v19 = vpop.eup %13291 }
 0xde7   : > { %4931 = vadd.xlane.f32.xlu0 %v16536_v30  ;;  %v16552_v7 = vpop.xlane.xlu0 %4867 }
 0xde8   : > { %v16562_v54 = vpop.xlane.xlu1 %4879 }
 0xde9   : > { %19008 = vst [vmem:[#allocation86_spill] sm:$0xff] %v16562_v54 }
 0xdea   : > { %v16541_v21 = vpop.eup %13293 }
 0xdeb   : > { %4937 = vadd.xlane.f32.xlu1 %v16541_v21  ;;  %4941 = vadd.xlane.f32.xlu0 %v16539_v19  ;;  %v16545_v35 = vpop.eup %13295  ;;  %v16556_v47 = vpop.xlane.xlu0 %4877 }
 0xdef   : > { %4939 = vadd.xlane.f32.xlu0 %v16545_v35  ;;  %v16560_v26 = vpop.xlane.xlu0 %4875 }
 0xe0b   : > { %v5529_v10 = vpop.xlane.xlu0 %5528 }
 0xe0c   : > { %v5558_v13 = vsub.f32 %v16406_v50, %v5529_v10 }
 0xe0e   : > { %v5576_v4 = vmul.f32 1.442695, %v5558_v13  ;;  %v5527_v16 = vpop.xlane.xlu1 %5526 }
 0xe0f   : > { %v5557_v49 = vsub.f32 %v16411_v33, %v5527_v16  ;;  %v5525_v42 = vpop.xlane.xlu0 %5524 }
 0xe10   : > { %13297 = vpow2.f32 %v5576_v4  ;;  %v5556_v6 = vsub.f32 %v16416_v56, %v5525_v42 }
 0xe11   : > { %v5574_v38 = vmul.f32 1.442695, %v5557_v49 }
 0xe12   : > { %v5572_v0 = vmul.f32 1.442695, %v5556_v6 }
 0xe13   : > { %13299 = vpow2.f32 %v5574_v38  ;;  %v5531_v24 = vpop.xlane.xlu0 %5530 }
 0xe14   : > { %13301 = vpow2.f32 %v5572_v0  ;;  %v5559_v54 = vsub.f32 %v16421_v45, %v5531_v24 }
 0xe15   : > { %v5539_v57 = vpop.xlane.xlu1 %5538  ;;  %13303 = vpow2.f32 %v4911_v22 }
 0xe16   : > { %v5578_v50 = vmul.f32 1.442695, %v5559_v54 }
 0xe17   : > { %v5537_v10 = vpop.xlane.xlu0 %5536 }
 0xe18   : > { %13305 = vpow2.f32 %v5578_v50  ;;  %v5562_v29 = vsub.f32 %v16431_v40, %v5537_v10 }
 0xe19   : > { %v5535_v12 = vpop.xlane.xlu1 %5534 }
 0xe1a   : > { %v16570_v33 = vpop.eup %13297  ;;  %v5584_v13 = vmul.f32 1.442695, %v5562_v29  ;;  %v5561_v42 = vsub.f32 %v16436_v36, %v5535_v12 }
 0xe1b   : > { %v5533_v6 = vpop.xlane.xlu0 %5532  ;;  %5608 = vadd.xlane.f32.xlu1 %v16570_v33 }
 0xe1c   : > { %13307 = vpow2.f32 %v5584_v13  ;;  %v5582_v38 = vmul.f32 1.442695, %v5561_v42  ;;  %v5560_v13 = vsub.f32 %v16441_v31, %v5533_v6  ;;  %v5563_v42 = vsub.f32 %v16426_v60, %v5539_v57 }
 0xe1d   : > { %v16574_v0 = vpop.eup %13299 }
 0xe1e   : > { %v16576_v28 = vpop.eup %13301  ;;  %5606 = vadd.xlane.f32.xlu0 %v16574_v0  ;;  %13309 = vpow2.f32 %v5582_v38  ;;  %v5580_v38 = vmul.f32 1.442695, %v5560_v13 }
 0xe1f   : > { %v5545_v49 = vpop.xlane.xlu0 %5544  ;;  %5604 = vadd.xlane.f32.xlu1 %v16576_v28  ;;  %v16580_v40 = vpop.eup %13303 }
 0xe22   : > { %v16582_v24 = vpop.eup %13305  ;;  %4943 = vadd.xlane.f32.xlu0 %v16580_v40 }
 0xe23   : > { %v5541_v56 = vpop.xlane.xlu0 %5540  ;;  %5610 = vadd.xlane.f32.xlu1 %v16582_v24 }
 0xe26   : > { %v16586_v45 = vpop.eup %13307 }
 0xe27   : > { %v5553_v36 = vpop.xlane.xlu0 %5552  ;;  %5616 = vadd.xlane.f32.xlu0 %v16586_v45 }
 0xe28   : > { %v5570_v22 = vsub.f32 %v16466_v8, %v5553_v36  ;;  %v16590_v54 = vpop.eup %13309  ;;  %v5547_v8 = vpop.xlane.xlu1 %5546  ;;  %v5586_v36 = vmul.f32 1.442695, %v5563_v42 }
 0xe2a   : > { %v5600_v4 = vmul.f32 1.442695, %v5570_v22  ;;  %v5566_v22 = vsub.f32 %v16451_v51, %v5545_v49 }
 0xe2b   : > { %v5549_v16 = vpop.xlane.xlu0 %5548  ;;  %5614 = vadd.xlane.f32.xlu0 %v16590_v54 }
 0xe2c   : > { %13311 = vpow2.f32 %v5600_v4  ;;  %v5568_v50 = vsub.f32 %v16473_v3, %v5549_v16  ;;  %v5543_v3 = vpop.xlane.xlu1 %5542  ;;  %v5592_v4 = vmul.f32 1.442695, %v5566_v22  ;;  %v5564_v16 = vsub.f32 %v16461_v34, %v5541_v56 }
 0xe2d   : > { %v5565_v57 = vsub.f32 %v16456_v59, %v5543_v3 }
 0xe2e   : > { %v5596_v10 = vmul.f32 1.442695, %v5568_v50  ;;  %v5567_v50 = vsub.f32 %v16446_v63, %v5547_v8 }
 0xe2f   : > { %v5590_v63 = vmul.f32 1.442695, %v5565_v57  ;;  %v16627_v13 = vpop.permute.xlu0 %6014 }
 0xe30   : > { %13313 = vpow2.f32 %v5596_v10  ;;  %v5588_v10 = vmul.f32 1.442695, %v5564_v16  ;;  %v5594_v60 = vmul.f32 1.442695, %v5567_v50 }
 0xe31   : > { %13315 = vpow2.f32 %v5580_v38 }
 0xe32   : > { %13317 = vpow2.f32 %v5586_v36 }
 0xe33   : > { %13319 = vpow2.f32 %v5592_v4 }
 0xe34   : > { %6715 = vrot.lane.b32.xlu1 %v18919_v41, %s13897_s11  ;;  %v16605_v41 = vpop.permute.xlu1 %6016  ;;  %13321 = vpow2.f32 %v5588_v10 }
 0xe35   : > { %19010 = vst [vmem:[#allocation84_spill] sm:$0xff] %v16605_v41  ;;  %13323 = vpow2.f32 %v5594_v60 }
 0xe36   : > { %v16596_v29 = vpop.eup %13311 }
 0xe37   : > { %19009 = vst [vmem:[#allocation85_spill] sm:$0xff] %v16596_v29  ;;  %5632 = vadd.xlane.f32.xlu0 %v16596_v29 }
 0xe38   : > { %v16609_v29 = vpop.permute.xlu1 %6713 }
 0xe39   : > { %19011 = vst [vmem:[#allocation82_spill] sm:$0xff] %v16609_v29 }
 0xe3a   : > { %v16599_v12 = vpop.eup %13313 }
 0xe3b   : > { %5628 = vadd.xlane.f32.xlu0 %v16599_v12  ;;  %v16611_v31 = vpop.eup %13315 }
 0xe3c   : > { %v16615_v6 = vpop.eup %13317 }
 0xe3d   : > { %v16619_v56 = vpop.eup %13319 }
 0xe3e   : > { %v16622_v8 = vpop.eup %13321 }
 0xe3f   : > { %v16625_v59 = vpop.eup %13323 }
 0xe58   : > { %5612 = vadd.xlane.f32.xlu1 %v16611_v31 }
 0xe5a   : > { %v5555_v51 = vpop.xlane.xlu1 %5554 }
 0xe5b   : > { %v5571_v49 = vsub.f32 %v16511_v27, %v5555_v51 }
 0xe5c   : > { %5618 = vadd.xlane.f32.xlu1 %v16615_v6 }
 0xe5d   : > { %v5602_v34 = vmul.f32 1.442695, %v5571_v49 }
 0xe5e   : > { %v5551_v38 = vpop.xlane.xlu1 %5550 }
 0xe5f   : > { %13325 = vpow2.f32 %v5602_v34 }
 0xe60   : > { %5624 = vadd.xlane.f32.xlu1 %v16619_v56  ;;  %13327 = vpow2.f32 %v5590_v63 }
 0xe64   : > { %5620 = vadd.xlane.f32.xlu1 %v16622_v8 }
 0xe68   : > { %5626 = vadd.xlane.f32.xlu1 %v16625_v59  ;;  %v4934_v3 = vpop.xlane.xlu0 %4933 }
 0xe69   : > { %v16630_v27 = vpop.eup %13325 }
 0xe6a   : > { %5634 = vadd.xlane.f32.xlu0 %v16630_v27  ;;  %v16633_v42 = vpop.eup %13327 }
 0xe6c   : > { %5622 = vadd.xlane.f32.xlu1 %v16633_v42  ;;  %v4930_v36 = vpop.xlane.xlu1 %4929 }
 0xe70   : > { %v4936_v22 = vpop.xlane.xlu0 %4935 }
 0xe71   : > { %13329 = vrcp.f32 %v4936_v22 }
 0xe72   : > { %13331 = vrcp.f32 %v4930_v36 }
 0xe73   : > { %13333 = vrcp.f32 %v4934_v3 }
 0xe74   : > { %v4932_v4 = vpop.xlane.xlu0 %4931 }
 0xe75   : > { %13335 = vrcp.f32 %v4932_v4 }
 0xe78   : > { %v4942_v16 = vpop.xlane.xlu0 %4941  ;;  %v4938_v50 = vpop.xlane.xlu1 %4937 }
 0xe79   : > { %13337 = vrcp.f32 %v4938_v50 }
 0xe7b   : > { %v13330_v10 = vpop.eup %13329 }
 0xe7c   : > { %v4940_v60 = vpop.xlane.xlu0 %4939  ;;  %v13332_v57 = vpop.eup %13331  ;;  %v4980_v63 = vmul.f32 %v13330_v10, %v16533_v14  ;;  %v4890_v10 = vsub.f32 %v16386_v25, %v16552_v7 }
 0xe7d   : > { %13339 = vrcp.f32 %v4940_v60  ;;  %6020 = vrot.lane.b32.xlu1 %v18929_v20, %s13896_s23  ;;  %v13334_v51 = vpop.eup %13333  ;;  %v4977_v34 = vmul.f32 %v13332_v57, %v16530_v48  ;;  %v5569_v48 = vsub.f32 %v16519_v62, %v5551_v38 }
 0xe7e   : > { %v4979_v36 = vmul.f32 %v13334_v51, %v16525_v58  ;;  %v4891_v58 = vsub.f32 %v16371_v2, %v16547_v39  ;;  %v4892_v51 = vsub.f32 %v16365_v32, %v16554_v15 }
 0xe7f   : > { %v13336_v49 = vpop.eup %13335  ;;  %v5598_v57 = vmul.f32 1.442695, %v5569_v48  ;;  %v6069_v48 = vsel %vm19012_vm0, %v16480_v1, 0 }
 0xe80   : > { %6018 = vrot.lane.b32.xlu0 %v18928_v61, %s13896_s23  ;;  %v4978_v3 = vmul.f32 %v13336_v49, %v16536_v30  ;;  %v4994_v4 = vpack.c.bf16 %v4980_v63, %v4979_v36  ;;  %v4915_v30 = vmul.f32 1.442695, %v4890_v10  ;;  %v4917_v49 = vmul.f32 1.442695, %v4891_v58 }
 0xe82   : > { %v4993_v22 = vpack.c.bf16 %v4978_v3, %v4977_v34  ;;  %13341 = vpow2.f32 %v4915_v30 }
 0xe83   : > { %v13338_v50 = vpop.eup %13337  ;;  %13343 = vpow2.f32 %v5598_v57 }
 0xe84   : > { %11867 = vmatprep.mubr.bf16.mxu0 %v4993_v22  ;;  %v4981_v29 = vmul.f32 %v13338_v50, %v16541_v21  ;;  %v4919_v21 = vmul.f32 1.442695, %v4892_v51  ;;  %13345 = vpow2.f32 %v4917_v49 }
 0xe85   : > { %11868 = vmatmul.mubr.bf16.vlgmr.msra.gmra.mrb[160].mxu0 %v4994_v4 }
 0xe86   : > { %13347 = vpow2.f32 %v4919_v21 }
 0xe87   : > { %v13340_v60 = vpop.eup %13339 }
 0xe88   : > { %v4982_v41 = vmul.f32 %v13340_v60, %v16545_v35 }
 0xe8a   : > { %v4995_v14 = vpack.c.bf16 %v4982_v41, %v4981_v29 }
 0xe8c   : > { %11871 = vmatprep.mubr.bf16.mxu0 %v4995_v14  ;;  %v16653_v35 = vpop.eup %13341 }
 0xe8d   : > { %v16656_v25 = vpop.eup %13343 }
 0xe8e   : > { %v16659_v2 = vpop.eup %13345 }
 0xe90   : > { %v16662_v62 = vpop.eup %13347 }
 0xe9f   : > { %4947 = vadd.xlane.f32.xlu0 %v16653_v35 }
 0xea1   : > { %5630 = vadd.xlane.f32.xlu1 %v16656_v25 }
 0xea3   : > { %4949 = vadd.xlane.f32.xlu0 %v16659_v2 }
 0xea7   : > { %4951 = vadd.xlane.f32.xlu0 %v16662_v62 }
 0xea8   : > { %v5609_v32 = vpop.xlane.xlu1 %5608 }
 0xeab   : > { %v5607_v39 = vpop.xlane.xlu0 %5606 }
 0xeac   : > { %13349 = vrcp.f32 %v5607_v39  ;;  %v5605_v7 = vpop.xlane.xlu1 %5604 }
 0xead   : > { %13351 = vrcp.f32 %v5605_v7 }
 0xeae   : > { %13353 = vrcp.f32 %v4942_v16 }
 0xeaf   : > { %13355 = vrcp.f32 %v5609_v32  ;;  %v4944_v15 = vpop.xlane.xlu0 %4943  ;;  %v6081_v32 = vsel %vm19012_vm0, %v16492_v11, 0 }
 0xeb0   : > { %13357 = vrcp.f32 %v4944_v15  ;;  %v5611_v29 = vpop.xlane.xlu1 %5610  ;;  %v19023_v15 = vld [vmem:[#allocation31_spill] sm:$0xff] }
 0xeb1   : > { %13359 = vrcp.f32 %v5611_v29 }
 0xeb2   : > { %6717 = vrot.lane.b32.xlu1 %v18920_v44, %s13897_s11 }
 0xeb6   : > { %v13350_v41 = vpop.eup %13349 }
 0xeb7   : > { %v13352_v38 = vpop.eup %13351  ;;  %v5653_v63 = vmul.f32 %v13350_v41, %v16574_v0 }
 0xeb8   : > { %v13354_v34 = vpop.eup %13353  ;;  %v5652_v3 = vmul.f32 %v13352_v38, %v16576_v28  ;;  %v6063_v28 = vsel %vm19012_vm0, %v16290_v23, 0  ;;  %v4895_v23 = vsub.f32 %v16396_v18, %v16556_v47  ;;  %v6075_v47 = vsel %vm19012_vm0, %v16486_v52, 0 }
 0xeb9   : > { %v13356_v36 = vpop.eup %13355  ;;  %v4983_v16 = vmul.f32 %v13354_v34, %v16539_v19  ;;  %v4889_v19 = vsub.f32 %v16376_v46, %v16550_v55 }
 0xeba   : > { %v13358_v22 = vpop.eup %13357  ;;  %v5668_v4 = vpack.c.bf16 %v5653_v63, %v5652_v3  ;;  %v5654_v14 = vmul.f32 %v13356_v36, %v16570_v33  ;;  %v4925_v46 = vmul.f32 1.442695, %v4895_v23  ;;  %v19027_v36 = vld [vmem:[#allocation35_spill] sm:$0xff] }
 0xebb   : > { %v13360_v50 = vpop.eup %13359  ;;  %v4984_v60 = vmul.f32 %v13358_v22, %v16580_v40  ;;  %v4913_v33 = vmul.f32 1.442695, %v4889_v19  ;;  %v6066_v40 = vsel %vm19014_vm14, %v16469_v53, 0  ;;  %vm19016_vm14 = vmmov %vm19012_vm0 }
 0xebc   : > { %v5655_v10 = vmul.f32 %v13360_v50, %v16582_v24  ;;  %11931 = vmatprep.mubr.bf16.mxu1 %v5668_v4  ;;  %v19031_v4 = vld [vmem:[#allocation48_spill] sm:$0xff] }
 0xebd   : > { %6689 = vrot.lane.b32.xlu0 %v18922_v9, %s13897_s11  ;;  %v4996_v44 = vpack.c.bf16 %v4984_v60, %v4983_v16  ;;  %v4894_v9 = vsub.f32 %v16401_v5, %v16560_v26  ;;  %13361 = vpow2.f32 %v4913_v33  ;;  %v16708_v26 = vpop.permute.xlu1 %6715  ;;  %v19032_v16 = vld [vmem:[#allocation86_spill] sm:$0xff]  ;;  %v19033_v60 = vld [vmem:[#allocation29_spill] sm:$0xff] }
 0xebe   : > { %v5669_v0 = vpack.c.bf16 %v5655_v10, %v5654_v14  ;;  %v4896_v14 = vsub.f32 %v19033_v60, %v19032_v16 }
 0xebf   : > { %11872 = vmatmul.mubr.bf16.gmra.mrb[164].mxu0 %v4996_v44  ;;  %v4923_v24 = vmul.f32 1.442695, %v4894_v9 }
 0xec0   : > { %11932 = vmatmul.mubr.bf16.vlgmr.msra.gmra.mrb[128].mxu1 %v5669_v0  ;;  %v4927_v33 = vmul.f32 1.442695, %v4896_v14  ;;  %v19058_v14 = vld [vmem:[#allocation84_spill] sm:$0xff] }
 0xec1   : > { %11948 = vmatpush3.bf16.xpose.msra.mxu1 %v6063_v28  ;;  %13363 = vpow2.f32 %v4923_v24  ;;  %v19034_v28 = vld [vmem:[#allocation52_spill] sm:$0xff]  ;;  %v19035_v24 = vld [vmem:[#allocation54_spill] sm:$0xff] }
 0xec2   : > { %12476 = vmatprep.subr.msk.bf16.mxu1 %vm19013_vm13, %v16469_v53  ;;  %13365 = vpow2.f32 %v4925_v46  ;;  %vm19018_vm13 = vmmov %vm19012_vm0 }
 0xec7   : > { %v16693_v53 = vpop.eup %13361 }
 0xec9   : > { %11950 = vmatpush3.bf16.xpose.msra.mxu1 %v6066_v40 }
 0xeca   : > { %12477 = vmatprep.subr.msk.bf16.mxu1 %vm19015_vm1, %v16480_v1  ;;  %vm19017_vm1 = vmmov %vm19012_vm0  ;;  %v5617_v1 = vpop.xlane.xlu0 %5616 }
 0xecb   : > { %v6072_v5 = vsel %vm19017_vm1, %v16476_v37, 0  ;;  %v16700_v18 = vpop.eup %13363  ;;  %vm19020_vm1 = vmmov %vm19012_vm0 }
 0xecc   : > { %v16703_v55 = vpop.eup %13365  ;;  %v6078_v30 = vsel %vm19020_vm1, %v16482_v17, 0  ;;  %vm19026_vm1 = vmmov %vm19012_vm0 }
 0xece   : > { %v5615_v58 = vpop.xlane.xlu0 %5614 }
 0xecf   : > { %13367 = vrcp.f32 %v5615_v58  ;;  %v19039_v58 = vld [vmem:[#allocation32_spill] sm:$0xff] }
 0xed1   : > { %11952 = vmatpush3.bf16.xpose.msra.mxu1 %v6069_v48 }
 0xed2   : > { %12478 = vmatprep.subr.msk.bf16.mxu1 %vm19016_vm14, %v16476_v37  ;;  %vm19019_vm14 = vmmov %vm19012_vm0 }
 0xed6   : > { %4945 = vadd.xlane.f32.xlu1 %v16693_v53 }
 0xed9   : > { %11954 = vmatpush3.bf16.xpose.msra.mxu1 %v6072_v5  ;;  %v13368_v49 = vpop.eup %13367  ;;  %v19036_v5 = vld [vmem:[#allocation58_spill] sm:$0xff] }
 0xeda   : > { %12479 = vmatprep.subr.msk.bf16.mxu1 %vm19018_vm13, %v16486_v52  ;;  %vm19021_vm13 = vmmov %vm19012_vm0  ;;  %v19022_v52 = vld [vmem:[#allocation26_spill] sm:$0xff] }
 0xedc   : > { %4955 = vadd.xlane.f32.xlu0 %v16700_v18 }
 0xee0   : > { %4957 = vadd.xlane.f32.xlu0 %v16703_v55 }
 0xee1   : > { %11956 = vmatpush3.bf16.xpose.msra.mxu1 %v6075_v47 }
 0xee2   : > { %12480 = vmatprep.subr.msk.bf16.mxu1 %vm19019_vm14, %v16482_v17  ;;  %v5657_v17 = vmul.f32 %v13368_v49, %v16590_v54  ;;  %vm19024_vm14 = vmmov %vm19012_vm0  ;;  %v6084_v54 = vsel %vm19026_vm1, %v19023_v15, 0  ;;  %v12781_v49 = vld [vmem:[#allocation10 + $0x84] ss:$8 sps:$4 sm:$0xff]  }
 0xee3   : > { %5154 = vmatprep.subr.bf16.mxu0 %v12781_v49  ;;  %vm19048_vm1 = vmmov %vm19012_vm0 }
 0xee5   : > { %v5613_v37 = vpop.xlane.xlu1 %5612 }
 0xee6   : > { %13369 = vrcp.f32 %v5613_v37 }
 0xee7   : > { %6719 = vrot.lane.b32.xlu1 %v18921_v43, %s13897_s11  ;;  %13371 = vrcp.f32 %v5617_v1 }
 0xee9   : > { %11958 = vmatpush3.bf16.xpose.msra.mxu1 %v6078_v30  ;;  %v5619_v57 = vpop.xlane.xlu1 %5618 }
 0xeea   : > { %12481 = vmatprep.subr.msk.bf16.mxu1 %vm19021_vm13, %v16492_v11  ;;  %13373 = vrcp.f32 %v5619_v57  ;;  %v19025_v11 = vld [vmem:[#allocation28_spill] sm:$0xff]  ;;  %vm19028_vm13 = vmmov %vm19012_vm0  ;;  %v19040_v57 = vld [vmem:[#allocation34_spill] sm:$0xff] }
 0xeeb   : > { %6691 = vrot.lane.b32.xlu1 %v19022_v52, %s13897_s11 }
 0xeed   : > { %v5625_v51 = vpop.xlane.xlu1 %5624 }
 0xef0   : > { %v13370_v21 = vpop.eup %13369 }
 0xef1   : > { %11960 = vmatpush3.bf16.xpose.msra.mxu1 %v6081_v32  ;;  %v5621_v43 = vpop.xlane.xlu1 %5620  ;;  %v5656_v39 = vmul.f32 %v13370_v21, %v16611_v31  ;;  %v13372_v7 = vpop.eup %13371  ;;  %v12784_v21 = vld [vmem:[#allocation10 + $0x94] ss:$8 sps:$4 sm:$0xff]   ;;  %v12782_v32 = vld [vmem:[#allocation10 + $0x90] ss:$8 sps:$4 sm:$0xff]  }
 0xef2   : > { %12482 = vmatprep.subr.msk.bf16.mxu1 %vm19024_vm14, %v19023_v15  ;;  %v5658_v63 = vmul.f32 %v13372_v7, %v16586_v45  ;;  %v19029_v45 = vld [vmem:[#allocation79_spill] sm:$0xff]  ;;  %vm19047_vm14 = vmmov %vm19012_vm0 }
 0xef3   : > { %v5670_v29 = vpack.c.bf16 %v5657_v17, %v5656_v39  ;;  %v12787_v39 = vld [vmem:[#allocation10 + $0xa4] ss:$8 sps:$4 sm:$0xff]  }
 0xef4   : > { %v13374_v41 = vpop.eup %13373 }
 0xef5   : > { %11935 = vmatprep.mubr.bf16.mxu1 %v5670_v29  ;;  %v5627_v38 = vpop.xlane.xlu1 %5626  ;;  %v5659_v34 = vmul.f32 %v13374_v41, %v16615_v6  ;;  %v19030_v6 = vld [vmem:[#allocation27_spill] sm:$0xff]  ;;  %v19042_v29 = vld [vmem:[#allocation56_spill] sm:$0xff] }
 0xef6   : > { %6693 = vrot.lane.b32.xlu0 %v19025_v11, %s13897_s11  ;;  %13375 = vrcp.f32 %v5627_v38  ;;  %v4893_v22 = vsub.f32 %v19030_v6, %v19029_v45  ;;  %v19045_v45 = vld [vmem:[#allocation33_spill] sm:$0xff] }
 0xef7   : > { %v5671_v3 = vpack.c.bf16 %v5659_v34, %v5658_v63  ;;  %13377 = vrcp.f32 %v5621_v43  ;;  %v19041_v43 = vld [vmem:[#allocation50_spill] sm:$0xff]  ;;  %v19043_v34 = vld [vmem:[#allocation85_spill] sm:$0xff] }
 0xef8   : > { %13379 = vrcp.f32 %v5625_v51  ;;  %v4921_v50 = vmul.f32 1.442695, %v4893_v22  ;;  %v12779_v51 = vld [vmem:[#allocation10 + $0x80] ss:$8 sps:$4 sm:$0xff]  }
 0xef9   : > { %11962 = vmatpush3.bf16.xpose.msra.mxu1 %v6084_v54  ;;  %v5623_v31 = vpop.xlane.xlu1 %5622  ;;  %5155 = vmatpush1.bf16.msra.mxu0 %v12779_v51  ;;  %v19051_v22 = vld [vmem:[#allocation49_spill] sm:$0xff] }
 0xefa   : > { %11936 = vmatmul.mubr.bf16.gmra.mrb[132].mxu1 %v5671_v3  ;;  %12483 = vmatprep.subr.msk.bf16.mxu1 %vm19028_vm13, %v19027_v36  ;;  %13381 = vrcp.f32 %v5623_v31  ;;  %v19044_v3 = vld [vmem:[#allocation60_spill] sm:$0xff]  ;;  %vm19050_vm13 = vmmov %vm19012_vm0  ;;  %v6749_v16 = vsel %vm19054_vm12, %v19051_v22, 0 }
 0xefb   : > { %6701 = vrot.lane.b32.xlu0 %v18928_v61, %s13897_s11  ;;  %13383 = vpow2.f32 %v4921_v50  ;;  %5156 = vmatprep.subr.bf16.mxu0 %v12784_v21  ;;  %v19053_v50 = vld [vmem:[#allocation80_spill] sm:$0xff]  ;;  %vm19063_vm12 = vmmov %vm19012_vm0 }
 0xefc   : > { %13385 = vpow2.f32 %v4927_v33 }
 0xefd   : > { %v16764_v30 = vpop.permute.xlu1 %6020  ;;  %5157 = vmatpush1.bf16.msra.mxu0 %v12782_v32 }
 0xefe   : > { %5861 = vmatprep.subr.bf16.mxu0 %v12787_v39 }
 0xeff   : > { %6367 = vrot.lane.b32.xlu0 %v19031_v4, %s13896_s23 }
 0xf00   : > { %v13376_v10 = vpop.eup %13375 }
 0xf01   : > { %v13378_v44 = vpop.eup %13377  ;;  %v5663_v61 = vmul.f32 %v13376_v10, %v16625_v59  ;;  %v19037_v59 = vld [vmem:[#allocation62_spill] sm:$0xff] }
 0xf02   : > { %v13380_v0 = vpop.eup %13379  ;;  %v5660_v40 = vmul.f32 %v13378_v44, %v16622_v8 }
 0xf03   : > { %6371 = vrot.lane.b32.xlu0 %v19034_v28, %s13896_s23  ;;  %v5662_v23 = vmul.f32 %v13380_v0, %v16619_v56  ;;  %v5633_v56 = vpop.xlane.xlu0 %5632 }
 0xf04   : > { %v13382_v19 = vpop.eup %13381 }
 0xf05   : > { %v5661_v9 = vmul.f32 %v13382_v19, %v16633_v42  ;;  %v5673_v46 = vpack.c.bf16 %v5663_v61, %v5662_v23  ;;  %v16752_v1 = vpop.eup %13383  ;;  %v19038_v42 = vld [vmem:[#allocation30_spill] sm:$0xff]  ;;  %v19062_v19 = vld [vmem:[#allocation83_spill] sm:$0xff] }
 0xf06   : > { %v16757_v8 = vpop.eup %13385 }
 0xf07   : > { %6373 = vrot.lane.b32.xlu0 %v19035_v24, %s13896_s23  ;;  %v5672_v48 = vpack.c.bf16 %v5661_v9, %v5660_v40  ;;  %v5629_v47 = vpop.xlane.xlu0 %5628 }
 0xf09   : > { %11939 = vmatprep.mubr.bf16.mxu1 %v5672_v48 }
 0xf0a   : > { %11940 = vmatmul.mubr.bf16.gmra.mrb[136].mxu1 %v5673_v46  ;;  %v6755_v46 = vsel %vm19012_vm0, %v19062_v19, 0 }
 0xf0b   : > { %6377 = vrot.lane.b32.xlu0 %v19036_v5, %s13896_s23  ;;  %v5635_v37 = vpop.xlane.xlu0 %5634 }
 0xf0c   : > { %13387 = vrcp.f32 %v5635_v37 }
 0xf0d   : > { %13389 = vrcp.f32 %v5629_v47 }
 0xf0e   : > { %13391 = vrcp.f32 %v5633_v56  ;;  %v19066_v56 = vld [vmem:[#allocation82_spill] sm:$0xff] }
 0xf0f   : > { %6381 = vrot.lane.b32.xlu0 %v19037_v59, %s13896_s23  ;;  %4953 = vadd.xlane.f32.xlu1 %v16752_v1  ;;  %v6019_v6 = vpop.permute.xlu0 %6018 }
 0xf13   : > { %4959 = vadd.xlane.f32.xlu1 %v16757_v8 }
 0xf16   : > { %v13388_v17 = vpop.eup %13387 }
 0xf17   : > { %v13390_v7 = vpop.eup %13389 }
 0xf18   : > { %v13392_v15 = vpop.eup %13391  ;;  %v5664_v38 = vmul.f32 %v13390_v7, %v16599_v12  ;;  %v19046_v12 = vld [vmem:[#allocation37_spill] sm:$0xff] }
 0xf19   : > { %v5666_v11 = vmul.f32 %v13392_v15, %v19043_v34 }
 0xf24   : > { %6695 = vrot.lane.b32.xlu1 %v19038_v42, %s13897_s11 }
 0xf28   : > { %6697 = vrot.lane.b32.xlu1 %v19039_v58, %s13897_s11 }
 0xf2c   : > { %6699 = vrot.lane.b32.xlu1 %v19040_v57, %s13897_s11 }
 0xf2e   : > { %v5631_v52 = vpop.xlane.xlu1 %5630 }
 0xf2f   : > { %13393 = vrcp.f32 %v5631_v52 }
 0xf30   : > { %6703 = vrot.lane.b32.xlu1 %v18929_v20, %s13897_s11  ;;  %v5667_v20 = vmul.f32 %v13388_v17, %v16630_v27  ;;  %v6746_v27 = vsel %vm19048_vm1, %v19027_v36, 0  ;;  %v19056_v36 = vld [vmem:[#allocation81_spill] sm:$0xff]  ;;  %vm19057_vm1 = vmmov %vm19012_vm0 }
 0xf32   : > { %v5675_v31 = vpack.c.bf16 %v5667_v20, %v5666_v11  ;;  %v6718_v23 = vpop.permute.xlu1 %6717 }
 0xf33   : > { %v6764_v17 = vsel %vm19012_vm0, %v6718_v23, 0 }
 0xf34   : > { %6369 = vrot.lane.b32.xlu1 %v19041_v43, %s13896_s23 }
 0xf38   : > { %6375 = vrot.lane.b32.xlu1 %v19042_v29, %s13896_s23 }
 0xf39   : > { %v13394_v41 = vpop.eup %13393 }
 0xf3a   : > { %v5665_v63 = vmul.f32 %v13394_v41, %v16656_v25  ;;  %v19049_v25 = vld [vmem:[#allocation47_spill] sm:$0xff] }
 0xf3c   : > { %6379 = vrot.lane.b32.xlu1 %v19044_v3, %s13896_s23  ;;  %v5674_v54 = vpack.c.bf16 %v5665_v63, %v5664_v38  ;;  %s19199_s23 = sld [smem:[#allocation92_spill]] }
 0xf3e   : > { %11943 = vmatprep.mubr.bf16.mxu1 %v5674_v54 }
 0xf3f   : > { %11944 = vmatmul.mubr.bf16.gmra.mrb[140].mxu1 %v5675_v31 }
 0xf40   : > { %7050 = vrot.lane.b32.xlu1 %v19031_v4, %s13897_s11  ;;  %11963 = vmatprep.mubr.msk.bf16.mxu1 %vm19012_vm0, %v19045_v45  ;;  %v4948_v4 = vpop.xlane.xlu0 %4947  ;;  %v19105_v45 = vld [vmem:[#allocation76_spill] sm:$0xff] }
 0xf44   : > { %7052 = vrot.lane.b32.xlu1 %v19041_v43, %s13897_s11  ;;  %v4950_v60 = vpop.xlane.xlu0 %4949 }
 0xf47   : > { %11964 = vmatmul.mubr.msk.bf16.vlgmr.msra.gmra.mrb[144].mxu1 %vm19047_vm14, %v19046_v12  ;;  %vm19055_vm14 = vmmov %vm19012_vm0 }
 0xf48   : > { %12012 = vmatpush3.bf16.xpose.msra.mxu1 %v6746_v27  ;;  %11967 = vmatprep.mubr.msk.bf16.mxu1 %vm19050_vm13, %v19049_v25  ;;  %vm19059_vm13 = vmmov %vm19012_vm0  ;;  %v4952_v0 = vpop.xlane.xlu0 %4951 }
 0xf49   : > { %12484 = vmatprep.subr.msk.bf16.mxu1 %vm19052_vm15, %v19051_v22  ;;  %vm19060_vm15 = vmmov %vm19012_vm0  ;;  %13395 = vrcp.f32 %v4952_v0 }
 0xf4a   : > { %v6752_v10 = vsel %vm19060_vm15, %v19056_v36, 0  ;;  %13397 = vrcp.f32 %v4948_v4  ;;  %vm19069_vm15 = vmmov %vm19012_vm0 }
 0xf4b   : > { %13399 = vrcp.f32 %v4950_v60 }
 0xf4c   : > { %v6690_v48 = vpop.permute.xlu0 %6689 }
 0xf4f   : > { %11968 = vmatmul.mubr.msk.bf16.gmra.mrb[148].mxu1 %vm19012_vm0, %v19053_v50 }
 0xf50   : > { %12014 = vmatpush3.bf16.xpose.msra.mxu1 %v6749_v16  ;;  %11971 = vmatprep.mubr.msk.bf16.mxu1 %vm19055_vm14, %v16627_v13  ;;  %vm19065_vm14 = vmmov %vm19012_vm0 }
 0xf51   : > { %12485 = vmatprep.subr.msk.bf16.mxu1 %vm19057_vm1, %v19056_v36  ;;  %vm19067_vm1 = vmmov %vm19012_vm0 }
 0xf53   : > { %v13396_v58 = vpop.eup %13395 }
 0xf54   : > { %v13398_v37 = vpop.eup %13397  ;;  %v4988_v52 = vmul.f32 %v13396_v58, %v16662_v62  ;;  %v12790_v58 = vld [vmem:[#allocation10 + $0xb4] ss:$8 sps:$4 sm:$0xff]  }
 0xf55   : > { %v4986_v21 = vmul.f32 %v13398_v37, %v16653_v35 }
 0xf57   : > { %11972 = vmatmul.mubr.msk.bf16.gmra.mrb[152].mxu1 %vm19059_vm13, %v19058_v14  ;;  %vm19068_vm13 = vmmov %vm19012_vm0 }
 0xf58   : > { %12016 = vmatpush3.bf16.xpose.msra.mxu1 %v6752_v10  ;;  %11975 = vmatprep.mubr.msk.bf16.mxu1 %vm19061_vm10, %v6019_v6  ;;  %v16807_v44 = vpop.f32.mrb[160].mxu0  ;;  %vm19064_vm10 = vmmov %vm19012_vm0  ;;  %v6758_v47 = vsel %vm19068_vm13, %v19066_v56, 0 }
 0xf59   : > { %12486 = vmatprep.subr.msk.bf16.mxu1 %vm19063_vm12, %v19062_v19  ;;  %v16811_v13 = vpop.f32.mrb[161].mxu0  ;;  %vm19070_vm12 = vmmov %vm19012_vm0 }
 0xf5a   : > { %v16813_v33 = vpop.f32.mrb[162].mxu0  ;;  %v6761_v51 = vsel %vm19070_vm12, %v16708_v26, 0  ;;  %vm19074_vm13 = vmmov %vm19012_vm0 }
 0xf5b   : > { %v5099_v61 = vpack.c.bf16 %v16813_v33, %v16807_v44  ;;  %v16817_v40 = vpop.f32.mrb[163].mxu0  ;;  %vm19076_vm12 = vmmov %vm19012_vm0  ;;  %v19102_v44 = vld [vmem:[#allocation75_spill] sm:$0xff] }
 0xf5c   : > { %v5098_v9 = vpack.c.bf16 %v16817_v40, %v16811_v13 }
 0xf5f   : > { %11976 = vmatmul.mubr.msk.bf16.gmra.mrb[156].mxu1 %vm19064_vm10, %v16764_v30  ;;  %v13400_v30 = vpop.eup %13399  ;;  %vm19071_vm10 = vmmov %vm19012_vm0 }
 0xf60   : > { %12018 = vmatpush3.bf16.xpose.msra.mxu1 %v6755_v46  ;;  %12027 = vmatprep.mubr.msk.bf16.mxu1 %vm19065_vm14, %v6690_v48  ;;  %v4987_v32 = vmul.f32 %v13400_v30, %v16659_v2  ;;  %vm19072_vm14 = vmmov %vm19012_vm0 }
 0xf61   : > { %12487 = vmatprep.subr.msk.bf16.mxu1 %vm19067_vm1, %v19066_v56  ;;  %vm19073_vm1 = vmmov %vm19012_vm0 }
 0xf62   : > { %v4998_v39 = vpack.c.bf16 %v4988_v52, %v4987_v32 }
 0xf63   : > { %v4946_v42 = vpop.xlane.xlu1 %4945 }
 0xf64   : > { %13401 = vrcp.f32 %v4946_v42 }
 0xf67   : > { %v6720_v7 = vpop.permute.xlu1 %6719 }
 0xf68   : > { %12020 = vmatpush3.bf16.xpose.msra.mxu1 %v6758_v47  ;;  %v12785_v47 = vld [vmem:[#allocation10 + $0xa0] ss:$8 sps:$4 sm:$0xff]  }
 0xf69   : > { %12488 = vmatprep.subr.msk.bf16.mxu1 %vm19069_vm15, %v16708_v26  ;;  %v4956_v62 = vpop.xlane.xlu0 %4955  ;;  %vm19075_vm15 = vmmov %vm19012_vm0 }
 0xf6a   : > { %13403 = vrcp.f32 %v4956_v62 }
 0xf6b   : > { %v6692_v26 = vpop.permute.xlu1 %6691 }
 0xf6d   : > { %v4958_v35 = vpop.xlane.xlu0 %4957 }
 0xf6e   : > { %v13402_v57 = vpop.eup %13401 }
 0xf6f   : > { %v4985_v49 = vmul.f32 %v13402_v57, %v16693_v53  ;;  %v6767_v53 = vsel %vm19073_vm1, %v6720_v7, 0  ;;  %vm19080_vm1 = vmmov %vm19012_vm0 }
 0xf70   : > { %12022 = vmatpush3.bf16.xpose.msra.mxu1 %v6761_v51 }
 0xf71   : > { %12489 = vmatprep.subr.msk.bf16.mxu1 %vm19071_vm10, %v6718_v23  ;;  %v4997_v43 = vpack.c.bf16 %v4986_v21, %v4985_v49  ;;  %v6694_v15 = vpop.permute.xlu0 %6693  ;;  %vm19077_vm10 = vmmov %vm19012_vm0 }
 0xf73   : > { %11875 = vmatprep.mubr.bf16.mxu0 %v4997_v43 }
 0xf74   : > { %11876 = vmatmul.mubr.bf16.gmra.mrb[168].mxu0 %v4998_v39  ;;  %v13404_v4 = vpop.eup %13403 }
 0xf75   : > { %v4990_v60 = vmul.f32 %v13404_v4, %v16700_v18  ;;  %v6702_v46 = vpop.permute.xlu0 %6701  ;;  %v19079_v18 = vmov 0  }
 0xf78   : > { %12024 = vmatpush3.bf16.xpose.msra.mxu1 %v6764_v17 }
 0xf79   : > { %12490 = vmatprep.subr.msk.bf16.mxu1 %vm19072_vm14, %v6720_v7  ;;  %vm19078_vm14 = vmmov %vm19012_vm0  ;;  %v16883_v30 = vpop.permute.xlu0 %6367 }
 0xf80   : > { %12026 = vmatpush3.bf16.xpose.msra.mxu1 %v6767_v53 }
 0xf87   : > { %12028 = vmatmul.mubr.msk.bf16.vlgmr.msra.gmra.mrb[160].mxu1 %vm19074_vm13, %v6692_v26  ;;  %vm19081_vm13 = vmmov %vm19012_vm0 }
 0xf88   : > { %12031 = vmatprep.mubr.msk.bf16.mxu1 %vm19075_vm15, %v6694_v15  ;;  %vm19082_vm15 = vmmov %vm19012_vm0 }
 0xf92   : > { %v16844_v2 = vpop.f32.mrb[164].mxu0 }
 0xf93   : > { %v5051_v41 = vpop.f32.mrb[165].mxu0  ;;  %v16846_v20 = vpop.f32.mrb[128].mxu1 }
 0xf94   : > { %v16848_v38 = vpop.f32.mrb[166].mxu0  ;;  %v16850_v63 = vpop.f32.mrb[129].mxu1 }
 0xf95   : > { %v5101_v34 = vpack.c.bf16 %v16848_v38, %v16844_v2  ;;  %v5054_v11 = vpop.f32.mrb[167].mxu0  ;;  %v16854_v54 = vpop.f32.mrb[130].mxu1 }
 0xf96   : > { %v5100_v31 = vpack.c.bf16 %v5054_v11, %v5051_v41  ;;  %v16858_v12 = vpop.f32.mrb[131].mxu1 }
 0xf9c   : > { %v4954_v25 = vpop.xlane.xlu1 %4953 }
 0xf9d   : > { %13405 = vrcp.f32 %v4954_v25 }
 0xf9e   : > { %13407 = vrcp.f32 %v4958_v35 }
 0xfa0   : > { %v4960_v6 = vpop.xlane.xlu1 %4959 }
 0xfa1   : > { %13409 = vrcp.f32 %v4960_v6 }
 0xfa4   : > { %v6696_v22 = vpop.permute.xlu1 %6695 }
 0xfa5   : > { %12032 = vmatmul.mubr.msk.bf16.gmra.mrb[164].mxu1 %vm19076_vm12, %v6696_v22  ;;  %vm19083_vm12 = vmmov %vm19012_vm0 }
 0xfa7   : > { %v13406_v50 = vpop.eup %13405 }
 0xfa8   : > { %v6698_v16 = vpop.permute.xlu1 %6697  ;;  %v4989_v36 = vmul.f32 %v13406_v50, %v16752_v1  ;;  %v13408_v14 = vpop.eup %13407 }
 0xfa9   : > { %12035 = vmatprep.mubr.msk.bf16.mxu1 %vm19077_vm10, %v6698_v16  ;;  %v4991_v23 = vmul.f32 %v13408_v14, %v16703_v55  ;;  %v12788_v55 = vld [vmem:[#allocation10 + $0xb0] ss:$8 sps:$4 sm:$0xff]   ;;  %vm19084_vm10 = vmmov %vm19012_vm0 }
 0xfaa   : > { %v4999_v10 = vpack.c.bf16 %v4990_v60, %v4989_v36 }
 0xfab   : > { %v13410_v0 = vpop.eup %13409 }
 0xfac   : > { %v6700_v19 = vpop.permute.xlu1 %6699  ;;  %11879 = vmatprep.mubr.bf16.mxu0 %v4999_v10  ;;  %v4992_v48 = vmul.f32 %v13410_v0, %v16757_v8 }
 0xfad   : > { %12036 = vmatmul.mubr.msk.bf16.gmra.mrb[168].mxu1 %vm19012_vm0, %v6700_v19 }
 0xfae   : > { %12039 = vmatprep.mubr.msk.bf16.mxu1 %vm19078_vm14, %v6702_v46  ;;  %v5000_v56 = vpack.c.bf16 %v4992_v48, %v4991_v23 }
 0xfb0   : > { %v6704_v1 = vpop.permute.xlu1 %6703  ;;  %11880 = vmatmul.mubr.bf16.gmra.mrb[172].mxu0 %v5000_v56 }
 0xfb1   : > { %5186 = vmatprep.mubr.bf16.mxu0 %v19079_v18 }
 0xfb4   : > { %v16871_v42 = vpop.permute.xlu1 %6369 }
 0xfb5   : > { %12040 = vmatmul.mubr.msk.bf16.gmra.mrb[172].mxu1 %vm19080_vm1, %v6704_v1 }
 0xfb8   : > { %v16874_v37 = vpop.permute.xlu1 %6375  ;;  %10976 = vmatmul.mubr.msk.bf16.vlgmr.msra.gmra.mrb[112].mxu0 %vm19081_vm13, %v5098_v9  ;;  %vm19103_vm13 = vnez %v19102_v44 }
 0xfb9   : > { %5862 = vmatpush1.bf16.msra.mxu0 %v12785_v47  ;;  %5196 = vmatprep.mubr.bf16.mxu0 %v19079_v18 }
 0xfba   : > { %5863 = vmatprep.subr.bf16.mxu0 %v12790_v58 }
 0xfbc   : > { %v16881_v8 = vpop.permute.xlu1 %6379 }
 0xfbd   : > { %5864 = vmatpush1.bf16.msra.mxu0 %v12788_v55 }
 0xfbe   : > { %11979 = vmatprep.subr.bf16.mxu0 %v16883_v30 }
 0xfc0   : > { %v7051_v57 = vpop.permute.xlu1 %7050  ;;  %10977 = vmatmul.mubr.msk.bf16.gmra.mrb[116].mxu0 %vm19082_vm15, %v5099_v61  ;;  %vm19106_vm15 = vnez %v19105_v45 }
 0xfc1   : > { %12043 = vmatprep.subr.bf16.mxu1 %v7051_v57  ;;  %5206 = vmatprep.mubr.bf16.mxu0 %v19079_v18 }
 0xfc2   : > { %12044 = vmatpush3.bf16.msra.mxu1 %v7051_v57 }
 0xfc4   : > { %v7053_v13 = vpop.permute.xlu1 %7052 }
 0xfc5   : > { %12045 = vmatprep.subr.bf16.mxu1 %v7053_v13 }
 0xfc6   : > { %12046 = vmatpush3.bf16.msra.mxu1 %v7053_v13 }
 0xfc8   : > { %10978 = vmatmul.mubr.msk.bf16.gmra.mrb[120].mxu0 %vm19083_vm12, %v5100_v31 }
 0xfc9   : > { %5216 = vmatprep.mubr.bf16.mxu0 %v19079_v18 }
 0xfcd   : > { %v16893_v40 = vpop.f32.mrb[132].mxu1 }
 0xfce   : > { %v16895_v9 = vpop.f32.mrb[133].mxu1 }
 0xfcf   : > { %v16897_v52 = vpop.f32.mrb[134].mxu1 }
 0xfd0   : > { %v16901_v33 = vpop.f32.mrb[135].mxu1  ;;  %10979 = vmatmul.mubr.msk.bf16.gmra.mrb[124].mxu0 %vm19084_vm10, %v5101_v34 }
 0xfd1   : > { %5226 = vmatprep.mubr.bf16.mxu0 %v19079_v18 }
 0xfdd   : > { %v16910_v51 = vpop.f32.mrb[136].mxu1 }
 0xfde   : > { %v16912_v49 = vpop.f32.mrb[137].mxu1 }
 0xfdf   : > { %v16914_v21 = vpop.f32.mrb[138].mxu1 }
 0xfe0   : > { %v16918_v43 = vpop.f32.mrb[139].mxu1 }
0x1012   : > { %v16922_v17 = vpop.f32.mrb[140].mxu1 }
0x1013   : > { %19085 = vst [vmem:[#allocation51_spill] sm:$0xff] %v16922_v17  ;;  %v16924_v7 = vpop.f32.mrb[141].mxu1 }
0x1014   : > { %v16926_v62 = vpop.f32.mrb[142].mxu1 }
0x1015   : > { %19086 = vst [vmem:[#allocation53_spill] sm:$0xff] %v16926_v62  ;;  %v16930_v35 = vpop.f32.mrb[143].mxu1 }
0x101a   : > { %v11965_v15 = vpop.f32.mrb[144].mxu1 }
0x101b   : > { %v6185_v2 = vmul.f32 0.2, %v11965_v15  ;;  %v6120_v41 = vpop.f32.mrb[145].mxu1 }
0x101c   : > { %v11966_v38 = vpop.f32.mrb[146].mxu1  ;;  %v6183_v34 = vmul.f32 0.2, %v6120_v41 }
0x101d   : > { %v6123_v11 = vpop.f32.mrb[147].mxu1  ;;  %v16936_v25 = vsel %vm15034_vm2, %v6185_v2, -1e+30  ;;  %v6186_v22 = vmul.f32 0.2, %v11966_v38 }
0x101e   : > { %v6184_v6 = vmul.f32 0.2, %v6123_v11  ;;  %6219 = vmax.xlane.f32.xlu0 %v16936_v25  ;;  %v16946_v36 = vsel %vm15051_vm4, %v6183_v34, -1e+30 }
0x101f   : > { %v16951_v19 = vsel %vm15066_vm5, %v6186_v22, -1e+30 }
0x1020   : > { %v16941_v50 = vsel %vm15043_vm3, %v6184_v6, -1e+30 }
0x1021   : > { %6217 = vmax.xlane.f32.xlu1 %v16941_v50 }
0x1022   : > { %6215 = vmax.xlane.f32.xlu0 %v16946_v36  ;;  %v11969_v60 = vpop.f32.mrb[148].mxu1 }
0x1023   : > { %v6136_v14 = vpop.f32.mrb[149].mxu1  ;;  %v6189_v23 = vmul.f32 0.2, %v11969_v60 }
0x1024   : > { %v11970_v10 = vpop.f32.mrb[150].mxu1  ;;  %v6187_v58 = vmul.f32 0.2, %v6136_v14 }
0x1025   : > { %v6190_v48 = vmul.f32 0.2, %v11970_v10  ;;  %v6139_v46 = vpop.f32.mrb[151].mxu1  ;;  %v16961_v57 = vsel %vm15085_vm7, %v6189_v23, -1e+30  ;;  %v19125_v10 = vpack.c.bf16 %v16897_v52, %v16893_v40 }
0x1026   : > { %6221 = vmax.xlane.f32.xlu0 %v16951_v19  ;;  %v6188_v56 = vmul.f32 0.2, %v6139_v46  ;;  %v16971_v11 = vsel %vm15105_vm9, %v6187_v58, -1e+30  ;;  %v19096_v46 = vld [vmem:[#allocation72_spill] sm:$0xff] }
0x1027   : > { %v16956_v47 = vsel %vm15077_vm6, %v6190_v48, -1e+30  ;;  %vm19097_vm0 = vnez %v19096_v46 }
0x1028   : > { %6229 = vmax.xlane.f32.xlu1 %v16956_v47  ;;  %v16966_v41 = vsel %vm15095_vm8, %v6188_v56, -1e+30 }
0x102a   : > { %6227 = vmax.xlane.f32.xlu0 %v16961_v57  ;;  %v11973_v13 = vpop.f32.mrb[152].mxu1 }
0x102b   : > { %v6152_v15 = vpop.f32.mrb[153].mxu1  ;;  %v6193_v6 = vmul.f32 0.2, %v11973_v13 }
0x102c   : > { %6225 = vmax.xlane.f32.xlu1 %v16966_v41  ;;  %v11974_v38 = vpop.f32.mrb[154].mxu1  ;;  %v6191_v48 = vmul.f32 0.2, %v6152_v15 }
0x102d   : > { %v6194_v22 = vmul.f32 0.2, %v11974_v38  ;;  %v6155_v60 = vpop.f32.mrb[155].mxu1  ;;  %v16981_v56 = vsel %vm19097_vm0, %v6193_v6, -1e+30  ;;  %v19098_v38 = vld [vmem:[#allocation73_spill] sm:$0xff] }
0x102e   : > { %6223 = vmax.xlane.f32.xlu0 %v16971_v11  ;;  %v6192_v14 = vmul.f32 0.2, %v6155_v60  ;;  %vm19099_vm14 = vnez %v19098_v38 }
0x102f   : > { %v16976_v23 = vsel %vm18985_vm11, %v6194_v22, -1e+30  ;;  %v19100_v22 = vld [vmem:[#allocation74_spill] sm:$0xff] }
0x1030   : > { %6237 = vmax.xlane.f32.xlu1 %v16976_v23  ;;  %v16986_v53 = vsel %vm19099_vm14, %v6192_v14, -1e+30  ;;  %vm19101_vm1 = vnez %v19100_v22 }
0x1031   : > { %v16991_v15 = vsel %vm19101_vm1, %v6191_v48, -1e+30  ;;  %v19108_v48 = vld [vmem:[#allocation77_spill] sm:$0xff] }
0x1032   : > { %6235 = vmax.xlane.f32.xlu0 %v16981_v56  ;;  %v11977_v58 = vpop.f32.mrb[156].mxu1  ;;  %vm19109_vm12 = vnez %v19108_v48 }
0x1033   : > { %v6168_v13 = vpop.f32.mrb[157].mxu1  ;;  %v6197_v26 = vmul.f32 0.2, %v11977_v58 }
0x1034   : > { %6233 = vmax.xlane.f32.xlu1 %v16986_v53  ;;  %v11978_v60 = vpop.f32.mrb[158].mxu1  ;;  %v6195_v14 = vmul.f32 0.2, %v6168_v13 }
0x1035   : > { %v6198_v32 = vmul.f32 0.2, %v11978_v60  ;;  %v6171_v39 = vpop.f32.mrb[159].mxu1  ;;  %v17001_v27 = vsel %vm19106_vm15, %v6197_v26, -1e+30 }
0x1036   : > { %6231 = vmax.xlane.f32.xlu0 %v16991_v15  ;;  %v6196_v6 = vmul.f32 0.2, %v6171_v39  ;;  %19107 = vst [vmem:[#allocation57_spill] sm:$0xff] %v17001_v27  ;;  %v19111_v39 = vld [vmem:[#allocation78_spill] sm:$0xff] }
0x1037   : > { %v16996_v61 = vsel %vm19103_vm13, %v6198_v32, -1e+30  ;;  %vm19112_vm10 = vnez %v19111_v39  ;;  %vm19114_vm13 = vcmask 261120  }
0x1038   : > { %19104 = vst [vmem:[#allocation25_spill] sm:$0xff] %v16996_v61  ;;  %6245 = vmax.xlane.f32.xlu1 %v16996_v61  ;;  %v17006_v58 = vsel %vm19109_vm12, %v6196_v6, -1e+30  ;;  %v17011_v60 = vsel %vm19112_vm10, %v6195_v14, -1e+30  ;;  %vm19115_vm12 = vmmov %vm19114_vm13 }
0x1039   : > { %19110 = vst [vmem:[#allocation55_spill] sm:$0xff] %v17006_v58  ;;  %19113 = vst [vmem:[#allocation61_spill] sm:$0xff] %v17011_v60 }
0x103a   : > { %6243 = vmax.xlane.f32.xlu0 %v17001_v27 }
0x103c   : > { %6241 = vmax.xlane.f32.xlu1 %v17006_v58 }
0x103e   : > { %6239 = vmax.xlane.f32.xlu0 %v17011_v60 }
0x1047   : > { %v11877_v32 = vpop.f32.mrb[168].mxu0 }
0x1048   : > { %v5067_v13 = vpop.f32.mrb[169].mxu0 }
0x1049   : > { %v11878_v3 = vpop.f32.mrb[170].mxu0 }
0x104a   : > { %v5103_v59 = vpack.c.bf16 %v11878_v3, %v11877_v32  ;;  %v5070_v26 = vpop.f32.mrb[171].mxu0 }
0x104b   : > { %v5102_v61 = vpack.c.bf16 %v5070_v26, %v5067_v13 }
0x104d   : > { %10980 = vmatmul.mubr.msk.bf16.gmra.mrb[128].mxu0 %vm19114_vm13, %v5102_v61 }
0x104e   : > { %5236 = vmatprep.mubr.bf16.mxu0 %v19079_v18 }
0x1055   : > { %10981 = vmatmul.mubr.msk.bf16.gmra.mrb[132].mxu0 %vm19115_vm12, %v5103_v59 }
0x1056   : > { %5246 = vmatprep.mubr.bf16.mxu0 %v19079_v18 }
0x105a   : > { %v12029_v6 = vpop.f32.mrb[160].mxu1 }
0x105b   : > { %v6868_v58 = vmul.f32 0.2, %v12029_v6  ;;  %v6803_v14 = vpop.f32.mrb[161].mxu1 }
0x105c   : > { %v6866_v17 = vmul.f32 0.2, %v6803_v14  ;;  %v12030_v62 = vpop.f32.mrb[162].mxu1 }
0x105d   : > { %v6869_v60 = vmul.f32 0.2, %v12030_v62  ;;  %v6806_v27 = vpop.f32.mrb[163].mxu1  ;;  %v17020_v3 = vsel %vm15034_vm2, %v6868_v58, -1e+30  ;;  %vm19117_vm2 = vmmov %vm19115_vm12 }
0x105e   : > { %6902 = vmax.xlane.f32.xlu0 %v17020_v3  ;;  %v6867_v61 = vmul.f32 0.2, %v6806_v27  ;;  %v17030_v59 = vsel %vm15051_vm4, %v6866_v17, -1e+30  ;;  %vm19120_vm4 = vmmov %vm19117_vm2 }
0x105f   : > { %v17025_v32 = vsel %vm15066_vm5, %v6869_v60, -1e+30  ;;  %vm19122_vm5 = vmmov %vm19117_vm2 }
0x1060   : > { %6904 = vmax.xlane.f32.xlu1 %v17025_v32  ;;  %v17035_v62 = vsel %vm15043_vm3, %v6867_v61, -1e+30  ;;  %vm19118_vm3 = vmmov %vm19117_vm2 }
0x1062   : > { %6898 = vmax.xlane.f32.xlu0 %v17030_v59 }
0x1064   : > { %6900 = vmax.xlane.f32.xlu1 %v17035_v62 }
0x1075   : > { %7056 = vrot.lane.b32.xlu1 %v19035_v24, %s13897_s11 }
0x1078   : > { %v12033_v27 = vpop.f32.mrb[164].mxu1 }
0x1079   : > { %7058 = vrot.lane.b32.xlu1 %v19042_v29, %s13897_s11  ;;  %v6872_v31 = vmul.f32 0.2, %v12033_v27  ;;  %v6819_v0 = vpop.f32.mrb[165].mxu1 }
0x107a   : > { %v12034_v16 = vpop.f32.mrb[166].mxu1  ;;  %v6870_v17 = vmul.f32 0.2, %v6819_v0 }
0x107b   : > { %v6822_v58 = vpop.f32.mrb[167].mxu1  ;;  %v17044_v60 = vsel %vm15085_vm7, %v6872_v31, -1e+30  ;;  %vm19126_vm7 = vmmov %vm19117_vm2 }
0x107c   : > { %19116 = vst [vmem:[#allocation59_spill] sm:$0xff] %v17044_v60  ;;  %6910 = vmax.xlane.f32.xlu0 %v17044_v60  ;;  %v17051_v24 = vsel %vm15105_vm9, %v6870_v17, -1e+30  ;;  %v6372_v17 = vpop.permute.xlu0 %6371  ;;  %vm19129_vm9 = vmmov %vm19117_vm2 }
0x107d   : > { %7060 = vrot.lane.b32.xlu1 %v19036_v5, %s13897_s11 }
0x1080   : > { %6906 = vmax.xlane.f32.xlu0 %v17051_v24  ;;  %v12037_v29 = vpop.f32.mrb[168].mxu1 }
0x1081   : > { %v6835_v4 = vpop.f32.mrb[169].mxu1 }
0x1082   : > { %v12038_v13 = vpop.f32.mrb[170].mxu1 }
0x1083   : > { %v11881_v26 = vpop.f32.mrb[172].mxu0  ;;  %v6838_v6 = vpop.f32.mrb[171].mxu1  ;;  %v6877_v1 = vmul.f32 0.2, %v12038_v13 }
0x1084   : > { %v5083_v14 = vpop.f32.mrb[173].mxu0 }
0x1085   : > { %v11882_v55 = vpop.f32.mrb[174].mxu0 }
0x1086   : > { %v5105_v61 = vpack.c.bf16 %v11882_v55, %v11881_v26  ;;  %v5086_v27 = vpop.f32.mrb[175].mxu0  ;;  %v19119_v26 = vpack.c.bf16 %v16858_v12, %v16850_v63  ;;  %v6873_v55 = vmul.f32 0.2, %v12034_v16  ;;  %v19121_v63 = vpack.c.bf16 %v16854_v54, %v16846_v20 }
0x1087   : > { %v5104_v31 = vpack.c.bf16 %v5086_v27, %v5083_v14  ;;  %v6374_v14 = vpop.permute.xlu0 %6373  ;;  %v6876_v12 = vmul.f32 0.2, %v12037_v29  ;;  %v19123_v54 = vpack.c.bf16 %v16901_v33, %v16895_v9  ;;  %v6875_v16 = vmul.f32 0.2, %v6838_v6 }
0x1088   : > { %v12041_v0 = vpop.f32.mrb[172].mxu1  ;;  %v6874_v29 = vmul.f32 0.2, %v6835_v4 }
0x1089   : > { %10982 = vmatmul.mubr.msk.bf16.gmra.mrb[136].mxu0 %vm19117_vm2, %v5104_v31  ;;  %v6851_v5 = vpop.f32.mrb[173].mxu1  ;;  %v17088_v20 = vsel %vm19097_vm0, %v6876_v12, -1e+30  ;;  %v6880_v33 = vmul.f32 0.2, %v12041_v0  ;;  %vm19132_vm0 = vmmov %vm19117_vm2 }
0x108a   : > { %v12042_v60 = vpop.f32.mrb[174].mxu1  ;;  %5256 = vmatprep.mubr.bf16.mxu0 %v19079_v18  ;;  %v17118_v38 = vsel %vm19101_vm1, %v6874_v29, -1e+30  ;;  %v6878_v31 = vmul.f32 0.2, %v6851_v5  ;;  %vm19140_vm1 = vmmov %vm19132_vm0 }
0x108b   : > { %v17056_v34 = vpop.f32.mrb[175].mxu1  ;;  %v6378_v27 = vpop.permute.xlu0 %6377  ;;  %v6881_v0 = vmul.f32 0.2, %v12042_v60  ;;  %v17122_v40 = vsel %vm19106_vm15, %v6880_v33, -1e+30  ;;  %vm19146_vm13 = vmmov %vm19132_vm0 }
0x108c   : > { %v6879_v22 = vmul.f32 0.2, %v17056_v34  ;;  %v17135_v60 = vsel %vm19112_vm10, %v6878_v31, -1e+30  ;;  %vm19147_vm15 = vmmov %vm19132_vm0 }
0x108d   : > { %vm19148_vm12 = vmmov %vm19132_vm0 }
0x108e   : > { %vm19149_vm10 = vmmov %vm19132_vm0 }
0x1091   : > { %10983 = vmatmul.mubr.msk.bf16.gmra.mrb[140].mxu0 %vm19118_vm3, %v5105_v61  ;;  %v6871_v61 = vmul.f32 0.2, %v6822_v58  ;;  %v17099_v58 = vsel %vm18985_vm11, %v6877_v1, -1e+30  ;;  %vm19130_vm11 = vnez %v19108_v48  ;;  %vm19151_vm3 = vmmov %vm19132_vm0 }
0x1092   : > { %5893 = vmatprep.mubr.bf16.mxu0 %v19079_v18 }
0x1096   : > { %7054 = vrot.lane.b32.xlu0 %v19034_v28, %s13897_s11  ;;  %v17072_v28 = vsel %vm15077_vm6, %v6873_v55, -1e+30  ;;  %vm19124_vm6 = vmmov %vm19117_vm2 }
0x1097   : > { %vm19150_vm2 = vmmov %vm19132_vm0 }
0x1099   : > { %10996 = vmatmul.mubr.msk.bf16.vlgmr.msra.gmra.mrb[112].mxu0 %vm19120_vm4, %v19119_v26  ;;  %vm19152_vm4 = vmmov %vm19132_vm0 }
0x109a   : > { %11980 = vmatpush3.bf16.msra.mxu0 %v16883_v30  ;;  %5903 = vmatprep.mubr.bf16.mxu0 %v19079_v18  ;;  %v6382_v30 = vpop.permute.xlu0 %6381 }
0x109b   : > { %11981 = vmatprep.subr.bf16.mxu0 %v16871_v42 }
0x109e   : > { %11982 = vmatpush3.bf16.msra.mxu0 %v16871_v42  ;;  %v17082_v42 = vsel %vm15095_vm8, %v6871_v61, -1e+30  ;;  %vm19127_vm8 = vnez %v19102_v44  ;;  %v17149_v61 = vsel %vm19130_vm11, %v6879_v22, -1e+30  ;;  %vm19158_vm11 = vmmov %vm19132_vm0 }
0x109f   : > { %11983 = vmatprep.subr.bf16.mxu0 %v6372_v17  ;;  %v17131_v45 = vsel %vm19127_vm8, %v6881_v0, -1e+30  ;;  %vm19156_vm8 = vmmov %vm19132_vm0 }
0x10a1   : > { %6912 = vmax.xlane.f32.xlu1 %v17072_v28  ;;  %10997 = vmatmul.mubr.msk.bf16.gmra.mrb[116].mxu0 %vm19122_vm5, %v19121_v63  ;;  %vm19153_vm5 = vmmov %vm19132_vm0 }
0x10a2   : > { %11984 = vmatpush3.bf16.msra.mxu0 %v6372_v17  ;;  %5913 = vmatprep.mubr.bf16.mxu0 %v19079_v18 }
0x10a3   : > { %11985 = vmatprep.subr.bf16.mxu0 %v6374_v14 }
0x10a5   : > { %6908 = vmax.xlane.f32.xlu1 %v17082_v42 }
0x10a6   : > { %11986 = vmatpush3.bf16.msra.mxu0 %v6374_v14 }
0x10a7   : > { %11987 = vmatprep.subr.bf16.mxu0 %v16874_v37 }
0x10a9   : > { %6918 = vmax.xlane.f32.xlu1 %v17088_v20  ;;  %10998 = vmatmul.mubr.msk.bf16.gmra.mrb[120].mxu0 %vm19124_vm6, %v19123_v54  ;;  %v19131_v54 = vpack.c.bf16 %v16914_v21, %v16910_v51  ;;  %vm19154_vm6 = vmmov %vm19132_vm0 }
0x10aa   : > { %11988 = vmatpush3.bf16.msra.mxu0 %v16874_v37  ;;  %5923 = vmatprep.mubr.bf16.mxu0 %v19079_v18  ;;  %v17106_v37 = vsel %vm19099_vm14, %v6875_v16, -1e+30  ;;  %vm19134_vm14 = vmmov %vm19132_vm0 }
0x10ab   : > { %11989 = vmatprep.subr.bf16.mxu0 %v6378_v27  ;;  %v6220_v2 = vpop.xlane.xlu0 %6219 }
0x10ac   : > { %v6249_v46 = vsub.f32 %v16936_v25, %v6220_v2 }
0x10ad   : > { %6920 = vmax.xlane.f32.xlu1 %v17099_v58 }
0x10ae   : > { %11990 = vmatpush3.bf16.msra.mxu0 %v6378_v27  ;;  %v6218_v13 = vpop.xlane.xlu1 %6217  ;;  %v6267_v6 = vmul.f32 1.442695, %v6249_v46 }
0x10af   : > { %11991 = vmatprep.subr.bf16.mxu0 %v16881_v8  ;;  %v6216_v9 = vpop.xlane.xlu0 %6215 }
0x10b0   : > { %v6247_v25 = vsub.f32 %v16946_v36, %v6216_v9  ;;  %13411 = vpow2.f32 %v6267_v6 }
0x10b1   : > { %6916 = vmax.xlane.f32.xlu1 %v17106_v37  ;;  %10999 = vmatmul.mubr.msk.bf16.gmra.mrb[124].mxu0 %vm19126_vm7, %v19125_v10  ;;  %vm19155_vm7 = vmmov %vm19132_vm0 }
0x10b2   : > { %11992 = vmatpush3.bf16.msra.mxu0 %v16881_v8  ;;  %5933 = vmatprep.mubr.bf16.mxu0 %v19079_v18  ;;  %v6263_v8 = vmul.f32 1.442695, %v6247_v25 }
0x10b3   : > { %11993 = vmatprep.subr.bf16.mxu0 %v6382_v30  ;;  %v6222_v4 = vpop.xlane.xlu0 %6221 }
0x10b4   : > { %v6250_v36 = vsub.f32 %v16951_v19, %v6222_v4  ;;  %v6248_v19 = vsub.f32 %v16941_v50, %v6218_v13  ;;  %13413 = vpow2.f32 %v6263_v8  ;;  %v19133_v13 = vpack.c.bf16 %v16930_v35, %v16924_v7 }
0x10b5   : > { %6926 = vmax.xlane.f32.xlu1 %v17122_v40  ;;  %6914 = vmax.xlane.f32.xlu0 %v17118_v38  ;;  %v6230_v52 = vpop.xlane.xlu1 %6229 }
0x10b6   : > { %11994 = vmatpush3.bf16.msra.mxu0 %v6382_v30  ;;  %v6269_v14 = vmul.f32 1.442695, %v6250_v36  ;;  %v6254_v39 = vsub.f32 %v16956_v47, %v6230_v52  ;;  %v6265_v27 = vmul.f32 1.442695, %v6248_v19  ;;  %v19136_v52 = vld [vmem:[#allocation61_spill] sm:$0xff] }
0x10b7   : > { %v6228_v17 = vpop.xlane.xlu0 %6227  ;;  %v19137_v36 = vld [vmem:[#allocation53_spill] sm:$0xff] }
0x10b8   : > { %v6253_v5 = vsub.f32 %v16961_v57, %v6228_v17  ;;  %v19128_v57 = vpack.c.bf16 %v16918_v43, %v16912_v49  ;;  %v6277_v30 = vmul.f32 1.442695, %v6254_v39  ;;  %v19138_v17 = vld [vmem:[#allocation51_spill] sm:$0xff] }
0x10b9   : > { %6928 = vmax.xlane.f32.xlu1 %v17131_v45  ;;  %6922 = vmax.xlane.f32.xlu0 %v17135_v60  ;;  %v6226_v26 = vpop.xlane.xlu1 %6225  ;;  %v19139_v22 = vpack.c.bf16 %v19137_v36, %v19138_v17  ;;  %v19142_v39 = vld [vmem:[#allocation55_spill] sm:$0xff] }
0x10ba   : > { %v6275_v34 = vmul.f32 1.442695, %v6253_v5  ;;  %11000 = vmatmul.mubr.msk.bf16.gmra.mrb[128].mxu0 %vm19129_vm9, %v19128_v57  ;;  %v6252_v49 = vsub.f32 %v16966_v41, %v6226_v26  ;;  %v17153_v12 = vpop.eup %13411  ;;  %v19141_v26 = vld [vmem:[#allocation25_spill] sm:$0xff]  ;;  %vm19157_vm9 = vmmov %vm19132_vm0 }
0x10bb   : > { %v6224_v44 = vpop.xlane.xlu0 %6223  ;;  %5943 = vmatprep.mubr.bf16.mxu0 %v19079_v18 }
0x10bc   : > { %13415 = vpow2.f32 %v6275_v34  ;;  %v6251_v55 = vsub.f32 %v16971_v11, %v6224_v44  ;;  %v6273_v11 = vmul.f32 1.442695, %v6252_v49 }
0x10bd   : > { %6924 = vmax.xlane.f32.xlu1 %v17149_v61  ;;  %v6238_v50 = vpop.xlane.xlu1 %6237  ;;  %13417 = vpow2.f32 %v6269_v14 }
0x10be   : > { %v6271_v43 = vmul.f32 1.442695, %v6251_v55  ;;  %v17163_v2 = vpop.eup %13413  ;;  %v6258_v9 = vsub.f32 %v16976_v23, %v6238_v50  ;;  %v19135_v23 = vld [vmem:[#allocation57_spill] sm:$0xff] }
0x10bf   : > { %v6236_v63 = vpop.xlane.xlu0 %6235 }
0x10c0   : > { %13419 = vpow2.f32 %v6271_v43  ;;  %v6257_v48 = vsub.f32 %v16981_v56, %v6236_v63  ;;  %v6285_v6 = vmul.f32 1.442695, %v6258_v9 }
0x10c1   : > { %6299 = vadd.xlane.f32.xlu1 %v17153_v12  ;;  %v6234_v47 = vpop.xlane.xlu1 %6233  ;;  %13421 = vpow2.f32 %v6265_v27 }
0x10c2   : > { %v6256_v1 = vsub.f32 %v16986_v53, %v6234_v47  ;;  %11001 = vmatmul.mubr.msk.bf16.gmra.mrb[132].mxu0 %vm19132_vm0, %v19131_v54  ;;  %13423 = vpow2.f32 %v6277_v30  ;;  %v6283_v56 = vmul.f32 1.442695, %v6257_v48 }
0x10c3   : > { %v6232_v41 = vpop.xlane.xlu0 %6231  ;;  %5953 = vmatprep.mubr.bf16.mxu0 %v19079_v18  ;;  %13425 = vpow2.f32 %v6273_v11 }
0x10c4   : > { %v6281_v16 = vmul.f32 1.442695, %v6256_v1  ;;  %v6255_v53 = vsub.f32 %v16991_v15, %v6232_v41 }
0x10c5   : > { %6295 = vadd.xlane.f32.xlu1 %v17163_v2  ;;  %v6246_v35 = vpop.xlane.xlu1 %6245 }
0x10c6   : > { %v17166_v46 = vpop.eup %13415  ;;  %13427 = vpow2.f32 %v6281_v16  ;;  %v6279_v33 = vmul.f32 1.442695, %v6255_v53  ;;  %v6262_v19 = vsub.f32 %v19141_v26, %v6246_v35 }
0x10c7   : > { %6307 = vadd.xlane.f32.xlu0 %v17166_v46  ;;  %v17170_v51 = vpop.eup %13417  ;;  %v6244_v21 = vpop.xlane.xlu0 %6243  ;;  %13429 = vpow2.f32 %v6283_v56 }
0x10c8   : > { %13431 = vpow2.f32 %v6279_v33  ;;  %v6261_v25 = vsub.f32 %v19135_v23, %v6244_v21  ;;  %v6293_v44 = vmul.f32 1.442695, %v6262_v19 }
0x10c9   : > { %6301 = vadd.xlane.f32.xlu1 %v17170_v51  ;;  %13433 = vpow2.f32 %v6285_v6  ;;  %v6242_v34 = vpop.xlane.xlu1 %6241  ;;  %v19143_v6 = vld [vmem:[#allocation59_spill] sm:$0xff] }
0x10ca   : > { %v17173_v29 = vpop.eup %13419  ;;  %11002 = vmatmul.mubr.msk.bf16.gmra.mrb[136].mxu0 %vm19134_vm14, %v19133_v13  ;;  %v6291_v0 = vmul.f32 1.442695, %v6261_v25  ;;  %v6260_v55 = vsub.f32 %v19142_v39, %v6242_v34  ;;  %vm19159_vm14 = vmmov %vm19132_vm0 }
0x10cb   : > { %6303 = vadd.xlane.f32.xlu0 %v17173_v29  ;;  %5963 = vmatprep.mubr.bf16.mxu0 %v19079_v18  ;;  %v17182_v15 = vpop.eup %13421  ;;  %v6240_v4 = vpop.xlane.xlu0 %6239 }
0x10cc   : > { %v17185_v10 = vpop.eup %13423  ;;  %v6259_v8 = vsub.f32 %v19136_v52, %v6240_v4  ;;  %13435 = vpow2.f32 %v6291_v0  ;;  %v6289_v27 = vmul.f32 1.442695, %v6260_v55 }
0x10cd   : > { %6297 = vadd.xlane.f32.xlu1 %v17182_v15  ;;  %v17189_v7 = vpop.eup %13425 }
0x10ce   : > { %v6287_v14 = vmul.f32 1.442695, %v6259_v8 }
0x10cf   : > { %6309 = vadd.xlane.f32.xlu0 %v17185_v10 }
0x10d0   : > { %v17192_v31 = vpop.eup %13427  ;;  %13437 = vpow2.f32 %v6287_v14 }
0x10d1   : > { %6305 = vadd.xlane.f32.xlu1 %v17189_v7  ;;  %v17200_v5 = vpop.eup %13429  ;;  %13439 = vpow2.f32 %v6293_v44 }
0x10d2   : > { %11003 = vmatmul.mubr.msk.bf16.gmra.mrb[140].mxu0 %vm19140_vm1, %v19139_v22  ;;  %v17204_v57 = vpop.eup %13431  ;;  %13441 = vpow2.f32 %v6289_v27  ;;  %vm19160_vm1 = vmmov %vm19132_vm0 }
0x10d3   : > { %6313 = vadd.xlane.f32.xlu0 %v17192_v31  ;;  %v17208_v50 = vpop.eup %13433 }
0x10d5   : > { %6315 = vadd.xlane.f32.xlu1 %v17200_v5 }
0x10d6   : > { %v17211_v49 = vpop.eup %13435 }
0x10d9   : > { %6311 = vadd.xlane.f32.xlu1 %v17204_v57 }
0x10da   : > { %v17214_v43 = vpop.eup %13437 }
0x10db   : > { %v17217_v63 = vpop.eup %13439 }
0x10dc   : > { %v17220_v47 = vpop.eup %13441 }
0x10dd   : > { %6317 = vadd.xlane.f32.xlu1 %v17208_v50 }
0x10e1   : > { %6323 = vadd.xlane.f32.xlu1 %v17211_v49 }
0x10e5   : > { %6319 = vadd.xlane.f32.xlu1 %v17214_v43 }
0x10e9   : > { %6325 = vadd.xlane.f32.xlu1 %v17217_v63 }
0x10eb   : > { %v6903_v30 = vpop.xlane.xlu0 %6902 }
0x10ec   : > { %v6932_v11 = vsub.f32 %v17020_v3, %v6903_v30 }
0x10ed   : > { %6321 = vadd.xlane.f32.xlu1 %v17220_v47  ;;  %v6905_v48 = vpop.xlane.xlu1 %6904 }
0x10ee   : > { %v6950_v1 = vmul.f32 1.442695, %v6932_v11  ;;  %v6933_v41 = vsub.f32 %v17025_v32, %v6905_v48 }
0x10ef   : > { %v6899_v54 = vpop.xlane.xlu0 %6898 }
0x10f0   : > { %13443 = vpow2.f32 %v6950_v1  ;;  %v6930_v16 = vsub.f32 %v17030_v59, %v6899_v54  ;;  %v6952_v21 = vmul.f32 1.442695, %v6933_v41 }
0x10f1   : > { %v6901_v56 = vpop.xlane.xlu1 %6900 }
0x10f2   : > { %v6946_v53 = vmul.f32 1.442695, %v6930_v16  ;;  %v6931_v9 = vsub.f32 %v17035_v62, %v6901_v56  ;;  %v19144_v16 = vld [vmem:[#allocation62_spill] sm:$0xff] }
0x10f4   : > { %13445 = vpow2.f32 %v6946_v53  ;;  %v6948_v33 = vmul.f32 1.442695, %v6931_v9 }
0x10f5   : > { %13447 = vpow2.f32 %v6952_v21  ;;  %v7057_v0 = vpop.permute.xlu1 %7056 }
0x10f6   : > { %13449 = vpow2.f32 %v6948_v33  ;;  %v19145_v33 = vld [vmem:[#allocation60_spill] sm:$0xff] }
0x10f9   : > { %v7059_v36 = vpop.permute.xlu1 %7058 }
0x10fa   : > { %v17227_v13 = vpop.eup %13443 }
0x10fb   : > { %6982 = vadd.xlane.f32.xlu0 %v17227_v13 }
0x10fd   : > { %v7061_v22 = vpop.permute.xlu1 %7060 }
0x10fe   : > { %v17230_v3 = vpop.eup %13445 }
0x10ff   : > { %6978 = vadd.xlane.f32.xlu0 %v17230_v3  ;;  %v17233_v32 = vpop.eup %13447 }
0x1100   : > { %v17236_v59 = vpop.eup %13449 }
0x1103   : > { %6984 = vadd.xlane.f32.xlu0 %v17233_v32 }
0x1107   : > { %6980 = vadd.xlane.f32.xlu0 %v17236_v59 }
0x1109   : > { %v6911_v62 = vpop.xlane.xlu0 %6910 }
0x110a   : > { %v6936_v23 = vsub.f32 %v19143_v6, %v6911_v62 }
0x110c   : > { %v6958_v25 = vmul.f32 1.442695, %v6936_v23 }
0x110d   : > { %v6907_v4 = vpop.xlane.xlu0 %6906 }
0x110e   : > { %13451 = vpow2.f32 %v6958_v25  ;;  %v6934_v35 = vsub.f32 %v17051_v24, %v6907_v4 }
0x1110   : > { %v6954_v52 = vmul.f32 1.442695, %v6934_v35 }
0x1111   : > { %v7055_v8 = vpop.permute.xlu0 %7054 }
0x1112   : > { %13453 = vpow2.f32 %v6954_v52  ;;  %12047 = vmatprep.subr.bf16.mxu1 %v7055_v8 }
0x1113   : > { %12048 = vmatpush3.bf16.msra.mxu1 %v7055_v8 }
0x1114   : > { %12049 = vmatprep.subr.bf16.mxu1 %v7057_v0 }
0x1117   : > { %12050 = vmatpush3.bf16.msra.mxu1 %v7057_v0 }
0x1118   : > { %v17241_v17 = vpop.eup %13451  ;;  %12051 = vmatprep.subr.bf16.mxu1 %v7059_v36 }
0x1119   : > { %6990 = vadd.xlane.f32.xlu1 %v17241_v17 }
0x111b   : > { %12052 = vmatpush3.bf16.msra.mxu1 %v7059_v36 }
0x111c   : > { %v17244_v26 = vpop.eup %13453  ;;  %12053 = vmatprep.subr.bf16.mxu1 %v7061_v22 }
0x111d   : > { %6986 = vadd.xlane.f32.xlu1 %v17244_v26 }
0x111f   : > { %12054 = vmatpush3.bf16.msra.mxu1 %v7061_v22 }
0x112e   : > { %v6913_v24 = vpop.xlane.xlu1 %6912 }
0x112f   : > { %v6937_v19 = vsub.f32 %v17072_v28, %v6913_v24 }
0x1131   : > { %v6960_v14 = vmul.f32 1.442695, %v6937_v19 }
0x1132   : > { %v6909_v34 = vpop.xlane.xlu1 %6908 }
0x1133   : > { %13455 = vpow2.f32 %v6960_v14  ;;  %v6935_v44 = vsub.f32 %v17082_v42, %v6909_v34 }
0x1135   : > { %v6956_v39 = vmul.f32 1.442695, %v6935_v44 }
0x1136   : > { %v17249_v55 = vpop.xlane.xlu1 %6918 }
0x1137   : > { %13457 = vpow2.f32 %v6956_v39 }
0x113a   : > { %v6921_v27 = vpop.xlane.xlu1 %6920 }
0x113b   : > { %v6941_v0 = vsub.f32 %v17099_v58, %v6921_v27  ;;  %v6940_v58 = vsub.f32 %v17088_v20, %v17249_v55 }
0x113d   : > { %v17251_v30 = vpop.eup %13455  ;;  %v6968_v44 = vmul.f32 1.442695, %v6941_v0  ;;  %v6966_v20 = vmul.f32 1.442695, %v6940_v58 }
0x113e   : > { %6992 = vadd.xlane.f32.xlu1 %v17251_v30  ;;  %v6917_v11 = vpop.xlane.xlu1 %6916 }
0x113f   : > { %v6939_v24 = vsub.f32 %v17106_v37, %v6917_v11 }
0x1141   : > { %v17254_v48 = vpop.eup %13457 }
0x1142   : > { %6988 = vadd.xlane.f32.xlu0 %v17254_v48  ;;  %v17257_v28 = vpop.xlane.xlu1 %6926  ;;  %v6915_v54 = vpop.xlane.xlu0 %6914 }
0x1143   : > { %v6938_v4 = vsub.f32 %v17118_v38, %v6915_v54 }
0x1145   : > { %v6962_v19 = vmul.f32 1.442695, %v6938_v4 }
0x1146   : > { %v17259_v1 = vpop.xlane.xlu1 %6928  ;;  %v17263_v56 = vpop.xlane.xlu0 %6922 }
0x114a   : > { %v6925_v42 = vpop.xlane.xlu1 %6924 }
0x114b   : > { %v6943_v37 = vsub.f32 %v17149_v61, %v6925_v42  ;;  %v6942_v61 = vsub.f32 %v17135_v60, %v17263_v56 }
0x114d   : > { %v6972_v42 = vmul.f32 1.442695, %v6943_v37 }
0x114e   : > { %v6300_v41 = vpop.xlane.xlu1 %6299 }
0x114f   : > { %7064 = vrot.lane.b32.xlu1 %v19144_v16, %s13897_s11  ;;  %v6964_v16 = vmul.f32 1.442695, %v6939_v24 }
0x1152   : > { %v6296_v53 = vpop.xlane.xlu1 %6295 }
0x1154   : > { %v6308_v21 = vpop.xlane.xlu0 %6307 }
0x1156   : > { %v6302_v9 = vpop.xlane.xlu1 %6301 }
0x1157   : > { %13459 = vrcp.f32 %v6302_v9 }
0x1158   : > { %7062 = vrot.lane.b32.xlu0 %v19145_v33, %s13897_s11  ;;  %v6304_v62 = vpop.xlane.xlu0 %6303  ;;  %13461 = vrcp.f32 %v6296_v53 }
0x1159   : > { %13463 = vrcp.f32 %v6300_v41 }
0x115a   : > { %v6298_v6 = vpop.xlane.xlu1 %6297 }
0x115b   : > { %13465 = vrcp.f32 %v6298_v6 }
0x115c   : > { %v6310_v23 = vpop.xlane.xlu0 %6309  ;;  %13467 = vrcp.f32 %v6304_v62 }
0x115e   : > { %v6306_v25 = vpop.xlane.xlu1 %6305 }
0x115f   : > { %13469 = vrcp.f32 %v6306_v25 }
0x1160   : > { %13471 = vrcp.f32 %v6310_v23  ;;  %v6314_v52 = vpop.xlane.xlu0 %6313 }
0x1161   : > { %v13460_v35 = vpop.eup %13459  ;;  %13473 = vrcp.f32 %v6308_v21 }
0x1162   : > { %v6316_v8 = vpop.xlane.xlu1 %6315  ;;  %v13462_v36 = vpop.eup %13461  ;;  %v6346_v34 = vmul.f32 %v13460_v35, %v17170_v51  ;;  %13475 = vrcp.f32 %v6314_v52 }
0x1163   : > { %v13464_v22 = vpop.eup %13463  ;;  %v6343_v38 = vmul.f32 %v13462_v36, %v17163_v2 }
0x1164   : > { %v6345_v27 = vmul.f32 %v13464_v22, %v17153_v12  ;;  %v6945_v12 = vsub.f32 %v17131_v45, %v17259_v1  ;;  %v6970_v1 = vmul.f32 1.442695, %v6942_v61 }
0x1165   : > { %v13466_v14 = vpop.eup %13465 }
0x1166   : > { %v6312_v39 = vpop.xlane.xlu1 %6311  ;;  %v6344_v54 = vmul.f32 %v13466_v14, %v17182_v15  ;;  %v13468_v41 = vpop.eup %13467  ;;  %v6360_v53 = vpack.c.bf16 %v6346_v34, %v6345_v27  ;;  %v6976_v23 = vmul.f32 1.442695, %v6945_v12  ;;  %v12794_v12 = vld [vmem:[#allocation10 + $0xd0] ss:$8 sps:$4 sm:$0xff]  }
0x1167   : > { %13477 = vrcp.f32 %v6312_v39  ;;  %v6347_v15 = vmul.f32 %v13468_v41, %v17173_v29 }
0x1168   : > { %13479 = vpow2.f32 %v6962_v19  ;;  %v6359_v11 = vpack.c.bf16 %v6344_v54, %v6343_v38 }
0x1169   : > { %v13470_v51 = vpop.eup %13469  ;;  %13481 = vrcp.f32 %v6316_v8 }
0x116a   : > { %v13472_v21 = vpop.eup %13471  ;;  %13483 = vpow2.f32 %v6968_v44  ;;  %v6318_v2 = vpop.xlane.xlu1 %6317  ;;  %11995 = vmatprep.mubr.bf16.mxu0 %v6359_v11  ;;  %v6348_v9 = vmul.f32 %v13470_v51, %v17189_v7  ;;  %v6944_v7 = vsub.f32 %v17122_v40, %v17257_v28 }
0x116b   : > { %13485 = vrcp.f32 %v6318_v2  ;;  %11996 = vmatmul.mubr.bf16.vlgmr.msra.gmra.mrb[176].mxu0 %v6360_v53  ;;  %v13474_v55 = vpop.eup %13473  ;;  %v6350_v62 = vmul.f32 %v13472_v21, %v17185_v10 }
0x116c   : > { %13487 = vpow2.f32 %v6964_v16  ;;  %v6361_v33 = vpack.c.bf16 %v6348_v9, %v6347_v15  ;;  %v13476_v29 = vpop.eup %13475  ;;  %v6349_v45 = vmul.f32 %v13474_v55, %v17166_v46  ;;  %v6974_v52 = vmul.f32 1.442695, %v6944_v7  ;;  %v12791_v9 = vld [vmem:[#allocation10 + $0xc0] ss:$8 sps:$4 sm:$0xff]   ;;  %v12796_v55 = vld [vmem:[#allocation10 + $0xd4] ss:$8 sps:$4 sm:$0xff]  }
0x116d   : > { %13489 = vpow2.f32 %v6966_v20  ;;  %v6352_v10 = vmul.f32 %v13476_v29, %v17192_v31 }
0x116e   : > { %v6324_v6 = vpop.xlane.xlu1 %6323  ;;  %11999 = vmatprep.mubr.bf16.mxu0 %v6361_v33  ;;  %13491 = vpow2.f32 %v6972_v42  ;;  %v6362_v4 = vpack.c.bf16 %v6350_v62, %v6349_v45 }
0x116f   : > { %13493 = vpow2.f32 %v6976_v23 }
0x1170   : > { %13495 = vpow2.f32 %v6970_v1 }
0x1171   : > { %v13478_v25 = vpop.eup %13477  ;;  %13497 = vpow2.f32 %v6974_v52 }
0x1172   : > { %v17287_v35 = vpop.eup %13479  ;;  %v6320_v60 = vpop.xlane.xlu1 %6319  ;;  %v6351_v56 = vmul.f32 %v13478_v25, %v17204_v57 }
0x1173   : > { %v13482_v0 = vpop.eup %13481  ;;  %6994 = vadd.xlane.f32.xlu1 %v17287_v35  ;;  %12000 = vmatmul.mubr.bf16.gmra.mrb[180].mxu0 %v6362_v4 }
0x1174   : > { %v17292_v40 = vpop.eup %13483  ;;  %v6363_v46 = vpack.c.bf16 %v6352_v10, %v6351_v56  ;;  %v6353_v22 = vmul.f32 %v13482_v0, %v17200_v5 }
0x1175   : > { %v13486_v28 = vpop.eup %13485 }
0x1176   : > { %v17294_v8 = vpop.eup %13487  ;;  %v6326_v36 = vpop.xlane.xlu1 %6325  ;;  %12003 = vmatprep.mubr.bf16.mxu0 %v6363_v46  ;;  %v6354_v57 = vmul.f32 %v13486_v28, %v17208_v50  ;;  %v12799_v28 = vld [vmem:[#allocation10 + $0xe4] ss:$8 sps:$4 sm:$0xff]  }
0x1177   : > { %7000 = vadd.xlane.f32.xlu1 %v17292_v40  ;;  %6996 = vadd.xlane.f32.xlu0 %v17294_v8  ;;  %13499 = vrcp.f32 %v6326_v36  ;;  %v17300_v24 = vpop.eup %13489 }
0x1178   : > { %v6364_v31 = vpack.c.bf16 %v6354_v57, %v6353_v22  ;;  %13501 = vrcp.f32 %v6320_v60  ;;  %v17302_v19 = vpop.eup %13491 }
0x1179   : > { %13503 = vrcp.f32 %v6324_v6  ;;  %v17306_v5 = vpop.eup %13493 }
0x117a   : > { %v6322_v14 = vpop.xlane.xlu1 %6321  ;;  %v17308_v50 = vpop.eup %13495 }
0x117b   : > { %13505 = vrcp.f32 %v6322_v14  ;;  %6998 = vadd.xlane.f32.xlu0 %v17300_v24  ;;  %7004 = vadd.xlane.f32.xlu1 %v17302_v19  ;;  %v17312_v34 = vpop.eup %13497 }
0x117c   : > { %12004 = vmatmul.mubr.bf16.gmra.mrb[184].mxu0 %v6364_v31 }
0x117f   : > { %7002 = vadd.xlane.f32.xlu0 %v17308_v50  ;;  %7008 = vadd.xlane.f32.xlu1 %v17306_v5 }
0x1181   : > { %v13500_v44 = vpop.eup %13499 }
0x1182   : > { %v13502_v39 = vpop.eup %13501  ;;  %v6358_v41 = vmul.f32 %v13500_v44, %v17217_v63 }
0x1183   : > { %7006 = vadd.xlane.f32.xlu0 %v17312_v34  ;;  %v13504_v38 = vpop.eup %13503  ;;  %v6355_v58 = vmul.f32 %v13502_v39, %v17214_v43 }
0x1184   : > { %v6357_v16 = vmul.f32 %v13504_v38, %v17211_v49  ;;  %v12793_v49 = vld [vmem:[#allocation10 + $0xc4] ss:$8 sps:$4 sm:$0xff]  }
0x1185   : > { %v13506_v54 = vpop.eup %13505  ;;  %6544 = vmatprep.subr.bf16.mxu0 %v12793_v49  ;;  %v12797_v49 = vld [vmem:[#allocation10 + $0xe0] ss:$8 sps:$4 sm:$0xff]  }
0x1186   : > { %v6356_v27 = vmul.f32 %v13506_v54, %v17220_v47  ;;  %v6366_v51 = vpack.c.bf16 %v6358_v41, %v6357_v16  ;;  %6545 = vmatpush1.bf16.msra.mxu0 %v12791_v9 }
0x1187   : > { %6546 = vmatprep.subr.bf16.mxu0 %v12796_v55 }
0x1188   : > { %v6983_v37 = vpop.xlane.xlu0 %6982  ;;  %v6365_v11 = vpack.c.bf16 %v6356_v27, %v6355_v58 }
0x118a   : > { %12007 = vmatprep.mubr.bf16.mxu0 %v6365_v11  ;;  %6547 = vmatpush1.bf16.msra.mxu0 %v12794_v12 }
0x118b   : > { %12008 = vmatmul.mubr.bf16.gmra.mrb[188].mxu0 %v6366_v51  ;;  %7227 = vmatprep.subr.bf16.mxu0 %v12799_v28 }
0x118c   : > { %v6979_v53 = vpop.xlane.xlu0 %6978  ;;  %6576 = vmatprep.mubr.bf16.mxu0 %v19079_v18 }
0x118d   : > { %13507 = vrcp.f32 %v6979_v53 }
0x1190   : > { %v6985_v21 = vpop.xlane.xlu0 %6984 }
0x1194   : > { %v6981_v2 = vpop.xlane.xlu0 %6980 }
0x1195   : > { %13509 = vrcp.f32 %v6981_v2 }
0x1196   : > { %13511 = vrcp.f32 %v6985_v21 }
0x1197   : > { %v13508_v15 = vpop.eup %13507  ;;  %13513 = vrcp.f32 %v6983_v37 }
0x1198   : > { %v7026_v43 = vmul.f32 %v13508_v15, %v17230_v3 }
0x119f   : > { %v13510_v63 = vpop.eup %13509 }
0x11a0   : > { %v7027_v47 = vmul.f32 %v13510_v63, %v17236_v59  ;;  %v13512_v3 = vpop.eup %13511 }
0x11a1   : > { %v13514_v6 = vpop.eup %13513  ;;  %v7029_v7 = vmul.f32 %v13512_v3, %v17233_v32 }
0x11a2   : > { %v7042_v20 = vpack.c.bf16 %v7027_v47, %v7026_v43  ;;  %v7028_v45 = vmul.f32 %v13514_v6, %v17227_v13 }
0x11a4   : > { %12059 = vmatprep.mubr.bf16.mxu1 %v7042_v20  ;;  %v7043_v25 = vpack.c.bf16 %v7029_v7, %v7028_v45 }
0x11a6   : > { %v6991_v61 = vpop.xlane.xlu1 %6990 }
0x11aa   : > { %v6987_v42 = vpop.xlane.xlu1 %6986 }
0x11ab   : > { %13515 = vrcp.f32 %v6987_v42 }
0x11b5   : > { %v13516_v23 = vpop.eup %13515 }
0x11b6   : > { %v7030_v60 = vmul.f32 %v13516_v23, %v17244_v26 }
0x11cb   : > { %v6993_v33 = vpop.xlane.xlu1 %6992 }
0x11cf   : > { %v6989_v62 = vpop.xlane.xlu0 %6988  ;;  %v7065_v29 = vpop.permute.xlu1 %7064 }
0x11d0   : > { %13517 = vrcp.f32 %v6989_v62 }
0x11d1   : > { %13519 = vrcp.f32 %v6993_v33 }
0x11d2   : > { %13521 = vrcp.f32 %v6991_v61 }
0x11d3   : > { %v7063_v59 = vpop.permute.xlu0 %7062 }
0x11d4   : > { %12055 = vmatprep.subr.bf16.mxu1 %v7063_v59 }
0x11d5   : > { %12056 = vmatpush3.bf16.msra.mxu1 %v7063_v59 }
0x11d6   : > { %12057 = vmatprep.subr.bf16.mxu1 %v7065_v29 }
0x11d9   : > { %12058 = vmatpush3.bf16.msra.mxu1 %v7065_v29 }
0x11da   : > { %v13518_v1 = vpop.eup %13517 }
0x11db   : > { %v13520_v4 = vpop.eup %13519  ;;  %v7031_v56 = vmul.f32 %v13518_v1, %v17254_v48 }
0x11dc   : > { %12060 = vmatmul.mubr.bf16.vlgmr.msra.gmra.mrb[176].mxu1 %v7043_v25  ;;  %v13522_v10 = vpop.eup %13521  ;;  %v7033_v52 = vmul.f32 %v13520_v4, %v17251_v30 }
0x11dd   : > { %v7044_v0 = vpack.c.bf16 %v7031_v56, %v7030_v60  ;;  %v7032_v32 = vmul.f32 %v13522_v10, %v17241_v17 }
0x11df   : > { %12063 = vmatprep.mubr.bf16.mxu1 %v7044_v0  ;;  %v7045_v46 = vpack.c.bf16 %v7033_v52, %v7032_v32 }
0x11e4   : > { %12064 = vmatmul.mubr.bf16.gmra.mrb[180].mxu1 %v7045_v46 }
0x1200   : > { %v6995_v13 = vpop.xlane.xlu1 %6994 }
0x1201   : > { %13523 = vrcp.f32 %v6995_v13 }
0x1204   : > { %v6997_v36 = vpop.xlane.xlu0 %6996  ;;  %v7001_v22 = vpop.xlane.xlu1 %7000 }
0x1205   : > { %13525 = vrcp.f32 %v6997_v36 }
0x1206   : > { %13527 = vrcp.f32 %v7001_v22 }
0x1208   : > { %v6999_v26 = vpop.xlane.xlu0 %6998  ;;  %v7005_v48 = vpop.xlane.xlu1 %7004 }
0x1209   : > { %13529 = vrcp.f32 %v6999_v26 }
0x120a   : > { %13531 = vrcp.f32 %v7005_v48 }
0x120b   : > { %v13524_v30 = vpop.eup %13523 }
0x120c   : > { %v7003_v57 = vpop.xlane.xlu0 %7002  ;;  %v7009_v31 = vpop.xlane.xlu1 %7008  ;;  %v7034_v44 = vmul.f32 %v13524_v30, %v17287_v35 }
0x120d   : > { %13533 = vrcp.f32 %v7003_v57 }
0x120e   : > { %13535 = vrcp.f32 %v7009_v31 }
0x120f   : > { %v13526_v14 = vpop.eup %13525 }
0x1210   : > { %v7007_v17 = vpop.xlane.xlu0 %7006  ;;  %v7035_v39 = vmul.f32 %v13526_v14, %v17294_v8  ;;  %v13528_v38 = vpop.eup %13527 }
0x1211   : > { %13537 = vrcp.f32 %v7007_v17  ;;  %v7037_v27 = vmul.f32 %v13528_v38, %v17292_v40 }
0x1212   : > { %v7046_v54 = vpack.c.bf16 %v7035_v39, %v7034_v44 }
0x1213   : > { %v13530_v41 = vpop.eup %13529 }
0x1214   : > { %12067 = vmatprep.mubr.bf16.mxu1 %v7046_v54  ;;  %v7036_v58 = vmul.f32 %v13530_v41, %v17300_v24  ;;  %v13532_v16 = vpop.eup %13531 }
0x1215   : > { %v7039_v53 = vmul.f32 %v13532_v16, %v17302_v19  ;;  %v12800_v19 = vld [vmem:[#allocation10 + $0xf0] ss:$8 sps:$4 sm:$0xff]  }
0x1216   : > { %v7047_v37 = vpack.c.bf16 %v7037_v27, %v7036_v58  ;;  %v7372_v27 = vld [vmem:[%s19161_s27] sm:$0x3]  ;;  %v19162_v16 = vld [vmem:[#allocation23_spill] sm:$0xff]  ;;  %s18286_s27 = scalar_lea.vmem [#allocation14], %s10779_s8  ;;  %s11306_s8 = sshll.u32 %s13998_s19, 12 }
0x1217   : > { %v13534_v11 = vpop.eup %13533  ;;  %s10636_s7 = sshll.u32 %s18286_s27, 4  ;;  %s18379_s26 = scalar_lea.hbm %s19229_s20, %s11306_s8  ;;  %s18381_s7 = int_to_ptr.vmem [resolvable:$true] %s10636_s7 }
0x1218   : > { %12068 = vmatmul.mubr.bf16.gmra.mrb[184].mxu1 %v7047_v37  ;;  %v7038_v51 = vmul.f32 %v13534_v11, %v17308_v50  ;;  %v13536_v35 = vpop.eup %13535  ;;  %v12802_v50 = vld [vmem:[#allocation10 + $0xf4] ss:$8 sps:$4 sm:$0xff]   ;;  %v17371_v37 = vrot.slane %v7372_v27, %v19162_v16  ;;  %s10623_s19 = scalar_lea.sflag [#allocation4], %s14247_s5  ;;  %p13808_p13 = scmp.lt.s32.totalorder %s18381_s7, %s13806_s14 }
0x1219   : > { %v7041_v15 = vmul.f32 %v13536_v35, %v17306_v5  ;;  %v19163_v11 = vld [vmem:[#allocation22_spill] sm:$0xff] }
0x121a   : > { %v7048_v21 = vpack.c.bf16 %v7039_v53, %v7038_v51  ;;  %v17374_v51 = vrot.slane %v7372_v27, %v19163_v11 }
0x121b   : > { %v13538_v8 = vpop.eup %13537 }
0x121c   : > { %12071 = vmatprep.mubr.bf16.mxu1 %v7048_v21  ;;  %v7040_v2 = vmul.f32 %v13538_v8, %v17312_v34 }
0x121e   : > { %v7049_v63 = vpack.c.bf16 %v7041_v15, %v7040_v2  ;;  %v13571_v15 = vld [vmem:[%s14253_s13 + $0x8] sm:$0xff] }
0x1220   : > { %12072 = vmatmul.mubr.bf16.gmra.mrb[188].mxu1 %v7049_v63 }
0x123e   : > { %v11997_v24 = vpop.f32.mrb[176].mxu0 }
0x123f   : > { %v6425_v40 = vpop.f32.mrb[177].mxu0 }
0x1240   : > { %v11998_v43 = vpop.f32.mrb[178].mxu0 }
0x1241   : > { %v6489_v47 = vpack.c.bf16 %v11998_v43, %v11997_v24  ;;  %v6428_v9 = vpop.f32.mrb[179].mxu0  ;;  %v13572_v43 = vld [vmem:[%s14253_s13] sm:$0xff] }
0x1242   : > { %v6488_v20 = vpack.c.bf16 %v6428_v9, %v6425_v40  ;;  %v13573_v9 = vld [vmem:[%s14253_s13 + $0x18] sm:$0xff] }
0x1244   : > { %11016 = vmatmul.mubr.msk.bf16.vlgmr.msra.gmra.mrb[112].mxu0 %vm19146_vm13, %v6488_v20  ;;  %v19165_v20 = vld [vmem:[#allocation20_spill] sm:$0xff] }
0x1245   : > { %6586 = vmatprep.mubr.bf16.mxu0 %v19079_v18  ;;  %7228 = vmatpush1.bf16.msra.mxu0 %v12797_v49 }
0x1246   : > { %v12001_v12 = vpop.f32.mrb[180].mxu0  ;;  %7229 = vmatprep.subr.bf16.mxu0 %v12802_v50 }
0x1247   : > { %v6441_v34 = vpop.f32.mrb[181].mxu0 }
0x1248   : > { %v12002_v5 = vpop.f32.mrb[182].mxu0 }
0x1249   : > { %v6491_v55 = vpack.c.bf16 %v12002_v5, %v12001_v12  ;;  %v6444_v61 = vpop.f32.mrb[183].mxu0  ;;  %7230 = vmatpush1.bf16.msra.mxu0 %v12800_v19  ;;  %v13574_v19 = vld [vmem:[%s14253_s13 + $0x10] sm:$0xff] }
0x124a   : > { %v6490_v42 = vpack.c.bf16 %v6444_v61, %v6441_v34 }
0x124c   : > { %11017 = vmatmul.mubr.msk.bf16.gmra.mrb[116].mxu0 %vm19147_vm15, %v6489_v47 }
0x124d   : > { %6596 = vmatprep.mubr.bf16.mxu0 %v19079_v18 }
0x124f   : > { %v12005_v33 = vpop.f32.mrb[184].mxu0 }
0x1250   : > { %v6457_v62 = vpop.f32.mrb[185].mxu0 }
0x1251   : > { %v12006_v3 = vpop.f32.mrb[186].mxu0 }
0x1252   : > { %v6493_v59 = vpack.c.bf16 %v12006_v3, %v12005_v33  ;;  %v6460_v6 = vpop.f32.mrb[187].mxu0 }
0x1253   : > { %v6492_v29 = vpack.c.bf16 %v6460_v6, %v6457_v62  ;;  %v13575_v6 = vld [vmem:[%s14253_s13 + $0x28] sm:$0xff] }
0x1254   : > { %11018 = vmatmul.mubr.msk.bf16.gmra.mrb[120].mxu0 %vm19148_vm12, %v6490_v42 }
0x1255   : > { %6606 = vmatprep.mubr.bf16.mxu0 %v19079_v18 }
0x125c   : > { %11019 = vmatmul.mubr.msk.bf16.gmra.mrb[124].mxu0 %vm19149_vm10, %v6491_v55 }
0x125d   : > { %6616 = vmatprep.mubr.bf16.mxu0 %v19079_v18 }
0x125e   : > { %v12009_v7 = vpop.f32.mrb[188].mxu0 }
0x125f   : > { %v6473_v23 = vpop.f32.mrb[189].mxu0 }
0x1260   : > { %v12010_v45 = vpop.f32.mrb[190].mxu0 }
0x1261   : > { %v6495_v1 = vpack.c.bf16 %v12010_v45, %v12009_v7  ;;  %v6476_v25 = vpop.f32.mrb[191].mxu0  ;;  %v13576_v45 = vld [vmem:[%s14253_s13 + $0x20] sm:$0xff] }
0x1262   : > { %v6494_v4 = vpack.c.bf16 %v6476_v25, %v6473_v23  ;;  %v13577_v25 = vld [vmem:[%s14253_s13 + $0x38] sm:$0xff] }
0x1264   : > { %11020 = vmatmul.mubr.msk.bf16.gmra.mrb[128].mxu0 %vm19150_vm2, %v6492_v29 }
0x1265   : > { %6626 = vmatprep.mubr.bf16.mxu0 %v19079_v18 }
0x126c   : > { %11021 = vmatmul.mubr.msk.bf16.gmra.mrb[132].mxu0 %vm19151_vm3, %v6493_v59 }
0x126d   : > { %6636 = vmatprep.mubr.bf16.mxu0 %v19079_v18 }
0x1274   : > { %11022 = vmatmul.mubr.msk.bf16.gmra.mrb[136].mxu0 %vm19152_vm4, %v6494_v4 }
0x1275   : > { %6646 = vmatprep.mubr.bf16.mxu0 %v19079_v18 }
0x127c   : > { %11023 = vmatmul.mubr.msk.bf16.gmra.mrb[140].mxu0 %vm19153_vm5, %v6495_v1 }
0x127d   : > { %7259 = vmatprep.mubr.bf16.mxu0 %v19079_v18 }
0x12af   : > { %v12061_v60 = vpop.f32.mrb[176].mxu1 }
0x12b0   : > { %v7108_v56 = vpop.f32.mrb[177].mxu1 }
0x12b1   : > { %v12062_v10 = vpop.f32.mrb[178].mxu1 }
0x12b2   : > { %v7172_v0 = vpack.c.bf16 %v12062_v10, %v12061_v60  ;;  %v7111_v52 = vpop.f32.mrb[179].mxu1 }
0x12b3   : > { %v7171_v32 = vpack.c.bf16 %v7111_v52, %v7108_v56  ;;  %v13578_v56 = vld [vmem:[%s14253_s13 + $0x30] sm:$0xff] }
0x12b5   : > { %11036 = vmatmul.mubr.msk.bf16.vlgmr.msra.gmra.mrb[112].mxu0 %vm19154_vm6, %v7171_v32 }
0x12b6   : > { %7269 = vmatprep.mubr.bf16.mxu0 %v19079_v18 }
0x12b7   : > { %v12065_v46 = vpop.f32.mrb[180].mxu1 }
0x12b8   : > { %v7124_v28 = vpop.f32.mrb[181].mxu1 }
0x12b9   : > { %v12066_v13 = vpop.f32.mrb[182].mxu1 }
0x12ba   : > { %v7174_v36 = vpack.c.bf16 %v12066_v13, %v12065_v46  ;;  %v7127_v22 = vpop.f32.mrb[183].mxu1 }
0x12bb   : > { %v7173_v26 = vpack.c.bf16 %v7127_v22, %v7124_v28 }
0x12bd   : > { %11037 = vmatmul.mubr.msk.bf16.gmra.mrb[116].mxu0 %vm19155_vm7, %v7172_v0 }
0x12be   : > { %7279 = vmatprep.mubr.bf16.mxu0 %v19079_v18 }
0x12c5   : > { %11038 = vmatmul.mubr.msk.bf16.gmra.mrb[120].mxu0 %vm19156_vm8, %v7173_v26 }
0x12c6   : > { %7289 = vmatprep.mubr.bf16.mxu0 %v19079_v18 }
0x12cd   : > { %11039 = vmatmul.mubr.msk.bf16.gmra.mrb[124].mxu0 %vm19157_vm9, %v7174_v36 }
0x12ce   : > { %7299 = vmatprep.mubr.bf16.mxu0 %v19079_v18 }
0x12eb   : > { %v12069_v48 = vpop.f32.mrb[184].mxu1 }
0x12ec   : > { %v7140_v57 = vpop.f32.mrb[185].mxu1 }
0x12ed   : > { %v12070_v31 = vpop.f32.mrb[186].mxu1 }
0x12ee   : > { %v7176_v30 = vpack.c.bf16 %v12070_v31, %v12069_v48  ;;  %v7143_v14 = vpop.f32.mrb[187].mxu1  ;;  %v13579_v48 = vld [vmem:[%s14253_s13 + $0x48] sm:$0xff] }
0x12ef   : > { %v7175_v17 = vpack.c.bf16 %v7143_v14, %v7140_v57  ;;  %v13580_v14 = vld [vmem:[%s14253_s13 + $0x40] sm:$0xff] }
0x12f1   : > { %11040 = vmatmul.mubr.msk.bf16.gmra.mrb[128].mxu0 %vm19158_vm11, %v7175_v17 }
0x12f2   : > { %7309 = vmatprep.mubr.bf16.mxu0 %v19079_v18 }
0x12f3   : > { %v12073_v44 = vpop.f32.mrb[188].mxu1 }
0x12f4   : > { %v7156_v39 = vpop.f32.mrb[189].mxu1 }
0x12f5   : > { %v12074_v38 = vpop.f32.mrb[190].mxu1 }
0x12f6   : > { %v7178_v54 = vpack.c.bf16 %v12074_v38, %v12073_v44  ;;  %v7159_v41 = vpop.f32.mrb[191].mxu1  ;;  %v13581_v44 = vld [vmem:[%s14253_s13 + $0x58] sm:$0xff] }
0x12f7   : > { %v7177_v58 = vpack.c.bf16 %v7159_v41, %v7156_v39 }
0x12f9   : > { %11041 = vmatmul.mubr.msk.bf16.gmra.mrb[132].mxu0 %vm19132_vm0, %v7176_v30 }
0x12fa   : > { %7319 = vmatprep.mubr.bf16.mxu0 %v19079_v18 }
0x1301   : > { %11042 = vmatmul.mubr.msk.bf16.gmra.mrb[136].mxu0 %vm19159_vm14, %v7177_v58 }
0x1302   : > { %7329 = vmatprep.mubr.bf16.mxu0 %v19079_v18 }
0x1309   : > { %11043 = vmatmul.mubr.msk.bf16.gmra.mrb[140].mxu0 %vm19160_vm1, %v7178_v54  ;;  %v13582_v54 = vld [vmem:[%s14253_s13 + $0x50] sm:$0xff] }
0x1388   : > { %v7261_v53 = vpop.f32.mrb[112].mxu0 }
0x1389   : > { %v7263_v35 = vpop.f32.mrb[113].mxu0  ;;  %v7384_v21 = vadd.f32 %v17371_v37, %v7261_v53 }
0x138a   : > { %v7385_v18 = vadd.f32 %v17374_v51, %v7263_v35  ;;  %v7265_v8 = vpop.f32.mrb[114].mxu0 }
0x138b   : > { %v7267_v2 = vpop.f32.mrb[115].mxu0  ;;  %v7386_v24 = vadd.f32 %v17371_v37, %v7265_v8  ;;  %v17384_v47 = vadd.f32 %v13572_v43, %v7384_v21 }
0x138c   : > { %v17379_v63 = vadd.f32 %v13571_v15, %v7385_v18  ;;  %v7387_v40 = vadd.f32 %v17374_v51, %v7267_v2 }
0x138d   : > { %v17392_v12 = vadd.f32 %v13574_v19, %v7386_v24  ;;  %v13583_v24 = vld [vmem:[%s14253_s13 + $0x68] sm:$0xff] }
0x138e   : > { %v17387_v49 = vadd.f32 %v13573_v9, %v7387_v40  ;;  %v7451_v50 = vmul.f32 %v19165_v20, %v17379_v63 }
0x1390   : > { %19164 = vst [vmem:[#allocation40_spill] sm:$0xff] %v17387_v49  ;;  %v7271_v34 = vpop.f32.mrb[116].mxu0  ;;  %v7482_v5 = vadd.f32 %v7451_v50, %v17384_v47  ;;  %v7453_v55 = vmul.f32 %v19165_v20, %v17387_v49  ;;  %v13584_v50 = vld [vmem:[%s14253_s13 + $0x60] sm:$0xff] }
0x1391   : > { %v7273_v61 = vpop.f32.mrb[117].mxu0  ;;  %v7388_v42 = vadd.f32 %v17371_v37, %v7271_v34  ;;  %v13585_v34 = vld [vmem:[%s14253_s13 + $0x78] sm:$0xff] }
0x1392   : > { %v7389_v33 = vadd.f32 %v17374_v51, %v7273_v61  ;;  %7483 = vadd.xlane.f32.xlu0 %v7482_v5  ;;  %v7275_v62 = vpop.f32.mrb[118].mxu0  ;;  %v7485_v3 = vadd.f32 %v7453_v55, %v17392_v12  ;;  %v13586_v61 = vld [vmem:[%s14253_s13 + $0x70] sm:$0xff] }
0x1393   : > { %v7277_v59 = vpop.f32.mrb[119].mxu0  ;;  %v7390_v7 = vadd.f32 %v17371_v37, %v7275_v62  ;;  %v17406_v1 = vadd.f32 %v13576_v45, %v7388_v42 }
0x1394   : > { %v17401_v29 = vadd.f32 %v13575_v6, %v7389_v33  ;;  %v7391_v23 = vadd.f32 %v17374_v51, %v7277_v59  ;;  %7486 = vadd.xlane.f32.xlu1 %v7485_v3 }
0x1395   : > { %19167 = vst [vmem:[#allocation39_spill] sm:$0xff] %v17406_v1  ;;  %v17414_v10 = vadd.f32 %v13578_v56, %v7390_v7 }
0x1396   : > { %19166 = vst [vmem:[#allocation41_spill] sm:$0xff] %v17401_v29  ;;  %v17409_v4 = vadd.f32 %v13577_v25, %v7391_v23  ;;  %v7455_v60 = vmul.f32 %v19165_v20, %v17401_v29 }
0x1397   : > { %19169 = vst [vmem:[#allocation43_spill] sm:$0xff] %v17414_v10 }
0x1398   : > { %19168 = vst [vmem:[#allocation42_spill] sm:$0xff] %v17409_v4  ;;  %v7281_v0 = vpop.f32.mrb[120].mxu0  ;;  %v7488_v52 = vadd.f32 %v7455_v60, %v17406_v1  ;;  %v7457_v32 = vmul.f32 %v19165_v20, %v17409_v4  ;;  %v13587_v60 = vld [vmem:[%s14253_s13 + $0x88] sm:$0xff] }
0x1399   : > { %v7283_v46 = vpop.f32.mrb[121].mxu0  ;;  %v7392_v28 = vadd.f32 %v17371_v37, %v7281_v0 }
0x139a   : > { %v7393_v13 = vadd.f32 %v17374_v51, %v7283_v46  ;;  %7489 = vadd.xlane.f32.xlu0 %v7488_v52  ;;  %v7285_v36 = vpop.f32.mrb[122].mxu0  ;;  %v7491_v22 = vadd.f32 %v7457_v32, %v17414_v10  ;;  %v13588_v32 = vld [vmem:[%s14253_s13 + $0x80] sm:$0xff] }
0x139b   : > { %v7287_v26 = vpop.f32.mrb[123].mxu0  ;;  %v7394_v31 = vadd.f32 %v17371_v37, %v7285_v36  ;;  %v17428_v17 = vadd.f32 %v13580_v14, %v7392_v28  ;;  %v13589_v28 = vld [vmem:[%s14253_s13 + $0x98] sm:$0xff] }
0x139c   : > { %v17423_v57 = vadd.f32 %v13579_v48, %v7393_v13  ;;  %v7395_v30 = vadd.f32 %v17374_v51, %v7287_v26  ;;  %7492 = vadd.xlane.f32.xlu1 %v7491_v22  ;;  %v13590_v22 = vld [vmem:[%s14253_s13 + $0x90] sm:$0xff] }
0x139d   : > { %19171 = vst [vmem:[#allocation45_spill] sm:$0xff] %v17428_v17  ;;  %v17436_v41 = vadd.f32 %v13582_v54, %v7394_v31 }
0x139e   : > { %19170 = vst [vmem:[#allocation44_spill] sm:$0xff] %v17423_v57  ;;  %v17431_v39 = vadd.f32 %v13581_v44, %v7395_v30  ;;  %v7459_v38 = vmul.f32 %v19165_v20, %v17423_v57 }
0x139f   : > { %19173 = vst [vmem:[#allocation24_spill] sm:$0xff] %v17436_v41 }
0x13a0   : > { %19172 = vst [vmem:[#allocation46_spill] sm:$0xff] %v17431_v39  ;;  %v7291_v58 = vpop.f32.mrb[124].mxu0  ;;  %v7494_v27 = vadd.f32 %v7459_v38, %v17428_v17  ;;  %v7461_v53 = vmul.f32 %v19165_v20, %v17431_v39 }
0x13a1   : > { %v7293_v35 = vpop.f32.mrb[125].mxu0  ;;  %v7396_v21 = vadd.f32 %v17371_v37, %v7291_v58 }
0x13a2   : > { %v7397_v18 = vadd.f32 %v17374_v51, %v7293_v35  ;;  %7495 = vadd.xlane.f32.xlu0 %v7494_v27  ;;  %v7295_v8 = vpop.f32.mrb[126].mxu0  ;;  %v7497_v2 = vadd.f32 %v7461_v53, %v17436_v41  ;;  %v13591_v53 = vld [vmem:[%s14253_s13 + $0xa8] sm:$0xff] }
0x13a3   : > { %v7297_v15 = vpop.f32.mrb[127].mxu0  ;;  %v7398_v43 = vadd.f32 %v17371_v37, %v7295_v8  ;;  %v17450_v19 = vadd.f32 %v13584_v50, %v7396_v21  ;;  %v13592_v8 = vld [vmem:[%s14253_s13 + $0xa0] sm:$0xff] }
0x13a4   : > { %v17445_v40 = vadd.f32 %v13583_v24, %v7397_v18  ;;  %v7399_v9 = vadd.f32 %v17374_v51, %v7297_v15  ;;  %7498 = vadd.xlane.f32.xlu1 %v7497_v2  ;;  %v13593_v15 = vld [vmem:[%s14253_s13 + $0xb8] sm:$0xff] }
0x13a5   : > { %19175 = vst [vmem:[#allocation38_spill] sm:$0xff] %v17450_v19  ;;  %v17458_v42 = vadd.f32 %v13586_v61, %v7398_v43 }
0x13a6   : > { %19174 = vst [vmem:[#allocation36_spill] sm:$0xff] %v17445_v40  ;;  %v17453_v5 = vadd.f32 %v13585_v34, %v7399_v9  ;;  %v7463_v55 = vmul.f32 %v19165_v20, %v17445_v40  ;;  %v13594_v9 = vld [vmem:[%s14253_s13 + $0xb0] sm:$0xff] }
0x13a7   : > { %19177 = vst [vmem:[#allocation31_spill] sm:$0xff] %v17458_v42 }
0x13a8   : > { %19176 = vst [vmem:[#allocation26_spill] sm:$0xff] %v17453_v5  ;;  %v7500_v33 = vadd.f32 %v7463_v55, %v17450_v19  ;;  %v7465_v62 = vmul.f32 %v19165_v20, %v17453_v5 }
0x13aa   : > { %7501 = vadd.xlane.f32.xlu0 %v7500_v33  ;;  %v7503_v3 = vadd.f32 %v7465_v62, %v17458_v42 }
0x13ac   : > { %7504 = vadd.xlane.f32.xlu1 %v7503_v3 }
0x13c4   : > { %v7301_v59 = vpop.f32.mrb[128].mxu0 }
0x13c5   : > { %v7303_v6 = vpop.f32.mrb[129].mxu0  ;;  %v7400_v7 = vadd.f32 %v17371_v37, %v7301_v59 }
0x13c6   : > { %v7401_v23 = vadd.f32 %v17374_v51, %v7303_v6  ;;  %v7305_v45 = vpop.f32.mrb[130].mxu0 }
0x13c7   : > { %v7307_v25 = vpop.f32.mrb[131].mxu0  ;;  %v7402_v0 = vadd.f32 %v17371_v37, %v7305_v45  ;;  %v17472_v46 = vadd.f32 %v13588_v32, %v7400_v7  ;;  %v13597_v32 = vld [vmem:[%s14253_s13 + $0xd8] sm:$0xff] }
0x13c8   : > { %v17467_v56 = vadd.f32 %v13587_v60, %v7401_v23  ;;  %v7403_v52 = vadd.f32 %v17374_v51, %v7307_v25  ;;  %v13595_v23 = vld [vmem:[%s14253_s13 + $0xc8] sm:$0xff] }
0x13c9   : > { %19179 = vst [vmem:[#allocation35_spill] sm:$0xff] %v17472_v46  ;;  %v17480_v26 = vadd.f32 %v13590_v22, %v7402_v0  ;;  %v13596_v0 = vld [vmem:[%s14253_s13 + $0xc0] sm:$0xff]  ;;  %v13598_v22 = vld [vmem:[%s14253_s13 + $0xd0] sm:$0xff] }
0x13ca   : > { %19178 = vst [vmem:[#allocation28_spill] sm:$0xff] %v17467_v56  ;;  %v17475_v13 = vadd.f32 %v13589_v28, %v7403_v52  ;;  %v7467_v36 = vmul.f32 %v19165_v20, %v17467_v56 }
0x13cb   : > { %19181 = vst [vmem:[#allocation27_spill] sm:$0xff] %v17480_v26 }
0x13cc   : > { %19180 = vst [vmem:[#allocation79_spill] sm:$0xff] %v17475_v13  ;;  %v7311_v48 = vpop.f32.mrb[132].mxu0  ;;  %v7506_v31 = vadd.f32 %v7467_v36, %v17472_v46  ;;  %v7469_v30 = vmul.f32 %v19165_v20, %v17475_v13 }
0x13cd   : > { %v7313_v14 = vpop.f32.mrb[133].mxu0  ;;  %v7404_v44 = vadd.f32 %v17371_v37, %v7311_v48 }
0x13ce   : > { %v7405_v38 = vadd.f32 %v17374_v51, %v7313_v14  ;;  %7507 = vadd.xlane.f32.xlu0 %v7506_v31  ;;  %v7315_v54 = vpop.f32.mrb[134].mxu0  ;;  %v7509_v58 = vadd.f32 %v7469_v30, %v17480_v26 }
0x13cf   : > { %v7317_v27 = vpop.f32.mrb[135].mxu0  ;;  %v7406_v21 = vadd.f32 %v17371_v37, %v7315_v54  ;;  %v17494_v2 = vadd.f32 %v13592_v8, %v7404_v44 }
0x13d0   : > { %v17489_v35 = vadd.f32 %v13591_v53, %v7405_v38  ;;  %v7407_v18 = vadd.f32 %v17374_v51, %v7317_v27  ;;  %7510 = vadd.xlane.f32.xlu1 %v7509_v58 }
0x13d1   : > { %19183 = vst [vmem:[#allocation86_spill] sm:$0xff] %v17494_v2  ;;  %v17502_v50 = vadd.f32 %v13594_v9, %v7406_v21  ;;  %v13599_v21 = vld [vmem:[%s14253_s13 + $0xe8] sm:$0xff] }
0x13d2   : > { %19182 = vst [vmem:[#allocation48_spill] sm:$0xff] %v17489_v35  ;;  %v17497_v24 = vadd.f32 %v13593_v15, %v7407_v18  ;;  %v7471_v43 = vmul.f32 %v19165_v20, %v17489_v35 }
0x13d3   : > { %19185 = vst [vmem:[#allocation52_spill] sm:$0xff] %v17502_v50 }
0x13d4   : > { %19184 = vst [vmem:[#allocation29_spill] sm:$0xff] %v17497_v24  ;;  %v7321_v34 = vpop.f32.mrb[136].mxu0  ;;  %v7512_v55 = vadd.f32 %v7471_v43, %v17494_v2  ;;  %v7473_v61 = vmul.f32 %v19165_v20, %v17497_v24  ;;  %v13600_v43 = vld [vmem:[%s14253_s13 + $0xe0] sm:$0xff] }
0x13d5   : > { %v7323_v33 = vpop.f32.mrb[137].mxu0  ;;  %v7408_v62 = vadd.f32 %v17371_v37, %v7321_v34  ;;  %v13601_v34 = vld [vmem:[%s14253_s13 + $0xf8] sm:$0xff] }
0x13d6   : > { %v7409_v3 = vadd.f32 %v17374_v51, %v7323_v33  ;;  %7513 = vadd.xlane.f32.xlu0 %v7512_v55  ;;  %v7325_v59 = vpop.f32.mrb[138].mxu0  ;;  %v7515_v6 = vadd.f32 %v7473_v61, %v17502_v50  ;;  %v13602_v33 = vld [vmem:[%s14253_s13 + $0xf0] sm:$0xff]  ;;  %s19194_s13 = sld [smem:[#allocation90_spill]] }
0x13d7   : > { %v7327_v7 = vpop.f32.mrb[139].mxu0  ;;  %v7410_v25 = vadd.f32 %v17371_v37, %v7325_v59  ;;  %v17516_v52 = vadd.f32 %v13596_v0, %v7408_v62  ;;  %v7872_v59 = vld [vmem:[#allocation11] sm:$0xff] }
0x13d8   : > { %v17511_v45 = vadd.f32 %v13595_v23, %v7409_v3  ;;  %v7411_v60 = vadd.f32 %v17374_v51, %v7327_v7  ;;  %7516 = vadd.xlane.f32.xlu1 %v7515_v6  ;;  %v7876_v6 = vld [vmem:[#allocation11 + $0x20] sm:$0xff]  ;;  %v7873_v7 = vld [vmem:[#allocation11 + $0x8] sm:$0xff] }
0x13d9   : > { %19187 = vst [vmem:[#allocation58_spill] sm:$0xff] %v17516_v52  ;;  %v17524_v48 = vadd.f32 %v13598_v22, %v7410_v25  ;;  %v11044_v23 = vcombine.low %v7872_v59, %v7876_v6  ;;  %v11045_v25 = vcombine.high %v7872_v59, %v7876_v6  ;;  %v7880_v0 = vld [vmem:[#allocation11 + $0x40] sm:$0xff] }
0x13da   : > { %19186 = vst [vmem:[#allocation54_spill] sm:$0xff] %v17511_v45  ;;  %v17519_v28 = vadd.f32 %v13597_v32, %v7411_v60  ;;  %v7475_v36 = vmul.f32 %v19165_v20, %v17511_v45  ;;  %v7877_v60 = vld [vmem:[#allocation11 + $0x28] sm:$0xff]  ;;  %v7884_v32 = vld [vmem:[#allocation11 + $0x60] sm:$0xff] }
0x13db   : > { %19189 = vst [vmem:[#allocation32_spill] sm:$0xff] %v17524_v48  ;;  %v11047_v22 = vcombine.high %v7873_v7, %v7877_v60  ;;  %8682 = vmatprep.subr.bf16.mxu1 %v11045_v25  ;;  %v7904_v6 = vld [vmem:[#allocation11 + $0x100] sm:$0xff]  ;;  %v7909_v25 = vld [vmem:[#allocation11 + $0x128] sm:$0xff] }
0x13dc   : > { %19188 = vst [vmem:[#allocation30_spill] sm:$0xff] %v17519_v28  ;;  %v7331_v31 = vpop.f32.mrb[140].mxu0  ;;  %v7518_v30 = vadd.f32 %v7475_v36, %v17516_v52  ;;  %v7477_v14 = vmul.f32 %v19165_v20, %v17519_v28  ;;  %v11046_v36 = vcombine.low %v7873_v7, %v7877_v60  ;;  %8683 = vmatpush1.bf16.msra.mxu1 %v11044_v23  ;;  %v7908_v7 = vld [vmem:[#allocation11 + $0x120] sm:$0xff]  ;;  %v7905_v23 = vld [vmem:[#allocation11 + $0x108] sm:$0xff] }
0x13dd   : > { %v7333_v44 = vpop.f32.mrb[141].mxu0  ;;  %v7412_v38 = vadd.f32 %v17371_v37, %v7331_v31  ;;  %v11053_v31 = vcombine.high %v7880_v0, %v7884_v32  ;;  %8795 = vmatprep.subr.bf16.mxu0 %v11047_v22  ;;  %v7912_v22 = vld [vmem:[#allocation11 + $0x140] sm:$0xff] }
0x13de   : > { %v7413_v54 = vadd.f32 %v17374_v51, %v7333_v44  ;;  %7519 = vadd.xlane.f32.xlu0 %v7518_v30  ;;  %v7335_v58 = vpop.f32.mrb[142].mxu0  ;;  %v7521_v27 = vadd.f32 %v7477_v14, %v17524_v48  ;;  %v7881_v30 = vld [vmem:[#allocation11 + $0x48] sm:$0xff]  ;;  %v7888_v44 = vld [vmem:[#allocation11 + $0x80] sm:$0xff]  ;;  %8796 = vmatpush1.bf16.msra.mxu0 %v11046_v36  ;;  %v11079_v36 = vcombine.high %v7905_v23, %v7909_v25 }
0x13df   : > { %v7337_v53 = vpop.f32.mrb[143].mxu0  ;;  %v7414_v8 = vadd.f32 %v17371_v37, %v7335_v58  ;;  %v17538_v9 = vadd.f32 %v13600_v43, %v7412_v38  ;;  %v7885_v14 = vld [vmem:[#allocation11 + $0x68] sm:$0xff]  ;;  %8684 = vmatprep.subr.bf16.mxu1 %v11053_v31  ;;  %v7896_v43 = vld [vmem:[#allocation11 + $0xc0] sm:$0xff] }
0x13e0   : > { %v17533_v18 = vadd.f32 %v13599_v21, %v7413_v54  ;;  %v7415_v15 = vadd.f32 %v17374_v51, %v7337_v53  ;;  %7522 = vadd.xlane.f32.xlu1 %v7521_v27  ;;  %v11055_v38 = vcombine.high %v7881_v30, %v7885_v14  ;;  %v7892_v54 = vld [vmem:[#allocation11 + $0xa0] sm:$0xff]  ;;  %v7889_v58 = vld [vmem:[#allocation11 + $0x88] sm:$0xff]  ;;  %v11052_v53 = vcombine.low %v7880_v0, %v7884_v32 }
0x13e1   : > { %19191 = vst [vmem:[#allocation50_spill] sm:$0xff] %v17538_v9  ;;  %v17546_v62 = vadd.f32 %v13602_v33, %v7414_v8  ;;  %v7893_v27 = vld [vmem:[#allocation11 + $0xa8] sm:$0xff]  ;;  %v11054_v21 = vcombine.low %v7881_v30, %v7885_v14  ;;  %v11061_v8 = vcombine.high %v7888_v44, %v7892_v54  ;;  %v11077_v32 = vcombine.high %v7904_v6, %v7908_v7  ;;  %v7916_v31 = vld [vmem:[#allocation11 + $0x160] sm:$0xff] }
0x13e2   : > { %19190 = vst [vmem:[#allocation34_spill] sm:$0xff] %v17533_v18  ;;  %v17541_v55 = vadd.f32 %v13601_v34, %v7415_v15  ;;  %v7479_v61 = vmul.f32 %v19165_v20, %v17533_v18  ;;  %8797 = vmatprep.subr.bf16.mxu0 %v11055_v38  ;;  %v11063_v15 = vcombine.high %v7889_v58, %v7893_v27  ;;  %v7900_v34 = vld [vmem:[#allocation11 + $0xe0] sm:$0xff]  ;;  %v7901_v33 = vld [vmem:[#allocation11 + $0xe8] sm:$0xff] }
0x13e3   : > { %19193 = vst [vmem:[#allocation85_spill] sm:$0xff] %v17546_v62  ;;  %8685 = vmatpush1.bf16.msra.mxu1 %v11052_v53  ;;  %8798 = vmatpush1.bf16.msra.mxu0 %v11054_v21  ;;  %v11068_v60 = vcombine.low %v7896_v43, %v7900_v34  ;;  %v7913_v30 = vld [vmem:[#allocation11 + $0x148] sm:$0xff]  ;;  %v11078_v38 = vcombine.low %v7905_v23, %v7909_v25  ;;  %v7924_v53 = vld [vmem:[#allocation11 + $0x1a0] sm:$0xff] }
0x13e4   : > { %19192 = vst [vmem:[#allocation56_spill] sm:$0xff] %v17541_v55  ;;  %v7524_v3 = vadd.f32 %v7479_v61, %v17538_v9  ;;  %v7481_v37 = vmul.f32 %v19165_v20, %v17541_v55  ;;  %v7897_v61 = vld [vmem:[#allocation11 + $0xc8] sm:$0xff]  ;;  %8686 = vmatprep.subr.bf16.mxu1 %v11061_v8  ;;  %8799 = vmatprep.subr.bf16.mxu0 %v11063_v15  ;;  %v7936_v25 = vld [vmem:[#allocation11 + $0x200] sm:$0xff] }
0x13e5   : > { %v11071_v59 = vcombine.high %v7897_v61, %v7901_v33  ;;  %v11070_v0 = vcombine.low %v7897_v61, %v7901_v33  ;;  %v7917_v14 = vld [vmem:[#allocation11 + $0x168] sm:$0xff]  ;;  %v11084_v15 = vcombine.low %v7912_v22, %v7916_v31  ;;  %v7928_v33 = vld [vmem:[#allocation11 + $0x1c0] sm:$0xff] }
0x13e6   : > { %7525 = vadd.xlane.f32.xlu0 %v7524_v3  ;;  %v7527_v51 = vadd.f32 %v7481_v37, %v17546_v62  ;;  %v11060_v3 = vcombine.low %v7888_v44, %v7892_v54  ;;  %v11062_v37 = vcombine.low %v7889_v58, %v7893_v27  ;;  %v11076_v44 = vcombine.low %v7904_v6, %v7908_v7  ;;  %v7920_v27 = vld [vmem:[#allocation11 + $0x180] sm:$0xff]  ;;  %v7921_v21 = vld [vmem:[#allocation11 + $0x188] sm:$0xff] }
0x13e7   : > { %v11085_v54 = vcombine.high %v7912_v22, %v7916_v31  ;;  %v11087_v58 = vcombine.high %v7913_v30, %v7917_v14  ;;  %v7925_v8 = vld [vmem:[#allocation11 + $0x1a8] sm:$0xff] }
0x13e8   : > { %7528 = vadd.xlane.f32.xlu1 %v7527_v51  ;;  %v11069_v51 = vcombine.high %v7896_v43, %v7900_v34  ;;  %8687 = vmatpush1.bf16.msra.mxu1 %v11060_v3  ;;  %v11086_v43 = vcombine.low %v7913_v30, %v7917_v14  ;;  %v11093_v34 = vcombine.high %v7920_v27, %v7924_v53  ;;  %v7932_v3 = vld [vmem:[#allocation11 + $0x1e0] sm:$0xff] }
0x13e9   : > { %8800 = vmatpush1.bf16.msra.mxu0 %v11062_v37  ;;  %v11095_v61 = vcombine.high %v7921_v21, %v7925_v8  ;;  %v7929_v37 = vld [vmem:[#allocation11 + $0x1c8] sm:$0xff]  ;;  %v11094_v6 = vcombine.low %v7921_v21, %v7925_v8  ;;  %v11101_v7 = vcombine.high %v7928_v33, %v7932_v3  ;;  %v7944_v14 = vld [vmem:[#allocation11 + $0x240] sm:$0xff] }
0x13ea   : > { %8688 = vmatprep.subr.bf16.mxu1 %v11069_v51  ;;  %8801 = vmatprep.subr.bf16.mxu0 %v11071_v59  ;;  %v7933_v51 = vld [vmem:[#allocation11 + $0x1e8] sm:$0xff]  ;;  %v11092_v59 = vcombine.low %v7920_v27, %v7924_v53 }
0x13eb   : > { %v11103_v23 = vcombine.high %v7929_v37, %v7933_v51  ;;  %v11102_v22 = vcombine.low %v7929_v37, %v7933_v51 }
0x13ec   : > { %8689 = vmatpush1.bf16.msra.mxu1 %v11068_v60  ;;  %v7940_v60 = vld [vmem:[#allocation11 + $0x220] sm:$0xff] }
0x13ed   : > { %8802 = vmatpush1.bf16.msra.mxu0 %v11070_v0  ;;  %8690 = vmatprep.subr.bf16.mxu1 %v11077_v32  ;;  %v7937_v0 = vld [vmem:[#allocation11 + $0x208] sm:$0xff]  ;;  %v11109_v31 = vcombine.high %v7936_v25, %v7940_v60  ;;  %v11108_v53 = vcombine.low %v7936_v25, %v7940_v60 }
0x13ee   : > { %8803 = vmatprep.subr.bf16.mxu0 %v11079_v36  ;;  %v7941_v32 = vld [vmem:[#allocation11 + $0x228] sm:$0xff]  ;;  %v11100_v36 = vcombine.low %v7928_v33, %v7932_v3 }
0x13ef   : > { %v11111_v30 = vcombine.high %v7937_v0, %v7941_v32  ;;  %v11110_v8 = vcombine.low %v7937_v0, %v7941_v32 }
0x13f0   : > { %8691 = vmatpush1.bf16.msra.mxu1 %v11076_v44  ;;  %v7948_v44 = vld [vmem:[#allocation11 + $0x260] sm:$0xff] }
0x13f1   : > { %8804 = vmatpush1.bf16.msra.mxu0 %v11078_v38  ;;  %8692 = vmatprep.subr.bf16.mxu1 %v11085_v54  ;;  %v7945_v54 = vld [vmem:[#allocation11 + $0x248] sm:$0xff] }
0x13f2   : > { %8805 = vmatprep.subr.bf16.mxu0 %v11087_v58  ;;  %v7949_v58 = vld [vmem:[#allocation11 + $0x268] sm:$0xff] }
0x13f3   : > { %v11119_v33 = vcombine.high %v7945_v54, %v7949_v58 }
0x13f4   : > { %8693 = vmatpush1.bf16.msra.mxu1 %v11084_v15  ;;  %v11117_v15 = vcombine.high %v7944_v14, %v7948_v44 }
0x13f5   : > { %8806 = vmatpush1.bf16.msra.mxu0 %v11086_v43  ;;  %8694 = vmatprep.subr.bf16.mxu1 %v11093_v34 }
0x13f6   : > { %8807 = vmatprep.subr.bf16.mxu0 %v11095_v61 }
0x13f8   : > { %8695 = vmatpush1.bf16.msra.mxu1 %v11092_v59  ;;  %v11116_v59 = vcombine.low %v7944_v14, %v7948_v44 }
0x13f9   : > { %8808 = vmatpush1.bf16.msra.mxu0 %v11094_v6  ;;  %8696 = vmatprep.subr.bf16.mxu1 %v11101_v7  ;;  %v11118_v6 = vcombine.low %v7945_v54, %v7949_v58 }
0x13fa   : > { %8809 = vmatprep.subr.bf16.mxu0 %v11103_v23 }
0x13fc   : > { %8697 = vmatpush1.bf16.msra.mxu1 %v11100_v36 }
0x13fd   : > { %8810 = vmatpush1.bf16.msra.mxu0 %v11102_v22  ;;  %8698 = vmatprep.subr.bf16.mxu1 %v11109_v31 }
0x13fe   : > { %8811 = vmatprep.subr.bf16.mxu0 %v11111_v30 }
0x1400   : > { %8699 = vmatpush1.bf16.msra.mxu1 %v11108_v53 }
0x1401   : > { %8812 = vmatpush1.bf16.msra.mxu0 %v11110_v8  ;;  %8700 = vmatprep.subr.bf16.mxu1 %v11117_v15 }
0x1402   : > { %8813 = vmatprep.subr.bf16.mxu0 %v11119_v33 }
0x1404   : > { %8701 = vmatpush1.bf16.msra.mxu1 %v11116_v59 }
0x1405   : > { %8814 = vmatpush1.bf16.msra.mxu0 %v11118_v6 }
0x141f   : > { %v7484_v38 = vpop.xlane.xlu0 %7483 }
0x1420   : > { %v7530_v27 = vmul.f32 0.005, %v7484_v38 }
0x1421   : > { %v7487_v21 = vpop.xlane.xlu1 %7486 }
0x1422   : > { %v17553_v43 = vsub.f32 %v17384_v47, %v7530_v27  ;;  %v17556_v34 = vsub.f32 %v17379_v63, %v7530_v27  ;;  %v7531_v61 = vmul.f32 0.005, %v7487_v21 }
0x1424   : > { %v7579_v3 = vmul.f32 %v17556_v34, %v17556_v34  ;;  %v17561_v37 = vsub.f32 %v17392_v12, %v7531_v61  ;;  %v17564_v51 = vsub.f32 %v17387_v49, %v7531_v61  ;;  %v7578_v7 = vmul.f32 %v17553_v43, %v17553_v43 }
0x1426   : > { %v7581_v23 = vmul.f32 %v17564_v51, %v17564_v51  ;;  %v7611_v25 = vmul.f32 %v19165_v20, %v7579_v3  ;;  %v7580_v0 = vmul.f32 %v17561_v37, %v17561_v37 }
0x1427   : > { %v7490_v60 = vpop.xlane.xlu0 %7489 }
0x1428   : > { %v7532_v32 = vmul.f32 0.005, %v7490_v60  ;;  %v7642_v36 = vadd.f32 %v7611_v25, %v7578_v7  ;;  %v7613_v22 = vmul.f32 %v19165_v20, %v7581_v23 }
0x1429   : > { %v7493_v31 = vpop.xlane.xlu1 %7492 }
0x142a   : > { %v17575_v30 = vsub.f32 %v17406_v1, %v7532_v32  ;;  %v17578_v14 = vsub.f32 %v17401_v29, %v7532_v32  ;;  %v7533_v44 = vmul.f32 0.005, %v7493_v31  ;;  %7643 = vadd.xlane.f32.xlu0 %v7642_v36  ;;  %v7645_v38 = vadd.f32 %v7613_v22, %v7580_v0 }
0x142c   : > { %v7583_v54 = vmul.f32 %v17578_v14, %v17578_v14  ;;  %v17583_v58 = vsub.f32 %v17414_v10, %v7533_v44  ;;  %v17586_v27 = vsub.f32 %v17409_v4, %v7533_v44  ;;  %7646 = vadd.xlane.f32.xlu1 %v7645_v38  ;;  %v7582_v53 = vmul.f32 %v17575_v30, %v17575_v30  ;;  %v7883_v4 = vld [vmem:[#allocation11 + $0x58] sm:$0xff] }
0x142e   : > { %v7585_v21 = vmul.f32 %v17586_v27, %v17586_v27  ;;  %v7615_v8 = vmul.f32 %v19165_v20, %v7583_v54  ;;  %v7584_v61 = vmul.f32 %v17583_v58, %v17583_v58 }
0x142f   : > { %v7496_v15 = vpop.xlane.xlu0 %7495 }
0x1430   : > { %v7534_v33 = vmul.f32 0.005, %v7496_v15  ;;  %v7648_v3 = vadd.f32 %v7615_v8, %v7582_v53  ;;  %v7617_v59 = vmul.f32 %v19165_v20, %v7585_v21 }
0x1431   : > { %v7499_v6 = vpop.xlane.xlu1 %7498 }
0x1432   : > { %v17597_v7 = vsub.f32 %v17428_v17, %v7534_v33  ;;  %v17600_v23 = vsub.f32 %v17423_v57, %v7534_v33  ;;  %v7535_v25 = vmul.f32 0.005, %v7499_v6  ;;  %7649 = vadd.xlane.f32.xlu0 %v7648_v3  ;;  %v7651_v60 = vadd.f32 %v7617_v59, %v7584_v61  ;;  %v7952_v6 = vld [vmem:[#allocation11 + $0x280] sm:$0xff] }
0x1433   : > { %v7968_v57 = vld [vmem:[#allocation11 + $0x300] sm:$0xff] }
0x1434   : > { %v7587_v0 = vmul.f32 %v17600_v23, %v17600_v23  ;;  %v17605_v32 = vsub.f32 %v17436_v41, %v7535_v25  ;;  %v17608_v36 = vsub.f32 %v17431_v39, %v7535_v25  ;;  %7652 = vadd.xlane.f32.xlu1 %v7651_v60  ;;  %v7586_v22 = vmul.f32 %v17597_v7, %v17597_v7  ;;  %v7956_v25 = vld [vmem:[#allocation11 + $0x2a0] sm:$0xff]  ;;  %v7953_v60 = vld [vmem:[#allocation11 + $0x288] sm:$0xff] }
0x1436   : > { %v7589_v31 = vmul.f32 %v17608_v36, %v17608_v36  ;;  %v7619_v44 = vmul.f32 %v19165_v20, %v7587_v0  ;;  %v7588_v54 = vmul.f32 %v17605_v32, %v17605_v32 }
0x1437   : > { %v7502_v38 = vpop.xlane.xlu0 %7501 }
0x1438   : > { %v7536_v53 = vmul.f32 0.005, %v7502_v38  ;;  %v7654_v21 = vadd.f32 %v7619_v44, %v7586_v22  ;;  %v7621_v8 = vmul.f32 %v19165_v20, %v7589_v31  ;;  %v7957_v44 = vld [vmem:[#allocation11 + $0x2a8] sm:$0xff]  ;;  %v11124_v38 = vcombine.low %v7952_v6, %v7956_v25 }
0x1439   : > { %v7505_v15 = vpop.xlane.xlu1 %7504 }
0x143a   : > { %v17619_v61 = vsub.f32 %v17450_v19, %v7536_v53  ;;  %v17622_v33 = vsub.f32 %v17445_v40, %v7536_v53  ;;  %v7537_v3 = vmul.f32 0.005, %v7505_v15  ;;  %7655 = vadd.xlane.f32.xlu0 %v7654_v21  ;;  %v7657_v59 = vadd.f32 %v7621_v8, %v7588_v54 }
0x143b   : > { %v11125_v53 = vcombine.high %v7952_v6, %v7956_v25  ;;  %v11126_v40 = vcombine.low %v7953_v60, %v7957_v44  ;;  %v11127_v15 = vcombine.high %v7953_v60, %v7957_v44  ;;  %v7965_v60 = vld [vmem:[#allocation11 + $0x2e8] sm:$0xff] }
0x143c   : > { %v7591_v0 = vmul.f32 %v17622_v33, %v17622_v33  ;;  %v17627_v22 = vsub.f32 %v17458_v42, %v7537_v3  ;;  %v17630_v31 = vsub.f32 %v17453_v5, %v7537_v3  ;;  %7658 = vadd.xlane.f32.xlu1 %v7657_v59  ;;  %v7590_v54 = vmul.f32 %v17619_v61, %v17619_v61  ;;  %v7960_v3 = vld [vmem:[#allocation11 + $0x2c0] sm:$0xff]  ;;  %v7961_v5 = vld [vmem:[#allocation11 + $0x2c8] sm:$0xff] }
0x143d   : > { %8702 = vmatprep.subr.bf16.mxu1 %v11125_v53  ;;  %8815 = vmatprep.subr.bf16.mxu0 %v11127_v15  ;;  %v7964_v59 = vld [vmem:[#allocation11 + $0x2e0] sm:$0xff]  ;;  %v11134_v39 = vcombine.low %v7961_v5, %v7965_v60  ;;  %v11135_v41 = vcombine.high %v7961_v5, %v7965_v60  ;;  %v7969_v15 = vld [vmem:[#allocation11 + $0x308] sm:$0xff] }
0x143e   : > { %v7593_v21 = vmul.f32 %v17630_v31, %v17630_v31  ;;  %v7623_v8 = vmul.f32 %v19165_v20, %v7591_v0  ;;  %v7592_v42 = vmul.f32 %v17627_v22, %v17627_v22  ;;  %8703 = vmatpush1.bf16.msra.mxu1 %v11124_v38  ;;  %8816 = vmatpush1.bf16.msra.mxu0 %v11126_v40  ;;  %v7972_v53 = vld [vmem:[#allocation11 + $0x320] sm:$0xff]  ;;  %v7977_v5 = vld [vmem:[#allocation11 + $0x348] sm:$0xff] }
0x143f   : > { %v11133_v25 = vcombine.high %v7960_v3, %v7964_v59  ;;  %v11132_v44 = vcombine.low %v7960_v3, %v7964_v59  ;;  %8817 = vmatprep.subr.bf16.mxu0 %v11135_v41  ;;  %v11141_v17 = vcombine.high %v7968_v57, %v7972_v53  ;;  %v7980_v3 = vld [vmem:[#allocation11 + $0x360] sm:$0xff] }
0x1440   : > { %v7660_v19 = vadd.f32 %v7623_v8, %v7590_v54  ;;  %v7625_v6 = vmul.f32 %v19165_v20, %v7593_v21  ;;  %v7973_v54 = vld [vmem:[#allocation11 + $0x328] sm:$0xff]  ;;  %v11140_v21 = vcombine.low %v7968_v57, %v7972_v53  ;;  %v7976_v8 = vld [vmem:[#allocation11 + $0x340] sm:$0xff] }
0x1441   : > { %8704 = vmatprep.subr.bf16.mxu1 %v11133_v25  ;;  %v11142_v38 = vcombine.low %v7969_v15, %v7973_v54  ;;  %v11143_v40 = vcombine.high %v7969_v15, %v7973_v54  ;;  %v11148_v41 = vcombine.low %v7976_v8, %v7980_v3  ;;  %v7984_v25 = vld [vmem:[#allocation11 + $0x380] sm:$0xff] }
0x1442   : > { %7661 = vadd.xlane.f32.xlu0 %v7660_v19  ;;  %v7663_v0 = vadd.f32 %v7625_v6, %v7592_v42  ;;  %8705 = vmatpush1.bf16.msra.mxu1 %v11132_v44  ;;  %v11149_v19 = vcombine.high %v7976_v8, %v7980_v3  ;;  %v7981_v42 = vld [vmem:[#allocation11 + $0x368] sm:$0xff]  ;;  %v7988_v60 = vld [vmem:[#allocation11 + $0x3a0] sm:$0xff] }
0x1443   : > { %8818 = vmatpush1.bf16.msra.mxu0 %v11134_v39  ;;  %8706 = vmatprep.subr.bf16.mxu1 %v11141_v17  ;;  %v11150_v59 = vcombine.low %v7977_v5, %v7981_v42  ;;  %v11151_v6 = vcombine.high %v7977_v5, %v7981_v42  ;;  %v7985_v39 = vld [vmem:[#allocation11 + $0x388] sm:$0xff]  ;;  %v11157_v57 = vcombine.high %v7984_v25, %v7988_v60  ;;  %v7992_v15 = vld [vmem:[#allocation11 + $0x3c0] sm:$0xff] }
0x1444   : > { %7664 = vadd.xlane.f32.xlu1 %v7663_v0  ;;  %8819 = vmatprep.subr.bf16.mxu0 %v11143_v40  ;;  %v7989_v44 = vld [vmem:[#allocation11 + $0x3a8] sm:$0xff]  ;;  %v11156_v17 = vcombine.low %v7984_v25, %v7988_v60  ;;  %v7996_v54 = vld [vmem:[#allocation11 + $0x3e0] sm:$0xff] }
0x1445   : > { %v11158_v0 = vcombine.low %v7985_v39, %v7989_v44  ;;  %v11159_v53 = vcombine.high %v7985_v39, %v7989_v44  ;;  %v7997_v40 = vld [vmem:[#allocation11 + $0x3e8] sm:$0xff]  ;;  %v11164_v8 = vcombine.low %v7992_v15, %v7996_v54 }
0x1446   : > { %8707 = vmatpush1.bf16.msra.mxu1 %v11140_v21  ;;  %v7993_v21 = vld [vmem:[#allocation11 + $0x3c8] sm:$0xff] }
0x1447   : > { %8820 = vmatpush1.bf16.msra.mxu0 %v11142_v38  ;;  %8708 = vmatprep.subr.bf16.mxu1 %v11149_v19  ;;  %v11165_v38 = vcombine.high %v7992_v15, %v7996_v54  ;;  %v11166_v3 = vcombine.low %v7993_v21, %v7997_v40  ;;  %v11167_v5 = vcombine.high %v7993_v21, %v7997_v40 }
0x1448   : > { %8821 = vmatprep.subr.bf16.mxu0 %v11151_v6 }
0x144a   : > { %8709 = vmatpush1.bf16.msra.mxu1 %v11148_v41 }
0x144b   : > { %8822 = vmatpush1.bf16.msra.mxu0 %v11150_v59  ;;  %8710 = vmatprep.subr.bf16.mxu1 %v11157_v57 }
0x144c   : > { %8823 = vmatprep.subr.bf16.mxu0 %v11159_v53 }
0x144e   : > { %8711 = vmatpush1.bf16.msra.mxu1 %v11156_v17 }
0x144f   : > { %8824 = vmatpush1.bf16.msra.mxu0 %v11158_v0  ;;  %8712 = vmatprep.subr.bf16.mxu1 %v11165_v38 }
0x1450   : > { %8825 = vmatprep.subr.bf16.mxu0 %v11167_v5 }
0x1452   : > { %8713 = vmatpush1.bf16.msra.mxu1 %v11164_v8 }
0x1453   : > { %8826 = vmatpush1.bf16.msra.mxu0 %v11166_v3 }
0x145b   : > { %v7508_v19 = vpop.xlane.xlu0 %7507 }
0x145c   : > { %v7538_v42 = vmul.f32 0.005, %v7508_v19 }
0x145d   : > { %v7511_v41 = vpop.xlane.xlu1 %7510 }
0x145e   : > { %v17641_v59 = vsub.f32 %v17472_v46, %v7538_v42  ;;  %v17644_v6 = vsub.f32 %v17467_v56, %v7538_v42  ;;  %v7539_v25 = vmul.f32 0.005, %v7511_v41  ;;  %v7882_v46 = vld [vmem:[#allocation11 + $0x50] sm:$0xff] }
0x1460   : > { %v7595_v60 = vmul.f32 %v17644_v6, %v17644_v6  ;;  %v17649_v39 = vsub.f32 %v17480_v26, %v7539_v25  ;;  %v17652_v57 = vsub.f32 %v17475_v13, %v7539_v25  ;;  %v7594_v44 = vmul.f32 %v17641_v59, %v17641_v59 }
0x1462   : > { %v7597_v17 = vmul.f32 %v17652_v57, %v17652_v57  ;;  %v7627_v0 = vmul.f32 %v19165_v20, %v7595_v60  ;;  %v7596_v15 = vmul.f32 %v17649_v39, %v17649_v39 }
0x1463   : > { %v7514_v53 = vpop.xlane.xlu0 %7513 }
0x1464   : > { %v7540_v54 = vmul.f32 0.005, %v7514_v53  ;;  %v7666_v21 = vadd.f32 %v7627_v0, %v7594_v44  ;;  %v7629_v38 = vmul.f32 %v19165_v20, %v7597_v17  ;;  %v17681_v0 = vld [vmem:[#allocation11 + $0x10] sm:$0xff] }
0x1465   : > { %v7517_v40 = vpop.xlane.xlu1 %7516  ;;  %v17683_v53 = vld [vmem:[#allocation11 + $0x30] sm:$0xff] }
0x1466   : > { %v17663_v8 = vsub.f32 %v17494_v2, %v7540_v54  ;;  %v17666_v3 = vsub.f32 %v17489_v35, %v7540_v54  ;;  %v7541_v5 = vmul.f32 0.005, %v7517_v40  ;;  %7667 = vadd.xlane.f32.xlu0 %v7666_v21  ;;  %v7669_v19 = vadd.f32 %v7629_v38, %v7596_v15  ;;  %v17685_v15 = vld [vmem:[#allocation11 + $0x18] sm:$0xff] }
0x1467   : > { %v11049_v40 = vcombine.high %v17681_v0, %v17683_v53 }
0x1468   : > { %v7599_v42 = vmul.f32 %v17666_v3, %v17666_v3  ;;  %v17671_v41 = vsub.f32 %v17502_v50, %v7541_v5  ;;  %v17674_v25 = vsub.f32 %v17497_v24, %v7541_v5  ;;  %7670 = vadd.xlane.f32.xlu1 %v7669_v19  ;;  %v7598_v60 = vmul.f32 %v17663_v8, %v17663_v8  ;;  %v17693_v5 = vld [vmem:[#allocation11 + $0x38] sm:$0xff] }
0x1469   : > { %8908 = vmatprep.subr.bf16.mxu1 %v11049_v40  ;;  %v11051_v2 = vcombine.high %v17685_v15, %v17693_v5 }
0x146a   : > { %v7601_v44 = vmul.f32 %v17674_v25, %v17674_v25  ;;  %v7631_v17 = vmul.f32 %v19165_v20, %v7599_v42  ;;  %v7600_v54 = vmul.f32 %v17671_v41, %v17671_v41 }
0x146b   : > { %v7520_v21 = vpop.xlane.xlu0 %7519  ;;  %9021 = vmatprep.subr.bf16.mxu0 %v11051_v2 }
0x146c   : > { %v7542_v19 = vmul.f32 0.005, %v7520_v21  ;;  %v7672_v42 = vadd.f32 %v7631_v17, %v7598_v60  ;;  %v7633_v24 = vmul.f32 %v19165_v20, %v7601_v44 }
0x146d   : > { %v7523_v35 = vpop.xlane.xlu1 %7522 }
0x146e   : > { %v17701_v13 = vsub.f32 %v17516_v52, %v7542_v19  ;;  %v17704_v38 = vsub.f32 %v17511_v45, %v7542_v19  ;;  %v7543_v26 = vmul.f32 0.005, %v7523_v35  ;;  %7673 = vadd.xlane.f32.xlu0 %v7672_v42  ;;  %v7675_v21 = vadd.f32 %v7633_v24, %v7600_v54 }
0x1470   : > { %v7603_v60 = vmul.f32 %v17704_v38, %v17704_v38  ;;  %v17709_v44 = vsub.f32 %v17524_v48, %v7543_v26  ;;  %v17712_v17 = vsub.f32 %v17519_v28, %v7543_v26  ;;  %7676 = vadd.xlane.f32.xlu1 %v7675_v21  ;;  %v7602_v40 = vmul.f32 %v17701_v13, %v17701_v13 }
0x1472   : > { %v7605_v19 = vmul.f32 %v17712_v17, %v17712_v17  ;;  %v7635_v35 = vmul.f32 %v19165_v20, %v7603_v60  ;;  %v7604_v2 = vmul.f32 %v17709_v44, %v17709_v44 }
0x1473   : > { %v7526_v24 = vpop.xlane.xlu0 %7525 }
0x1474   : > { %v7544_v54 = vmul.f32 0.005, %v7526_v24  ;;  %v7678_v42 = vadd.f32 %v7635_v35, %v7602_v40  ;;  %v7637_v50 = vmul.f32 %v19165_v20, %v7605_v19 }
0x1475   : > { %v7529_v48 = vpop.xlane.xlu1 %7528 }
0x1476   : > { %v17723_v26 = vsub.f32 %v17538_v9, %v7544_v54  ;;  %v17726_v21 = vsub.f32 %v17533_v18, %v7544_v54  ;;  %v7545_v28 = vmul.f32 0.005, %v7529_v48  ;;  %7679 = vadd.xlane.f32.xlu0 %v7678_v42  ;;  %v7681_v45 = vadd.f32 %v7637_v50, %v7604_v2 }
0x1478   : > { %v7607_v60 = vmul.f32 %v17726_v21, %v17726_v21  ;;  %v17731_v52 = vsub.f32 %v17546_v62, %v7545_v28  ;;  %v17734_v40 = vsub.f32 %v17541_v55, %v7545_v28  ;;  %7682 = vadd.xlane.f32.xlu1 %v7681_v45  ;;  %v7606_v19 = vmul.f32 %v17723_v26, %v17723_v26 }
0x147a   : > { %v7609_v35 = vmul.f32 %v17734_v40, %v17734_v40  ;;  %v7639_v48 = vmul.f32 %v19165_v20, %v7607_v60  ;;  %v7608_v50 = vmul.f32 %v17731_v52, %v17731_v52 }
0x147c   : > { %v7684_v24 = vadd.f32 %v7639_v48, %v7606_v19  ;;  %v7641_v2 = vmul.f32 %v19165_v20, %v7609_v35  ;;  %v7448_v19 = vld [vmem:[%s19194_s13] sm:$0x3] }
0x147e   : > { %7685 = vadd.xlane.f32.xlu0 %v7684_v24  ;;  %v7687_v54 = vadd.f32 %v7641_v2, %v7608_v50  ;;  %v17748_v50 = vrot.slane %v7448_v19, %v19162_v16 }
0x1480   : > { %7688 = vadd.xlane.f32.xlu1 %v7687_v54 }
0x14b7   : > { %v7644_v28 = vpop.xlane.xlu0 %7643 }
0x14b8   : > { %v7690_v42 = vmul.f32 0.005, %v7644_v28 }
0x14b9   : > { %v7647_v45 = vpop.xlane.xlu1 %7646 }
0x14ba   : > { %v7706_v55 = vadd.f32 1e-05, %v7690_v42  ;;  %v7691_v62 = vmul.f32 0.005, %v7647_v45 }
0x14bc   : > { %13539 = vrsqrt.f32 %v7706_v55  ;;  %v7707_v18 = vadd.f32 1e-05, %v7691_v62  ;;  %v7449_v55 = vld [vmem:[%s19195_s28] sm:$0x3]  ;;  %s13801_s28 = scalar_lea.vmem %s18381_s7, 4096 }
0x14bd   : > { %v17759_v28 = vrot.slane %v7449_v55, %v19162_v16  ;;  %v17762_v42 = vrot.slane %v7449_v55, %v19163_v11  ;;  %p13802_p6 = scmp.ne.s32.totalorder %s18381_s7, %s13801_s28 }
0x14be   : > { %13541 = vrsqrt.f32 %v7707_v18  ;;  %v17754_v18 = vrot.slane %v7448_v19, %v19163_v11 }
0x14bf   : > { %v7650_v9 = vpop.xlane.xlu0 %7649  ;;  %p13803_p12 = pnand %p13802_p6, %p19231_p9 }
0x14c0   : > { %v7692_v56 = vmul.f32 0.005, %v7650_v9 }
0x14c1   : > { %v7653_v60 = vpop.xlane.xlu1 %7652  ;;  %p13804_p1 = pneg %p13803_p12 }
0x14c2   : > { %v7708_v48 = vadd.f32 1e-05, %v7692_v56  ;;  %v7693_v20 = vmul.f32 0.005, %v7653_v60 }
0x14c4   : > { %13543 = vrsqrt.f32 %v7708_v48  ;;  %v7709_v35 = vadd.f32 1e-05, %v7693_v20 }
0x14c6   : > { %v13540_v9 = vpop.eup %13539  ;;  %13545 = vrsqrt.f32 %v7709_v35 }
0x14c7   : > { %v7738_v62 = vmul.f32 %v13540_v9, %v17553_v43  ;;  %v7739_v24 = vmul.f32 %v13540_v9, %v17556_v34  ;;  %v7656_v56 = vpop.xlane.xlu0 %7655 }
0x14c8   : > { %v13542_v2 = vpop.eup %13541  ;;  %v7694_v54 = vmul.f32 0.005, %v7656_v56 }
0x14c9   : > { %v7781_v45 = vmul.f32 %v17748_v50, %v7738_v62  ;;  %v7740_v60 = vmul.f32 %v13542_v2, %v17561_v37  ;;  %v7741_v19 = vmul.f32 %v13542_v2, %v17564_v51  ;;  %v7659_v48 = vpop.xlane.xlu1 %7658  ;;  %v7782_v43 = vmul.f32 %v17754_v18, %v7739_v24  ;;  %v7886_v2 = vld [vmem:[#allocation11 + $0x70] sm:$0xff]  ;;  %v7887_v24 = vld [vmem:[#allocation11 + $0x78] sm:$0xff] }
0x14ca   : > { %v7710_v20 = vadd.f32 1e-05, %v7694_v54  ;;  %v7695_v34 = vmul.f32 0.005, %v7659_v48  ;;  %v11057_v10 = vcombine.high %v7882_v46, %v7886_v2  ;;  %v11058_v1 = vcombine.low %v7883_v4, %v7887_v24 }
0x14cb   : > { %v7783_v35 = vmul.f32 %v17748_v50, %v7740_v60  ;;  %v7784_v9 = vmul.f32 %v17754_v18, %v7741_v19  ;;  %v7825_v55 = vadd.f32 %v17762_v42, %v7782_v43  ;;  %v7824_v37 = vadd.f32 %v17759_v28, %v7781_v45 }
0x14cc   : > { %13547 = vrsqrt.f32 %v7710_v20  ;;  %v7711_v56 = vadd.f32 1e-05, %v7695_v34  ;;  %v11059_v45 = vcombine.high %v7883_v4, %v7887_v24 }
0x14cd   : > { %v7827_v62 = vadd.f32 %v17762_v42, %v7784_v9  ;;  %v7826_v51 = vadd.f32 %v17759_v28, %v7783_v35 }
0x14ce   : > { %v13544_v54 = vpop.eup %13543  ;;  %13549 = vrsqrt.f32 %v7711_v56  ;;  %v7890_v56 = vld [vmem:[#allocation11 + $0x90] sm:$0xff] }
0x14cf   : > { %v7742_v60 = vmul.f32 %v13544_v54, %v17575_v30  ;;  %v7743_v19 = vmul.f32 %v13544_v54, %v17578_v14  ;;  %v7662_v48 = vpop.xlane.xlu0 %7661  ;;  %v17776_v20 = vpack.c.bf16 %v7827_v62, %v7825_v55  ;;  %v17778_v34 = vpack.c.bf16 %v7826_v51, %v7824_v37  ;;  %v7894_v55 = vld [vmem:[#allocation11 + $0xb0] sm:$0xff] }
0x14d0   : > { %v13546_v43 = vpop.eup %13545  ;;  %v7696_v9 = vmul.f32 0.005, %v7662_v48  ;;  %v19196_v54 = vcombine.low %v17681_v0, %v17683_v53  ;;  %v11056_v48 = vcombine.low %v7882_v46, %v7886_v2  ;;  %v7903_v46 = vld [vmem:[#allocation11 + $0xf8] sm:$0xff] }
0x14d1   : > { %v7744_v35 = vmul.f32 %v13546_v43, %v17583_v58  ;;  %v7745_v29 = vmul.f32 %v13546_v43, %v17586_v27  ;;  %8714 = vmatprep.mubr.bf16.mxu1 %v17776_v20  ;;  %8827 = vmatprep.mubr.bf16.mxu0 %v17776_v20  ;;  %v7665_v30 = vpop.xlane.xlu1 %7664  ;;  %v7786_v14 = vmul.f32 %v17754_v18, %v7743_v19  ;;  %v7891_v43 = vld [vmem:[#allocation11 + $0x98] sm:$0xff] }
0x14d2   : > { %v7712_v62 = vadd.f32 1e-05, %v7696_v9  ;;  %v7697_v37 = vmul.f32 0.005, %v7665_v30  ;;  %8715 = vmatmul.mubr.bf16.vlgmr.msra.gmra.mrb[192].mxu1 %v17778_v34  ;;  %8828 = vmatmul.mubr.bf16.vlgmr.msra.gmra.mrb[192].mxu0 %v17778_v34  ;;  %v7785_v51 = vmul.f32 %v17748_v50, %v7742_v60  ;;  %v19197_v19 = vcombine.low %v17685_v15, %v17693_v5  ;;  %v7895_v9 = vld [vmem:[#allocation11 + $0xb8] sm:$0xff]  ;;  %v7902_v15 = vld [vmem:[#allocation11 + $0xf0] sm:$0xff] }
0x14d3   : > { %v7788_v58 = vmul.f32 %v17754_v18, %v7745_v29  ;;  %v7787_v27 = vmul.f32 %v17748_v50, %v7744_v35  ;;  %8909 = vmatpush1.bf16.msra.mxu1 %v19196_v54  ;;  %v11065_v60 = vcombine.high %v7890_v56, %v7894_v55  ;;  %v7898_v29 = vld [vmem:[#allocation11 + $0xd0] sm:$0xff]  ;;  %v7829_v35 = vadd.f32 %v17762_v42, %v7786_v14  ;;  %v7899_v5 = vld [vmem:[#allocation11 + $0xd8] sm:$0xff] }
0x14d4   : > { %9022 = vmatpush1.bf16.msra.mxu0 %v19197_v19  ;;  %13551 = vrsqrt.f32 %v7712_v62  ;;  %v7713_v30 = vadd.f32 1e-05, %v7697_v37  ;;  %8910 = vmatprep.subr.bf16.mxu1 %v11057_v10  ;;  %v7828_v0 = vadd.f32 %v17759_v28, %v7785_v51  ;;  %v11064_v62 = vcombine.low %v7890_v56, %v7894_v55  ;;  %v7907_v19 = vld [vmem:[#allocation11 + $0x118] sm:$0xff] }
0x14d5   : > { %9023 = vmatprep.subr.bf16.mxu0 %v11059_v45  ;;  %v7831_v49 = vadd.f32 %v17762_v42, %v7788_v58  ;;  %v7830_v53 = vadd.f32 %v17759_v28, %v7787_v27  ;;  %v11067_v37 = vcombine.high %v7891_v43, %v7895_v9  ;;  %v11066_v51 = vcombine.low %v7891_v43, %v7895_v9 }
0x14d6   : > { %v13548_v2 = vpop.eup %13547  ;;  %13553 = vrsqrt.f32 %v7713_v30  ;;  %v11073_v58 = vcombine.high %v7898_v29, %v7902_v15  ;;  %v11075_v27 = vcombine.high %v7899_v5, %v7903_v46  ;;  %v11074_v43 = vcombine.low %v7899_v5, %v7903_v46  ;;  %v7914_v30 = vld [vmem:[#allocation11 + $0x150] sm:$0xff] }
0x14d7   : > { %v7746_v4 = vmul.f32 %v13548_v2, %v17597_v7  ;;  %v7747_v10 = vmul.f32 %v13548_v2, %v17600_v23  ;;  %v17802_v24 = vpack.c.bf16 %v7831_v49, %v7829_v35  ;;  %v17804_v45 = vpack.c.bf16 %v7830_v53, %v7828_v0  ;;  %8911 = vmatpush1.bf16.msra.mxu1 %v11056_v48  ;;  %v7906_v7 = vld [vmem:[#allocation11 + $0x110] sm:$0xff]  ;;  %v7911_v48 = vld [vmem:[#allocation11 + $0x138] sm:$0xff] }
0x14d8   : > { %v13550_v14 = vpop.eup %13549  ;;  %9024 = vmatpush1.bf16.msra.mxu0 %v11058_v1  ;;  %8912 = vmatprep.subr.bf16.mxu1 %v11065_v60  ;;  %v7910_v23 = vld [vmem:[#allocation11 + $0x130] sm:$0xff] }
0x14d9   : > { %v7748_v54 = vmul.f32 %v13550_v14, %v17605_v32  ;;  %v7749_v56 = vmul.f32 %v13550_v14, %v17608_v36  ;;  %8724 = vmatprep.mubr.bf16.mxu1 %v17802_v24  ;;  %8837 = vmatprep.mubr.bf16.mxu0 %v17802_v24  ;;  %v7790_v49 = vmul.f32 %v17754_v18, %v7747_v10  ;;  %v7918_v2 = vld [vmem:[#allocation11 + $0x170] sm:$0xff] }
0x14da   : > { %8725 = vmatmul.mubr.bf16.gmra.mrb[196].mxu1 %v17804_v45  ;;  %8838 = vmatmul.mubr.bf16.gmra.mrb[196].mxu0 %v17804_v45  ;;  %v7789_v1 = vmul.f32 %v17748_v50, %v7746_v4  ;;  %v11072_v36 = vcombine.low %v7898_v29, %v7902_v15  ;;  %v11081_v9 = vcombine.high %v7906_v7, %v7910_v23 }
0x14db   : > { %v7792_v55 = vmul.f32 %v17754_v18, %v7749_v56  ;;  %v7791_v32 = vmul.f32 %v17748_v50, %v7748_v54  ;;  %9025 = vmatprep.subr.bf16.mxu0 %v11067_v37  ;;  %8913 = vmatpush1.bf16.msra.mxu1 %v11064_v62  ;;  %v7833_v60 = vadd.f32 %v17762_v42, %v7790_v49  ;;  %v7915_v37 = vld [vmem:[#allocation11 + $0x158] sm:$0xff] }
0x14dc   : > { %9026 = vmatpush1.bf16.msra.mxu0 %v11066_v51  ;;  %8914 = vmatprep.subr.bf16.mxu1 %v11073_v58  ;;  %v7832_v0 = vadd.f32 %v17759_v28, %v7789_v1  ;;  %v7919_v62 = vld [vmem:[#allocation11 + $0x178] sm:$0xff]  ;;  %v11080_v15 = vcombine.low %v7906_v7, %v7910_v23  ;;  %v11083_v4 = vcombine.high %v7907_v19, %v7911_v48  ;;  %v7926_v7 = vld [vmem:[#allocation11 + $0x1b0] sm:$0xff] }
0x14dd   : > { %v7835_v35 = vadd.f32 %v17762_v42, %v7792_v55  ;;  %v7834_v53 = vadd.f32 %v17759_v28, %v7791_v32  ;;  %9027 = vmatprep.subr.bf16.mxu0 %v11075_v27  ;;  %v11082_v58 = vcombine.low %v7907_v19, %v7911_v48  ;;  %v11089_v27 = vcombine.high %v7914_v30, %v7918_v2  ;;  %v7927_v19 = vld [vmem:[#allocation11 + $0x1b8] sm:$0xff] }
0x14de   : > { %v13552_v29 = vpop.eup %13551  ;;  %v11091_v54 = vcombine.high %v7915_v37, %v7919_v62  ;;  %v11090_v55 = vcombine.low %v7915_v37, %v7919_v62 }
0x14df   : > { %v7750_v10 = vmul.f32 %v13552_v29, %v17619_v61  ;;  %v7751_v5 = vmul.f32 %v13552_v29, %v17622_v33  ;;  %v17822_v46 = vpack.c.bf16 %v7835_v35, %v7833_v60  ;;  %v17824_v14 = vpack.c.bf16 %v7834_v53, %v7832_v0  ;;  %8915 = vmatpush1.bf16.msra.mxu1 %v11072_v36  ;;  %v7922_v33 = vld [vmem:[#allocation11 + $0x190] sm:$0xff]  ;;  %v7923_v36 = vld [vmem:[#allocation11 + $0x198] sm:$0xff] }
0x14e0   : > { %v13554_v51 = vpop.eup %13553  ;;  %9028 = vmatpush1.bf16.msra.mxu0 %v11074_v43  ;;  %8916 = vmatprep.subr.bf16.mxu1 %v11081_v9  ;;  %v11097_v32 = vcombine.high %v7922_v33, %v7926_v7  ;;  %v7930_v35 = vld [vmem:[#allocation11 + $0x1d0] sm:$0xff]  ;;  %v7931_v53 = vld [vmem:[#allocation11 + $0x1d8] sm:$0xff]  ;;  %v11096_v37 = vcombine.low %v7922_v33, %v7926_v7  ;;  %v11099_v62 = vcombine.high %v7923_v36, %v7927_v19 }
0x14e1   : > { %v7752_v56 = vmul.f32 %v13554_v51, %v17627_v22  ;;  %v7753_v49 = vmul.f32 %v13554_v51, %v17630_v31  ;;  %8734 = vmatprep.mubr.bf16.mxu1 %v17822_v46  ;;  %8847 = vmatprep.mubr.bf16.mxu0 %v17822_v46  ;;  %v7794_v61 = vmul.f32 %v17754_v18, %v7751_v5  ;;  %v7934_v0 = vld [vmem:[#allocation11 + $0x1f0] sm:$0xff]  ;;  %v7935_v29 = vld [vmem:[#allocation11 + $0x1f8] sm:$0xff] }
0x14e2   : > { %8735 = vmatmul.mubr.bf16.gmra.mrb[200].mxu1 %v17824_v14  ;;  %8848 = vmatmul.mubr.bf16.gmra.mrb[200].mxu0 %v17824_v14  ;;  %v7793_v23 = vmul.f32 %v17748_v50, %v7750_v10  ;;  %v11088_v31 = vcombine.low %v7914_v30, %v7918_v2  ;;  %v11107_v10 = vcombine.high %v7931_v53, %v7935_v29  ;;  %v7938_v5 = vld [vmem:[#allocation11 + $0x210] sm:$0xff] }
0x14e3   : > { %v7796_v1 = vmul.f32 %v17754_v18, %v7753_v49  ;;  %v7795_v22 = vmul.f32 %v17748_v50, %v7752_v56  ;;  %9029 = vmatprep.subr.bf16.mxu0 %v11083_v4  ;;  %8917 = vmatpush1.bf16.msra.mxu1 %v11080_v15  ;;  %v7837_v48 = vadd.f32 %v17762_v42, %v7794_v61  ;;  %v7942_v51 = vld [vmem:[#allocation11 + $0x230] sm:$0xff] }
0x14e4   : > { %9030 = vmatpush1.bf16.msra.mxu0 %v11082_v58  ;;  %8918 = vmatprep.subr.bf16.mxu1 %v11089_v27  ;;  %v7836_v9 = vadd.f32 %v17759_v28, %v7793_v23  ;;  %v11098_v15 = vcombine.low %v7923_v36, %v7927_v19  ;;  %v11105_v4 = vcombine.high %v7930_v35, %v7934_v0  ;;  %v7939_v58 = vld [vmem:[#allocation11 + $0x218] sm:$0xff]  ;;  %v7946_v33 = vld [vmem:[#allocation11 + $0x250] sm:$0xff] }
0x14e5   : > { %v7839_v43 = vadd.f32 %v17762_v42, %v7796_v1  ;;  %v7838_v60 = vadd.f32 %v17759_v28, %v7795_v22  ;;  %9031 = vmatprep.subr.bf16.mxu0 %v11091_v54  ;;  %v7943_v27 = vld [vmem:[#allocation11 + $0x238] sm:$0xff]  ;;  %v11104_v54 = vcombine.low %v7930_v35, %v7934_v0  ;;  %v11106_v56 = vcombine.low %v7931_v53, %v7935_v29  ;;  %v7950_v7 = vld [vmem:[#allocation11 + $0x270] sm:$0xff] }
0x14e6   : > { %v11113_v49 = vcombine.high %v7938_v5, %v7942_v51  ;;  %v11115_v61 = vcombine.high %v7939_v58, %v7943_v27  ;;  %v7947_v23 = vld [vmem:[#allocation11 + $0x258] sm:$0xff]  ;;  %v11112_v22 = vcombine.low %v7938_v5, %v7942_v51  ;;  %v7954_v36 = vld [vmem:[#allocation11 + $0x290] sm:$0xff] }
0x14e7   : > { %v17840_v30 = vpack.c.bf16 %v7839_v43, %v7837_v48  ;;  %v17842_v2 = vpack.c.bf16 %v7838_v60, %v7836_v9  ;;  %8919 = vmatpush1.bf16.msra.mxu1 %v11088_v31  ;;  %v7951_v1 = vld [vmem:[#allocation11 + $0x278] sm:$0xff]  ;;  %v11114_v31 = vcombine.low %v7939_v58, %v7943_v27  ;;  %v7958_v19 = vld [vmem:[#allocation11 + $0x2b0] sm:$0xff]  ;;  %v11120_v60 = vcombine.low %v7946_v33, %v7950_v7 }
0x14e8   : > { %9032 = vmatpush1.bf16.msra.mxu0 %v11090_v55  ;;  %8920 = vmatprep.subr.bf16.mxu1 %v11097_v32  ;;  %v11121_v55 = vcombine.high %v7946_v33, %v7950_v7  ;;  %v11123_v32 = vcombine.high %v7947_v23, %v7951_v1  ;;  %v7955_v48 = vld [vmem:[#allocation11 + $0x298] sm:$0xff]  ;;  %v11122_v0 = vcombine.low %v7947_v23, %v7951_v1  ;;  %v7974_v33 = vld [vmem:[#allocation11 + $0x330] sm:$0xff] }
0x14e9   : > { %8744 = vmatprep.mubr.bf16.mxu1 %v17840_v30  ;;  %8857 = vmatprep.mubr.bf16.mxu0 %v17840_v30  ;;  %v7959_v43 = vld [vmem:[#allocation11 + $0x2b8] sm:$0xff]  ;;  %v11129_v53 = vcombine.high %v7954_v36, %v7958_v19  ;;  %v11128_v58 = vcombine.low %v7954_v36, %v7958_v19 }
0x14ea   : > { %8745 = vmatmul.mubr.bf16.gmra.mrb[204].mxu1 %v17842_v2  ;;  %8858 = vmatmul.mubr.bf16.gmra.mrb[204].mxu0 %v17842_v2  ;;  %v7963_v5 = vld [vmem:[#allocation11 + $0x2d8] sm:$0xff] }
0x14eb   : > { %9033 = vmatprep.subr.bf16.mxu0 %v11099_v62  ;;  %8921 = vmatpush1.bf16.msra.mxu1 %v11096_v37  ;;  %v11131_v37 = vcombine.high %v7955_v48, %v7959_v43  ;;  %v7962_v62 = vld [vmem:[#allocation11 + $0x2d0] sm:$0xff]  ;;  %v7967_v51 = vld [vmem:[#allocation11 + $0x2f8] sm:$0xff] }
0x14ec   : > { %9034 = vmatpush1.bf16.msra.mxu0 %v11098_v15  ;;  %8922 = vmatprep.subr.bf16.mxu1 %v11105_v4  ;;  %v7966_v15 = vld [vmem:[#allocation11 + $0x2f0] sm:$0xff]  ;;  %v7971_v7 = vld [vmem:[#allocation11 + $0x318] sm:$0xff] }
0x14ed   : > { %9035 = vmatprep.subr.bf16.mxu0 %v11107_v10  ;;  %v7975_v23 = vld [vmem:[#allocation11 + $0x338] sm:$0xff] }
0x14ee   : > { %v11147_v19 = vcombine.high %v7971_v7, %v7975_v23 }
0x14ef   : > { %8923 = vmatpush1.bf16.msra.mxu1 %v11104_v54  ;;  %v11130_v54 = vcombine.low %v7955_v48, %v7959_v43  ;;  %v7978_v48 = vld [vmem:[#allocation11 + $0x350] sm:$0xff] }
0x14f0   : > { %9036 = vmatpush1.bf16.msra.mxu0 %v11106_v56  ;;  %8924 = vmatprep.subr.bf16.mxu1 %v11113_v49  ;;  %v11137_v56 = vcombine.high %v7962_v62, %v7966_v15  ;;  %v11139_v49 = vcombine.high %v7963_v5, %v7967_v51  ;;  %v7982_v43 = vld [vmem:[#allocation11 + $0x370] sm:$0xff] }
0x14f1   : > { %9037 = vmatprep.subr.bf16.mxu0 %v11115_v61  ;;  %v7970_v61 = vld [vmem:[#allocation11 + $0x310] sm:$0xff] }
0x14f3   : > { %v7668_v9 = vpop.xlane.xlu0 %7667  ;;  %8925 = vmatpush1.bf16.msra.mxu1 %v11112_v22  ;;  %v11136_v22 = vcombine.low %v7962_v62, %v7966_v15  ;;  %v11153_v62 = vcombine.high %v7978_v48, %v7982_v43  ;;  %v7986_v15 = vld [vmem:[#allocation11 + $0x390] sm:$0xff] }
0x14f4   : > { %v7698_v35 = vmul.f32 0.005, %v7668_v9  ;;  %9038 = vmatpush1.bf16.msra.mxu0 %v11114_v31  ;;  %8926 = vmatprep.subr.bf16.mxu1 %v11121_v55  ;;  %v11138_v55 = vcombine.low %v7963_v5, %v7967_v51  ;;  %v7987_v5 = vld [vmem:[#allocation11 + $0x398] sm:$0xff] }
0x14f5   : > { %v7671_v29 = vpop.xlane.xlu1 %7670  ;;  %9039 = vmatprep.subr.bf16.mxu0 %v11123_v32  ;;  %v11145_v32 = vcombine.high %v7970_v61, %v7974_v33  ;;  %v7991_v51 = vld [vmem:[#allocation11 + $0x3b8] sm:$0xff] }
0x14f6   : > { %v7714_v4 = vadd.f32 1e-05, %v7698_v35  ;;  %v7699_v10 = vmul.f32 0.005, %v7671_v29  ;;  %v7979_v35 = vld [vmem:[#allocation11 + $0x358] sm:$0xff] }
0x14f7   : > { %8927 = vmatpush1.bf16.msra.mxu1 %v11120_v60 }
0x14f8   : > { %13555 = vrsqrt.f32 %v7714_v4  ;;  %v7715_v27 = vadd.f32 1e-05, %v7699_v10  ;;  %9040 = vmatpush1.bf16.msra.mxu0 %v11122_v0  ;;  %8928 = vmatprep.subr.bf16.mxu1 %v11129_v53  ;;  %v7983_v0 = vld [vmem:[#allocation11 + $0x378] sm:$0xff]  ;;  %v11144_v53 = vcombine.low %v7970_v61, %v7974_v33  ;;  %v7990_v10 = vld [vmem:[#allocation11 + $0x3b0] sm:$0xff] }
0x14f9   : > { %9041 = vmatprep.subr.bf16.mxu0 %v11131_v37  ;;  %v11146_v37 = vcombine.low %v7971_v7, %v7975_v23  ;;  %v11155_v4 = vcombine.high %v7979_v35, %v7983_v0  ;;  %v11154_v7 = vcombine.low %v7979_v35, %v7983_v0  ;;  %v11161_v23 = vcombine.high %v7986_v15, %v7990_v10  ;;  %v7995_v35 = vld [vmem:[#allocation11 + $0x3d8] sm:$0xff] }
0x14fa   : > { %13557 = vrsqrt.f32 %v7715_v27  ;;  %v11162_v0 = vcombine.low %v7987_v5, %v7991_v51 }
0x14fb   : > { %v7674_v1 = vpop.xlane.xlu0 %7673  ;;  %8929 = vmatpush1.bf16.msra.mxu1 %v11128_v58 }
0x14fc   : > { %v7700_v31 = vmul.f32 0.005, %v7674_v1  ;;  %9042 = vmatpush1.bf16.msra.mxu0 %v11130_v54  ;;  %8930 = vmatprep.subr.bf16.mxu1 %v11137_v56  ;;  %v11163_v1 = vcombine.high %v7987_v5, %v7991_v51 }
0x14fd   : > { %v7677_v36 = vpop.xlane.xlu1 %7676  ;;  %9043 = vmatprep.subr.bf16.mxu0 %v11139_v49  ;;  %v11152_v49 = vcombine.low %v7978_v48, %v7982_v43 }
0x14fe   : > { %v7716_v9 = vadd.f32 1e-05, %v7700_v31  ;;  %v7701_v60 = vmul.f32 0.005, %v7677_v36  ;;  %v7998_v36 = vld [vmem:[#allocation11 + $0x3f0] sm:$0xff] }
0x14ff   : > { %8931 = vmatpush1.bf16.msra.mxu1 %v11136_v22 }
0x1500   : > { %13559 = vrsqrt.f32 %v7716_v9  ;;  %v7717_v29 = vadd.f32 1e-05, %v7701_v60  ;;  %9044 = vmatpush1.bf16.msra.mxu0 %v11138_v55  ;;  %8932 = vmatprep.subr.bf16.mxu1 %v11145_v32  ;;  %v11160_v60 = vcombine.low %v7986_v15, %v7990_v10 }
0x1501   : > { %9045 = vmatprep.subr.bf16.mxu0 %v11147_v19 }
0x1502   : > { %v13556_v58 = vpop.eup %13555  ;;  %13561 = vrsqrt.f32 %v7717_v29 }
0x1503   : > { %v7754_v27 = vmul.f32 %v13556_v58, %v17641_v59  ;;  %v7755_v54 = vmul.f32 %v13556_v58, %v17644_v6  ;;  %v7680_v56 = vpop.xlane.xlu0 %7679  ;;  %8933 = vmatpush1.bf16.msra.mxu1 %v11144_v53  ;;  %v7994_v6 = vld [vmem:[#allocation11 + $0x3d0] sm:$0xff] }
0x1504   : > { %v13558_v61 = vpop.eup %13557  ;;  %v7702_v33 = vmul.f32 0.005, %v7680_v56  ;;  %9046 = vmatpush1.bf16.msra.mxu0 %v11146_v37  ;;  %8934 = vmatprep.subr.bf16.mxu1 %v11153_v62  ;;  %v11169_v53 = vcombine.high %v7994_v6, %v7998_v36  ;;  %v11168_v15 = vcombine.low %v7994_v6, %v7998_v36 }
0x1505   : > { %v7756_v22 = vmul.f32 %v13558_v61, %v17649_v39  ;;  %v7757_v31 = vmul.f32 %v13558_v61, %v17652_v57  ;;  %v7683_v55 = vpop.xlane.xlu1 %7682  ;;  %v7798_v32 = vmul.f32 %v17754_v18, %v7755_v54  ;;  %v7797_v59 = vmul.f32 %v17748_v50, %v7754_v27  ;;  %9047 = vmatprep.subr.bf16.mxu0 %v11155_v4  ;;  %v7999_v39 = vld [vmem:[#allocation11 + $0x3f8] sm:$0xff] }
0x1506   : > { %v7718_v19 = vadd.f32 1e-05, %v7702_v33  ;;  %v7703_v48 = vmul.f32 0.005, %v7683_v55  ;;  %v11171_v10 = vcombine.high %v7995_v35, %v7999_v39  ;;  %v11170_v33 = vcombine.low %v7995_v35, %v7999_v39 }
0x1507   : > { %v7800_v43 = vmul.f32 %v17754_v18, %v7757_v31  ;;  %v7799_v9 = vmul.f32 %v17748_v50, %v7756_v22  ;;  %8935 = vmatpush1.bf16.msra.mxu1 %v11152_v49  ;;  %v7841_v29 = vadd.f32 %v17762_v42, %v7798_v32  ;;  %v7840_v62 = vadd.f32 %v17759_v28, %v7797_v59 }
0x1508   : > { %13563 = vrsqrt.f32 %v7718_v19  ;;  %v7719_v57 = vadd.f32 1e-05, %v7703_v48  ;;  %9048 = vmatpush1.bf16.msra.mxu0 %v11154_v7  ;;  %8936 = vmatprep.subr.bf16.mxu1 %v11161_v23  ;;  %v12805_v7 = vld [vmem:[#allocation13 + $0x4] ss:$8 sps:$4 sm:$0xff]  }
0x1509   : > { %v7843_v37 = vadd.f32 %v17762_v42, %v7800_v43  ;;  %v7842_v4 = vadd.f32 %v17759_v28, %v7799_v9  ;;  %9049 = vmatprep.subr.bf16.mxu0 %v11163_v1 }
0x150a   : > { %v13560_v58 = vpop.eup %13559  ;;  %13565 = vrsqrt.f32 %v7719_v57 }
0x150b   : > { %v7758_v27 = vmul.f32 %v13560_v58, %v17663_v8  ;;  %v7759_v54 = vmul.f32 %v13560_v58, %v17666_v3  ;;  %v7686_v56 = vpop.xlane.xlu0 %7685  ;;  %v17862_v5 = vpack.c.bf16 %v7843_v37, %v7841_v29  ;;  %v17864_v51 = vpack.c.bf16 %v7842_v4, %v7840_v62  ;;  %8937 = vmatpush1.bf16.msra.mxu1 %v11160_v60 }
0x150c   : > { %v13562_v49 = vpop.eup %13561  ;;  %v7704_v61 = vmul.f32 0.005, %v7686_v56  ;;  %9050 = vmatpush1.bf16.msra.mxu0 %v11162_v0  ;;  %8938 = vmatprep.subr.bf16.mxu1 %v11169_v53 }
0x150d   : > { %v7760_v23 = vmul.f32 %v13562_v49, %v17671_v41  ;;  %v7761_v1 = vmul.f32 %v13562_v49, %v17674_v25  ;;  %8754 = vmatprep.mubr.bf16.mxu1 %v17862_v5  ;;  %8867 = vmatprep.mubr.bf16.mxu0 %v17862_v5  ;;  %v7689_v8 = vpop.xlane.xlu1 %7688  ;;  %v7802_v3 = vmul.f32 %v17754_v18, %v7759_v54 }
0x150e   : > { %v7720_v22 = vadd.f32 1e-05, %v7704_v61  ;;  %v7705_v31 = vmul.f32 0.005, %v7689_v8  ;;  %8755 = vmatmul.mubr.bf16.gmra.mrb[208].mxu1 %v17864_v51  ;;  %8868 = vmatmul.mubr.bf16.gmra.mrb[208].mxu0 %v17864_v51  ;;  %v7801_v55 = vmul.f32 %v17748_v50, %v7758_v27 }
0x150f   : > { %v7804_v32 = vmul.f32 %v17754_v18, %v7761_v1  ;;  %v7803_v41 = vmul.f32 %v17748_v50, %v7760_v23  ;;  %9051 = vmatprep.subr.bf16.mxu0 %v11171_v10  ;;  %8939 = vmatpush1.bf16.msra.mxu1 %v11168_v15  ;;  %v7845_v59 = vadd.f32 %v17762_v42, %v7802_v3  ;;  %v12809_v3 = vld [vmem:[#allocation13 + $0x20] ss:$8 sps:$4 sm:$0xff]  }
0x1510   : > { %13567 = vrsqrt.f32 %v7720_v22  ;;  %v7721_v25 = vadd.f32 1e-05, %v7705_v31  ;;  %9052 = vmatpush1.bf16.msra.mxu0 %v11170_v33  ;;  %10106 = vmatprep.subr.bf16.mxu1 %v12805_v7  ;;  %v7844_v36 = vadd.f32 %v17759_v28, %v7801_v55  ;;  %v12814_v22 = vld [vmem:[#allocation13 + $0x34] ss:$8 sps:$4 sm:$0xff]   ;;  %v12821_v55 = vld [vmem:[#allocation13 + $0x60] ss:$8 sps:$4 sm:$0xff]  }
0x1511   : > { %v7847_v6 = vadd.f32 %v17762_v42, %v7804_v32  ;;  %v7846_v19 = vadd.f32 %v17759_v28, %v7803_v41  ;;  %v12820_v31 = vld [vmem:[#allocation13 + $0x54] ss:$8 sps:$4 sm:$0xff]   ;;  %v12827_v41 = vld [vmem:[#allocation13 + $0x80] ss:$8 sps:$4 sm:$0xff]  }
0x1512   : > { %v13564_v48 = vpop.eup %13563  ;;  %13569 = vrsqrt.f32 %v7721_v25  ;;  %v12826_v32 = vld [vmem:[#allocation13 + $0x74] ss:$8 sps:$4 sm:$0xff]  }
0x1513   : > { %v7762_v43 = vmul.f32 %v13564_v48, %v17701_v13  ;;  %v7763_v9 = vmul.f32 %v13564_v48, %v17704_v38  ;;  %v17882_v60 = vpack.c.bf16 %v7847_v6, %v7845_v59  ;;  %v17884_v35 = vpack.c.bf16 %v7846_v19, %v7844_v36  ;;  %v12832_v25 = vld [vmem:[#allocation13 + $0x94] ss:$8 sps:$4 sm:$0xff]   ;;  %v12833_v59 = vld [vmem:[#allocation13 + $0xa0] ss:$8 sps:$4 sm:$0xff]   ;;  %v12841_v36 = vld [vmem:[#allocation13 + $0xc4] ss:$8 sps:$4 sm:$0xff]  }
0x1514   : > { %v13566_v39 = vpop.eup %13565  ;;  %v12838_v6 = vld [vmem:[#allocation13 + $0xb4] ss:$8 sps:$4 sm:$0xff]   ;;  %v12839_v19 = vld [vmem:[#allocation13 + $0xc0] ss:$8 sps:$4 sm:$0xff]  }
0x1515   : > { %v7764_v57 = vmul.f32 %v13566_v39, %v17709_v44  ;;  %v7765_v0 = vmul.f32 %v13566_v39, %v17712_v17  ;;  %8764 = vmatprep.mubr.bf16.mxu1 %v17882_v60  ;;  %8877 = vmatprep.mubr.bf16.mxu0 %v17882_v60  ;;  %v7806_v53 = vmul.f32 %v17754_v18, %v7763_v9  ;;  %v12844_v48 = vld [vmem:[#allocation13 + $0xd4] ss:$8 sps:$4 sm:$0xff]   ;;  %v12847_v9 = vld [vmem:[#allocation13 + $0xe4] ss:$8 sps:$4 sm:$0xff]   ;;  %v12848_v39 = vld [vmem:[#allocation13 + $0xf0] ss:$8 sps:$4 sm:$0xff]  }
0x1516   : > { %8765 = vmatmul.mubr.bf16.gmra.mrb[212].mxu1 %v17884_v35  ;;  %8878 = vmatmul.mubr.bf16.gmra.mrb[212].mxu0 %v17884_v35  ;;  %v7805_v13 = vmul.f32 %v17748_v50, %v7762_v43  ;;  %v12842_v43 = vld [vmem:[#allocation13 + $0xd0] ss:$8 sps:$4 sm:$0xff]  }
0x1517   : > { %v7808_v38 = vmul.f32 %v17754_v18, %v7765_v0  ;;  %v7807_v29 = vmul.f32 %v17748_v50, %v7764_v57  ;;  %v7849_v44 = vadd.f32 %v17762_v42, %v7806_v53  ;;  %v12853_v57 = vld [vmem:[#allocation13 + $0x104] ss:$8 sps:$4 sm:$0xff]  }
0x1518   : > { %v7848_v37 = vadd.f32 %v17759_v28, %v7805_v13  ;;  %v19198_v0 = vld [vmem:[#allocation21_spill] sm:$0xff]  ;;  %v17964_v13 = vld [vmem:[%s19199_s23] sm:$0xff]  ;;  %s13807_s23 = scalar_lea.vmem %s13806_s14, 8192 }
0x1519   : > { %v7851_v17 = vadd.f32 %v17762_v42, %v7808_v38  ;;  %v7850_v62 = vadd.f32 %v17759_v28, %v7807_v29  ;;  %v8012_v53 = vsub.s32 2, %v19198_v0  ;;  %v8016_v38 = vsub.s32 3, %v19198_v0  ;;  %p13809_p0 = scmp.lt.s32.totalorder %s13807_s23, %s13801_s28 }
0x151a   : > { %v13568_v4 = vpop.eup %13567  ;;  %v17969_v29 = vrot.slane %v17964_v13, %v19162_v16 }
0x151b   : > { %v7766_v58 = vmul.f32 %v13568_v4, %v17723_v26  ;;  %v7767_v15 = vmul.f32 %v13568_v4, %v17726_v21  ;;  %v17902_v10 = vpack.c.bf16 %v7851_v17, %v7849_v44  ;;  %v17904_v27 = vpack.c.bf16 %v7850_v62, %v7848_v37  ;;  %p13810_p2 = por %p13809_p0, %p13808_p13 }
0x151c   : > { %v13570_v54 = vpop.eup %13569  ;;  %v17972_v44 = vrot.slane %v17964_v13, %v8012_v53  ;;  %v17976_v17 = vrot.slane %v17964_v13, %v19163_v11  ;;  %v17979_v37 = vrot.slane %v17964_v13, %v8016_v38  ;;  %v12859_v53 = vld [vmem:[#allocation13 + $0x124] ss:$8 sps:$4 sm:$0xff]  }
0x151d   : > { %v7768_v56 = vmul.f32 %v13570_v54, %v17731_v52  ;;  %v7769_v49 = vmul.f32 %v13570_v54, %v17734_v40  ;;  %8774 = vmatprep.mubr.bf16.mxu1 %v17902_v10  ;;  %8887 = vmatprep.mubr.bf16.mxu0 %v17902_v10  ;;  %v7810_v61 = vmul.f32 %v17754_v18, %v7767_v15  ;;  %p13811_p8 = pnand %p13810_p2, %p13804_p1 }
0x151e   : > { %8775 = vmatmul.mubr.bf16.gmra.mrb[216].mxu1 %v17904_v27  ;;  %8888 = vmatmul.mubr.bf16.gmra.mrb[216].mxu0 %v17904_v27  ;;  %v7809_v26 = vmul.f32 %v17748_v50, %v7766_v58 }
0x151f   : > { %v7812_v21 = vmul.f32 %v17754_v18, %v7769_v49  ;;  %v7811_v33 = vmul.f32 %v17748_v50, %v7768_v56  ;;  %v7853_v52 = vadd.f32 %v17762_v42, %v7810_v61  ;;  %v12803_v50 = vld [vmem:[#allocation13] ss:$8 sps:$4 sm:$0xff]   ;;  %v12808_v18 = vld [vmem:[#allocation13 + $0x14] ss:$8 sps:$4 sm:$0xff]  }
0x1520   : > { %v7852_v7 = vadd.f32 %v17759_v28, %v7809_v26 }
0x1521   : > { %v7855_v40 = vadd.f32 %v17762_v42, %v7812_v21  ;;  %v7854_v23 = vadd.f32 %v17759_v28, %v7811_v33  ;;  %v12806_v28 = vld [vmem:[#allocation13 + $0x10] ss:$8 sps:$4 sm:$0xff]   ;;  %v12811_v42 = vld [vmem:[#allocation13 + $0x24] ss:$8 sps:$4 sm:$0xff]  }
0x1523   : > { %v17920_v1 = vpack.c.bf16 %v7855_v40, %v7853_v52  ;;  %v17922_v8 = vpack.c.bf16 %v7854_v23, %v7852_v7 }
0x1525   : > { %8784 = vmatprep.mubr.bf16.mxu1 %v17920_v1  ;;  %8897 = vmatprep.mubr.bf16.mxu0 %v17920_v1 }
0x1526   : > { %8785 = vmatmul.mubr.bf16.gmra.mrb[220].mxu1 %v17922_v8  ;;  %8898 = vmatmul.mubr.bf16.gmra.mrb[220].mxu0 %v17922_v8 }
0x1527   : > { %8940 = vmatprep.mubr.bf16.mxu1 %v17776_v20  ;;  %9053 = vmatprep.mubr.bf16.mxu0 %v17776_v20  ;;  %v12812_v20 = vld [vmem:[#allocation13 + $0x30] ss:$8 sps:$4 sm:$0xff]  }
0x152e   : > { %8941 = vmatmul.mubr.bf16.vlgmr.msra.gmra.mrb[224].mxu1 %v17778_v34  ;;  %9054 = vmatmul.mubr.bf16.vlgmr.msra.gmra.mrb[224].mxu0 %v17778_v34  ;;  %v12817_v34 = vld [vmem:[#allocation13 + $0x44] ss:$8 sps:$4 sm:$0xff]  }
0x152f   : > { %8950 = vmatprep.mubr.bf16.mxu1 %v17802_v24  ;;  %9063 = vmatprep.mubr.bf16.mxu0 %v17802_v24  ;;  %v12815_v24 = vld [vmem:[#allocation13 + $0x40] ss:$8 sps:$4 sm:$0xff]  }
0x1530   : > { %10107 = vmatpush1.bf16.msra.mxu1 %v12803_v50 }
0x1531   : > { %10108 = vmatprep.subr.bf16.mxu1 %v12808_v18 }
0x1534   : > { %10109 = vmatpush1.bf16.msra.mxu1 %v12806_v28 }
0x1535   : > { %10110 = vmatprep.subr.bf16.mxu1 %v12811_v42 }
0x1536   : > { %8951 = vmatmul.mubr.bf16.gmra.mrb[228].mxu1 %v17804_v45  ;;  %9064 = vmatmul.mubr.bf16.gmra.mrb[228].mxu0 %v17804_v45  ;;  %v12818_v45 = vld [vmem:[#allocation13 + $0x50] ss:$8 sps:$4 sm:$0xff]  }
0x1537   : > { %8960 = vmatprep.mubr.bf16.mxu1 %v17822_v46  ;;  %9073 = vmatprep.mubr.bf16.mxu0 %v17822_v46  ;;  %v12823_v46 = vld [vmem:[#allocation13 + $0x64] ss:$8 sps:$4 sm:$0xff]  }
0x1538   : > { %10111 = vmatpush1.bf16.msra.mxu1 %v12809_v3 }
0x1539   : > { %10112 = vmatprep.subr.bf16.mxu1 %v12814_v22 }
0x153c   : > { %10113 = vmatpush1.bf16.msra.mxu1 %v12812_v20 }
0x153d   : > { %10114 = vmatprep.subr.bf16.mxu1 %v12817_v34 }
0x153e   : > { %8961 = vmatmul.mubr.bf16.gmra.mrb[232].mxu1 %v17824_v14  ;;  %9074 = vmatmul.mubr.bf16.gmra.mrb[232].mxu0 %v17824_v14  ;;  %v12824_v14 = vld [vmem:[#allocation13 + $0x70] ss:$8 sps:$4 sm:$0xff]  }
0x153f   : > { %8970 = vmatprep.mubr.bf16.mxu1 %v17840_v30  ;;  %9083 = vmatprep.mubr.bf16.mxu0 %v17840_v30  ;;  %v12829_v30 = vld [vmem:[#allocation13 + $0x84] ss:$8 sps:$4 sm:$0xff]  }
0x1540   : > { %10115 = vmatpush1.bf16.msra.mxu1 %v12815_v24 }
0x1541   : > { %10116 = vmatprep.subr.bf16.mxu1 %v12820_v31 }
0x1544   : > { %10117 = vmatpush1.bf16.msra.mxu1 %v12818_v45 }
0x1545   : > { %10118 = vmatprep.subr.bf16.mxu1 %v12823_v46  ;;  %v12851_v46 = vld [vmem:[#allocation13 + $0x100] ss:$8 sps:$4 sm:$0xff]  }
0x1546   : > { %8971 = vmatmul.mubr.bf16.gmra.mrb[236].mxu1 %v17842_v2  ;;  %9084 = vmatmul.mubr.bf16.gmra.mrb[236].mxu0 %v17842_v2  ;;  %v12830_v2 = vld [vmem:[#allocation13 + $0x90] ss:$8 sps:$4 sm:$0xff]  }
0x1547   : > { %8980 = vmatprep.mubr.bf16.mxu1 %v17862_v5  ;;  %9093 = vmatprep.mubr.bf16.mxu0 %v17862_v5  ;;  %v12835_v5 = vld [vmem:[#allocation13 + $0xa4] ss:$8 sps:$4 sm:$0xff]  }
0x1548   : > { %10119 = vmatpush1.bf16.msra.mxu1 %v12821_v55 }
0x1549   : > { %10120 = vmatprep.subr.bf16.mxu1 %v12826_v32 }
0x154c   : > { %10121 = vmatpush1.bf16.msra.mxu1 %v12824_v14 }
0x154d   : > { %10122 = vmatprep.subr.bf16.mxu1 %v12829_v30 }
0x154e   : > { %8981 = vmatmul.mubr.bf16.gmra.mrb[240].mxu1 %v17864_v51  ;;  %9094 = vmatmul.mubr.bf16.gmra.mrb[240].mxu0 %v17864_v51  ;;  %v12836_v51 = vld [vmem:[#allocation13 + $0xb0] ss:$8 sps:$4 sm:$0xff]  }
0x154f   : > { %8990 = vmatprep.mubr.bf16.mxu1 %v17882_v60  ;;  %9103 = vmatprep.mubr.bf16.mxu0 %v17882_v60  ;;  %v12845_v60 = vld [vmem:[#allocation13 + $0xe0] ss:$8 sps:$4 sm:$0xff]  }
0x1550   : > { %10123 = vmatpush1.bf16.msra.mxu1 %v12827_v41  ;;  %v12856_v41 = vld [vmem:[#allocation13 + $0x114] ss:$8 sps:$4 sm:$0xff]  }
0x1551   : > { %10124 = vmatprep.subr.bf16.mxu1 %v12832_v25 }
0x1554   : > { %10125 = vmatpush1.bf16.msra.mxu1 %v12830_v2 }
0x1555   : > { %10126 = vmatprep.subr.bf16.mxu1 %v12835_v5 }
0x1556   : > { %8991 = vmatmul.mubr.bf16.gmra.mrb[244].mxu1 %v17884_v35  ;;  %9104 = vmatmul.mubr.bf16.gmra.mrb[244].mxu0 %v17884_v35  ;;  %v12850_v35 = vld [vmem:[#allocation13 + $0xf4] ss:$8 sps:$4 sm:$0xff]  }
0x1557   : > { %9000 = vmatprep.mubr.bf16.mxu1 %v17902_v10  ;;  %9113 = vmatprep.mubr.bf16.mxu0 %v17902_v10 }
0x1558   : > { %10127 = vmatpush1.bf16.msra.mxu1 %v12833_v59 }
0x1559   : > { %10128 = vmatprep.subr.bf16.mxu1 %v12838_v6 }
0x155c   : > { %10129 = vmatpush1.bf16.msra.mxu1 %v12836_v51 }
0x155d   : > { %10130 = vmatprep.subr.bf16.mxu1 %v12841_v36 }
0x155e   : > { %9001 = vmatmul.mubr.bf16.gmra.mrb[248].mxu1 %v17904_v27  ;;  %9114 = vmatmul.mubr.bf16.gmra.mrb[248].mxu0 %v17904_v27 }
0x155f   : > { %9010 = vmatprep.mubr.bf16.mxu1 %v17920_v1  ;;  %9123 = vmatprep.mubr.bf16.mxu0 %v17920_v1 }
0x1560   : > { %10131 = vmatpush1.bf16.msra.mxu1 %v12839_v19 }
0x1561   : > { %10132 = vmatprep.subr.bf16.mxu1 %v12844_v48 }
0x1564   : > { %10133 = vmatpush1.bf16.msra.mxu1 %v12842_v43 }
0x1565   : > { %10134 = vmatprep.subr.bf16.mxu1 %v12847_v9  ;;  %v12854_v9 = vld [vmem:[#allocation13 + $0x110] ss:$8 sps:$4 sm:$0xff]  }
0x1566   : > { %9011 = vmatmul.mubr.bf16.gmra.mrb[252].mxu1 %v17922_v8  ;;  %9124 = vmatmul.mubr.bf16.gmra.mrb[252].mxu0 %v17922_v8 }
0x1568   : > { %10135 = vmatpush1.bf16.msra.mxu1 %v12845_v60 }
0x1569   : > { %10136 = vmatprep.subr.bf16.mxu1 %v12850_v35 }
0x156c   : > { %10137 = vmatpush1.bf16.msra.mxu1 %v12848_v39 }
0x156d   : > { %10219 = vmatprep.subr.bf16.mxu1 %v12853_v57 }
0x15a5   : > { %v8716_v62 = vpop.f32.mrb[192].mxu1  ;;  %v8829_v4 = vpop.f32.mrb[192].mxu0 }
0x15a6   : > { %v8717_v58 = vadd.f32 %v8716_v62, %v17969_v29  ;;  %v8830_v15 = vadd.f32 %v8829_v4, %v17972_v44  ;;  %v8718_v10 = vpop.f32.mrb[193].mxu1  ;;  %v8831_v27 = vpop.f32.mrb[193].mxu0 }
0x15a7   : > { %v8719_v54 = vadd.f32 %v8718_v10, %v17976_v17  ;;  %v8832_v56 = vadd.f32 %v8831_v27, %v17979_v37  ;;  %v8720_v49 = vpop.f32.mrb[194].mxu1  ;;  %v8833_v61 = vpop.f32.mrb[194].mxu0 }
0x15a8   : > { %v8721_v26 = vadd.f32 %v8720_v49, %v17969_v29  ;;  %v8834_v21 = vadd.f32 %v8833_v61, %v17972_v44  ;;  %v8722_v33 = vpop.f32.mrb[195].mxu1  ;;  %v8835_v52 = vpop.f32.mrb[195].mxu0  ;;  %v9134_v23 = vmax.f32 %v8717_v58, 0.0  ;;  %v9136_v1 = vmax.f32 %v8830_v15, 0.0  ;;  %v12857_v61 = vld [vmem:[#allocation13 + $0x120] ss:$8 sps:$4 sm:$0xff]  }
0x15a9   : > { %v8723_v40 = vadd.f32 %v8722_v33, %v17976_v17  ;;  %v8836_v7 = vadd.f32 %v8835_v52, %v17979_v37  ;;  %v9135_v18 = vmax.f32 %v8719_v54, 0.0  ;;  %v9137_v28 = vmax.f32 %v8832_v56, 0.0 }
0x15aa   : > { %v9142_v8 = vmax.f32 %v8721_v26, 0.0  ;;  %v9144_v50 = vmax.f32 %v8834_v21, 0.0 }
0x15ab   : > { %v9143_v42 = vmax.f32 %v8723_v40, 0.0  ;;  %v9145_v3 = vmax.f32 %v8836_v7, 0.0  ;;  %v12862_v40 = vld [vmem:[#allocation13 + $0x134] ss:$8 sps:$4 sm:$0xff]  }
0x15ac   : > { %v9262_v22 = vpack.c.bf16 %v9142_v8, %v9134_v23  ;;  %v17989_v20 = vpack.c.bf16 %v9144_v50, %v9136_v1 }
0x15ad   : > { %v9263_v34 = vpack.c.bf16 %v9143_v42, %v9135_v18  ;;  %v17991_v24 = vpack.c.bf16 %v9145_v3, %v9137_v28  ;;  %v8726_v31 = vpop.f32.mrb[196].mxu1  ;;  %v8839_v45 = vpop.f32.mrb[196].mxu0 }
0x15ae   : > { %v8727_v55 = vadd.f32 %v8726_v31, %v17969_v29  ;;  %v8840_v32 = vadd.f32 %v8839_v45, %v17972_v44  ;;  %v8728_v14 = vpop.f32.mrb[197].mxu1  ;;  %v8841_v30 = vpop.f32.mrb[197].mxu0 }
0x15af   : > { %v8729_v25 = vadd.f32 %v8728_v14, %v17976_v17  ;;  %v8842_v2 = vadd.f32 %v8841_v30, %v17979_v37  ;;  %v8730_v5 = vpop.f32.mrb[198].mxu1  ;;  %v8843_v59 = vpop.f32.mrb[198].mxu0  ;;  %10138 = vmatprep.mubr.bf16.mxu1 %v9263_v34  ;;  %v12860_v34 = vld [vmem:[#allocation13 + $0x130] ss:$8 sps:$4 sm:$0xff]  }
0x15b0   : > { %v8731_v6 = vadd.f32 %v8730_v5, %v17969_v29  ;;  %v8844_v51 = vadd.f32 %v8843_v59, %v17972_v44  ;;  %v8732_v36 = vpop.f32.mrb[199].mxu1  ;;  %v8845_v19 = vpop.f32.mrb[199].mxu0  ;;  %10139 = vmatmul.mubr.bf16.vlgmr.msra.gmra.mrb[0].mxu1 %v9262_v22  ;;  %v9150_v60 = vmax.f32 %v8727_v55, 0.0  ;;  %v9152_v35 = vmax.f32 %v8840_v32, 0.0  ;;  %v12865_v32 = vld [vmem:[#allocation13 + $0x144] ss:$8 sps:$4 sm:$0xff]  }
0x15b1   : > { %v8733_v48 = vadd.f32 %v8732_v36, %v17976_v17  ;;  %v8846_v43 = vadd.f32 %v8845_v19, %v17979_v37  ;;  %10220 = vmatpush1.bf16.msra.mxu1 %v12851_v46  ;;  %v9151_v38 = vmax.f32 %v8729_v25, 0.0  ;;  %v9153_v62 = vmax.f32 %v8842_v2, 0.0  ;;  %v12863_v19 = vld [vmem:[#allocation13 + $0x140] ss:$8 sps:$4 sm:$0xff]  }
0x15b2   : > { %v9158_v39 = vmax.f32 %v8731_v6, 0.0  ;;  %v9160_v57 = vmax.f32 %v8844_v51, 0.0  ;;  %10221 = vmatprep.subr.bf16.mxu1 %v12856_v41 }
0x15b3   : > { %v9159_v4 = vmax.f32 %v8733_v48, 0.0  ;;  %v9161_v58 = vmax.f32 %v8846_v43, 0.0 }
0x15b4   : > { %v9270_v15 = vpack.c.bf16 %v9158_v39, %v9150_v60  ;;  %v18001_v10 = vpack.c.bf16 %v9160_v57, %v9152_v35  ;;  %v12868_v35 = vld [vmem:[#allocation13 + $0x154] ss:$8 sps:$4 sm:$0xff]  }
0x15b5   : > { %v9271_v27 = vpack.c.bf16 %v9159_v4, %v9151_v38  ;;  %v18003_v54 = vpack.c.bf16 %v9161_v58, %v9153_v62  ;;  %v8736_v56 = vpop.f32.mrb[200].mxu1  ;;  %v8849_v49 = vpop.f32.mrb[200].mxu0  ;;  %10222 = vmatpush1.bf16.msra.mxu1 %v12854_v9 }
0x15b6   : > { %v8737_v26 = vadd.f32 %v8736_v56, %v17969_v29  ;;  %v8850_v21 = vadd.f32 %v8849_v49, %v17972_v44  ;;  %v8738_v33 = vpop.f32.mrb[201].mxu1  ;;  %v8851_v52 = vpop.f32.mrb[201].mxu0  ;;  %10223 = vmatprep.subr.bf16.mxu1 %v12859_v53  ;;  %v12866_v49 = vld [vmem:[#allocation13 + $0x150] ss:$8 sps:$4 sm:$0xff]  }
0x15b7   : > { %v8739_v7 = vadd.f32 %v8738_v33, %v17976_v17  ;;  %v8852_v23 = vadd.f32 %v8851_v52, %v17979_v37  ;;  %v8740_v1 = vpop.f32.mrb[202].mxu1  ;;  %v8853_v8 = vpop.f32.mrb[202].mxu0  ;;  %10148 = vmatprep.mubr.bf16.mxu1 %v9271_v27  ;;  %v12871_v52 = vld [vmem:[#allocation13 + $0x164] ss:$8 sps:$4 sm:$0xff]  }
0x15b8   : > { %v8741_v50 = vadd.f32 %v8740_v1, %v17969_v29  ;;  %v8854_v18 = vadd.f32 %v8853_v8, %v17972_v44  ;;  %v8742_v28 = vpop.f32.mrb[203].mxu1  ;;  %v8855_v42 = vpop.f32.mrb[203].mxu0  ;;  %10149 = vmatmul.mubr.bf16.gmra.mrb[4].mxu1 %v9270_v15  ;;  %v9166_v31 = vmax.f32 %v8737_v26, 0.0  ;;  %v9168_v45 = vmax.f32 %v8850_v21, 0.0 }
0x15b9   : > { %v8743_v3 = vadd.f32 %v8742_v28, %v17976_v17  ;;  %v8856_v22 = vadd.f32 %v8855_v42, %v17979_v37  ;;  %10224 = vmatpush1.bf16.msra.mxu1 %v12857_v61  ;;  %v9167_v14 = vmax.f32 %v8739_v7, 0.0  ;;  %v9169_v30 = vmax.f32 %v8852_v23, 0.0  ;;  %v12869_v42 = vld [vmem:[#allocation13 + $0x160] ss:$8 sps:$4 sm:$0xff]  }
0x15ba   : > { %v9174_v46 = vmax.f32 %v8741_v50, 0.0  ;;  %v9176_v55 = vmax.f32 %v8854_v18, 0.0  ;;  %10225 = vmatprep.subr.bf16.mxu1 %v12862_v40 }
0x15bb   : > { %v9175_v41 = vmax.f32 %v8743_v3, 0.0  ;;  %v9177_v25 = vmax.f32 %v8856_v22, 0.0  ;;  %v12874_v3 = vld [vmem:[#allocation13 + $0x174] ss:$8 sps:$4 sm:$0xff]   ;;  %v12872_v22 = vld [vmem:[#allocation13 + $0x170] ss:$8 sps:$4 sm:$0xff]  }
0x15bc   : > { %v9278_v2 = vpack.c.bf16 %v9174_v46, %v9166_v31  ;;  %v18013_v5 = vpack.c.bf16 %v9176_v55, %v9168_v45  ;;  %v12875_v31 = vld [vmem:[#allocation13 + $0x180] ss:$8 sps:$4 sm:$0xff]   ;;  %v12880_v45 = vld [vmem:[#allocation13 + $0x194] ss:$8 sps:$4 sm:$0xff]   ;;  %v12878_v46 = vld [vmem:[#allocation13 + $0x190] ss:$8 sps:$4 sm:$0xff]  }
0x15bd   : > { %v9279_v59 = vpack.c.bf16 %v9175_v41, %v9167_v14  ;;  %v18015_v6 = vpack.c.bf16 %v9177_v25, %v9169_v30  ;;  %v8746_v51 = vpop.f32.mrb[204].mxu1  ;;  %v8859_v36 = vpop.f32.mrb[204].mxu0  ;;  %10226 = vmatpush1.bf16.msra.mxu1 %v12860_v34  ;;  %v12877_v34 = vld [vmem:[#allocation13 + $0x184] ss:$8 sps:$4 sm:$0xff]   ;;  %v12886_v14 = vld [vmem:[#allocation13 + $0x1b4] ss:$8 sps:$4 sm:$0xff]  }
0x15be   : > { %v8747_v48 = vadd.f32 %v8746_v51, %v17969_v29  ;;  %v8860_v43 = vadd.f32 %v8859_v36, %v17972_v44  ;;  %v8748_v9 = vpop.f32.mrb[205].mxu1  ;;  %v8861_v60 = vpop.f32.mrb[205].mxu0  ;;  %10227 = vmatprep.subr.bf16.mxu1 %v12865_v32  ;;  %v12883_v55 = vld [vmem:[#allocation13 + $0x1a4] ss:$8 sps:$4 sm:$0xff]   ;;  %v12881_v32 = vld [vmem:[#allocation13 + $0x1a0] ss:$8 sps:$4 sm:$0xff]  }
0x15bf   : > { %v8749_v39 = vadd.f32 %v8748_v9, %v17976_v17  ;;  %v8862_v57 = vadd.f32 %v8861_v60, %v17979_v37  ;;  %v8750_v53 = vpop.f32.mrb[206].mxu1  ;;  %v8863_v38 = vpop.f32.mrb[206].mxu0  ;;  %10158 = vmatprep.mubr.bf16.mxu1 %v9279_v59  ;;  %v12884_v30 = vld [vmem:[#allocation13 + $0x1b0] ss:$8 sps:$4 sm:$0xff]   ;;  %v12889_v41 = vld [vmem:[#allocation13 + $0x1c4] ss:$8 sps:$4 sm:$0xff]  }
0x15c0   : > { %v8751_v62 = vadd.f32 %v8750_v53, %v17969_v29  ;;  %v8864_v4 = vadd.f32 %v8863_v38, %v17972_v44  ;;  %v8752_v58 = vpop.f32.mrb[207].mxu1  ;;  %v8865_v15 = vpop.f32.mrb[207].mxu0  ;;  %10159 = vmatmul.mubr.bf16.gmra.mrb[8].mxu1 %v9278_v2  ;;  %v9182_v61 = vmax.f32 %v8747_v48, 0.0  ;;  %v9184_v26 = vmax.f32 %v8860_v43, 0.0  ;;  %v12887_v25 = vld [vmem:[#allocation13 + $0x1c0] ss:$8 sps:$4 sm:$0xff]  }
0x15c1   : > { %v8753_v27 = vadd.f32 %v8752_v58, %v17976_v17  ;;  %v8866_v56 = vadd.f32 %v8865_v15, %v17979_v37  ;;  %10228 = vmatpush1.bf16.msra.mxu1 %v12863_v19  ;;  %v9183_v40 = vmax.f32 %v8749_v39, 0.0  ;;  %v9185_v7 = vmax.f32 %v8862_v57, 0.0  ;;  %v12892_v2 = vld [vmem:[#allocation13 + $0x1d4] ss:$8 sps:$4 sm:$0xff]   ;;  %v12890_v36 = vld [vmem:[#allocation13 + $0x1d0] ss:$8 sps:$4 sm:$0xff]  }
0x15c2   : > { %v9190_v21 = vmax.f32 %v8751_v62, 0.0  ;;  %v9192_v33 = vmax.f32 %v8864_v4, 0.0  ;;  %10229 = vmatprep.subr.bf16.mxu1 %v12868_v35  ;;  %v12895_v60 = vld [vmem:[#allocation13 + $0x1e4] ss:$8 sps:$4 sm:$0xff]  }
0x15c3   : > { %v9191_v23 = vmax.f32 %v8753_v27, 0.0  ;;  %v9193_v1 = vmax.f32 %v8866_v56, 0.0  ;;  %v12893_v56 = vld [vmem:[#allocation13 + $0x1e0] ss:$8 sps:$4 sm:$0xff]  }
0x15c4   : > { %v9286_v8 = vpack.c.bf16 %v9190_v21, %v9182_v61  ;;  %v18025_v50 = vpack.c.bf16 %v9192_v33, %v9184_v26  ;;  %v12898_v33 = vld [vmem:[#allocation13 + $0x1f4] ss:$8 sps:$4 sm:$0xff]  }
0x15c5   : > { %v9287_v18 = vpack.c.bf16 %v9191_v23, %v9183_v40  ;;  %v18027_v28 = vpack.c.bf16 %v9193_v1, %v9185_v7  ;;  %10230 = vmatpush1.bf16.msra.mxu1 %v12866_v49 }
0x15c6   : > { %10231 = vmatprep.subr.bf16.mxu1 %v12871_v52 }
0x15c7   : > { %10168 = vmatprep.mubr.bf16.mxu1 %v9287_v18 }
0x15c8   : > { %10169 = vmatmul.mubr.bf16.gmra.mrb[12].mxu1 %v9286_v8 }
0x15c9   : > { %10232 = vmatpush1.bf16.msra.mxu1 %v12869_v42 }
0x15ca   : > { %10233 = vmatprep.subr.bf16.mxu1 %v12874_v3 }
0x15cd   : > { %10234 = vmatpush1.bf16.msra.mxu1 %v12872_v22 }
0x15ce   : > { %10235 = vmatprep.subr.bf16.mxu1 %v12877_v34  ;;  %v12896_v34 = vld [vmem:[#allocation13 + $0x1f0] ss:$8 sps:$4 sm:$0xff]  }
0x15d1   : > { %10236 = vmatpush1.bf16.msra.mxu1 %v12875_v31 }
0x15d2   : > { %10237 = vmatprep.subr.bf16.mxu1 %v12880_v45 }
0x15d5   : > { %10238 = vmatpush1.bf16.msra.mxu1 %v12878_v46 }
0x15d6   : > { %10239 = vmatprep.subr.bf16.mxu1 %v12883_v55 }
0x15d9   : > { %10240 = vmatpush1.bf16.msra.mxu1 %v12881_v32  ;;  %v12901_v32 = vld [vmem:[#allocation13 + $0x204] ss:$8 sps:$4 sm:$0xff]  }
0x15da   : > { %10241 = vmatprep.subr.bf16.mxu1 %v12886_v14 }
0x15dd   : > { %10242 = vmatpush1.bf16.msra.mxu1 %v12884_v30 }
0x15de   : > { %10243 = vmatprep.subr.bf16.mxu1 %v12889_v41 }
0x15e1   : > { %v8756_v59 = vpop.f32.mrb[208].mxu1  ;;  %v8869_v51 = vpop.f32.mrb[208].mxu0  ;;  %10244 = vmatpush1.bf16.msra.mxu1 %v12887_v25 }
0x15e2   : > { %v8757_v19 = vadd.f32 %v8756_v59, %v17969_v29  ;;  %v8870_v48 = vadd.f32 %v8869_v51, %v17972_v44  ;;  %v8758_v43 = vpop.f32.mrb[209].mxu1  ;;  %v8871_v9 = vpop.f32.mrb[209].mxu0  ;;  %10245 = vmatprep.subr.bf16.mxu1 %v12892_v2 }
0x15e3   : > { %v8759_v35 = vadd.f32 %v8758_v43, %v17976_v17  ;;  %v8872_v39 = vadd.f32 %v8871_v9, %v17979_v37  ;;  %v8760_v57 = vpop.f32.mrb[210].mxu1  ;;  %v8873_v53 = vpop.f32.mrb[210].mxu0 }
0x15e4   : > { %v8761_v38 = vadd.f32 %v8760_v57, %v17969_v29  ;;  %v8874_v62 = vadd.f32 %v8873_v53, %v17972_v44  ;;  %v8762_v4 = vpop.f32.mrb[211].mxu1  ;;  %v8875_v58 = vpop.f32.mrb[211].mxu0  ;;  %v9198_v49 = vmax.f32 %v8757_v19, 0.0  ;;  %v9200_v61 = vmax.f32 %v8870_v48, 0.0 }
0x15e5   : > { %v8763_v15 = vadd.f32 %v8762_v4, %v17976_v17  ;;  %v8876_v27 = vadd.f32 %v8875_v58, %v17979_v37  ;;  %10246 = vmatpush1.bf16.msra.mxu1 %v12890_v36  ;;  %v9199_v52 = vmax.f32 %v8759_v35, 0.0  ;;  %v9201_v40 = vmax.f32 %v8872_v39, 0.0 }
0x15e6   : > { %v9206_v26 = vmax.f32 %v8761_v38, 0.0  ;;  %v9208_v21 = vmax.f32 %v8874_v62, 0.0  ;;  %10247 = vmatprep.subr.bf16.mxu1 %v12895_v60 }
0x15e7   : > { %v9207_v7 = vmax.f32 %v8763_v15, 0.0  ;;  %v9209_v23 = vmax.f32 %v8876_v27, 0.0 }
0x15e8   : > { %v9294_v1 = vpack.c.bf16 %v9206_v26, %v9198_v49  ;;  %v18037_v8 = vpack.c.bf16 %v9208_v21, %v9200_v61 }
0x15e9   : > { %v9295_v18 = vpack.c.bf16 %v9207_v7, %v9199_v52  ;;  %v18039_v42 = vpack.c.bf16 %v9209_v23, %v9201_v40  ;;  %v8766_v3 = vpop.f32.mrb[212].mxu1  ;;  %v8879_v22 = vpop.f32.mrb[212].mxu0  ;;  %10248 = vmatpush1.bf16.msra.mxu1 %v12893_v56 }
0x15ea   : > { %v8767_v31 = vadd.f32 %v8766_v3, %v17969_v29  ;;  %v8880_v45 = vadd.f32 %v8879_v22, %v17972_v44  ;;  %v8768_v46 = vpop.f32.mrb[213].mxu1  ;;  %v8881_v55 = vpop.f32.mrb[213].mxu0  ;;  %10249 = vmatprep.subr.bf16.mxu1 %v12898_v33 }
0x15eb   : > { %v8769_v14 = vadd.f32 %v8768_v46, %v17976_v17  ;;  %v8882_v30 = vadd.f32 %v8881_v55, %v17979_v37  ;;  %v8770_v41 = vpop.f32.mrb[214].mxu1  ;;  %v8883_v25 = vpop.f32.mrb[214].mxu0  ;;  %10178 = vmatprep.mubr.bf16.mxu1 %v9295_v18 }
0x15ec   : > { %v8771_v2 = vadd.f32 %v8770_v41, %v17969_v29  ;;  %v8884_v59 = vadd.f32 %v8883_v25, %v17972_v44  ;;  %v8772_v51 = vpop.f32.mrb[215].mxu1  ;;  %v8885_v36 = vpop.f32.mrb[215].mxu0  ;;  %10179 = vmatmul.mubr.bf16.gmra.mrb[16].mxu1 %v9294_v1  ;;  %v9214_v43 = vmax.f32 %v8767_v31, 0.0  ;;  %v9216_v9 = vmax.f32 %v8880_v45, 0.0 }
0x15ed   : > { %v8773_v19 = vadd.f32 %v8772_v51, %v17976_v17  ;;  %v8886_v48 = vadd.f32 %v8885_v36, %v17979_v37  ;;  %10250 = vmatpush1.bf16.msra.mxu1 %v12896_v34  ;;  %v9215_v39 = vmax.f32 %v8769_v14, 0.0  ;;  %v9217_v57 = vmax.f32 %v8882_v30, 0.0 }
0x15ee   : > { %v9222_v60 = vmax.f32 %v8771_v2, 0.0  ;;  %v9224_v35 = vmax.f32 %v8884_v59, 0.0  ;;  %10332 = vmatprep.subr.bf16.mxu1 %v12901_v32  ;;  %v8020_v59 = vsub.s32 4, %v19198_v0  ;;  %v8028_v51 = vsub.s32 6, %v19198_v0 }
0x15ef   : > { %v9223_v53 = vmax.f32 %v8773_v19, 0.0  ;;  %v9225_v38 = vmax.f32 %v8886_v48, 0.0 }
0x15f0   : > { %v9302_v62 = vpack.c.bf16 %v9222_v60, %v9214_v43  ;;  %v18049_v4 = vpack.c.bf16 %v9224_v35, %v9216_v9  ;;  %v8024_v9 = vsub.s32 5, %v19198_v0  ;;  %v8032_v60 = vsub.s32 7, %v19198_v0 }
0x15f1   : > { %v9303_v58 = vpack.c.bf16 %v9223_v53, %v9215_v39  ;;  %v18051_v15 = vpack.c.bf16 %v9225_v38, %v9217_v57  ;;  %v8776_v27 = vpop.f32.mrb[216].mxu1  ;;  %v8889_v56 = vpop.f32.mrb[216].mxu0  ;;  %v18076_v0 = vrot.slane %v17964_v13, %v8020_v59 }
0x15f2   : > { %v8777_v49 = vadd.f32 %v8776_v27, %v17969_v29  ;;  %v8890_v61 = vadd.f32 %v8889_v56, %v17972_v44  ;;  %v8778_v26 = vpop.f32.mrb[217].mxu1  ;;  %v8891_v21 = vpop.f32.mrb[217].mxu0 }
0x15f3   : > { %v8779_v33 = vadd.f32 %v8778_v26, %v17976_v17  ;;  %v8892_v52 = vadd.f32 %v8891_v21, %v17979_v37  ;;  %v8780_v40 = vpop.f32.mrb[218].mxu1  ;;  %v8893_v7 = vpop.f32.mrb[218].mxu0  ;;  %10188 = vmatprep.mubr.bf16.mxu1 %v9303_v58  ;;  %v18079_v21 = vrot.slane %v17964_v13, %v8028_v51 }
0x15f4   : > { %v8781_v23 = vadd.f32 %v8780_v40, %v17969_v29  ;;  %v8894_v1 = vadd.f32 %v8893_v7, %v17972_v44  ;;  %v8782_v18 = vpop.f32.mrb[219].mxu1  ;;  %v8895_v3 = vpop.f32.mrb[219].mxu0  ;;  %10189 = vmatmul.mubr.bf16.gmra.mrb[20].mxu1 %v9302_v62  ;;  %v9230_v31 = vmax.f32 %v8777_v49, 0.0  ;;  %v9232_v45 = vmax.f32 %v8890_v61, 0.0 }
0x15f5   : > { %v8783_v22 = vadd.f32 %v8782_v18, %v17976_v17  ;;  %v8896_v34 = vadd.f32 %v8895_v3, %v17979_v37  ;;  %v9231_v32 = vmax.f32 %v8779_v33, 0.0  ;;  %v9233_v14 = vmax.f32 %v8892_v52, 0.0 }
0x15f6   : > { %v9238_v46 = vmax.f32 %v8781_v23, 0.0  ;;  %v9240_v55 = vmax.f32 %v8894_v1, 0.0  ;;  %v18084_v40 = vrot.slane %v17964_v13, %v8024_v9 }
0x15f7   : > { %v9239_v30 = vmax.f32 %v8783_v22, 0.0  ;;  %v9241_v41 = vmax.f32 %v8896_v34, 0.0 }
0x15f8   : > { %v9310_v25 = vpack.c.bf16 %v9238_v46, %v9230_v31  ;;  %v18061_v2 = vpack.c.bf16 %v9240_v55, %v9232_v45 }
0x15f9   : > { %v9311_v36 = vpack.c.bf16 %v9239_v30, %v9231_v32  ;;  %v18065_v19 = vpack.c.bf16 %v9241_v41, %v9233_v14  ;;  %v8786_v48 = vpop.f32.mrb[220].mxu1  ;;  %v8899_v43 = vpop.f32.mrb[220].mxu0 }
0x15fa   : > { %v8787_v35 = vadd.f32 %v8786_v48, %v17969_v29  ;;  %v8900_v39 = vadd.f32 %v8899_v43, %v17972_v44  ;;  %v8788_v57 = vpop.f32.mrb[221].mxu1  ;;  %v8901_v53 = vpop.f32.mrb[221].mxu0 }
0x15fb   : > { %v8789_v38 = vadd.f32 %v8788_v57, %v17976_v17  ;;  %v8902_v62 = vadd.f32 %v8901_v53, %v17979_v37  ;;  %v8790_v58 = vpop.f32.mrb[222].mxu1  ;;  %v8903_v27 = vpop.f32.mrb[222].mxu0  ;;  %10198 = vmatprep.mubr.bf16.mxu1 %v9311_v36 }
0x15fc   : > { %v8791_v56 = vadd.f32 %v8790_v58, %v17969_v29  ;;  %v8904_v49 = vadd.f32 %v8903_v27, %v17972_v44  ;;  %v8792_v61 = vpop.f32.mrb[223].mxu1  ;;  %v8905_v26 = vpop.f32.mrb[223].mxu0  ;;  %10199 = vmatmul.mubr.bf16.gmra.mrb[24].mxu1 %v9310_v25  ;;  %v18087_v29 = vrot.slane %v17964_v13, %v8032_v60  ;;  %v9246_v44 = vmax.f32 %v8787_v35, 0.0 }
0x15fd   : > { %v8793_v33 = vadd.f32 %v8792_v61, %v17976_v17  ;;  %v8906_v52 = vadd.f32 %v8905_v26, %v17979_v37  ;;  %v9248_v7 = vmax.f32 %v8900_v39, 0.0  ;;  %v9247_v18 = vmax.f32 %v8789_v38, 0.0 }
0x15fe   : > { %v9254_v23 = vmax.f32 %v8791_v56, 0.0  ;;  %v9256_v1 = vmax.f32 %v8904_v49, 0.0  ;;  %v9249_v3 = vmax.f32 %v8902_v62, 0.0 }
0x15ff   : > { %v9255_v22 = vmax.f32 %v8793_v33, 0.0  ;;  %v9257_v34 = vmax.f32 %v8906_v52, 0.0 }
0x1600   : > { %v9318_v31 = vpack.c.bf16 %v9254_v23, %v9246_v44  ;;  %v18089_v45 = vpack.c.bf16 %v9256_v1, %v9248_v7  ;;  %v12899_v7 = vld [vmem:[#allocation13 + $0x200] ss:$8 sps:$4 sm:$0xff]  }
0x1601   : > { %v9319_v17 = vpack.c.bf16 %v9255_v22, %v9247_v18  ;;  %v18091_v46 = vpack.c.bf16 %v9257_v34, %v9249_v3  ;;  %v8942_v37 = vpop.f32.mrb[224].mxu1  ;;  %v9055_v55 = vpop.f32.mrb[224].mxu0  ;;  %v12904_v3 = vld [vmem:[#allocation13 + $0x214] ss:$8 sps:$4 sm:$0xff]  }
0x1602   : > { %v8943_v32 = vadd.f32 %v8942_v37, %v18076_v0  ;;  %v9056_v13 = vadd.f32 %v9055_v55, %v18079_v21  ;;  %v8944_v14 = vpop.f32.mrb[225].mxu1  ;;  %v9057_v30 = vpop.f32.mrb[225].mxu0 }
0x1603   : > { %v8945_v41 = vadd.f32 %v8944_v14, %v18084_v40  ;;  %v9058_v25 = vadd.f32 %v9057_v30, %v18087_v29  ;;  %v8946_v59 = vpop.f32.mrb[226].mxu1  ;;  %v9059_v51 = vpop.f32.mrb[226].mxu0  ;;  %10208 = vmatprep.mubr.bf16.mxu1 %v9319_v17 }
0x1604   : > { %v8947_v36 = vadd.f32 %v8946_v59, %v18076_v0  ;;  %v9060_v48 = vadd.f32 %v9059_v51, %v18079_v21  ;;  %v8948_v43 = vpop.f32.mrb[227].mxu1  ;;  %v9061_v9 = vpop.f32.mrb[227].mxu0  ;;  %10209 = vmatmul.mubr.bf16.gmra.mrb[28].mxu1 %v9318_v31  ;;  %v9138_v39 = vmax.f32 %v8943_v32, 0.0  ;;  %v9140_v57 = vmax.f32 %v9056_v13, 0.0 }
0x1605   : > { %v8949_v60 = vadd.f32 %v8948_v43, %v18084_v40  ;;  %v9062_v35 = vadd.f32 %v9061_v9, %v18087_v29  ;;  %10251 = vmatprep.mubr.bf16.mxu1 %v17991_v24  ;;  %v9139_v62 = vmax.f32 %v8945_v41, 0.0  ;;  %v9141_v58 = vmax.f32 %v9058_v25, 0.0  ;;  %v12902_v41 = vld [vmem:[#allocation13 + $0x210] ss:$8 sps:$4 sm:$0xff]  }
0x1606   : > { %v9146_v53 = vmax.f32 %v8947_v36, 0.0  ;;  %v9148_v38 = vmax.f32 %v9060_v48, 0.0  ;;  %v12907_v48 = vld [vmem:[#allocation13 + $0x224] ss:$8 sps:$4 sm:$0xff]  }
0x1607   : > { %v9147_v27 = vmax.f32 %v8949_v60, 0.0  ;;  %v9149_v56 = vmax.f32 %v9062_v35, 0.0 }
0x1608   : > { %v18102_v49 = vpack.c.bf16 %v9146_v53, %v9138_v39  ;;  %v18104_v61 = vpack.c.bf16 %v9148_v38, %v9140_v57 }
0x1609   : > { %v18106_v26 = vpack.c.bf16 %v9147_v27, %v9139_v62  ;;  %v18108_v33 = vpack.c.bf16 %v9149_v56, %v9141_v58  ;;  %v8952_v52 = vpop.f32.mrb[228].mxu1  ;;  %v9065_v44 = vpop.f32.mrb[228].mxu0  ;;  %v12905_v62 = vld [vmem:[#allocation13 + $0x220] ss:$8 sps:$4 sm:$0xff]  }
0x160a   : > { %v8953_v24 = vadd.f32 %v8952_v52, %v18076_v0  ;;  %v9066_v23 = vadd.f32 %v9065_v44, %v18079_v21  ;;  %v8954_v1 = vpop.f32.mrb[229].mxu1  ;;  %v9067_v18 = vpop.f32.mrb[229].mxu0  ;;  %v12910_v44 = vld [vmem:[#allocation13 + $0x234] ss:$8 sps:$4 sm:$0xff]  }
0x160b   : > { %v8955_v22 = vadd.f32 %v8954_v1, %v18084_v40  ;;  %v9068_v34 = vadd.f32 %v9067_v18, %v18087_v29  ;;  %v8956_v31 = vpop.f32.mrb[230].mxu1  ;;  %v9069_v17 = vpop.f32.mrb[230].mxu0 }
0x160c   : > { %v8957_v37 = vadd.f32 %v8956_v31, %v18076_v0  ;;  %v9070_v55 = vadd.f32 %v9069_v17, %v18079_v21  ;;  %v8958_v32 = vpop.f32.mrb[231].mxu1  ;;  %v9071_v13 = vpop.f32.mrb[231].mxu0  ;;  %10252 = vmatmul.mubr.bf16.vlgmr.msra.gmra.mrb[0].mxu1 %v17989_v20  ;;  %v9154_v25 = vmax.f32 %v8953_v24, 0.0  ;;  %v9156_v59 = vmax.f32 %v9066_v23, 0.0 }
0x160d   : > { %v8959_v14 = vadd.f32 %v8958_v32, %v18084_v40  ;;  %v9072_v30 = vadd.f32 %v9071_v13, %v18087_v29  ;;  %10261 = vmatprep.mubr.bf16.mxu1 %v18003_v54  ;;  %10333 = vmatpush1.bf16.msra.mxu1 %v12899_v7  ;;  %v9155_v43 = vmax.f32 %v8955_v22, 0.0  ;;  %v9157_v9 = vmax.f32 %v9068_v34, 0.0 }
0x160e   : > { %v9162_v51 = vmax.f32 %v8957_v37, 0.0  ;;  %v9164_v36 = vmax.f32 %v9070_v55, 0.0  ;;  %10334 = vmatprep.subr.bf16.mxu1 %v12904_v3  ;;  %v12908_v37 = vld [vmem:[#allocation13 + $0x230] ss:$8 sps:$4 sm:$0xff]  }
0x160f   : > { %v9163_v60 = vmax.f32 %v8959_v14, 0.0  ;;  %v9165_v35 = vmax.f32 %v9072_v30, 0.0  ;;  %v12913_v30 = vld [vmem:[#allocation13 + $0x244] ss:$8 sps:$4 sm:$0xff]  }
0x1610   : > { %v18120_v39 = vpack.c.bf16 %v9162_v51, %v9154_v25  ;;  %v18122_v20 = vpack.c.bf16 %v9164_v36, %v9156_v59 }
0x1611   : > { %v18124_v57 = vpack.c.bf16 %v9163_v60, %v9155_v43  ;;  %v18126_v53 = vpack.c.bf16 %v9165_v35, %v9157_v9  ;;  %v8962_v54 = vpop.f32.mrb[232].mxu1  ;;  %v9075_v38 = vpop.f32.mrb[232].mxu0  ;;  %10335 = vmatpush1.bf16.msra.mxu1 %v12902_v41  ;;  %v12911_v60 = vld [vmem:[#allocation13 + $0x240] ss:$8 sps:$4 sm:$0xff]  }
0x1612   : > { %v8963_v58 = vadd.f32 %v8962_v54, %v18076_v0  ;;  %v9076_v27 = vadd.f32 %v9075_v38, %v18079_v21  ;;  %v8964_v56 = vpop.f32.mrb[233].mxu1  ;;  %v9077_v52 = vpop.f32.mrb[233].mxu0  ;;  %10336 = vmatprep.subr.bf16.mxu1 %v12907_v48 }
0x1613   : > { %v8965_v7 = vadd.f32 %v8964_v56, %v18084_v40  ;;  %v9078_v24 = vadd.f32 %v9077_v52, %v18087_v29  ;;  %v8966_v23 = vpop.f32.mrb[234].mxu1  ;;  %v9079_v1 = vpop.f32.mrb[234].mxu0 }
0x1614   : > { %v8967_v18 = vadd.f32 %v8966_v23, %v18076_v0  ;;  %v9080_v3 = vadd.f32 %v9079_v1, %v18079_v21  ;;  %v8968_v22 = vpop.f32.mrb[235].mxu1  ;;  %v9081_v34 = vpop.f32.mrb[235].mxu0  ;;  %10262 = vmatmul.mubr.bf16.gmra.mrb[4].mxu1 %v18001_v10  ;;  %v9170_v55 = vmax.f32 %v8963_v58, 0.0  ;;  %v9172_v32 = vmax.f32 %v9076_v27, 0.0  ;;  %v12916_v58 = vld [vmem:[#allocation13 + $0x254] ss:$8 sps:$4 sm:$0xff]  }
0x1615   : > { %v8969_v31 = vadd.f32 %v8968_v22, %v18084_v40  ;;  %v9082_v17 = vadd.f32 %v9081_v34, %v18087_v29  ;;  %10271 = vmatprep.mubr.bf16.mxu1 %v18015_v6  ;;  %10337 = vmatpush1.bf16.msra.mxu1 %v12905_v62  ;;  %v9171_v41 = vmax.f32 %v8965_v7, 0.0  ;;  %v9173_v25 = vmax.f32 %v9078_v24, 0.0  ;;  %v12914_v22 = vld [vmem:[#allocation13 + $0x250] ss:$8 sps:$4 sm:$0xff]  }
0x1616   : > { %v9178_v13 = vmax.f32 %v8967_v18, 0.0  ;;  %v9180_v14 = vmax.f32 %v9080_v3, 0.0  ;;  %10338 = vmatprep.subr.bf16.mxu1 %v12910_v44 }
0x1617   : > { %v9179_v59 = vmax.f32 %v8969_v31, 0.0  ;;  %v9181_v51 = vmax.f32 %v9082_v17, 0.0 }
0x1618   : > { %v18138_v36 = vpack.c.bf16 %v9178_v13, %v9170_v55  ;;  %v18140_v10 = vpack.c.bf16 %v9180_v14, %v9172_v32  ;;  %v12919_v55 = vld [vmem:[#allocation13 + $0x264] ss:$8 sps:$4 sm:$0xff]  }
0x1619   : > { %v18142_v48 = vpack.c.bf16 %v9179_v59, %v9171_v41  ;;  %v18144_v43 = vpack.c.bf16 %v9181_v51, %v9173_v25  ;;  %v8972_v6 = vpop.f32.mrb[236].mxu1  ;;  %v9085_v9 = vpop.f32.mrb[236].mxu0  ;;  %10339 = vmatpush1.bf16.msra.mxu1 %v12908_v37 }
0x161a   : > { %v8973_v35 = vadd.f32 %v8972_v6, %v18076_v0  ;;  %v9086_v54 = vadd.f32 %v9085_v9, %v18079_v21  ;;  %v8974_v38 = vpop.f32.mrb[237].mxu1  ;;  %v9087_v62 = vpop.f32.mrb[237].mxu0  ;;  %10340 = vmatprep.subr.bf16.mxu1 %v12913_v30  ;;  %v12917_v6 = vld [vmem:[#allocation13 + $0x260] ss:$8 sps:$4 sm:$0xff]  }
0x161b   : > { %v8975_v27 = vadd.f32 %v8974_v38, %v18084_v40  ;;  %v9088_v56 = vadd.f32 %v9087_v62, %v18087_v29  ;;  %v8976_v52 = vpop.f32.mrb[238].mxu1  ;;  %v9089_v44 = vpop.f32.mrb[238].mxu0  ;;  %v12922_v38 = vld [vmem:[#allocation13 + $0x274] ss:$8 sps:$4 sm:$0xff]  }
0x161c   : > { %v8977_v7 = vadd.f32 %v8976_v52, %v18076_v0  ;;  %v9090_v24 = vadd.f32 %v9089_v44, %v18079_v21  ;;  %v8978_v23 = vpop.f32.mrb[239].mxu1  ;;  %v9091_v1 = vpop.f32.mrb[239].mxu0  ;;  %10272 = vmatmul.mubr.bf16.gmra.mrb[8].mxu1 %v18013_v5  ;;  %v9186_v34 = vmax.f32 %v8973_v35, 0.0  ;;  %v9188_v31 = vmax.f32 %v9086_v54, 0.0 }
0x161d   : > { %v8979_v18 = vadd.f32 %v8978_v23, %v18084_v40  ;;  %v9092_v3 = vadd.f32 %v9091_v1, %v18087_v29  ;;  %10281 = vmatprep.mubr.bf16.mxu1 %v18027_v28  ;;  %10341 = vmatpush1.bf16.msra.mxu1 %v12911_v60  ;;  %v9187_v32 = vmax.f32 %v8975_v27, 0.0  ;;  %v9189_v13 = vmax.f32 %v9088_v56, 0.0 }
0x161e   : > { %v9194_v17 = vmax.f32 %v8977_v7, 0.0  ;;  %v9196_v37 = vmax.f32 %v9090_v24, 0.0  ;;  %10342 = vmatprep.subr.bf16.mxu1 %v12916_v58 }
0x161f   : > { %v9195_v14 = vmax.f32 %v8979_v18, 0.0  ;;  %v9197_v30 = vmax.f32 %v9092_v3, 0.0  ;;  %v12920_v18 = vld [vmem:[#allocation13 + $0x270] ss:$8 sps:$4 sm:$0xff]  }
0x1620   : > { %v18156_v41 = vpack.c.bf16 %v9194_v17, %v9186_v34  ;;  %v18158_v5 = vpack.c.bf16 %v9196_v37, %v9188_v31  ;;  %v12925_v17 = vld [vmem:[#allocation13 + $0x284] ss:$8 sps:$4 sm:$0xff]  }
0x1621   : > { %v18160_v25 = vpack.c.bf16 %v9195_v14, %v9187_v32  ;;  %v18162_v59 = vpack.c.bf16 %v9197_v30, %v9189_v13  ;;  %v8982_v28 = vpop.f32.mrb[240].mxu1  ;;  %v9095_v51 = vpop.f32.mrb[240].mxu0  ;;  %10343 = vmatpush1.bf16.msra.mxu1 %v12914_v22 }
0x1622   : > { %v8983_v9 = vadd.f32 %v8982_v28, %v18076_v0  ;;  %v9096_v60 = vadd.f32 %v9095_v51, %v18079_v21  ;;  %v8984_v35 = vpop.f32.mrb[241].mxu1  ;;  %v9097_v54 = vpop.f32.mrb[241].mxu0  ;;  %10344 = vmatprep.subr.bf16.mxu1 %v12919_v55 }
0x1623   : > { %v8985_v62 = vadd.f32 %v8984_v35, %v18084_v40  ;;  %v9098_v58 = vadd.f32 %v9097_v54, %v18087_v29  ;;  %v8986_v27 = vpop.f32.mrb[242].mxu1  ;;  %v9099_v56 = vpop.f32.mrb[242].mxu0 }
0x1624   : > { %v8987_v52 = vadd.f32 %v8986_v27, %v18076_v0  ;;  %v9100_v44 = vadd.f32 %v9099_v56, %v18079_v21  ;;  %v8988_v7 = vpop.f32.mrb[243].mxu1  ;;  %v9101_v24 = vpop.f32.mrb[243].mxu0  ;;  %10282 = vmatmul.mubr.bf16.gmra.mrb[12].mxu1 %v18025_v50  ;;  %v9202_v3 = vmax.f32 %v8983_v9, 0.0  ;;  %v9204_v22 = vmax.f32 %v9096_v60, 0.0 }
0x1625   : > { %v8989_v23 = vadd.f32 %v8988_v7, %v18084_v40  ;;  %v9102_v1 = vadd.f32 %v9101_v24, %v18087_v29  ;;  %10291 = vmatprep.mubr.bf16.mxu1 %v18039_v42  ;;  %10345 = vmatpush1.bf16.msra.mxu1 %v12917_v6  ;;  %v9203_v37 = vmax.f32 %v8985_v62, 0.0  ;;  %v9205_v55 = vmax.f32 %v9098_v58, 0.0  ;;  %v12923_v6 = vld [vmem:[#allocation13 + $0x280] ss:$8 sps:$4 sm:$0xff]  }
0x1626   : > { %v9210_v34 = vmax.f32 %v8987_v52, 0.0  ;;  %v9212_v31 = vmax.f32 %v9100_v44, 0.0  ;;  %10346 = vmatprep.subr.bf16.mxu1 %v12922_v38  ;;  %v12928_v38 = vld [vmem:[#allocation13 + $0x294] ss:$8 sps:$4 sm:$0xff]  }
0x1627   : > { %v9211_v32 = vmax.f32 %v8989_v23, 0.0  ;;  %v9213_v13 = vmax.f32 %v9102_v1, 0.0 }
0x1628   : > { %v18174_v14 = vpack.c.bf16 %v9210_v34, %v9202_v3  ;;  %v18176_v50 = vpack.c.bf16 %v9212_v31, %v9204_v22 }
0x1629   : > { %v18178_v30 = vpack.c.bf16 %v9211_v32, %v9203_v37  ;;  %v18180_v28 = vpack.c.bf16 %v9213_v13, %v9205_v55  ;;  %v8992_v42 = vpop.f32.mrb[244].mxu1  ;;  %v9105_v51 = vpop.f32.mrb[244].mxu0  ;;  %10347 = vmatpush1.bf16.msra.mxu1 %v12920_v18  ;;  %v12926_v18 = vld [vmem:[#allocation13 + $0x290] ss:$8 sps:$4 sm:$0xff]  }
0x162a   : > { %v8993_v9 = vadd.f32 %v8992_v42, %v18076_v0  ;;  %v9106_v60 = vadd.f32 %v9105_v51, %v18079_v21  ;;  %v8994_v35 = vpop.f32.mrb[245].mxu1  ;;  %v9107_v54 = vpop.f32.mrb[245].mxu0  ;;  %10348 = vmatprep.subr.bf16.mxu1 %v12925_v17  ;;  %v12931_v17 = vld [vmem:[#allocation13 + $0x2a4] ss:$8 sps:$4 sm:$0xff]  }
0x162b   : > { %v8995_v62 = vadd.f32 %v8994_v35, %v18084_v40  ;;  %v9108_v58 = vadd.f32 %v9107_v54, %v18087_v29  ;;  %v8996_v27 = vpop.f32.mrb[246].mxu1  ;;  %v9109_v56 = vpop.f32.mrb[246].mxu0 }
0x162c   : > { %v8997_v52 = vadd.f32 %v8996_v27, %v18076_v0  ;;  %v9110_v44 = vadd.f32 %v9109_v56, %v18079_v21  ;;  %v8998_v7 = vpop.f32.mrb[247].mxu1  ;;  %v9111_v24 = vpop.f32.mrb[247].mxu0  ;;  %10292 = vmatmul.mubr.bf16.gmra.mrb[16].mxu1 %v18037_v8  ;;  %v9218_v3 = vmax.f32 %v8993_v9, 0.0  ;;  %v9220_v22 = vmax.f32 %v9106_v60, 0.0  ;;  %v12929_v9 = vld [vmem:[#allocation13 + $0x2a0] ss:$8 sps:$4 sm:$0xff]  }
0x162d   : > { %v8999_v23 = vadd.f32 %v8998_v7, %v18084_v40  ;;  %v9112_v1 = vadd.f32 %v9111_v24, %v18087_v29  ;;  %10301 = vmatprep.mubr.bf16.mxu1 %v18051_v15  ;;  %10349 = vmatpush1.bf16.msra.mxu1 %v12923_v6  ;;  %v9219_v37 = vmax.f32 %v8995_v62, 0.0  ;;  %v9221_v55 = vmax.f32 %v9108_v58, 0.0  ;;  %v12934_v58 = vld [vmem:[#allocation13 + $0x2b4] ss:$8 sps:$4 sm:$0xff]  }
0x162e   : > { %v9226_v34 = vmax.f32 %v8997_v52, 0.0  ;;  %v9228_v31 = vmax.f32 %v9110_v44, 0.0  ;;  %10350 = vmatprep.subr.bf16.mxu1 %v12928_v38 }
0x162f   : > { %v9227_v32 = vmax.f32 %v8999_v23, 0.0  ;;  %v9229_v13 = vmax.f32 %v9112_v1, 0.0 }
0x1630   : > { %v18192_v42 = vpack.c.bf16 %v9226_v34, %v9218_v3  ;;  %v18194_v8 = vpack.c.bf16 %v9228_v31, %v9220_v22  ;;  %v12932_v22 = vld [vmem:[#allocation13 + $0x2b0] ss:$8 sps:$4 sm:$0xff]  }
0x1631   : > { %v18196_v51 = vpack.c.bf16 %v9227_v32, %v9219_v37  ;;  %v18198_v35 = vpack.c.bf16 %v9229_v13, %v9221_v55  ;;  %v9002_v15 = vpop.f32.mrb[248].mxu1  ;;  %v9115_v6 = vpop.f32.mrb[248].mxu0  ;;  %10351 = vmatpush1.bf16.msra.mxu1 %v12926_v18  ;;  %v12937_v55 = vld [vmem:[#allocation13 + $0x2c4] ss:$8 sps:$4 sm:$0xff]  }
0x1632   : > { %v9003_v60 = vadd.f32 %v9002_v15, %v18076_v0  ;;  %v9116_v54 = vadd.f32 %v9115_v6, %v18079_v21  ;;  %v9004_v38 = vpop.f32.mrb[249].mxu1  ;;  %v9117_v62 = vpop.f32.mrb[249].mxu0  ;;  %10352 = vmatprep.subr.bf16.mxu1 %v12931_v17 }
0x1633   : > { %v9005_v27 = vadd.f32 %v9004_v38, %v18084_v40  ;;  %v9118_v56 = vadd.f32 %v9117_v62, %v18087_v29  ;;  %v9006_v52 = vpop.f32.mrb[250].mxu1  ;;  %v9119_v44 = vpop.f32.mrb[250].mxu0 }
0x1634   : > { %v9007_v7 = vadd.f32 %v9006_v52, %v18076_v0  ;;  %v9120_v24 = vadd.f32 %v9119_v44, %v18079_v21  ;;  %v9008_v23 = vpop.f32.mrb[251].mxu1  ;;  %v9121_v1 = vpop.f32.mrb[251].mxu0  ;;  %10302 = vmatmul.mubr.bf16.gmra.mrb[20].mxu1 %v18049_v4  ;;  %v9234_v34 = vmax.f32 %v9003_v60, 0.0  ;;  %v9236_v31 = vmax.f32 %v9116_v54, 0.0  ;;  %v12935_v60 = vld [vmem:[#allocation13 + $0x2c0] ss:$8 sps:$4 sm:$0xff]  }
0x1635   : > { %v9009_v18 = vadd.f32 %v9008_v23, %v18084_v40  ;;  %v9122_v3 = vadd.f32 %v9121_v1, %v18087_v29  ;;  %10311 = vmatprep.mubr.bf16.mxu1 %v18065_v19  ;;  %10353 = vmatpush1.bf16.msra.mxu1 %v12929_v9  ;;  %v9235_v32 = vmax.f32 %v9005_v27, 0.0  ;;  %v9237_v13 = vmax.f32 %v9118_v56, 0.0  ;;  %v12940_v44 = vld [vmem:[#allocation13 + $0x2d4] ss:$8 sps:$4 sm:$0xff]  }
0x1636   : > { %v9242_v17 = vmax.f32 %v9007_v7, 0.0  ;;  %v9244_v37 = vmax.f32 %v9120_v24, 0.0  ;;  %10354 = vmatprep.subr.bf16.mxu1 %v12934_v58 }
0x1637   : > { %v9243_v15 = vmax.f32 %v9009_v18, 0.0  ;;  %v9245_v6 = vmax.f32 %v9122_v3, 0.0 }
0x1638   : > { %v18210_v38 = vpack.c.bf16 %v9242_v17, %v9234_v34  ;;  %v18212_v4 = vpack.c.bf16 %v9244_v37, %v9236_v31  ;;  %v12938_v37 = vld [vmem:[#allocation13 + $0x2d0] ss:$8 sps:$4 sm:$0xff]  }
0x1639   : > { %v18214_v62 = vpack.c.bf16 %v9243_v15, %v9235_v32  ;;  %v18216_v52 = vpack.c.bf16 %v9245_v6, %v9237_v13  ;;  %v9012_v19 = vpop.f32.mrb[252].mxu1  ;;  %v9125_v9 = vpop.f32.mrb[252].mxu0  ;;  %10355 = vmatpush1.bf16.msra.mxu1 %v12932_v22 }
0x163a   : > { %v9013_v54 = vadd.f32 %v9012_v19, %v18076_v0  ;;  %v9126_v58 = vadd.f32 %v9125_v9, %v18079_v21  ;;  %v9014_v27 = vpop.f32.mrb[253].mxu1  ;;  %v9127_v56 = vpop.f32.mrb[253].mxu0  ;;  %10356 = vmatprep.subr.bf16.mxu1 %v12937_v55 }
0x163b   : > { %v9015_v7 = vadd.f32 %v9014_v27, %v18084_v40  ;;  %v9128_v24 = vadd.f32 %v9127_v56, %v18087_v29  ;;  %v9016_v23 = vpop.f32.mrb[254].mxu1  ;;  %v9129_v1 = vpop.f32.mrb[254].mxu0  ;;  %v12947_v56 = vld [vmem:[#allocation13 + $0x300] ss:$8 sps:$4 sm:$0xff]  }
0x163c   : > { %v9017_v18 = vadd.f32 %v9016_v23, %v18076_v0  ;;  %v9130_v3 = vadd.f32 %v9129_v1, %v18079_v21  ;;  %v9018_v22 = vpop.f32.mrb[255].mxu1  ;;  %v9131_v34 = vpop.f32.mrb[255].mxu0  ;;  %10312 = vmatmul.mubr.bf16.gmra.mrb[24].mxu1 %v18061_v2  ;;  %v9250_v55 = vmax.f32 %v9013_v54, 0.0  ;;  %v9252_v32 = vmax.f32 %v9126_v58, 0.0  ;;  %v12943_v0 = vld [vmem:[#allocation13 + $0x2e4] ss:$8 sps:$4 sm:$0xff]  }
0x163d   : > { %v9019_v31 = vadd.f32 %v9018_v22, %v18084_v40  ;;  %v9132_v17 = vadd.f32 %v9131_v34, %v18087_v29  ;;  %10321 = vmatprep.mubr.bf16.mxu1 %v18091_v46  ;;  %10357 = vmatpush1.bf16.msra.mxu1 %v12935_v60  ;;  %v9251_v6 = vmax.f32 %v9015_v7, 0.0  ;;  %v9253_v21 = vmax.f32 %v9128_v24, 0.0  ;;  %v12941_v46 = vld [vmem:[#allocation13 + $0x2e0] ss:$8 sps:$4 sm:$0xff]   ;;  %v12946_v60 = vld [vmem:[#allocation13 + $0x2f4] ss:$8 sps:$4 sm:$0xff]  }
0x163e   : > { %v9258_v13 = vmax.f32 %v9017_v18, 0.0  ;;  %v9260_v15 = vmax.f32 %v9130_v3, 0.0  ;;  %10358 = vmatprep.subr.bf16.mxu1 %v12940_v44  ;;  %v12944_v54 = vld [vmem:[#allocation13 + $0x2f0] ss:$8 sps:$4 sm:$0xff]   ;;  %v12949_v58 = vld [vmem:[#allocation13 + $0x304] ss:$8 sps:$4 sm:$0xff]  }
0x163f   : > { %v9259_v19 = vmax.f32 %v9019_v31, 0.0  ;;  %v9261_v9 = vmax.f32 %v9132_v17, 0.0  ;;  %v12952_v44 = vld [vmem:[#allocation13 + $0x314] ss:$8 sps:$4 sm:$0xff]   ;;  %v12950_v7 = vld [vmem:[#allocation13 + $0x310] ss:$8 sps:$4 sm:$0xff]  }
0x1640   : > { %v18228_v27 = vpack.c.bf16 %v9258_v13, %v9250_v55  ;;  %v18230_v2 = vpack.c.bf16 %v9260_v15, %v9252_v32  ;;  %v12955_v24 = vld [vmem:[#allocation13 + $0x324] ss:$8 sps:$4 sm:$0xff]   ;;  %v12958_v23 = vld [vmem:[#allocation13 + $0x334] ss:$8 sps:$4 sm:$0xff]   ;;  %v12962_v18 = vld [vmem:[#allocation13 + $0x350] ss:$8 sps:$4 sm:$0xff]  }
0x1641   : > { %v18232_v40 = vpack.c.bf16 %v9259_v19, %v9251_v6  ;;  %v18234_v29 = vpack.c.bf16 %v9261_v9, %v9253_v21  ;;  %10359 = vmatpush1.bf16.msra.mxu1 %v12938_v37  ;;  %v12961_v1 = vld [vmem:[#allocation13 + $0x344] ss:$8 sps:$4 sm:$0xff]   ;;  %v12968_v22 = vld [vmem:[#allocation13 + $0x370] ss:$8 sps:$4 sm:$0xff]  }
0x1642   : > { %10360 = vmatprep.subr.bf16.mxu1 %v12943_v0  ;;  %v12967_v3 = vld [vmem:[#allocation13 + $0x364] ss:$8 sps:$4 sm:$0xff]   ;;  %v12974_v31 = vld [vmem:[#allocation13 + $0x390] ss:$8 sps:$4 sm:$0xff]  }
0x1643   : > { %v12973_v34 = vld [vmem:[#allocation13 + $0x384] ss:$8 sps:$4 sm:$0xff]   ;;  %v12980_v37 = vld [vmem:[#allocation13 + $0x3b0] ss:$8 sps:$4 sm:$0xff]  }
0x1644   : > { %10322 = vmatmul.mubr.bf16.gmra.mrb[28].mxu1 %v18089_v45  ;;  %v12953_v45 = vld [vmem:[#allocation13 + $0x320] ss:$8 sps:$4 sm:$0xff]   ;;  %v12979_v17 = vld [vmem:[#allocation13 + $0x3a4] ss:$8 sps:$4 sm:$0xff]   ;;  %v12986_v32 = vld [vmem:[#allocation13 + $0x3d0] ss:$8 sps:$4 sm:$0xff]  }
0x1645   : > { %10361 = vmatpush1.bf16.msra.mxu1 %v12941_v46  ;;  %10364 = vmatprep.mubr.bf16.mxu1 %v18106_v26  ;;  %v12956_v26 = vld [vmem:[#allocation13 + $0x330] ss:$8 sps:$4 sm:$0xff]   ;;  %v12985_v55 = vld [vmem:[#allocation13 + $0x3c4] ss:$8 sps:$4 sm:$0xff]  }
0x1646   : > { %10362 = vmatprep.subr.bf16.mxu1 %v12946_v60  ;;  %v12991_v13 = vld [vmem:[#allocation13 + $0x3e4] ss:$8 sps:$4 sm:$0xff]   ;;  %v12992_v15 = vld [vmem:[#allocation13 + $0x3f0] ss:$8 sps:$4 sm:$0xff]  }
0x1647   : > { %v19202_v21 = vld [vmem:[#allocation39_spill] sm:$0xff]  ;;  %v19205_v60 = vld [vmem:[#allocation42_spill] sm:$0xff] }
0x1649   : > { %10363 = vmatpush1.bf16.msra.mxu1 %v12944_v54 }
0x164a   : > { %10445 = vmatprep.subr.bf16.mxu1 %v12949_v58 }
0x164c   : > { %10365 = vmatmul.mubr.bf16.vlgmr.msra.gmra.mrb[0].mxu1 %v18102_v49  ;;  %v12959_v49 = vld [vmem:[#allocation13 + $0x340] ss:$8 sps:$4 sm:$0xff]  }
0x164d   : > { %10374 = vmatprep.mubr.bf16.mxu1 %v18124_v57  ;;  %10446 = vmatpush1.bf16.msra.mxu1 %v12947_v56  ;;  %v12964_v57 = vld [vmem:[#allocation13 + $0x354] ss:$8 sps:$4 sm:$0xff]  }
0x164e   : > { %10447 = vmatprep.subr.bf16.mxu1 %v12952_v44 }
0x1651   : > { %10448 = vmatpush1.bf16.msra.mxu1 %v12950_v7 }
0x1652   : > { %10449 = vmatprep.subr.bf16.mxu1 %v12955_v24 }
0x1654   : > { %10375 = vmatmul.mubr.bf16.gmra.mrb[4].mxu1 %v18120_v39  ;;  %v12965_v39 = vld [vmem:[#allocation13 + $0x360] ss:$8 sps:$4 sm:$0xff]  }
0x1655   : > { %10384 = vmatprep.mubr.bf16.mxu1 %v18142_v48  ;;  %10450 = vmatpush1.bf16.msra.mxu1 %v12953_v45  ;;  %v12970_v48 = vld [vmem:[#allocation13 + $0x374] ss:$8 sps:$4 sm:$0xff]   ;;  %v19206_v45 = vld [vmem:[#allocation45_spill] sm:$0xff] }
0x1656   : > { %10451 = vmatprep.subr.bf16.mxu1 %v12958_v23 }
0x1659   : > { %10452 = vmatpush1.bf16.msra.mxu1 %v12956_v26 }
0x165a   : > { %10453 = vmatprep.subr.bf16.mxu1 %v12961_v1 }
0x165c   : > { %10385 = vmatmul.mubr.bf16.gmra.mrb[8].mxu1 %v18138_v36  ;;  %v12971_v36 = vld [vmem:[#allocation13 + $0x380] ss:$8 sps:$4 sm:$0xff]  }
0x165d   : > { %10394 = vmatprep.mubr.bf16.mxu1 %v18160_v25  ;;  %10454 = vmatpush1.bf16.msra.mxu1 %v12959_v49  ;;  %v12976_v25 = vld [vmem:[#allocation13 + $0x394] ss:$8 sps:$4 sm:$0xff]   ;;  %v19207_v49 = vld [vmem:[#allocation44_spill] sm:$0xff] }
0x165e   : > { %10455 = vmatprep.subr.bf16.mxu1 %v12964_v57 }
0x1661   : > { %10456 = vmatpush1.bf16.msra.mxu1 %v12962_v18 }
0x1662   : > { %10457 = vmatprep.subr.bf16.mxu1 %v12967_v3  ;;  %v19208_v3 = vld [vmem:[#allocation24_spill] sm:$0xff] }
0x1664   : > { %10395 = vmatmul.mubr.bf16.gmra.mrb[12].mxu1 %v18156_v41  ;;  %v12977_v41 = vld [vmem:[#allocation13 + $0x3a0] ss:$8 sps:$4 sm:$0xff]  }
0x1665   : > { %10404 = vmatprep.mubr.bf16.mxu1 %v18178_v30  ;;  %10458 = vmatpush1.bf16.msra.mxu1 %v12965_v39  ;;  %v12982_v30 = vld [vmem:[#allocation13 + $0x3b4] ss:$8 sps:$4 sm:$0xff]  }
0x1666   : > { %10459 = vmatprep.subr.bf16.mxu1 %v12970_v48  ;;  %v19209_v48 = vld [vmem:[#allocation46_spill] sm:$0xff] }
0x1669   : > { %10460 = vmatpush1.bf16.msra.mxu1 %v12968_v22 }
0x166a   : > { %10461 = vmatprep.subr.bf16.mxu1 %v12973_v34 }
0x166c   : > { %10405 = vmatmul.mubr.bf16.gmra.mrb[16].mxu1 %v18174_v14  ;;  %v12983_v14 = vld [vmem:[#allocation13 + $0x3c0] ss:$8 sps:$4 sm:$0xff]  }
0x166d   : > { %10414 = vmatprep.mubr.bf16.mxu1 %v18196_v51  ;;  %10462 = vmatpush1.bf16.msra.mxu1 %v12971_v36  ;;  %v12988_v51 = vld [vmem:[#allocation13 + $0x3d4] ss:$8 sps:$4 sm:$0xff]  }
0x166e   : > { %10463 = vmatprep.subr.bf16.mxu1 %v12976_v25 }
0x1671   : > { %10464 = vmatpush1.bf16.msra.mxu1 %v12974_v31 }
0x1672   : > { %10465 = vmatprep.subr.bf16.mxu1 %v12979_v17 }
0x1674   : > { %10415 = vmatmul.mubr.bf16.gmra.mrb[20].mxu1 %v18192_v42  ;;  %v12989_v42 = vld [vmem:[#allocation13 + $0x3e0] ss:$8 sps:$4 sm:$0xff]  }
0x1675   : > { %10424 = vmatprep.mubr.bf16.mxu1 %v18214_v62  ;;  %10466 = vmatpush1.bf16.msra.mxu1 %v12977_v41  ;;  %v12994_v62 = vld [vmem:[#allocation13 + $0x3f4] ss:$8 sps:$4 sm:$0xff]  }
0x1676   : > { %10467 = vmatprep.subr.bf16.mxu1 %v12982_v30  ;;  %v19210_v41 = vld [vmem:[#allocation38_spill] sm:$0xff] }
0x1679   : > { %10468 = vmatpush1.bf16.msra.mxu1 %v12980_v37 }
0x167a   : > { %10469 = vmatprep.subr.bf16.mxu1 %v12985_v55 }
0x167c   : > { %10425 = vmatmul.mubr.bf16.gmra.mrb[24].mxu1 %v18210_v38 }
0x167d   : > { %10434 = vmatprep.mubr.bf16.mxu1 %v18232_v40  ;;  %10470 = vmatpush1.bf16.msra.mxu1 %v12983_v14  ;;  %v19211_v14 = vld [vmem:[#allocation36_spill] sm:$0xff] }
0x167e   : > { %10471 = vmatprep.subr.bf16.mxu1 %v12988_v51 }
0x1681   : > { %10472 = vmatpush1.bf16.msra.mxu1 %v12986_v32 }
0x1682   : > { %10473 = vmatprep.subr.bf16.mxu1 %v12991_v13  ;;  %v19212_v13 = vld [vmem:[#allocation31_spill] sm:$0xff] }
0x1684   : > { %10435 = vmatmul.mubr.bf16.gmra.mrb[28].mxu1 %v18228_v27  ;;  %v19203_v27 = vld [vmem:[#allocation41_spill] sm:$0xff] }
0x1685   : > { %10474 = vmatpush1.bf16.msra.mxu1 %v12989_v42  ;;  %10477 = vmatprep.mubr.bf16.mxu1 %v18108_v33 }
0x1686   : > { %10475 = vmatprep.subr.bf16.mxu1 %v12994_v62  ;;  %v19213_v62 = vld [vmem:[#allocation26_spill] sm:$0xff] }
0x1689   : > { %10476 = vmatpush1.bf16.msra.mxu1 %v12992_v15 }
0x168c   : > { %10478 = vmatmul.mubr.bf16.vlgmr.msra.gmra.mrb[0].mxu1 %v18104_v61  ;;  %v9454_v61 = vld [vmem:[%s19200_s22] sm:$0x3] }
0x168d   : > { %10487 = vmatprep.mubr.bf16.mxu1 %v18126_v53  ;;  %v18273_v33 = vrot.slane %v9454_v61, %v19162_v16 }
0x1694   : > { %10488 = vmatmul.mubr.bf16.gmra.mrb[4].mxu1 %v18122_v20  ;;  %v18276_v20 = vrot.slane %v9454_v61, %v19163_v11 }
0x1695   : > { %10497 = vmatprep.mubr.bf16.mxu1 %v18144_v43 }
0x169c   : > { %10498 = vmatmul.mubr.bf16.gmra.mrb[8].mxu1 %v18140_v10 }
0x169d   : > { %10507 = vmatprep.mubr.bf16.mxu1 %v18162_v59 }
0x16a4   : > { %10508 = vmatmul.mubr.bf16.gmra.mrb[12].mxu1 %v18158_v5 }
0x16a5   : > { %10517 = vmatprep.mubr.bf16.mxu1 %v18180_v28 }
0x16ac   : > { %10518 = vmatmul.mubr.bf16.gmra.mrb[16].mxu1 %v18176_v50 }
0x16ad   : > { %10527 = vmatprep.mubr.bf16.mxu1 %v18198_v35 }
0x16b4   : > { %10528 = vmatmul.mubr.bf16.gmra.mrb[20].mxu1 %v18194_v8 }
0x16b5   : > { %10537 = vmatprep.mubr.bf16.mxu1 %v18216_v52 }
0x16bc   : > { %10538 = vmatmul.mubr.bf16.gmra.mrb[24].mxu1 %v18212_v4 }
0x16bd   : > { %10547 = vmatprep.mubr.bf16.mxu1 %v18234_v29  ;;  %v19204_v29 = vld [vmem:[#allocation43_spill] sm:$0xff] }
0x16c4   : > { %10548 = vmatmul.mubr.bf16.gmra.mrb[28].mxu1 %v18230_v2 }
0x175f   : > { %v10479_v53 = vpop.f32.mrb[0].mxu1 }
0x1760   : > { %v12075_v10 = vadd.f32 %v10479_v53, %v18273_v33  ;;  %v10481_v43 = vpop.f32.mrb[1].mxu1 }
0x1761   : > { %v12076_v5 = vadd.f32 %v10481_v43, %v18276_v20  ;;  %v10483_v59 = vpop.f32.mrb[2].mxu1 }
0x1762   : > { %v10558_v50 = vadd.f32 %v12075_v10, %v17384_v47  ;;  %v12077_v28 = vadd.f32 %v10483_v59, %v18273_v33  ;;  %v10485_v8 = vpop.f32.mrb[3].mxu1  ;;  %v19201_v47 = vld [vmem:[#allocation40_spill] sm:$0xff]  ;;  %v19214_v59 = vld [vmem:[#allocation35_spill] sm:$0xff] }
0x1763   : > { %v10559_v35 = vadd.f32 %v12076_v5, %v17379_v63  ;;  %v12078_v16 = vadd.f32 %v10485_v8, %v18276_v20 }
0x1764   : > { %10590 = vst [vmem:[%s18286_s27] sm:$0xff] %v10558_v50  ;;  %v10560_v11 = vadd.f32 %v12077_v28, %v17392_v12 }
0x1765   : > { %10591 = vst [vmem:[%s18286_s27 + $0x8] sm:$0xff] %v10559_v35  ;;  %v10561_v38 = vadd.f32 %v12078_v16, %v19201_v47  ;;  %v19215_v35 = vld [vmem:[#allocation28_spill] sm:$0xff]  ;;  %v19216_v47 = vld [vmem:[#allocation27_spill] sm:$0xff] }
0x1766   : > { %10592 = vst [vmem:[%s18286_s27 + $0x10] sm:$0xff] %v10560_v11 }
0x1767   : > { %10593 = vst [vmem:[%s18286_s27 + $0x18] sm:$0xff] %v10561_v38  ;;  %v10489_v63 = vpop.f32.mrb[4].mxu1 }
0x1768   : > { %v12079_v4 = vadd.f32 %v10489_v63, %v18273_v33  ;;  %v10491_v52 = vpop.f32.mrb[5].mxu1  ;;  %v19217_v63 = vld [vmem:[#allocation79_spill] sm:$0xff] }
0x1769   : > { %v12080_v0 = vadd.f32 %v10491_v52, %v18276_v20  ;;  %v10493_v6 = vpop.f32.mrb[6].mxu1 }
0x176a   : > { %v10562_v19 = vadd.f32 %v12079_v4, %v19202_v21  ;;  %v12081_v9 = vadd.f32 %v10493_v6, %v18273_v33  ;;  %v10495_v12 = vpop.f32.mrb[7].mxu1 }
0x176b   : > { %v10563_v2 = vadd.f32 %v12080_v0, %v19203_v27  ;;  %v12082_v40 = vadd.f32 %v10495_v12, %v18276_v20 }
0x176c   : > { %10594 = vst [vmem:[%s18286_s27 + $0x20] sm:$0xff] %v10562_v19  ;;  %v10564_v46 = vadd.f32 %v12081_v9, %v19204_v29  ;;  %v19218_v9 = vld [vmem:[#allocation86_spill] sm:$0xff] }
0x176d   : > { %10595 = vst [vmem:[%s18286_s27 + $0x28] sm:$0xff] %v10563_v2  ;;  %v10565_v54 = vadd.f32 %v12082_v40, %v19205_v60  ;;  %v19219_v40 = vld [vmem:[#allocation48_spill] sm:$0xff] }
0x176e   : > { %10596 = vst [vmem:[%s18286_s27 + $0x30] sm:$0xff] %v10564_v46  ;;  %v19220_v60 = vld [vmem:[#allocation52_spill] sm:$0xff] }
0x176f   : > { %10597 = vst [vmem:[%s18286_s27 + $0x38] sm:$0xff] %v10565_v54  ;;  %v10499_v58 = vpop.f32.mrb[8].mxu1 }
0x1770   : > { %v12083_v56 = vadd.f32 %v10499_v58, %v18273_v33  ;;  %v10501_v44 = vpop.f32.mrb[9].mxu1  ;;  %v19221_v58 = vld [vmem:[#allocation29_spill] sm:$0xff] }
0x1771   : > { %v12084_v7 = vadd.f32 %v10501_v44, %v18276_v20  ;;  %v10503_v24 = vpop.f32.mrb[10].mxu1 }
0x1772   : > { %v10566_v23 = vadd.f32 %v12083_v56, %v19206_v45  ;;  %v12085_v26 = vadd.f32 %v10503_v24, %v18273_v33  ;;  %v10505_v1 = vpop.f32.mrb[11].mxu1 }
0x1773   : > { %v10567_v57 = vadd.f32 %v12084_v7, %v19207_v49  ;;  %v12086_v18 = vadd.f32 %v10505_v1, %v18276_v20 }
0x1774   : > { %10598 = vst [vmem:[%s18286_s27 + $0x40] sm:$0xff] %v10566_v23  ;;  %v10568_v39 = vadd.f32 %v12085_v26, %v19208_v3  ;;  %v19222_v26 = vld [vmem:[#allocation58_spill] sm:$0xff] }
0x1775   : > { %10599 = vst [vmem:[%s18286_s27 + $0x48] sm:$0xff] %v10567_v57  ;;  %v10569_v22 = vadd.f32 %v12086_v18, %v19209_v48  ;;  %v19223_v18 = vld [vmem:[#allocation54_spill] sm:$0xff]  ;;  %v19224_v48 = vld [vmem:[#allocation32_spill] sm:$0xff] }
0x1776   : > { %10600 = vst [vmem:[%s18286_s27 + $0x50] sm:$0xff] %v10568_v39 }
0x1777   : > { %10601 = vst [vmem:[%s18286_s27 + $0x58] sm:$0xff] %v10569_v22  ;;  %v10509_v34 = vpop.f32.mrb[12].mxu1 }
0x1778   : > { %v12087_v36 = vadd.f32 %v10509_v34, %v18273_v33  ;;  %v10511_v25 = vpop.f32.mrb[13].mxu1  ;;  %v19225_v34 = vld [vmem:[#allocation30_spill] sm:$0xff] }
0x1779   : > { %v12088_v31 = vadd.f32 %v10511_v25, %v18276_v20  ;;  %v10513_v17 = vpop.f32.mrb[14].mxu1 }
0x177a   : > { %v10570_v30 = vadd.f32 %v12087_v36, %v19210_v41  ;;  %v12089_v37 = vadd.f32 %v10513_v17, %v18273_v33  ;;  %v10515_v55 = vpop.f32.mrb[15].mxu1 }
0x177b   : > { %v10571_v51 = vadd.f32 %v12088_v31, %v19211_v14  ;;  %v12090_v32 = vadd.f32 %v10515_v55, %v18276_v20 }
0x177c   : > { %10602 = vst [vmem:[%s18286_s27 + $0x60] sm:$0xff] %v10570_v30  ;;  %v10572_v42 = vadd.f32 %v12089_v37, %v19212_v13  ;;  %v19226_v37 = vld [vmem:[#allocation50_spill] sm:$0xff] }
0x177d   : > { %10603 = vst [vmem:[%s18286_s27 + $0x68] sm:$0xff] %v10571_v51  ;;  %v10573_v15 = vadd.f32 %v12090_v32, %v19213_v62  ;;  %v19227_v32 = vld [vmem:[#allocation34_spill] sm:$0xff]  ;;  %v19228_v62 = vld [vmem:[#allocation85_spill] sm:$0xff] }
0x177e   : > { %10604 = vst [vmem:[%s18286_s27 + $0x70] sm:$0xff] %v10572_v42 }
0x177f   : > { %10605 = vst [vmem:[%s18286_s27 + $0x78] sm:$0xff] %v10573_v15  ;;  %v10519_v61 = vpop.f32.mrb[16].mxu1 }
0x1780   : > { %v12091_v53 = vadd.f32 %v10519_v61, %v18273_v33  ;;  %v10521_v10 = vpop.f32.mrb[17].mxu1 }
0x1781   : > { %v12092_v43 = vadd.f32 %v10521_v10, %v18276_v20  ;;  %v10523_v5 = vpop.f32.mrb[18].mxu1 }
0x1782   : > { %v10574_v50 = vadd.f32 %v12091_v53, %v19214_v59  ;;  %v12093_v28 = vadd.f32 %v10523_v5, %v18273_v33  ;;  %v10525_v8 = vpop.f32.mrb[19].mxu1 }
0x1783   : > { %v10575_v16 = vadd.f32 %v12092_v43, %v19215_v35  ;;  %v12094_v11 = vadd.f32 %v10525_v8, %v18276_v20 }
0x1784   : > { %10606 = vst [vmem:[%s18286_s27 + $0x80] sm:$0xff] %v10574_v50  ;;  %v10576_v38 = vadd.f32 %v12093_v28, %v19216_v47 }
0x1785   : > { %10607 = vst [vmem:[%s18286_s27 + $0x88] sm:$0xff] %v10575_v16  ;;  %v10577_v4 = vadd.f32 %v12094_v11, %v19217_v63 }
0x1786   : > { %10608 = vst [vmem:[%s18286_s27 + $0x90] sm:$0xff] %v10576_v38 }
0x1787   : > { %10609 = vst [vmem:[%s18286_s27 + $0x98] sm:$0xff] %v10577_v4  ;;  %v10529_v52 = vpop.f32.mrb[20].mxu1 }
0x1788   : > { %v12095_v0 = vadd.f32 %v10529_v52, %v18273_v33  ;;  %v10531_v6 = vpop.f32.mrb[21].mxu1 }
0x1789   : > { %v12096_v21 = vadd.f32 %v10531_v6, %v18276_v20  ;;  %v10533_v19 = vpop.f32.mrb[22].mxu1 }
0x178a   : > { %v10578_v12 = vadd.f32 %v12095_v0, %v19218_v9  ;;  %v12097_v27 = vadd.f32 %v10533_v19, %v18273_v33  ;;  %v10535_v2 = vpop.f32.mrb[23].mxu1 }
0x178b   : > { %v10579_v29 = vadd.f32 %v12096_v21, %v19219_v40  ;;  %v12098_v46 = vadd.f32 %v10535_v2, %v18276_v20 }
0x178c   : > { %10610 = vst [vmem:[%s18286_s27 + $0xa0] sm:$0xff] %v10578_v12  ;;  %v10580_v54 = vadd.f32 %v12097_v27, %v19220_v60 }
0x178d   : > { %10611 = vst [vmem:[%s18286_s27 + $0xa8] sm:$0xff] %v10579_v29  ;;  %v10581_v56 = vadd.f32 %v12098_v46, %v19221_v58 }
0x178e   : > { %10612 = vst [vmem:[%s18286_s27 + $0xb0] sm:$0xff] %v10580_v54 }
0x178f   : > { %10613 = vst [vmem:[%s18286_s27 + $0xb8] sm:$0xff] %v10581_v56  ;;  %v10539_v44 = vpop.f32.mrb[24].mxu1 }
0x1790   : > { %v12099_v7 = vadd.f32 %v10539_v44, %v18273_v33  ;;  %v10541_v24 = vpop.f32.mrb[25].mxu1 }
0x1791   : > { %v12100_v45 = vadd.f32 %v10541_v24, %v18276_v20  ;;  %v10543_v23 = vpop.f32.mrb[26].mxu1 }
0x1792   : > { %v10582_v1 = vadd.f32 %v12099_v7, %v19222_v26  ;;  %v12101_v49 = vadd.f32 %v10543_v23, %v18273_v33  ;;  %v10545_v57 = vpop.f32.mrb[27].mxu1 }
0x1793   : > { %v10583_v3 = vadd.f32 %v12100_v45, %v19223_v18  ;;  %v12102_v39 = vadd.f32 %v10545_v57, %v18276_v20 }
0x1794   : > { %10614 = vst [vmem:[%s18286_s27 + $0xc0] sm:$0xff] %v10582_v1  ;;  %v10584_v22 = vadd.f32 %v12101_v49, %v19224_v48 }
0x1795   : > { %10615 = vst [vmem:[%s18286_s27 + $0xc8] sm:$0xff] %v10583_v3  ;;  %v10585_v36 = vadd.f32 %v12102_v39, %v19225_v34 }
0x1796   : > { %10616 = vst [vmem:[%s18286_s27 + $0xd0] sm:$0xff] %v10584_v22 }
0x1797   : > { %10617 = vst [vmem:[%s18286_s27 + $0xd8] sm:$0xff] %v10585_v36  ;;  %v10549_v25 = vpop.f32.mrb[28].mxu1 }
0x1798   : > { %v12103_v31 = vadd.f32 %v10549_v25, %v18273_v33  ;;  %v10551_v17 = vpop.f32.mrb[29].mxu1 }
0x1799   : > { %v12104_v41 = vadd.f32 %v10551_v17, %v18276_v20  ;;  %v10553_v30 = vpop.f32.mrb[30].mxu1 }
0x179a   : > { %v10586_v55 = vadd.f32 %v12103_v31, %v19226_v37  ;;  %v12105_v14 = vadd.f32 %v10553_v30, %v18273_v33  ;;  %v10555_v51 = vpop.f32.mrb[31].mxu1  ;;  %v19230_v33 = vld [vmem:[#allocation56_spill] sm:$0xff] }
0x179b   : > { %v10587_v13 = vadd.f32 %v12104_v41, %v19227_v32  ;;  %v12106_v42 = vadd.f32 %v10555_v51, %v18276_v20 }
0x179c   : > { %10618 = vst [vmem:[%s18286_s27 + $0xe0] sm:$0xff] %v10586_v55  ;;  %v10588_v15 = vadd.f32 %v12105_v14, %v19228_v62 }
0x179d   : > { %10619 = vst [vmem:[%s18286_s27 + $0xe8] sm:$0xff] %v10587_v13  ;;  %v10589_v61 = vadd.f32 %v12106_v42, %v19230_v33 }
0x179e   : > { %10620 = vst [vmem:[%s18286_s27 + $0xf0] sm:$0xff] %v10588_v15 }
0x179f   : > { %10621 = vst [vmem:[%s18286_s27 + $0xf8] sm:$0xff] %v10589_v61 }
0x17a0   : > { %13814 = shalt.err (!%p13811_p8)
}
0x17a1   : > { %s13815_s11 = scalar_lea.hbm %s18379_s26, 4096  ;;  %s13819_s27 = scalar_lea.hbm %s19229_s20, 8192 }
0x17a2   : > { %p13816_p4 = scmp.ne.s32.totalorder %s18379_s26, %s13815_s11  ;;  %p13820_p3 = scmp.lt.u32.totalorder %s18379_s26, %s19229_s20 }
0x17a3   : > { %p13821_p5 = scmp.lt.u32.totalorder %s13819_s27, %s13815_s11  ;;  %p13823_p6 = scmp.lt.u32.totalorder %s13815_s11, %s18379_s26 }
0x17a4   : > { %p13817_p10 = pnand %p13816_p4, %p19231_p9 }
0x17a5   : > { %p13822_p7 = por %p13821_p5, %p13820_p3 }
0x17a6   : > { %p13818_p11 = pneg %p13817_p10 }
0x17a7   : > { %p13824_p12 = por %p13823_p6, %p13822_p7 }
0x17a9   : > { %p13825_p1 = pnand %p13824_p12, %p13818_p11 }
0x17ab   : > { %13828 = shalt.err (!%p13825_p1)
}
0x17ac   : > { %s13900_s13 = smov 256   ;;  %s13901_s28 = smov 16  }
0x17ad   : > { %12517 = dma.vmem_to_hbm [thread:$0]  (%p19231_p9), %s18381_s7, 4096, %s18379_s26, %s10623_s19, %s13900_s13, %s13900_s13, %s13901_s28  }
0x17ae PF: > { %s10651_s24 = sand.u32 1, %s13867_s29   ;;  %p19232_p13 = scmp.ne.s32.totalorder %s18676_s18, 0 }
0x17af   : > { %p19233_p0 = scmp.ge.s32.totalorder %s13879_s16, 2  ;;  %s10652_s14 = scalar_lea.sflag [#allocation4], %s10651_s24 }
0x17b1   : > { %p12543_p2 = pnand %p19233_p0, %p19232_p13 }
0x17b3   : > { %13862 = dma.done.wait (!%p12543_p2), %s10652_s14, 4096  }
0x17b4   : > { %13864 = vsyncadd (!%p12543_p2), %s10652_s14, 4294963200  ;;  %p30_p8 = scmp.ge.s32.totalorder %s14168_s21, 4   ;;  %s19234_s29 = smov %s13871_s30 }
0x17b5   : > { %s19235_s30 = smov %s13875_s15  ;;  %s19236_s15 = smov %s14179_s25 }
0x17b6   : > { %s19237_s16 = smov %s14168_s21  ;;  %32 = sbr.rel (!%p30_p8) target bundleno = 17 (0x11), region = 145 }
0x17bd   :  { %10657 = vsyncpa [#allocation3], 1 }
0x17be   :  { %10659 = vsyncpa [#allocation3 + $0x1], 1 }
0x17bf   :  { %10660 = vsyncpa [#allocation6], 1 }
0x17c0   :  { %10661 = vsyncpa [#allocation9], 1 }
0x17c1   :  { %10662 = vsyncpa [#allocation12], 1 }
0x17c2   :  { %10663 = vsyncpa [#allocation4], 1 }
0x17c3   :  { %10665 = vsyncpa [#allocation4 + $0x1], 1 }

</bundles_post_ra>
